<compile_context>
chip_gen: v5e
topology: v5e:2x2
jax: 0.10.0
libtpu: 0.0.40
codegen_flags: <defaults>
</compile_context>

<pallas_src>
import math

import jax
import jax.numpy as jnp
from jax.experimental import pallas as pl
from jax.experimental.pallas import tpu as pltpu


# --------------------------- in-kernel helpers ------------------------------ #

def _conv3x3_relu(img, w_ref, b_ref):
    """3x3 / pad=1 conv + bias + ReLU on one (H, W, Cin) f32 image.

    w_ref: (9*Cin, Cout) bf16, rows ordered (dy, dx, cin).
    b_ref: (1, Cout) f32.  Returns (H, W, Cout) f32.
    """
    H, W, cin = img.shape
    cout = w_ref.shape[1]
    # Zero halo built with concatenations (no wrapper-level jnp.pad).
    zrow = jnp.zeros((1, W, cin), img.dtype)
    zcol = jnp.zeros((H + 2, 1, cin), img.dtype)
    xp = jnp.concatenate([zrow, img, zrow], axis=0)        # (H+2, W,   Cin)
    xp = jnp.concatenate([zcol, xp, zcol], axis=1)         # (H+2, W+2, Cin)
    # im2col: one (H*W, 9*Cin) patch matrix -> one MXU matmul.
    taps = [xp[dy:dy + H, dx:dx + W, :] for dy in range(3) for dx in range(3)]
    patches = jnp.concatenate(taps, axis=-1)               # (H, W, 9*Cin)
    patches = patches.reshape(H * W, 9 * cin)
    acc = jnp.dot(patches.astype(jnp.bfloat16), w_ref[...],
                  preferred_element_type=jnp.float32)      # (H*W, Cout) f32
    y = jnp.maximum(acc + b_ref[...], 0.0)                 # bias + ReLU in f32
    return y.reshape(H, W, cout)


def _pool_rows(y):
    """Max over 2x1 row windows: (H, W, C) -> (H//2, W, C)."""
    H, W, C = y.shape
    return jnp.max(y.reshape(H // 2, 2, W, C), axis=1)


def _maxpool2x2(y):
    """2x2 / stride-2 max pool: (H, W, C) -> (H//2, W//2, C)."""
    t = _pool_rows(y)                                      # (H//2, W, C)
    W = y.shape[1]
    cols = [jnp.maximum(t[:, 2 * j, :], t[:, 2 * j + 1, :])
            for j in range(W // 2)]                        # each (H//2, C)
    return jnp.stack(cols, axis=1)                         # (H//2, W//2, C)


def _maxpool2x2_flatten(y):
    """2x2 max pool fused with NHWC flatten: (H, W, C) -> (1, (H//2)*(W//2)*C)."""
    t = _pool_rows(y)                                      # (H//2, W, C)
    H, W, C = y.shape
    cols = [jnp.maximum(t[:, 2 * j, :], t[:, 2 * j + 1, :])
            for j in range(W // 2)]                        # each (H//2, C)
    rows = jnp.concatenate(cols, axis=-1)                  # (H//2, (W//2)*C)
    return jnp.concatenate([rows[h:h + 1, :] for h in range(H // 2)], axis=-1)


# ------------------------------ fused kernel -------------------------------- #

def _vgg_fused_kernel(x_ref, w1_ref, b1_ref, w2_ref, b2_ref,
                      fc1w_ref, fc1b_ref, fc2w_ref, fc2b_ref,
                      fc3w_ref, fc3b_ref, out_ref):
    n = x_ref.shape[0]
    # ---- features: [Conv3x3 + ReLU + MaxPool2x2] x 2, all resident in VMEM -- #
    feats = []
    for b in range(n):                          # small static batch, unrolled
        img = x_ref[b]                          # (H, W, Cin) f32
        y = _conv3x3_relu(img, w1_ref, b1_ref)
        y = _maxpool2x2(y)
        y = _conv3x3_relu(y, w2_ref, b2_ref)
        feats.append(_maxpool2x2_flatten(y))    # (1, FLAT), NHWC flatten order
    x = jnp.concatenate(feats, axis=0)          # (N, FLAT): batch folded into M

    # ---- classifier: Linear->ReLU->Dropout->Linear->ReLU->Dropout->Linear --- #
    # TODO(synk): nn.Dropout is treated as identity (eval/inference semantics).
    h = jnp.dot(x.astype(jnp.bfloat16), fc1w_ref[...],
                preferred_element_type=jnp.float32) + fc1b_ref[...]
    h = jnp.maximum(h, 0.0)
    h = jnp.dot(h.astype(jnp.bfloat16), fc2w_ref[...],
                preferred_element_type=jnp.float32) + fc2b_ref[...]
    h = jnp.maximum(h, 0.0)
    out = jnp.dot(h.astype(jnp.bfloat16), fc3w_ref[...],
                  preferred_element_type=jnp.float32) + fc3b_ref[...]
    out_ref[...] = out.astype(out_ref.dtype)


# ------------------------------- wrapper ------------------------------------ #

def _full_spec(shape):
    zeros = (0,) * len(shape)
    return pl.BlockSpec(shape, lambda i, _z=zeros: _z)


def trt_basis_vgg_forward(x_nchw, params):
    # One tiny NCHW -> NHWC transpose of the 8 KiB input at the boundary;
    # everything else is a single fused pallas_call with VMEM-resident
    # intermediates (only the (N, num_classes) output touches HBM).
    x = jnp.transpose(x_nchw, (0, 2, 3, 1))
    n = x.shape[0]
    num_classes = params["fc3_b"].shape[1]
    args = (x,
            params["conv1_w"], params["conv1_b"],
            params["conv2_w"], params["conv2_b"],
            params["fc1_w"], params["fc1_b"],
            params["fc2_w"], params["fc2_b"],
            params["fc3_w"], params["fc3_b"])
    return pl.pallas_call(
        _vgg_fused_kernel,
        out_shape=jax.ShapeDtypeStruct((n, num_classes), jnp.float32),
        grid=(1,),
        in_specs=[_full_spec(a.shape) for a in args],
        out_specs=_full_spec((n, num_classes)),
        compiler_params=pltpu.CompilerParams(
            dimension_semantics=("arbitrary",)),
    )(*args)


# -------------------------------- params ------------------------------------ #

def init_params(key, *, cin, c1, c2, hw, hidden, num_classes):
    ks = jax.random.split(key, 5)
    h4 = hw // 4
    flat = c2 * h4 * h4
    # Conv2d init: normal(0, sqrt(2 / (kh*kw*out_channels))), bias = 0.
    conv1_w = jax.random.normal(ks[0], (3, 3, cin, c1), jnp.float32) * math.sqrt(2.0 / (9 * c1))
    conv2_w = jax.random.normal(ks[1], (3, 3, c1, c2), jnp.float32) * math.sqrt(2.0 / (9 * c2))
    # Linear init: normal(0, 0.01), bias = 0.  fc1 is generated in PyTorch
    # (NCHW-flatten) row order, then permuted OFFLINE to the NHWC-flatten
    # order the fused kernel produces (so no activation transpose is needed).
    fc1_w_torch = jax.random.normal(ks[2], (flat, hidden), jnp.float32) * 0.01
    fc1_w = jnp.transpose(fc1_w_torch.reshape(c2, h4, h4, hidden),
                          (1, 2, 0, 3)).reshape(flat, hidden)
    fc2_w = jax.random.normal(ks[3], (hidden, hidden), jnp.float32) * 0.01
    fc3_w = jax.random.normal(ks[4], (hidden, num_classes), jnp.float32) * 0.01
    return {
        # conv weights reshaped to im2col layout (9*Cin, Cout), stored bf16
        "conv1_w": conv1_w.reshape(9 * cin, c1).astype(jnp.bfloat16),
        "conv1_b": jnp.zeros((1, c1), jnp.float32),
        "conv2_w": conv2_w.reshape(9 * c1, c2).astype(jnp.bfloat16),
        "conv2_b": jnp.zeros((1, c2), jnp.float32),
        "fc1_w": fc1_w.astype(jnp.bfloat16), "fc1_b": jnp.zeros((1, hidden), jnp.float32),
        "fc2_w": fc2_w.astype(jnp.bfloat16), "fc2_b": jnp.zeros((1, hidden), jnp.float32),
        "fc3_w": fc3_w.astype(jnp.bfloat16), "fc3_b": jnp.zeros((1, num_classes), jnp.float32),
    }


if __name__ == "__main__":
    N, CIN, HW = 2, 4, 16          # small shapes consistent with the forward pass
    C1, C2 = 8, 16                 # scaled-down VGG channel widths
    HIDDEN, NUM_CLASSES = 256, 16  # scaled-down 4096 / 1000

    key = jax.random.PRNGKey(0)
    pkey, xkey = jax.random.split(key)
    params = init_params(pkey, cin=CIN, c1=C1, c2=C2, hw=HW,
                         hidden=HIDDEN, num_classes=NUM_CLASSES)
    x = jax.random.normal(xkey, (N, CIN, HW, HW), jnp.float32)

    out = jax.jit(trt_basis_vgg_forward)(x, params)
    out = jax.block_until_ready(out)
    assert out.shape == (N, NUM_CLASSES) and out.dtype == jnp.float32
    print("KERNEL_OK")
</pallas_src>

<mosaic_0001>
module attributes {stable_mosaic.version = 11 : i64} {
  func.func @_vgg_fused_kernel(%arg0: i32, %arg1: memref<2x16x16x4xf32, #tpu.memory_space<vmem>>, %arg2: memref<36x8xbf16, #tpu.memory_space<vmem>>, %arg3: memref<1x8xf32, #tpu.memory_space<vmem>>, %arg4: memref<72x16xbf16, #tpu.memory_space<vmem>>, %arg5: memref<1x16xf32, #tpu.memory_space<vmem>>, %arg6: memref<256x256xbf16, #tpu.memory_space<vmem>>, %arg7: memref<1x256xf32, #tpu.memory_space<vmem>>, %arg8: memref<256x256xbf16, #tpu.memory_space<vmem>>, %arg9: memref<1x256xf32, #tpu.memory_space<vmem>>, %arg10: memref<256x16xbf16, #tpu.memory_space<vmem>>, %arg11: memref<1x16xf32, #tpu.memory_space<vmem>>, %arg12: memref<2x16xf32, #tpu.memory_space<vmem>>) attributes {dimension_semantics = [#tpu.dimension_semantics<arbitrary>], iteration_bounds = array<i64: 1>, scalar_prefetch = 0 : i64, scratch_operands = 0 : i64, tpu.core_type = #tpu.core_type<tc>, window_params = [{pipeline_mode = #tpu.pipeline_mode<synchronous>, transform_indices = @transform_0, window_bounds = array<i64: 2, 16, 16, 4>}, {pipeline_mode = #tpu.pipeline_mode<synchronous>, transform_indices = @transform_1, window_bounds = array<i64: 36, 8>}, {pipeline_mode = #tpu.pipeline_mode<synchronous>, transform_indices = @transform_2, window_bounds = array<i64: 1, 8>}, {pipeline_mode = #tpu.pipeline_mode<synchronous>, transform_indices = @transform_3, window_bounds = array<i64: 72, 16>}, {pipeline_mode = #tpu.pipeline_mode<synchronous>, transform_indices = @transform_4, window_bounds = array<i64: 1, 16>}, {pipeline_mode = #tpu.pipeline_mode<synchronous>, transform_indices = @transform_5, window_bounds = array<i64: 256, 256>}, {pipeline_mode = #tpu.pipeline_mode<synchronous>, transform_indices = @transform_6, window_bounds = array<i64: 1, 256>}, {pipeline_mode = #tpu.pipeline_mode<synchronous>, transform_indices = @transform_7, window_bounds = array<i64: 256, 256>}, {pipeline_mode = #tpu.pipeline_mode<synchronous>, transform_indices = @transform_8, window_bounds = array<i64: 1, 256>}, {pipeline_mode = #tpu.pipeline_mode<synchronous>, transform_indices = @transform_9, window_bounds = array<i64: 256, 16>}, {pipeline_mode = #tpu.pipeline_mode<synchronous>, transform_indices = @transform_10, window_bounds = array<i64: 1, 16>}, {pipeline_mode = #tpu.pipeline_mode<synchronous>, transform_indices = @transform_11, window_bounds = array<i64: 2, 16>}]} {
    %c0 = arith.constant 0 : index
    %c0_0 = arith.constant 0 : index
    %c0_1 = arith.constant 0 : index
    %c0_2 = arith.constant 0 : index
    %0 = vector.load %arg1[%c0, %c0_0, %c0_1, %c0_2] : memref<2x16x16x4xf32, #tpu.memory_space<vmem>>, vector<1x16x16x4xf32>
    %1 = vector.shape_cast %0 : vector<1x16x16x4xf32> to vector<16x16x4xf32>
    %cst = arith.constant 0.000000e+00 : f32
    %2 = vector.broadcast %cst : f32 to vector<1x16x4xf32>
    %cst_3 = arith.constant 0.000000e+00 : f32
    %3 = vector.broadcast %cst_3 : f32 to vector<18x1x4xf32>
    %4 = tpu.concatenate %2, %1, %2 in 0 : vector<1x16x4xf32>, vector<16x16x4xf32>, vector<1x16x4xf32> -> vector<18x16x4xf32>
    %5 = tpu.concatenate %3, %4, %3 in 1 : vector<18x1x4xf32>, vector<18x16x4xf32>, vector<18x1x4xf32> -> vector<18x18x4xf32>
    %6 = vector.extract_strided_slice %5 {offsets = [0, 0, 0], sizes = [16, 16, 4], strides = [1, 1, 1]} : vector<18x18x4xf32> to vector<16x16x4xf32>
    %7 = vector.extract_strided_slice %5 {offsets = [0, 1, 0], sizes = [16, 16, 4], strides = [1, 1, 1]} : vector<18x18x4xf32> to vector<16x16x4xf32>
    %8 = vector.extract_strided_slice %5 {offsets = [0, 2, 0], sizes = [16, 16, 4], strides = [1, 1, 1]} : vector<18x18x4xf32> to vector<16x16x4xf32>
    %9 = vector.extract_strided_slice %5 {offsets = [1, 0, 0], sizes = [16, 16, 4], strides = [1, 1, 1]} : vector<18x18x4xf32> to vector<16x16x4xf32>
    %10 = vector.extract_strided_slice %5 {offsets = [1, 1, 0], sizes = [16, 16, 4], strides = [1, 1, 1]} : vector<18x18x4xf32> to vector<16x16x4xf32>
    %11 = vector.extract_strided_slice %5 {offsets = [1, 2, 0], sizes = [16, 16, 4], strides = [1, 1, 1]} : vector<18x18x4xf32> to vector<16x16x4xf32>
    %12 = vector.extract_strided_slice %5 {offsets = [2, 0, 0], sizes = [16, 16, 4], strides = [1, 1, 1]} : vector<18x18x4xf32> to vector<16x16x4xf32>
    %13 = vector.extract_strided_slice %5 {offsets = [2, 1, 0], sizes = [16, 16, 4], strides = [1, 1, 1]} : vector<18x18x4xf32> to vector<16x16x4xf32>
    %14 = vector.extract_strided_slice %5 {offsets = [2, 2, 0], sizes = [16, 16, 4], strides = [1, 1, 1]} : vector<18x18x4xf32> to vector<16x16x4xf32>
    %15 = tpu.concatenate %6, %7, %8, %9, %10, %11, %12, %13, %14 in 2 : vector<16x16x4xf32>, vector<16x16x4xf32>, vector<16x16x4xf32>, vector<16x16x4xf32>, vector<16x16x4xf32>, vector<16x16x4xf32>, vector<16x16x4xf32>, vector<16x16x4xf32>, vector<16x16x4xf32> -> vector<16x16x36xf32>
    %16 = vector.shape_cast %15 : vector<16x16x36xf32> to vector<256x36xf32>
    %17 = arith.truncf %16 : vector<256x36xf32> to vector<256x36xbf16>
    %c0_4 = arith.constant 0 : index
    %c0_5 = arith.constant 0 : index
    %18 = vector.load %arg2[%c0_4, %c0_5] : memref<36x8xbf16, #tpu.memory_space<vmem>>, vector<36x8xbf16>
    %cst_6 = arith.constant dense<0.000000e+00> : vector<256x8xf32>
    %19 = tpu.matmul %17, %18, %cst_6 {dimension_numbers = #tpu.dot_dimension_numbers<[1], [0], [0], [1], [0, 0, 1, 1], [], []>} : vector<256x36xbf16>, vector<36x8xbf16>, vector<256x8xf32> -> vector<256x8xf32>
    %c0_7 = arith.constant 0 : index
    %c0_8 = arith.constant 0 : index
    %20 = vector.load %arg3[%c0_7, %c0_8] : memref<1x8xf32, #tpu.memory_space<vmem>>, vector<1x8xf32>
    %21 = vector.broadcast %20 : vector<1x8xf32> to vector<256x8xf32>
    %22 = arith.addf %19, %21 : vector<256x8xf32>
    %cst_9 = arith.constant 0.000000e+00 : f32
    %23 = vector.broadcast %cst_9 : f32 to vector<256x8xf32>
    %24 = arith.maximumf %22, %23 : vector<256x8xf32>
    %25 = vector.shape_cast %24 : vector<256x8xf32> to vector<16x16x8xf32>
    %26 = vector.shape_cast %25 : vector<16x16x8xf32> to vector<8x2x16x8xf32>
    %cst_10 = arith.constant dense<0xFF800000> : vector<8x16x8xf32>
    %27 = vector.multi_reduction <maximumf>, %26, %cst_10 [1] : vector<8x2x16x8xf32> to vector<8x16x8xf32>
    %28 = vector.extract_strided_slice %27 {offsets = [0, 0, 0], sizes = [8, 1, 8], strides = [1, 1, 1]} : vector<8x16x8xf32> to vector<8x1x8xf32>
    %29 = vector.shape_cast %28 : vector<8x1x8xf32> to vector<8x8xf32>
    %30 = vector.extract_strided_slice %27 {offsets = [0, 1, 0], sizes = [8, 1, 8], strides = [1, 1, 1]} : vector<8x16x8xf32> to vector<8x1x8xf32>
    %31 = vector.shape_cast %30 : vector<8x1x8xf32> to vector<8x8xf32>
    %32 = arith.maximumf %29, %31 : vector<8x8xf32>
    %33 = vector.extract_strided_slice %27 {offsets = [0, 2, 0], sizes = [8, 1, 8], strides = [1, 1, 1]} : vector<8x16x8xf32> to vector<8x1x8xf32>
    %34 = vector.shape_cast %33 : vector<8x1x8xf32> to vector<8x8xf32>
    %35 = vector.extract_strided_slice %27 {offsets = [0, 3, 0], sizes = [8, 1, 8], strides = [1, 1, 1]} : vector<8x16x8xf32> to vector<8x1x8xf32>
    %36 = vector.shape_cast %35 : vector<8x1x8xf32> to vector<8x8xf32>
    %37 = arith.maximumf %34, %36 : vector<8x8xf32>
    %38 = vector.extract_strided_slice %27 {offsets = [0, 4, 0], sizes = [8, 1, 8], strides = [1, 1, 1]} : vector<8x16x8xf32> to vector<8x1x8xf32>
    %39 = vector.shape_cast %38 : vector<8x1x8xf32> to vector<8x8xf32>
    %40 = vector.extract_strided_slice %27 {offsets = [0, 5, 0], sizes = [8, 1, 8], strides = [1, 1, 1]} : vector<8x16x8xf32> to vector<8x1x8xf32>
    %41 = vector.shape_cast %40 : vector<8x1x8xf32> to vector<8x8xf32>
    %42 = arith.maximumf %39, %41 : vector<8x8xf32>
    %43 = vector.extract_strided_slice %27 {offsets = [0, 6, 0], sizes = [8, 1, 8], strides = [1, 1, 1]} : vector<8x16x8xf32> to vector<8x1x8xf32>
    %44 = vector.shape_cast %43 : vector<8x1x8xf32> to vector<8x8xf32>
    %45 = vector.extract_strided_slice %27 {offsets = [0, 7, 0], sizes = [8, 1, 8], strides = [1, 1, 1]} : vector<8x16x8xf32> to vector<8x1x8xf32>
    %46 = vector.shape_cast %45 : vector<8x1x8xf32> to vector<8x8xf32>
    %47 = arith.maximumf %44, %46 : vector<8x8xf32>
    %48 = vector.extract_strided_slice %27 {offsets = [0, 8, 0], sizes = [8, 1, 8], strides = [1, 1, 1]} : vector<8x16x8xf32> to vector<8x1x8xf32>
    %49 = vector.shape_cast %48 : vector<8x1x8xf32> to vector<8x8xf32>
    %50 = vector.extract_strided_slice %27 {offsets = [0, 9, 0], sizes = [8, 1, 8], strides = [1, 1, 1]} : vector<8x16x8xf32> to vector<8x1x8xf32>
    %51 = vector.shape_cast %50 : vector<8x1x8xf32> to vector<8x8xf32>
    %52 = arith.maximumf %49, %51 : vector<8x8xf32>
    %53 = vector.extract_strided_slice %27 {offsets = [0, 10, 0], sizes = [8, 1, 8], strides = [1, 1, 1]} : vector<8x16x8xf32> to vector<8x1x8xf32>
    %54 = vector.shape_cast %53 : vector<8x1x8xf32> to vector<8x8xf32>
    %55 = vector.extract_strided_slice %27 {offsets = [0, 11, 0], sizes = [8, 1, 8], strides = [1, 1, 1]} : vector<8x16x8xf32> to vector<8x1x8xf32>
    %56 = vector.shape_cast %55 : vector<8x1x8xf32> to vector<8x8xf32>
    %57 = arith.maximumf %54, %56 : vector<8x8xf32>
    %58 = vector.extract_strided_slice %27 {offsets = [0, 12, 0], sizes = [8, 1, 8], strides = [1, 1, 1]} : vector<8x16x8xf32> to vector<8x1x8xf32>
    %59 = vector.shape_cast %58 : vector<8x1x8xf32> to vector<8x8xf32>
    %60 = vector.extract_strided_slice %27 {offsets = [0, 13, 0], sizes = [8, 1, 8], strides = [1, 1, 1]} : vector<8x16x8xf32> to vector<8x1x8xf32>
    %61 = vector.shape_cast %60 : vector<8x1x8xf32> to vector<8x8xf32>
    %62 = arith.maximumf %59, %61 : vector<8x8xf32>
    %63 = vector.extract_strided_slice %27 {offsets = [0, 14, 0], sizes = [8, 1, 8], strides = [1, 1, 1]} : vector<8x16x8xf32> to vector<8x1x8xf32>
    %64 = vector.shape_cast %63 : vector<8x1x8xf32> to vector<8x8xf32>
    %65 = vector.extract_strided_slice %27 {offsets = [0, 15, 0], sizes = [8, 1, 8], strides = [1, 1, 1]} : vector<8x16x8xf32> to vector<8x1x8xf32>
    %66 = vector.shape_cast %65 : vector<8x1x8xf32> to vector<8x8xf32>
    %67 = arith.maximumf %64, %66 : vector<8x8xf32>
    %68 = vector.shape_cast %32 : vector<8x8xf32> to vector<8x1x8xf32>
    %69 = vector.shape_cast %37 : vector<8x8xf32> to vector<8x1x8xf32>
    %70 = vector.shape_cast %42 : vector<8x8xf32> to vector<8x1x8xf32>
    %71 = vector.shape_cast %47 : vector<8x8xf32> to vector<8x1x8xf32>
    %72 = vector.shape_cast %52 : vector<8x8xf32> to vector<8x1x8xf32>
    %73 = vector.shape_cast %57 : vector<8x8xf32> to vector<8x1x8xf32>
    %74 = vector.shape_cast %62 : vector<8x8xf32> to vector<8x1x8xf32>
    %75 = vector.shape_cast %67 : vector<8x8xf32> to vector<8x1x8xf32>
    %76 = tpu.concatenate %68, %69, %70, %71, %72, %73, %74, %75 in 1 : vector<8x1x8xf32>, vector<8x1x8xf32>, vector<8x1x8xf32>, vector<8x1x8xf32>, vector<8x1x8xf32>, vector<8x1x8xf32>, vector<8x1x8xf32>, vector<8x1x8xf32> -> vector<8x8x8xf32>
    %cst_11 = arith.constant 0.000000e+00 : f32
    %77 = vector.broadcast %cst_11 : f32 to vector<1x8x8xf32>
    %cst_12 = arith.constant 0.000000e+00 : f32
    %78 = vector.broadcast %cst_12 : f32 to vector<10x1x8xf32>
    %79 = tpu.concatenate %77, %76, %77 in 0 : vector<1x8x8xf32>, vector<8x8x8xf32>, vector<1x8x8xf32> -> vector<10x8x8xf32>
    %80 = tpu.concatenate %78, %79, %78 in 1 : vector<10x1x8xf32>, vector<10x8x8xf32>, vector<10x1x8xf32> -> vector<10x10x8xf32>
    %81 = vector.extract_strided_slice %80 {offsets = [0, 0, 0], sizes = [8, 8, 8], strides = [1, 1, 1]} : vector<10x10x8xf32> to vector<8x8x8xf32>
    %82 = vector.extract_strided_slice %80 {offsets = [0, 1, 0], sizes = [8, 8, 8], strides = [1, 1, 1]} : vector<10x10x8xf32> to vector<8x8x8xf32>
    %83 = vector.extract_strided_slice %80 {offsets = [0, 2, 0], sizes = [8, 8, 8], strides = [1, 1, 1]} : vector<10x10x8xf32> to vector<8x8x8xf32>
    %84 = vector.extract_strided_slice %80 {offsets = [1, 0, 0], sizes = [8, 8, 8], strides = [1, 1, 1]} : vector<10x10x8xf32> to vector<8x8x8xf32>
    %85 = vector.extract_strided_slice %80 {offsets = [1, 1, 0], sizes = [8, 8, 8], strides = [1, 1, 1]} : vector<10x10x8xf32> to vector<8x8x8xf32>
    %86 = vector.extract_strided_slice %80 {offsets = [1, 2, 0], sizes = [8, 8, 8], strides = [1, 1, 1]} : vector<10x10x8xf32> to vector<8x8x8xf32>
    %87 = vector.extract_strided_slice %80 {offsets = [2, 0, 0], sizes = [8, 8, 8], strides = [1, 1, 1]} : vector<10x10x8xf32> to vector<8x8x8xf32>
    %88 = vector.extract_strided_slice %80 {offsets = [2, 1, 0], sizes = [8, 8, 8], strides = [1, 1, 1]} : vector<10x10x8xf32> to vector<8x8x8xf32>
    %89 = vector.extract_strided_slice %80 {offsets = [2, 2, 0], sizes = [8, 8, 8], strides = [1, 1, 1]} : vector<10x10x8xf32> to vector<8x8x8xf32>
    %90 = tpu.concatenate %81, %82, %83, %84, %85, %86, %87, %88, %89 in 2 : vector<8x8x8xf32>, vector<8x8x8xf32>, vector<8x8x8xf32>, vector<8x8x8xf32>, vector<8x8x8xf32>, vector<8x8x8xf32>, vector<8x8x8xf32>, vector<8x8x8xf32>, vector<8x8x8xf32> -> vector<8x8x72xf32>
    %91 = vector.shape_cast %90 : vector<8x8x72xf32> to vector<64x72xf32>
    %92 = arith.truncf %91 : vector<64x72xf32> to vector<64x72xbf16>
    %c0_13 = arith.constant 0 : index
    %c0_14 = arith.constant 0 : index
    %93 = vector.load %arg4[%c0_13, %c0_14] : memref<72x16xbf16, #tpu.memory_space<vmem>>, vector<72x16xbf16>
    %cst_15 = arith.constant dense<0.000000e+00> : vector<64x16xf32>
    %94 = tpu.matmul %92, %93, %cst_15 {dimension_numbers = #tpu.dot_dimension_numbers<[1], [0], [0], [1], [0, 0, 1, 1], [], []>} : vector<64x72xbf16>, vector<72x16xbf16>, vector<64x16xf32> -> vector<64x16xf32>
    %c0_16 = arith.constant 0 : index
    %c0_17 = arith.constant 0 : index
    %95 = vector.load %arg5[%c0_16, %c0_17] : memref<1x16xf32, #tpu.memory_space<vmem>>, vector<1x16xf32>
    %96 = vector.broadcast %95 : vector<1x16xf32> to vector<64x16xf32>
    %97 = arith.addf %94, %96 : vector<64x16xf32>
    %cst_18 = arith.constant 0.000000e+00 : f32
    %98 = vector.broadcast %cst_18 : f32 to vector<64x16xf32>
    %99 = arith.maximumf %97, %98 : vector<64x16xf32>
    %100 = vector.shape_cast %99 : vector<64x16xf32> to vector<8x8x16xf32>
    %101 = vector.shape_cast %100 : vector<8x8x16xf32> to vector<4x2x8x16xf32>
    %cst_19 = arith.constant dense<0xFF800000> : vector<4x8x16xf32>
    %102 = vector.multi_reduction <maximumf>, %101, %cst_19 [1] : vector<4x2x8x16xf32> to vector<4x8x16xf32>
    %103 = vector.extract_strided_slice %102 {offsets = [0, 0, 0], sizes = [4, 1, 16], strides = [1, 1, 1]} : vector<4x8x16xf32> to vector<4x1x16xf32>
    %104 = vector.shape_cast %103 : vector<4x1x16xf32> to vector<4x16xf32>
    %105 = vector.extract_strided_slice %102 {offsets = [0, 1, 0], sizes = [4, 1, 16], strides = [1, 1, 1]} : vector<4x8x16xf32> to vector<4x1x16xf32>
    %106 = vector.shape_cast %105 : vector<4x1x16xf32> to vector<4x16xf32>
    %107 = arith.maximumf %104, %106 : vector<4x16xf32>
    %108 = vector.extract_strided_slice %102 {offsets = [0, 2, 0], sizes = [4, 1, 16], strides = [1, 1, 1]} : vector<4x8x16xf32> to vector<4x1x16xf32>
    %109 = vector.shape_cast %108 : vector<4x1x16xf32> to vector<4x16xf32>
    %110 = vector.extract_strided_slice %102 {offsets = [0, 3, 0], sizes = [4, 1, 16], strides = [1, 1, 1]} : vector<4x8x16xf32> to vector<4x1x16xf32>
    %111 = vector.shape_cast %110 : vector<4x1x16xf32> to vector<4x16xf32>
    %112 = arith.maximumf %109, %111 : vector<4x16xf32>
    %113 = vector.extract_strided_slice %102 {offsets = [0, 4, 0], sizes = [4, 1, 16], strides = [1, 1, 1]} : vector<4x8x16xf32> to vector<4x1x16xf32>
    %114 = vector.shape_cast %113 : vector<4x1x16xf32> to vector<4x16xf32>
    %115 = vector.extract_strided_slice %102 {offsets = [0, 5, 0], sizes = [4, 1, 16], strides = [1, 1, 1]} : vector<4x8x16xf32> to vector<4x1x16xf32>
    %116 = vector.shape_cast %115 : vector<4x1x16xf32> to vector<4x16xf32>
    %117 = arith.maximumf %114, %116 : vector<4x16xf32>
    %118 = vector.extract_strided_slice %102 {offsets = [0, 6, 0], sizes = [4, 1, 16], strides = [1, 1, 1]} : vector<4x8x16xf32> to vector<4x1x16xf32>
    %119 = vector.shape_cast %118 : vector<4x1x16xf32> to vector<4x16xf32>
    %120 = vector.extract_strided_slice %102 {offsets = [0, 7, 0], sizes = [4, 1, 16], strides = [1, 1, 1]} : vector<4x8x16xf32> to vector<4x1x16xf32>
    %121 = vector.shape_cast %120 : vector<4x1x16xf32> to vector<4x16xf32>
    %122 = arith.maximumf %119, %121 : vector<4x16xf32>
    %123 = tpu.concatenate %107, %112, %117, %122 in 1 : vector<4x16xf32>, vector<4x16xf32>, vector<4x16xf32>, vector<4x16xf32> -> vector<4x64xf32>
    %124 = vector.extract_strided_slice %123 {offsets = [0, 0], sizes = [1, 64], strides = [1, 1]} : vector<4x64xf32> to vector<1x64xf32>
    %125 = vector.extract_strided_slice %123 {offsets = [1, 0], sizes = [1, 64], strides = [1, 1]} : vector<4x64xf32> to vector<1x64xf32>
    %126 = vector.extract_strided_slice %123 {offsets = [2, 0], sizes = [1, 64], strides = [1, 1]} : vector<4x64xf32> to vector<1x64xf32>
    %127 = vector.extract_strided_slice %123 {offsets = [3, 0], sizes = [1, 64], strides = [1, 1]} : vector<4x64xf32> to vector<1x64xf32>
    %128 = tpu.concatenate %124, %125, %126, %127 in 1 : vector<1x64xf32>, vector<1x64xf32>, vector<1x64xf32>, vector<1x64xf32> -> vector<1x256xf32>
    %c1 = arith.constant 1 : index
    %c0_20 = arith.constant 0 : index
    %c0_21 = arith.constant 0 : index
    %c0_22 = arith.constant 0 : index
    %129 = vector.load %arg1[%c1, %c0_20, %c0_21, %c0_22] : memref<2x16x16x4xf32, #tpu.memory_space<vmem>>, vector<1x16x16x4xf32>
    %130 = vector.shape_cast %129 : vector<1x16x16x4xf32> to vector<16x16x4xf32>
    %cst_23 = arith.constant 0.000000e+00 : f32
    %131 = vector.broadcast %cst_23 : f32 to vector<1x16x4xf32>
    %cst_24 = arith.constant 0.000000e+00 : f32
    %132 = vector.broadcast %cst_24 : f32 to vector<18x1x4xf32>
    %133 = tpu.concatenate %131, %130, %131 in 0 : vector<1x16x4xf32>, vector<16x16x4xf32>, vector<1x16x4xf32> -> vector<18x16x4xf32>
    %134 = tpu.concatenate %132, %133, %132 in 1 : vector<18x1x4xf32>, vector<18x16x4xf32>, vector<18x1x4xf32> -> vector<18x18x4xf32>
    %135 = vector.extract_strided_slice %134 {offsets = [0, 0, 0], sizes = [16, 16, 4], strides = [1, 1, 1]} : vector<18x18x4xf32> to vector<16x16x4xf32>
    %136 = vector.extract_strided_slice %134 {offsets = [0, 1, 0], sizes = [16, 16, 4], strides = [1, 1, 1]} : vector<18x18x4xf32> to vector<16x16x4xf32>
    %137 = vector.extract_strided_slice %134 {offsets = [0, 2, 0], sizes = [16, 16, 4], strides = [1, 1, 1]} : vector<18x18x4xf32> to vector<16x16x4xf32>
    %138 = vector.extract_strided_slice %134 {offsets = [1, 0, 0], sizes = [16, 16, 4], strides = [1, 1, 1]} : vector<18x18x4xf32> to vector<16x16x4xf32>
    %139 = vector.extract_strided_slice %134 {offsets = [1, 1, 0], sizes = [16, 16, 4], strides = [1, 1, 1]} : vector<18x18x4xf32> to vector<16x16x4xf32>
    %140 = vector.extract_strided_slice %134 {offsets = [1, 2, 0], sizes = [16, 16, 4], strides = [1, 1, 1]} : vector<18x18x4xf32> to vector<16x16x4xf32>
    %141 = vector.extract_strided_slice %134 {offsets = [2, 0, 0], sizes = [16, 16, 4], strides = [1, 1, 1]} : vector<18x18x4xf32> to vector<16x16x4xf32>
    %142 = vector.extract_strided_slice %134 {offsets = [2, 1, 0], sizes = [16, 16, 4], strides = [1, 1, 1]} : vector<18x18x4xf32> to vector<16x16x4xf32>
    %143 = vector.extract_strided_slice %134 {offsets = [2, 2, 0], sizes = [16, 16, 4], strides = [1, 1, 1]} : vector<18x18x4xf32> to vector<16x16x4xf32>
    %144 = tpu.concatenate %135, %136, %137, %138, %139, %140, %141, %142, %143 in 2 : vector<16x16x4xf32>, vector<16x16x4xf32>, vector<16x16x4xf32>, vector<16x16x4xf32>, vector<16x16x4xf32>, vector<16x16x4xf32>, vector<16x16x4xf32>, vector<16x16x4xf32>, vector<16x16x4xf32> -> vector<16x16x36xf32>
    %145 = vector.shape_cast %144 : vector<16x16x36xf32> to vector<256x36xf32>
    %146 = arith.truncf %145 : vector<256x36xf32> to vector<256x36xbf16>
    %c0_25 = arith.constant 0 : index
    %c0_26 = arith.constant 0 : index
    %147 = vector.load %arg2[%c0_25, %c0_26] : memref<36x8xbf16, #tpu.memory_space<vmem>>, vector<36x8xbf16>
    %cst_27 = arith.constant dense<0.000000e+00> : vector<256x8xf32>
    %148 = tpu.matmul %146, %147, %cst_27 {dimension_numbers = #tpu.dot_dimension_numbers<[1], [0], [0], [1], [0, 0, 1, 1], [], []>} : vector<256x36xbf16>, vector<36x8xbf16>, vector<256x8xf32> -> vector<256x8xf32>
    %c0_28 = arith.constant 0 : index
    %c0_29 = arith.constant 0 : index
    %149 = vector.load %arg3[%c0_28, %c0_29] : memref<1x8xf32, #tpu.memory_space<vmem>>, vector<1x8xf32>
    %150 = vector.broadcast %149 : vector<1x8xf32> to vector<256x8xf32>
    %151 = arith.addf %148, %150 : vector<256x8xf32>
    %cst_30 = arith.constant 0.000000e+00 : f32
    %152 = vector.broadcast %cst_30 : f32 to vector<256x8xf32>
    %153 = arith.maximumf %151, %152 : vector<256x8xf32>
    %154 = vector.shape_cast %153 : vector<256x8xf32> to vector<16x16x8xf32>
    %155 = vector.shape_cast %154 : vector<16x16x8xf32> to vector<8x2x16x8xf32>
    %cst_31 = arith.constant dense<0xFF800000> : vector<8x16x8xf32>
    %156 = vector.multi_reduction <maximumf>, %155, %cst_31 [1] : vector<8x2x16x8xf32> to vector<8x16x8xf32>
    %157 = vector.extract_strided_slice %156 {offsets = [0, 0, 0], sizes = [8, 1, 8], strides = [1, 1, 1]} : vector<8x16x8xf32> to vector<8x1x8xf32>
    %158 = vector.shape_cast %157 : vector<8x1x8xf32> to vector<8x8xf32>
    %159 = vector.extract_strided_slice %156 {offsets = [0, 1, 0], sizes = [8, 1, 8], strides = [1, 1, 1]} : vector<8x16x8xf32> to vector<8x1x8xf32>
    %160 = vector.shape_cast %159 : vector<8x1x8xf32> to vector<8x8xf32>
    %161 = arith.maximumf %158, %160 : vector<8x8xf32>
    %162 = vector.extract_strided_slice %156 {offsets = [0, 2, 0], sizes = [8, 1, 8], strides = [1, 1, 1]} : vector<8x16x8xf32> to vector<8x1x8xf32>
    %163 = vector.shape_cast %162 : vector<8x1x8xf32> to vector<8x8xf32>
    %164 = vector.extract_strided_slice %156 {offsets = [0, 3, 0], sizes = [8, 1, 8], strides = [1, 1, 1]} : vector<8x16x8xf32> to vector<8x1x8xf32>
    %165 = vector.shape_cast %164 : vector<8x1x8xf32> to vector<8x8xf32>
    %166 = arith.maximumf %163, %165 : vector<8x8xf32>
    %167 = vector.extract_strided_slice %156 {offsets = [0, 4, 0], sizes = [8, 1, 8], strides = [1, 1, 1]} : vector<8x16x8xf32> to vector<8x1x8xf32>
    %168 = vector.shape_cast %167 : vector<8x1x8xf32> to vector<8x8xf32>
    %169 = vector.extract_strided_slice %156 {offsets = [0, 5, 0], sizes = [8, 1, 8], strides = [1, 1, 1]} : vector<8x16x8xf32> to vector<8x1x8xf32>
    %170 = vector.shape_cast %169 : vector<8x1x8xf32> to vector<8x8xf32>
    %171 = arith.maximumf %168, %170 : vector<8x8xf32>
    %172 = vector.extract_strided_slice %156 {offsets = [0, 6, 0], sizes = [8, 1, 8], strides = [1, 1, 1]} : vector<8x16x8xf32> to vector<8x1x8xf32>
    %173 = vector.shape_cast %172 : vector<8x1x8xf32> to vector<8x8xf32>
    %174 = vector.extract_strided_slice %156 {offsets = [0, 7, 0], sizes = [8, 1, 8], strides = [1, 1, 1]} : vector<8x16x8xf32> to vector<8x1x8xf32>
    %175 = vector.shape_cast %174 : vector<8x1x8xf32> to vector<8x8xf32>
    %176 = arith.maximumf %173, %175 : vector<8x8xf32>
    %177 = vector.extract_strided_slice %156 {offsets = [0, 8, 0], sizes = [8, 1, 8], strides = [1, 1, 1]} : vector<8x16x8xf32> to vector<8x1x8xf32>
    %178 = vector.shape_cast %177 : vector<8x1x8xf32> to vector<8x8xf32>
    %179 = vector.extract_strided_slice %156 {offsets = [0, 9, 0], sizes = [8, 1, 8], strides = [1, 1, 1]} : vector<8x16x8xf32> to vector<8x1x8xf32>
    %180 = vector.shape_cast %179 : vector<8x1x8xf32> to vector<8x8xf32>
    %181 = arith.maximumf %178, %180 : vector<8x8xf32>
    %182 = vector.extract_strided_slice %156 {offsets = [0, 10, 0], sizes = [8, 1, 8], strides = [1, 1, 1]} : vector<8x16x8xf32> to vector<8x1x8xf32>
    %183 = vector.shape_cast %182 : vector<8x1x8xf32> to vector<8x8xf32>
    %184 = vector.extract_strided_slice %156 {offsets = [0, 11, 0], sizes = [8, 1, 8], strides = [1, 1, 1]} : vector<8x16x8xf32> to vector<8x1x8xf32>
    %185 = vector.shape_cast %184 : vector<8x1x8xf32> to vector<8x8xf32>
    %186 = arith.maximumf %183, %185 : vector<8x8xf32>
    %187 = vector.extract_strided_slice %156 {offsets = [0, 12, 0], sizes = [8, 1, 8], strides = [1, 1, 1]} : vector<8x16x8xf32> to vector<8x1x8xf32>
    %188 = vector.shape_cast %187 : vector<8x1x8xf32> to vector<8x8xf32>
    %189 = vector.extract_strided_slice %156 {offsets = [0, 13, 0], sizes = [8, 1, 8], strides = [1, 1, 1]} : vector<8x16x8xf32> to vector<8x1x8xf32>
    %190 = vector.shape_cast %189 : vector<8x1x8xf32> to vector<8x8xf32>
    %191 = arith.maximumf %188, %190 : vector<8x8xf32>
    %192 = vector.extract_strided_slice %156 {offsets = [0, 14, 0], sizes = [8, 1, 8], strides = [1, 1, 1]} : vector<8x16x8xf32> to vector<8x1x8xf32>
    %193 = vector.shape_cast %192 : vector<8x1x8xf32> to vector<8x8xf32>
    %194 = vector.extract_strided_slice %156 {offsets = [0, 15, 0], sizes = [8, 1, 8], strides = [1, 1, 1]} : vector<8x16x8xf32> to vector<8x1x8xf32>
    %195 = vector.shape_cast %194 : vector<8x1x8xf32> to vector<8x8xf32>
    %196 = arith.maximumf %193, %195 : vector<8x8xf32>
    %197 = vector.shape_cast %161 : vector<8x8xf32> to vector<8x1x8xf32>
    %198 = vector.shape_cast %166 : vector<8x8xf32> to vector<8x1x8xf32>
    %199 = vector.shape_cast %171 : vector<8x8xf32> to vector<8x1x8xf32>
    %200 = vector.shape_cast %176 : vector<8x8xf32> to vector<8x1x8xf32>
    %201 = vector.shape_cast %181 : vector<8x8xf32> to vector<8x1x8xf32>
    %202 = vector.shape_cast %186 : vector<8x8xf32> to vector<8x1x8xf32>
    %203 = vector.shape_cast %191 : vector<8x8xf32> to vector<8x1x8xf32>
    %204 = vector.shape_cast %196 : vector<8x8xf32> to vector<8x1x8xf32>
    %205 = tpu.concatenate %197, %198, %199, %200, %201, %202, %203, %204 in 1 : vector<8x1x8xf32>, vector<8x1x8xf32>, vector<8x1x8xf32>, vector<8x1x8xf32>, vector<8x1x8xf32>, vector<8x1x8xf32>, vector<8x1x8xf32>, vector<8x1x8xf32> -> vector<8x8x8xf32>
    %cst_32 = arith.constant 0.000000e+00 : f32
    %206 = vector.broadcast %cst_32 : f32 to vector<1x8x8xf32>
    %cst_33 = arith.constant 0.000000e+00 : f32
    %207 = vector.broadcast %cst_33 : f32 to vector<10x1x8xf32>
    %208 = tpu.concatenate %206, %205, %206 in 0 : vector<1x8x8xf32>, vector<8x8x8xf32>, vector<1x8x8xf32> -> vector<10x8x8xf32>
    %209 = tpu.concatenate %207, %208, %207 in 1 : vector<10x1x8xf32>, vector<10x8x8xf32>, vector<10x1x8xf32> -> vector<10x10x8xf32>
    %210 = vector.extract_strided_slice %209 {offsets = [0, 0, 0], sizes = [8, 8, 8], strides = [1, 1, 1]} : vector<10x10x8xf32> to vector<8x8x8xf32>
    %211 = vector.extract_strided_slice %209 {offsets = [0, 1, 0], sizes = [8, 8, 8], strides = [1, 1, 1]} : vector<10x10x8xf32> to vector<8x8x8xf32>
    %212 = vector.extract_strided_slice %209 {offsets = [0, 2, 0], sizes = [8, 8, 8], strides = [1, 1, 1]} : vector<10x10x8xf32> to vector<8x8x8xf32>
    %213 = vector.extract_strided_slice %209 {offsets = [1, 0, 0], sizes = [8, 8, 8], strides = [1, 1, 1]} : vector<10x10x8xf32> to vector<8x8x8xf32>
    %214 = vector.extract_strided_slice %209 {offsets = [1, 1, 0], sizes = [8, 8, 8], strides = [1, 1, 1]} : vector<10x10x8xf32> to vector<8x8x8xf32>
    %215 = vector.extract_strided_slice %209 {offsets = [1, 2, 0], sizes = [8, 8, 8], strides = [1, 1, 1]} : vector<10x10x8xf32> to vector<8x8x8xf32>
    %216 = vector.extract_strided_slice %209 {offsets = [2, 0, 0], sizes = [8, 8, 8], strides = [1, 1, 1]} : vector<10x10x8xf32> to vector<8x8x8xf32>
    %217 = vector.extract_strided_slice %209 {offsets = [2, 1, 0], sizes = [8, 8, 8], strides = [1, 1, 1]} : vector<10x10x8xf32> to vector<8x8x8xf32>
    %218 = vector.extract_strided_slice %209 {offsets = [2, 2, 0], sizes = [8, 8, 8], strides = [1, 1, 1]} : vector<10x10x8xf32> to vector<8x8x8xf32>
    %219 = tpu.concatenate %210, %211, %212, %213, %214, %215, %216, %217, %218 in 2 : vector<8x8x8xf32>, vector<8x8x8xf32>, vector<8x8x8xf32>, vector<8x8x8xf32>, vector<8x8x8xf32>, vector<8x8x8xf32>, vector<8x8x8xf32>, vector<8x8x8xf32>, vector<8x8x8xf32> -> vector<8x8x72xf32>
    %220 = vector.shape_cast %219 : vector<8x8x72xf32> to vector<64x72xf32>
    %221 = arith.truncf %220 : vector<64x72xf32> to vector<64x72xbf16>
    %c0_34 = arith.constant 0 : index
    %c0_35 = arith.constant 0 : index
    %222 = vector.load %arg4[%c0_34, %c0_35] : memref<72x16xbf16, #tpu.memory_space<vmem>>, vector<72x16xbf16>
    %cst_36 = arith.constant dense<0.000000e+00> : vector<64x16xf32>
    %223 = tpu.matmul %221, %222, %cst_36 {dimension_numbers = #tpu.dot_dimension_numbers<[1], [0], [0], [1], [0, 0, 1, 1], [], []>} : vector<64x72xbf16>, vector<72x16xbf16>, vector<64x16xf32> -> vector<64x16xf32>
    %c0_37 = arith.constant 0 : index
    %c0_38 = arith.constant 0 : index
    %224 = vector.load %arg5[%c0_37, %c0_38] : memref<1x16xf32, #tpu.memory_space<vmem>>, vector<1x16xf32>
    %225 = vector.broadcast %224 : vector<1x16xf32> to vector<64x16xf32>
    %226 = arith.addf %223, %225 : vector<64x16xf32>
    %cst_39 = arith.constant 0.000000e+00 : f32
    %227 = vector.broadcast %cst_39 : f32 to vector<64x16xf32>
    %228 = arith.maximumf %226, %227 : vector<64x16xf32>
    %229 = vector.shape_cast %228 : vector<64x16xf32> to vector<8x8x16xf32>
    %230 = vector.shape_cast %229 : vector<8x8x16xf32> to vector<4x2x8x16xf32>
    %cst_40 = arith.constant dense<0xFF800000> : vector<4x8x16xf32>
    %231 = vector.multi_reduction <maximumf>, %230, %cst_40 [1] : vector<4x2x8x16xf32> to vector<4x8x16xf32>
    %232 = vector.extract_strided_slice %231 {offsets = [0, 0, 0], sizes = [4, 1, 16], strides = [1, 1, 1]} : vector<4x8x16xf32> to vector<4x1x16xf32>
    %233 = vector.shape_cast %232 : vector<4x1x16xf32> to vector<4x16xf32>
    %234 = vector.extract_strided_slice %231 {offsets = [0, 1, 0], sizes = [4, 1, 16], strides = [1, 1, 1]} : vector<4x8x16xf32> to vector<4x1x16xf32>
    %235 = vector.shape_cast %234 : vector<4x1x16xf32> to vector<4x16xf32>
    %236 = arith.maximumf %233, %235 : vector<4x16xf32>
    %237 = vector.extract_strided_slice %231 {offsets = [0, 2, 0], sizes = [4, 1, 16], strides = [1, 1, 1]} : vector<4x8x16xf32> to vector<4x1x16xf32>
    %238 = vector.shape_cast %237 : vector<4x1x16xf32> to vector<4x16xf32>
    %239 = vector.extract_strided_slice %231 {offsets = [0, 3, 0], sizes = [4, 1, 16], strides = [1, 1, 1]} : vector<4x8x16xf32> to vector<4x1x16xf32>
    %240 = vector.shape_cast %239 : vector<4x1x16xf32> to vector<4x16xf32>
    %241 = arith.maximumf %238, %240 : vector<4x16xf32>
    %242 = vector.extract_strided_slice %231 {offsets = [0, 4, 0], sizes = [4, 1, 16], strides = [1, 1, 1]} : vector<4x8x16xf32> to vector<4x1x16xf32>
    %243 = vector.shape_cast %242 : vector<4x1x16xf32> to vector<4x16xf32>
    %244 = vector.extract_strided_slice %231 {offsets = [0, 5, 0], sizes = [4, 1, 16], strides = [1, 1, 1]} : vector<4x8x16xf32> to vector<4x1x16xf32>
    %245 = vector.shape_cast %244 : vector<4x1x16xf32> to vector<4x16xf32>
    %246 = arith.maximumf %243, %245 : vector<4x16xf32>
    %247 = vector.extract_strided_slice %231 {offsets = [0, 6, 0], sizes = [4, 1, 16], strides = [1, 1, 1]} : vector<4x8x16xf32> to vector<4x1x16xf32>
    %248 = vector.shape_cast %247 : vector<4x1x16xf32> to vector<4x16xf32>
    %249 = vector.extract_strided_slice %231 {offsets = [0, 7, 0], sizes = [4, 1, 16], strides = [1, 1, 1]} : vector<4x8x16xf32> to vector<4x1x16xf32>
    %250 = vector.shape_cast %249 : vector<4x1x16xf32> to vector<4x16xf32>
    %251 = arith.maximumf %248, %250 : vector<4x16xf32>
    %252 = tpu.concatenate %236, %241, %246, %251 in 1 : vector<4x16xf32>, vector<4x16xf32>, vector<4x16xf32>, vector<4x16xf32> -> vector<4x64xf32>
    %253 = vector.extract_strided_slice %252 {offsets = [0, 0], sizes = [1, 64], strides = [1, 1]} : vector<4x64xf32> to vector<1x64xf32>
    %254 = vector.extract_strided_slice %252 {offsets = [1, 0], sizes = [1, 64], strides = [1, 1]} : vector<4x64xf32> to vector<1x64xf32>
    %255 = vector.extract_strided_slice %252 {offsets = [2, 0], sizes = [1, 64], strides = [1, 1]} : vector<4x64xf32> to vector<1x64xf32>
    %256 = vector.extract_strided_slice %252 {offsets = [3, 0], sizes = [1, 64], strides = [1, 1]} : vector<4x64xf32> to vector<1x64xf32>
    %257 = tpu.concatenate %253, %254, %255, %256 in 1 : vector<1x64xf32>, vector<1x64xf32>, vector<1x64xf32>, vector<1x64xf32> -> vector<1x256xf32>
    %258 = tpu.concatenate %128, %257 in 0 : vector<1x256xf32>, vector<1x256xf32> -> vector<2x256xf32>
    %259 = arith.truncf %258 : vector<2x256xf32> to vector<2x256xbf16>
    %c0_41 = arith.constant 0 : index
    %c0_42 = arith.constant 0 : index
    %260 = vector.load %arg6[%c0_41, %c0_42] : memref<256x256xbf16, #tpu.memory_space<vmem>>, vector<256x256xbf16>
    %cst_43 = arith.constant dense<0.000000e+00> : vector<2x256xf32>
    %261 = tpu.matmul %259, %260, %cst_43 {dimension_numbers = #tpu.dot_dimension_numbers<[1], [0], [0], [1], [0, 0, 1, 1], [], []>} : vector<2x256xbf16>, vector<256x256xbf16>, vector<2x256xf32> -> vector<2x256xf32>
    %c0_44 = arith.constant 0 : index
    %c0_45 = arith.constant 0 : index
    %262 = vector.load %arg7[%c0_44, %c0_45] : memref<1x256xf32, #tpu.memory_space<vmem>>, vector<1x256xf32>
    %263 = vector.broadcast %262 : vector<1x256xf32> to vector<2x256xf32>
    %264 = arith.addf %261, %263 : vector<2x256xf32>
    %cst_46 = arith.constant 0.000000e+00 : f32
    %265 = vector.broadcast %cst_46 : f32 to vector<2x256xf32>
    %266 = arith.maximumf %264, %265 : vector<2x256xf32>
    %267 = arith.truncf %266 : vector<2x256xf32> to vector<2x256xbf16>
    %c0_47 = arith.constant 0 : index
    %c0_48 = arith.constant 0 : index
    %268 = vector.load %arg8[%c0_47, %c0_48] : memref<256x256xbf16, #tpu.memory_space<vmem>>, vector<256x256xbf16>
    %cst_49 = arith.constant dense<0.000000e+00> : vector<2x256xf32>
    %269 = tpu.matmul %267, %268, %cst_49 {dimension_numbers = #tpu.dot_dimension_numbers<[1], [0], [0], [1], [0, 0, 1, 1], [], []>} : vector<2x256xbf16>, vector<256x256xbf16>, vector<2x256xf32> -> vector<2x256xf32>
    %c0_50 = arith.constant 0 : index
    %c0_51 = arith.constant 0 : index
    %270 = vector.load %arg9[%c0_50, %c0_51] : memref<1x256xf32, #tpu.memory_space<vmem>>, vector<1x256xf32>
    %271 = vector.broadcast %270 : vector<1x256xf32> to vector<2x256xf32>
    %272 = arith.addf %269, %271 : vector<2x256xf32>
    %cst_52 = arith.constant 0.000000e+00 : f32
    %273 = vector.broadcast %cst_52 : f32 to vector<2x256xf32>
    %274 = arith.maximumf %272, %273 : vector<2x256xf32>
    %275 = arith.truncf %274 : vector<2x256xf32> to vector<2x256xbf16>
    %c0_53 = arith.constant 0 : index
    %c0_54 = arith.constant 0 : index
    %276 = vector.load %arg10[%c0_53, %c0_54] : memref<256x16xbf16, #tpu.memory_space<vmem>>, vector<256x16xbf16>
    %cst_55 = arith.constant dense<0.000000e+00> : vector<2x16xf32>
    %277 = tpu.matmul %275, %276, %cst_55 {dimension_numbers = #tpu.dot_dimension_numbers<[1], [0], [0], [1], [0, 0, 1, 1], [], []>} : vector<2x256xbf16>, vector<256x16xbf16>, vector<2x16xf32> -> vector<2x16xf32>
    %c0_56 = arith.constant 0 : index
    %c0_57 = arith.constant 0 : index
    %278 = vector.load %arg11[%c0_56, %c0_57] : memref<1x16xf32, #tpu.memory_space<vmem>>, vector<1x16xf32>
    %279 = vector.broadcast %278 : vector<1x16xf32> to vector<2x16xf32>
    %280 = arith.addf %277, %279 : vector<2x16xf32>
    %c0_58 = arith.constant 0 : index
    %c0_59 = arith.constant 0 : index
    %281 = vector.load %arg12[%c0_58, %c0_59] : memref<2x16xf32, #tpu.memory_space<vmem>>, vector<2x16xf32>
    tpu.vector_store %arg12[%c0_58, %c0_59], %280 {strides = array<i32>} : memref<2x16xf32, #tpu.memory_space<vmem>>, vector<2x16xf32>,
    return
  }
  func.func @transform_0(%arg0: i32) -> (i32, i32, i32, i32) {
    %c0_i32 = arith.constant 0 : i32
    %c0_i32_0 = arith.constant 0 : i32
    %c0_i32_1 = arith.constant 0 : i32
    %c0_i32_2 = arith.constant 0 : i32
    %c0_i32_3 = arith.constant 0 : i32
    return %c0_i32, %c0_i32_0, %c0_i32_1, %c0_i32_2 : i32, i32, i32, i32
  }
  func.func @transform_1(%arg0: i32) -> (i32, i32) {
    %c0_i32 = arith.constant 0 : i32
    %c0_i32_0 = arith.constant 0 : i32
    %c0_i32_1 = arith.constant 0 : i32
    return %c0_i32, %c0_i32_0 : i32, i32
  }
  func.func @transform_2(%arg0: i32) -> (i32, i32) {
    %c0_i32 = arith.constant 0 : i32
    %c0_i32_0 = arith.constant 0 : i32
    %c0_i32_1 = arith.constant 0 : i32
    return %c0_i32, %c0_i32_0 : i32, i32
  }
  func.func @transform_3(%arg0: i32) -> (i32, i32) {
    %c0_i32 = arith.constant 0 : i32
    %c0_i32_0 = arith.constant 0 : i32
    %c0_i32_1 = arith.constant 0 : i32
    return %c0_i32, %c0_i32_0 : i32, i32
  }
  func.func @transform_4(%arg0: i32) -> (i32, i32) {
    %c0_i32 = arith.constant 0 : i32
    %c0_i32_0 = arith.constant 0 : i32
    %c0_i32_1 = arith.constant 0 : i32
    return %c0_i32, %c0_i32_0 : i32, i32
  }
  func.func @transform_5(%arg0: i32) -> (i32, i32) {
    %c0_i32 = arith.constant 0 : i32
    %c0_i32_0 = arith.constant 0 : i32
    %c0_i32_1 = arith.constant 0 : i32
    return %c0_i32, %c0_i32_0 : i32, i32
  }
  func.func @transform_6(%arg0: i32) -> (i32, i32) {
    %c0_i32 = arith.constant 0 : i32
    %c0_i32_0 = arith.constant 0 : i32
    %c0_i32_1 = arith.constant 0 : i32
    return %c0_i32, %c0_i32_0 : i32, i32
  }
  func.func @transform_7(%arg0: i32) -> (i32, i32) {
    %c0_i32 = arith.constant 0 : i32
    %c0_i32_0 = arith.constant 0 : i32
    %c0_i32_1 = arith.constant 0 : i32
    return %c0_i32, %c0_i32_0 : i32, i32
  }
  func.func @transform_8(%arg0: i32) -> (i32, i32) {
    %c0_i32 = arith.constant 0 : i32
    %c0_i32_0 = arith.constant 0 : i32
    %c0_i32_1 = arith.constant 0 : i32
    return %c0_i32, %c0_i32_0 : i32, i32
  }
  func.func @transform_9(%arg0: i32) -> (i32, i32) {
    %c0_i32 = arith.constant 0 : i32
    %c0_i32_0 = arith.constant 0 : i32
    %c0_i32_1 = arith.constant 0 : i32
    return %c0_i32, %c0_i32_0 : i32, i32
  }
  func.func @transform_10(%arg0: i32) -> (i32, i32) {
    %c0_i32 = arith.constant 0 : i32
    %c0_i32_0 = arith.constant 0 : i32
    %c0_i32_1 = arith.constant 0 : i32
    return %c0_i32, %c0_i32_0 : i32, i32
  }
  func.func @transform_11(%arg0: i32) -> (i32, i32) {
    %c0_i32 = arith.constant 0 : i32
    %c0_i32_0 = arith.constant 0 : i32
    %c0_i32_1 = arith.constant 0 : i32
    return %c0_i32, %c0_i32_0 : i32, i32
  }
}

</mosaic_0001>

<bundles_post_ra>
// kernel: trt_basis_vgg_forward.1
= control target key start
LH: loop header
LB: loop body
LE: loop exit
PB: predicated region body
PF: predicated region fallthrough
CT: control target
= control target key end

     0   :  { %vm105_vm0 = vcmask 1040384   ;;  %v7697_v2 = vmov 0.0   ;;  %vm271_vm1 = vcmask 1046528   ;;  %s7698_s14 = smov 4   ;;  %s12715_s0 = inlined_call_operand.vmem [shape: f32[2,16,16,4], index: 0, kind: input, shape index: {}]   ;;  %s12716_s1 = inlined_call_operand.vmem [shape: bf16[36,8], index: 1, kind: input, shape index: {}]   ;;  %s12717_s2 = inlined_call_operand.vmem [shape: f32[1,8], index: 2, kind: input, shape index: {}]   ;;  %s12718_s3 = inlined_call_operand.vmem [shape: bf16[72,16], index: 3, kind: input, shape index: {}]   ;;  %s12719_s4 = inlined_call_operand.vmem [shape: f32[1,16], index: 4, kind: input, shape index: {}]   ;;  %s12720_s5 = inlined_call_operand.vmem [shape: bf16[256,256], index: 5, kind: input, shape index: {}]   ;;  %s12721_s6 = inlined_call_operand.vmem [shape: f32[1,256], index: 6, kind: input, shape index: {}]   ;;  %s12722_s7 = inlined_call_operand.vmem [shape: bf16[256,256], index: 7, kind: input, shape index: {}]   ;;  %s12723_s8 = inlined_call_operand.vmem [shape: f32[1,256], index: 8, kind: input, shape index: {}]   ;;  %s12724_s9 = inlined_call_operand.vmem [shape: bf16[256,16], index: 9, kind: input, shape index: {}]   ;;  %s12725_s10 = inlined_call_operand.vmem [shape: f32[1,16], index: 10, kind: input, shape index: {}]   ;;  %s12726_s11 = inlined_call_operand.hbm [shape: f32[2,16], index: 11, kind: output, shape index: {}]  }
   0x1   :  { %v46_v0 = vld [vmem:[%s12715_s0 + $0x30] sm:$0xff]  ;;  %v47_v1 = vld [vmem:[%s12715_s0 + $0x38] sm:$0xff]  ;;  %v7777_v3 = vrot.slane %v7697_v2, 7  ;;  %v48_v14 = vld [vmem:[%s12715_s0 + $0x40] sm:$0xff] }
   0x2   :  { %v117_v4 = vrot.slane %v46_v0, 7  ;;  %v118_v5 = vrot.slane %v47_v1, 7  ;;  %v42_v6 = vld [vmem:[%s12715_s0 + $0x10] sm:$0xff]  ;;  %v43_v7 = vld [vmem:[%s12715_s0 + $0x18] sm:$0xff]  ;;  %v49_v25 = vld [vmem:[%s12715_s0 + $0x48] sm:$0xff]  ;;  %v120_v26 = vrot.slane %v48_v14, 7 }
   0x3   :  { %12923 = vst [vmem:[#allocation5_spill] sm:$0xff] %v7777_v3  ;;  %v111_v8 = vrot.slane %v42_v6, 7  ;;  %v112_v9 = vrot.slane %v43_v7, 7  ;;  %v7787_v10 = vsel %vm105_vm0, 0.0, %v7777_v3  ;;  %v7791_v11 = vsel %vm105_vm0, %v7777_v3, 0.0  ;;  %v44_v30 = vld [vmem:[%s12715_s0 + $0x20] sm:$0xff] }
   0x4   :  { %12924 = vst [vmem:[#allocation6_spill] sm:$0xff] %v7787_v10  ;;  %v273_v12 = vrot.slane %v7777_v3, 1  ;;  %v7795_v13 = vsel %vm105_vm0, %v117_v4, %v118_v5  ;;  %v12727_v15 = vrot.slane %v7787_v10, 1  ;;  %v12728_v16 = vrot.slane %v7791_v11, 1  ;;  %v45_v31 = vld [vmem:[%s12715_s0 + $0x28] sm:$0xff]  ;;  %v40_v44 = vld [vmem:[%s12715_s0] sm:$0xff] }
   0x5   :  { %12925 = vst [vmem:[#allocation7_spill] sm:$0xff] %v7791_v11  ;;  %v7803_v17 = vsel %vm105_vm0, 0.0, %v117_v4  ;;  %v7806_v18 = vsel %vm105_vm0, %v118_v5, 0.0  ;;  %v293_v20 = vrot.slane %v7795_v13, 1  ;;  %v7811_v21 = vsel %vm105_vm0, %v111_v8, %v112_v9  ;;  %v41_v53 = vld [vmem:[%s12715_s0 + $0x8] sm:$0xff]  ;;  %v54_v54 = vld [vmem:[%s12715_s0 + $0x70] sm:$0xff] }
   0x6   :  { %v292_v19 = vrot.slane %v7803_v17, 1  ;;  %12926 = vst [vmem:[#allocation8_spill] sm:$0xff] %v7811_v21  ;;  %v274_v22 = vsel %vm271_vm1, %v12727_v15, %v273_v12  ;;  %v276_v23 = vsel %vm271_vm1, %v273_v12, %v12728_v16  ;;  %v295_v24 = vrot.slane %v7806_v18, 1 }
   0x7   :  { %v7823_v27 = vpack.i.bf16 %v276_v23, %v274_v22  ;;  %v7827_v29 = vsel %vm105_vm0, 0.0, %v111_v8  ;;  %v7837_v33 = vsel %vm105_vm0, %v112_v9, 0.0  ;;  %v283_v35 = vrot.slane %v7811_v21, 1 }
   0x8   :  { %v294_v28 = vsel %vm271_vm1, %v292_v19, %v293_v20  ;;  %12928 = vst [vmem:[#allocation10_spill] sm:$0xff] %v7827_v29  ;;  %v296_v32 = vsel %vm271_vm1, %v293_v20, %v295_v24  ;;  %v282_v34 = vrot.slane %v7827_v29, 1  ;;  %v285_v38 = vrot.slane %v7837_v33, 1 }
   0x9   :  { %12927 = vst [vmem:[#allocation9_spill] sm:$0xff] %v7823_v27  ;;  %6092 = vrot.lane.b32.xlu0 %v7823_v27, %s7698_s14  ;;  %v7844_v37 = vpack.i.bf16 %v296_v32, %v294_v28  ;;  %v121_v39 = vrot.slane %v49_v25, 7  ;;  %v7849_v41 = vsel %vm105_vm0, 0.0, %v120_v26  ;;  %v114_v42 = vrot.slane %v44_v30, 7 }
   0xa   :  { %v284_v40 = vsel %vm271_vm1, %v282_v34, %v283_v35  ;;  %12930 = vst [vmem:[#allocation12_spill] sm:$0xff] %v7849_v41  ;;  %v115_v43 = vrot.slane %v45_v31, 7  ;;  %v286_v45 = vsel %vm271_vm1, %v283_v35, %v285_v38  ;;  %v297_v48 = vrot.slane %v7849_v41, 1 }
   0xb   :  { %12929 = vst [vmem:[#allocation11_spill] sm:$0xff] %v7844_v37  ;;  %6112 = vrot.lane.b32.xlu2 %v7844_v37, %s7698_s14  ;;  %v7858_v46 = vsel %vm105_vm0, %v120_v26, %v121_v39  ;;  %v7861_v47 = vsel %vm105_vm0, %v121_v39, 0.0  ;;  %v7864_v49 = vpack.i.bf16 %v286_v45, %v284_v40 }
   0xc   :  { %12931 = vst [vmem:[#allocation13_spill] sm:$0xff] %v7858_v46  ;;  %v298_v50 = vrot.slane %v7858_v46, 1  ;;  %v300_v51 = vrot.slane %v7861_v47, 1  ;;  %v7869_v52 = vsel %vm105_vm0, %v114_v42, %v115_v43 }
   0xd   :  { %12932 = vst [vmem:[#allocation14_spill] sm:$0xff] %v7864_v49 }
   0xe   :  { %12933 = vst [vmem:[#allocation15_spill] sm:$0xff] %v7869_v52 }
   0xf   :  { %16 = vsyncpa [#allocation3], 0  ;;  %v7878_v55 = vsel %vm105_vm0, 0.0, %v114_v42  ;;  %v7881_v56 = vsel %vm105_vm0, %v115_v43, 0.0  ;;  %v288_v57 = vrot.slane %v7869_v52, 1  ;;  %v108_v58 = vrot.slane %v40_v44, 7  ;;  %6102 = vrot.lane.b32.xlu1 %v7864_v49, %s7698_s14 }
  0x10   :  { %12934 = vst [vmem:[#allocation16_spill] sm:$0xff] %v7878_v55  ;;  %v55_v59 = vld [vmem:[%s12715_s0 + $0x78] sm:$0xff]  ;;  %v299_v60 = vsel %vm271_vm1, %v297_v48, %v298_v50  ;;  %v301_v61 = vsel %vm271_vm1, %v298_v50, %v300_v51  ;;  %v287_v62 = vrot.slane %v7878_v55, 1  ;;  %v290_v63 = vrot.slane %v7881_v56, 1  ;;  %v52_v9 = vld [vmem:[%s12715_s0 + $0x60] sm:$0xff]  ;;  %v53_v22 = vld [vmem:[%s12715_s0 + $0x68] sm:$0xff] }
  0x11   :  { %v7893_v0 = vpack.i.bf16 %v301_v61, %v299_v60  ;;  %v109_v1 = vrot.slane %v41_v53, 7  ;;  %v7896_v2 = vsel %vm105_vm0, 0.0, %v108_v58  ;;  %v129_v4 = vrot.slane %v54_v54, 7  ;;  %v50_v23 = vld [vmem:[%s12715_s0 + $0x50] sm:$0xff]  ;;  %v51_v40 = vld [vmem:[%s12715_s0 + $0x58] sm:$0xff]  ;;  %v60_v50 = vld [vmem:[%s12715_s0 + $0xa0] sm:$0xff] }
  0x12   :  { %12936 = vst [vmem:[#allocation18_spill] sm:$0xff] %v7896_v2  ;;  %v289_v5 = vsel %vm271_vm1, %v287_v62, %v288_v57  ;;  %v291_v6 = vsel %vm271_vm1, %v288_v57, %v290_v63  ;;  %v277_v7 = vrot.slane %v7896_v2, 1  ;;  %v130_v8 = vrot.slane %v55_v59, 7  ;;  %v61_v51 = vld [vmem:[%s12715_s0 + $0xa8] sm:$0xff]  ;;  %v58_v53 = vld [vmem:[%s12715_s0 + $0x90] sm:$0xff]  ;;  %s7699_s23 = smov 8  }
  0x13   :  { %12935 = vst [vmem:[#allocation17_spill] sm:$0xff] %v7893_v0  ;;  %v7904_v12 = vpack.i.bf16 %v291_v6, %v289_v5  ;;  %v7907_v14 = vsel %vm105_vm0, %v108_v58, %v109_v1  ;;  %v7910_v19 = vsel %vm105_vm0, %v109_v1, 0.0  ;;  %v7913_v20 = vsel %vm105_vm0, 0.0, %v129_v4  ;;  %6117 = vrot.lane.b32.xlu2 %v7893_v0, %s7698_s14  ;;  %v59_v6 = vld [vmem:[%s12715_s0 + $0x98] sm:$0xff]  ;;  %v62_v16 = vld [vmem:[%s12715_s0 + $0xb0] sm:$0xff]  ;;  %s7700_s24 = smov 12  }
  0x14   :  { %12938 = vst [vmem:[#allocation20_spill] sm:$0xff] %v7907_v14  ;;  %v278_v24 = vrot.slane %v7907_v14, 1  ;;  %v280_v25 = vrot.slane %v7910_v19, 1  ;;  %v7924_v26 = vsel %vm105_vm0, %v129_v4, %v130_v8  ;;  %v7927_v28 = vsel %vm105_vm0, %v130_v8, 0.0  ;;  %s7701_s29 = smov 16   ;;  %s7702_s30 = smov 20  }
  0x15   :  { %12937 = vst [vmem:[#allocation19_spill] sm:$0xff] %v7904_v12  ;;  %v312_v30 = vrot.slane %v7913_v20, 1  ;;  %v313_v31 = vrot.slane %v7924_v26, 1  ;;  %v315_v32 = vrot.slane %v7927_v28, 1  ;;  %v126_v34 = vrot.slane %v52_v9, 7  ;;  %s7703_s12 = smov 24  }
  0x16   :  { %12939 = vst [vmem:[#allocation21_spill] sm:$0xff] %v7913_v20  ;;  %v279_v35 = vsel %vm271_vm1, %v277_v7, %v278_v24  ;;  %v281_v38 = vsel %vm271_vm1, %v278_v24, %v280_v25  ;;  %v127_v39 = vrot.slane %v53_v22, 7  ;;  %v123_v42 = vrot.slane %v50_v23, 7  ;;  %s7704_s13 = smov 28   ;;  %s7705_s15 = smov 32  }
  0x17   :  { %12940 = vst [vmem:[#allocation22_spill] sm:$0xff] %v7924_v26  ;;  %v7939_v43 = vpack.i.bf16 %v281_v38, %v279_v35  ;;  %v314_v44 = vsel %vm271_vm1, %v312_v30, %v313_v31  ;;  %v316_v45 = vsel %vm271_vm1, %v313_v31, %v315_v32  ;;  %v7944_v48 = vsel %vm105_vm0, 0.0, %v126_v34  ;;  %6107 = vrot.lane.b32.xlu1 %v7904_v12, %s7698_s14 }
  0x18   :  { %12942 = vst [vmem:[#allocation24_spill] sm:$0xff] %v7944_v48  ;;  %v7957_v54 = vpack.i.bf16 %v316_v45, %v314_v44  ;;  %v7960_v57 = vsel %vm105_vm0, %v126_v34, %v127_v39  ;;  %v7963_v58 = vsel %vm105_vm0, %v127_v39, 0.0  ;;  %v307_v59 = vrot.slane %v7944_v48, 1  ;;  %v56_v45 = vld [vmem:[%s12715_s0 + $0x80] sm:$0xff] }
  0x19   :  { %12941 = vst [vmem:[#allocation23_spill] sm:$0xff] %v7939_v43  ;;  %6097 = vrot.lane.b32.xlu0 %v7939_v43, %s7698_s14  ;;  %v308_v60 = vrot.slane %v7960_v57, 1  ;;  %v310_v61 = vrot.slane %v7963_v58, 1  ;;  %v124_v62 = vrot.slane %v51_v40, 7  ;;  %v7971_v63 = vsel %vm105_vm0, 0.0, %v123_v42 }
  0x1a   :  { %12943 = vst [vmem:[#allocation25_spill] sm:$0xff] %v7957_v54  ;;  %v302_v1 = vrot.slane %v7971_v63, 1  ;;  %v138_v4 = vrot.slane %v60_v50, 7  ;;  %v139_v5 = vrot.slane %v61_v51, 7  ;;  %v135_v7 = vrot.slane %v58_v53, 7  ;;  %v57_v50 = vld [vmem:[%s12715_s0 + $0x88] sm:$0xff] }
  0x1b   :  { %12944 = vst [vmem:[#allocation26_spill] sm:$0xff] %v7960_v57  ;;  %v309_v8 = vsel %vm271_vm1, %v307_v59, %v308_v60  ;;  %v311_v9 = vsel %vm271_vm1, %v308_v60, %v310_v61  ;;  %v7980_v22 = vsel %vm105_vm0, %v123_v42, %v124_v62  ;;  %v7983_v23 = vsel %vm105_vm0, %v124_v62, 0.0  ;;  %6132 = vrot.lane.b32.xlu2 %v7957_v54, %s7698_s14  ;;  %v66_v61 = vld [vmem:[%s12715_s0 + $0xd0] sm:$0xff]  ;;  %v67_v62 = vld [vmem:[%s12715_s0 + $0xd8] sm:$0xff] }
  0x1c   :  { %12945 = vst [vmem:[#allocation27_spill] sm:$0xff] %v7971_v63  ;;  %v7985_v24 = vpack.i.bf16 %v311_v9, %v309_v8  ;;  %v303_v25 = vrot.slane %v7980_v22, 1  ;;  %v305_v30 = vrot.slane %v7983_v23, 1  ;;  %v7990_v31 = vsel %vm105_vm0, %v138_v4, %v139_v5 }
  0x1d   :  { %12946 = vst [vmem:[#allocation28_spill] sm:$0xff] %v7980_v22  ;;  %v7995_v32 = vsel %vm105_vm0, 0.0, %v138_v4  ;;  %v7998_v34 = vsel %vm105_vm0, %v139_v5, 0.0  ;;  %v328_v35 = vrot.slane %v7990_v31, 1  ;;  %v136_v38 = vrot.slane %v59_v6, 7 }
  0x1e   :  { %12947 = vst [vmem:[#allocation29_spill] sm:$0xff] %v7985_v24  ;;  %v304_v39 = vsel %vm271_vm1, %v302_v1, %v303_v25  ;;  %v306_v40 = vsel %vm271_vm1, %v303_v25, %v305_v30  ;;  %v327_v42 = vrot.slane %v7995_v32, 1  ;;  %v330_v44 = vrot.slane %v7998_v34, 1  ;;  %v64_v1 = vld [vmem:[%s12715_s0 + $0xc0] sm:$0xff] }
  0x1f   :  { %12948 = vst [vmem:[#allocation30_spill] sm:$0xff] %v7990_v31  ;;  %v8011_v51 = vpack.i.bf16 %v306_v40, %v304_v39  ;;  %v8014_v53 = vsel %vm105_vm0, %v135_v7, %v136_v38  ;;  %v8017_v59 = vsel %vm105_vm0, 0.0, %v135_v7  ;;  %v8020_v60 = vsel %vm105_vm0, %v136_v38, 0.0  ;;  %6127 = vrot.lane.b32.xlu1 %v7985_v24, %s7698_s14 }
  0x20   :  { %12949 = vst [vmem:[#allocation31_spill] sm:$0xff] %v7995_v32  ;;  %v329_v4 = vsel %vm271_vm1, %v327_v42, %v328_v35  ;;  %v331_v5 = vsel %vm271_vm1, %v328_v35, %v330_v44  ;;  %v322_v6 = vrot.slane %v8017_v59, 1  ;;  %v323_v7 = vrot.slane %v8014_v53, 1  ;;  %v65_v35 = vld [vmem:[%s12715_s0 + $0xc8] sm:$0xff] }
  0x21   :  { %12950 = vst [vmem:[#allocation32_spill] sm:$0xff] %v8011_v51  ;;  %6122 = vrot.lane.b32.xlu0 %v8011_v51, %s7698_s14  ;;  %v8039_v8 = vpack.i.bf16 %v331_v5, %v329_v4  ;;  %v325_v9 = vrot.slane %v8020_v60, 1  ;;  %v132_v25 = vrot.slane %v56_v45, 7  ;;  %v133_v30 = vrot.slane %v57_v50, 7 }
  0x22   :  { %12951 = vst [vmem:[#allocation33_spill] sm:$0xff] %v8014_v53  ;;  %v324_v38 = vsel %vm271_vm1, %v322_v6, %v323_v7  ;;  %v147_v39 = vrot.slane %v66_v61, 7  ;;  %v148_v40 = vrot.slane %v67_v62, 7  ;;  %v144_v42 = vrot.slane %v64_v1, 7 }
  0x23   :  { %12952 = vst [vmem:[#allocation34_spill] sm:$0xff] %v8017_v59  ;;  %v326_v44 = vsel %vm271_vm1, %v323_v7, %v325_v9  ;;  %v8048_v15 = vsel %vm105_vm0, %v132_v25, %v133_v30  ;;  %v8051_v4 = vsel %vm105_vm0, 0.0, %v132_v25  ;;  %v8054_v45 = vsel %vm105_vm0, %v133_v30, 0.0  ;;  %6147 = vrot.lane.b32.xlu2 %v8039_v8, %s7698_s14 }
  0x24   :  { %12953 = vst [vmem:[#allocation35_spill] sm:$0xff] %v8039_v8  ;;  %v8056_v50 = vpack.i.bf16 %v326_v44, %v324_v38  ;;  %v317_v61 = vrot.slane %v8051_v4, 1  ;;  %v318_v62 = vrot.slane %v8048_v15, 1  ;;  %v320_v5 = vrot.slane %v8054_v45, 1 }
  0x25   :  { %12954 = vst [vmem:[#allocation36_spill] sm:$0xff] %v8048_v15  ;;  %v8064_v1 = vsel %vm105_vm0, %v147_v39, %v148_v40  ;;  %v8067_v6 = vsel %vm105_vm0, 0.0, %v147_v39  ;;  %v8070_v7 = vsel %vm105_vm0, %v148_v40, 0.0  ;;  %v145_v9 = vrot.slane %v65_v35, 7  ;;  %v63_v39 = vld [vmem:[%s12715_s0 + $0xb8] sm:$0xff] }
  0x26   :  { %12955 = vst [vmem:[#allocation37_spill] sm:$0xff] %v8051_v4  ;;  %v319_v25 = vsel %vm271_vm1, %v317_v61, %v318_v62  ;;  %v321_v30 = vsel %vm271_vm1, %v318_v62, %v320_v5  ;;  %v342_v38 = vrot.slane %v8067_v6, 1  ;;  %v343_v44 = vrot.slane %v8064_v1, 1 }
  0x27   :  { %12956 = vst [vmem:[#allocation38_spill] sm:$0xff] %v8056_v50  ;;  %v8082_v36 = vpack.i.bf16 %v321_v30, %v319_v25  ;;  %v345_v40 = vrot.slane %v8070_v7, 1  ;;  %v8086_v35 = vsel %vm105_vm0, %v144_v42, %v145_v9  ;;  %v8089_v61 = vsel %vm105_vm0, 0.0, %v144_v42  ;;  %6142 = vrot.lane.b32.xlu1 %v8056_v50, %s7698_s14 }
  0x28   :  { %12957 = vst [vmem:[#allocation39_spill] sm:$0xff] %v8064_v1  ;;  %v344_v62 = vsel %vm271_vm1, %v342_v38, %v343_v44  ;;  %v8095_v5 = vsel %vm105_vm0, %v145_v9, 0.0  ;;  %v337_v27 = vrot.slane %v8089_v61, 1  ;;  %v338_v25 = vrot.slane %v8086_v35, 1 }
  0x29   :  { %12958 = vst [vmem:[#allocation40_spill] sm:$0xff] %v8067_v6  ;;  %6137 = vrot.lane.b32.xlu0 %v8082_v36, %s7698_s14  ;;  %v346_v30 = vsel %vm271_vm1, %v343_v44, %v345_v40  ;;  %v340_v42 = vrot.slane %v8095_v5, 1  ;;  %v141_v8 = vrot.slane %v62_v16, 7  ;;  %v142_v24 = vrot.slane %v63_v39, 7  ;;  %v68_v16 = vld [vmem:[%s12715_s0 + $0xe0] sm:$0xff] }
  0x2a   :  { %12959 = vst [vmem:[#allocation41_spill] sm:$0xff] %v8082_v36  ;;  %v8103_v54 = vpack.i.bf16 %v346_v30, %v344_v62  ;;  %v339_v38 = vsel %vm271_vm1, %v337_v27, %v338_v25  ;;  %vm448_vm2 = vcmask 1045504   ;;  %v69_v27 = vld [vmem:[%s12715_s0 + $0xe8] sm:$0xff]  ;;  %v455_v30 = vrot.slane %v7907_v14, 2 }
  0x2b   :  { %12960 = vst [vmem:[#allocation42_spill] sm:$0xff] %v8086_v35  ;;  %v341_v50 = vsel %vm271_vm1, %v338_v25, %v340_v42  ;;  %v8109_v37 = vsel %vm105_vm0, %v141_v8, %v142_v24  ;;  %v8112_v36 = vsel %vm105_vm0, 0.0, %v141_v8  ;;  %v8115_v44 = vsel %vm105_vm0, %v142_v24, 0.0 }
  0x2c   :  { %12961 = vst [vmem:[#allocation43_spill] sm:$0xff] %v8089_v61  ;;  %v8123_v39 = vpack.i.bf16 %v341_v50, %v339_v38  ;;  %v332_v40 = vrot.slane %v8112_v36, 1  ;;  %v333_v62 = vrot.slane %v8109_v37, 1  ;;  %v335_v8 = vrot.slane %v8115_v44, 1  ;;  %6162 = vrot.lane.b32.xlu2 %v8103_v54, %s7698_s14 }
  0x2d   :  { %12962 = vst [vmem:[#allocation44_spill] sm:$0xff] %v8103_v54  ;;  %v450_v24 = vrot.slane %v7777_v3, 2  ;;  %v454_v25 = vrot.slane %v7896_v2, 2  ;;  %v457_v42 = vrot.slane %v7910_v19, 2  ;;  %v150_v9 = vrot.slane %v68_v16, 7 }
  0x2e   :  { %12963 = vst [vmem:[#allocation45_spill] sm:$0xff] %v8109_v37  ;;  %v334_v50 = vsel %vm271_vm1, %v332_v40, %v333_v62  ;;  %v336_v38 = vsel %vm271_vm1, %v333_v62, %v335_v8  ;;  %v151_v0 = vrot.slane %v69_v27, 7  ;;  %v12965_v43 = vrot.slane %v7787_v10, 2 }
  0x2f   :  { %12964 = vst [vmem:[#allocation46_spill] sm:$0xff] %v8112_v36  ;;  %v8136_v51 = vpack.i.bf16 %v336_v38, %v334_v50  ;;  %v12966_v3 = vrot.slane %v7791_v11, 2  ;;  %v456_v12 = vsel %vm448_vm2, %v454_v25, %v455_v30  ;;  %6157 = vrot.lane.b32.xlu1 %v8123_v39, %s7698_s14  ;;  %v458_v16 = vsel %vm448_vm2, %v455_v30, %v457_v42 }
  0x30   :  { %v451_v54 = vsel %vm448_vm2, %v12965_v43, %v450_v24  ;;  %v8151_v27 = vsel %vm105_vm0, %v150_v9, %v151_v0  ;;  %v8155_v43 = vpack.i.bf16 %v458_v16, %v456_v12  ;;  %v8158_v40 = vsel %vm105_vm0, 0.0, %v150_v9 }
  0x31   :  { %v453_v49 = vsel %vm448_vm2, %v450_v24, %v12966_v3  ;;  %12968 = vst [vmem:[#allocation48_spill] sm:$0xff] %v8151_v27  ;;  %6152 = vrot.lane.b32.xlu0 %v8136_v51, %s7698_s14  ;;  %v8161_v3 = vsel %vm105_vm0, %v151_v0, 0.0  ;;  %v348_v62 = vrot.slane %v8151_v27, 1  ;;  %v462_v24 = vrot.slane %v7837_v33, 2 }
  0x32   :  { %v8147_v19 = vpack.i.bf16 %v453_v49, %v451_v54  ;;  %12969 = vst [vmem:[#allocation49_spill] sm:$0xff] %v8158_v40  ;;  %v472_v49 = vrot.slane %v7806_v18, 2  ;;  %v347_v54 = vrot.slane %v8158_v40, 1  ;;  %v350_v8 = vrot.slane %v8161_v3, 1 }
  0x33   :  { %v469_v25 = vrot.slane %v7803_v17, 2  ;;  %v470_v12 = vrot.slane %v7795_v13, 2  ;;  %v464_v0 = vrot.slane %v7878_v55, 2  ;;  %v465_v42 = vrot.slane %v7869_v52, 2 }
  0x34   :  { %12967 = vst [vmem:[#allocation47_spill] sm:$0xff] %v8147_v19  ;;  %v349_v9 = vsel %vm271_vm1, %v347_v54, %v348_v62  ;;  %v351_v30 = vsel %vm271_vm1, %v348_v62, %v350_v8  ;;  %6177 = vrot.lane.b32.xlu2 %v8155_v43, %s7699_s23  ;;  %v467_v33 = vrot.slane %v7881_v56, 2  ;;  %v459_v50 = vrot.slane %v7827_v29, 2 }
  0x35   :  { %v8176_v18 = vpack.i.bf16 %v351_v30, %v349_v9  ;;  %v460_v38 = vrot.slane %v7811_v21, 2  ;;  %v471_v16 = vsel %vm448_vm2, %v469_v25, %v470_v12  ;;  %v473_v62 = vsel %vm448_vm2, %v470_v12, %v472_v49 }
  0x36   :  { %v466_v54 = vsel %vm448_vm2, %v464_v0, %v465_v42  ;;  %v468_v8 = vsel %vm448_vm2, %v465_v42, %v467_v33  ;;  %v8189_v9 = vpack.i.bf16 %v473_v62, %v471_v16  ;;  %v484_v25 = vrot.slane %v7944_v48, 2 }
  0x37   :  { %6172 = vrot.lane.b32.xlu1 %v8147_v19, %s7699_s23  ;;  %v461_v56 = vsel %vm448_vm2, %v459_v50, %v460_v38  ;;  %v463_v30 = vsel %vm448_vm2, %v460_v38, %v462_v24  ;;  %v485_v49 = vrot.slane %v7960_v57, 2  ;;  %v487_v12 = vrot.slane %v7963_v58, 2 }
  0x38   :  { %v8196_v11 = vpack.i.bf16 %v468_v8, %v466_v54  ;;  %v8198_v0 = vpack.i.bf16 %v463_v30, %v461_v56  ;;  %v479_v19 = vrot.slane %v7971_v63, 2  ;;  %v480_v42 = vrot.slane %v7980_v22, 2 }
  0x39   :  { %6167 = vrot.lane.b32.xlu0 %v8176_v18, %s7698_s14  ;;  %v482_v33 = vrot.slane %v7983_v23, 2  ;;  %v474_v24 = vrot.slane %v7849_v41, 2  ;;  %v475_v50 = vrot.slane %v7858_v46, 2  ;;  %v486_v38 = vsel %vm448_vm2, %v484_v25, %v485_v49 }
  0x3a   :  { %v488_v58 = vsel %vm448_vm2, %v485_v49, %v487_v12  ;;  %v477_v16 = vrot.slane %v7861_v47, 2  ;;  %v481_v62 = vsel %vm448_vm2, %v479_v19, %v480_v42  ;;  %v499_v30 = vrot.slane %v8017_v59, 2 }
  0x3b   :  { %v483_v23 = vsel %vm448_vm2, %v480_v42, %v482_v33  ;;  %v8216_v54 = vpack.i.bf16 %v488_v58, %v486_v38  ;;  %v476_v8 = vsel %vm448_vm2, %v474_v24, %v475_v50  ;;  %v500_v47 = vrot.slane %v8014_v53, 2 }
  0x3c   :  { %6192 = vrot.lane.b32.xlu2 %v8189_v9, %s7699_s23  ;;  %v478_v56 = vsel %vm448_vm2, %v475_v50, %v477_v16  ;;  %v502_v25 = vrot.slane %v8020_v60, 2  ;;  %v8223_v49 = vpack.i.bf16 %v483_v23, %v481_v62  ;;  %v494_v12 = vrot.slane %v8051_v4, 2 }
  0x3d   :  { %v495_v19 = vrot.slane %v8048_v15, 2  ;;  %v8229_v42 = vpack.i.bf16 %v478_v56, %v476_v8  ;;  %v497_v33 = vrot.slane %v8054_v45, 2  ;;  %v489_v24 = vrot.slane %v7913_v20, 2 }
  0x3e   :  { %v490_v50 = vrot.slane %v7924_v26, 2  ;;  %v501_v38 = vsel %vm448_vm2, %v499_v30, %v500_v47  ;;  %v503_v60 = vsel %vm448_vm2, %v500_v47, %v502_v25  ;;  %v492_v58 = vrot.slane %v7927_v28, 2 }
  0x3f   :  { %6187 = vrot.lane.b32.xlu1 %v8196_v11, %s7699_s23  ;;  %v496_v16 = vsel %vm448_vm2, %v494_v12, %v495_v19  ;;  %v498_v45 = vsel %vm448_vm2, %v495_v19, %v497_v33  ;;  %v8243_v62 = vpack.i.bf16 %v503_v60, %v501_v38  ;;  %v514_v56 = vrot.slane %v8089_v61, 2 }
  0x40   :  { %v491_v23 = vsel %vm448_vm2, %v489_v24, %v490_v50  ;;  %v493_v8 = vsel %vm448_vm2, %v490_v50, %v492_v58  ;;  %v515_v28 = vrot.slane %v8086_v35, 2  ;;  %v517_v30 = vrot.slane %v8095_v5, 2 }
  0x41   :  { %6182 = vrot.lane.b32.xlu0 %v8198_v0, %s7699_s23  ;;  %v8250_v47 = vpack.i.bf16 %v498_v45, %v496_v16  ;;  %v509_v25 = vrot.slane %v8112_v36, 2  ;;  %v8255_v12 = vpack.i.bf16 %v493_v8, %v491_v23  ;;  %v510_v19 = vrot.slane %v8109_v37, 2 }
  0x42   :  { %v512_v33 = vrot.slane %v8115_v44, 2  ;;  %v504_v24 = vrot.slane %v7995_v32, 2  ;;  %v516_v50 = vsel %vm448_vm2, %v514_v56, %v515_v28  ;;  %v518_v38 = vsel %vm448_vm2, %v515_v28, %v517_v30 }
  0x43   :  { %v505_v5 = vrot.slane %v7990_v31, 2  ;;  %v507_v60 = vrot.slane %v7998_v34, 2  ;;  %v8269_v58 = vsel %vm448_vm2, %v509_v25, %v510_v19  ;;  %v8274_v16 = vpack.i.bf16 %v518_v38, %v516_v50 }
  0x44   :  { %6207 = vrot.lane.b32.xlu2 %v8216_v54, %s7699_s23  ;;  %v8272_v44 = vsel %vm448_vm2, %v510_v19, %v512_v33  ;;  %v524_v56 = vrot.slane %v8158_v40, 2  ;;  %v525_v28 = vrot.slane %v8151_v27, 2  ;;  %v527_v30 = vrot.slane %v8161_v3, 2 }
  0x45   :  { %12970 = vst [vmem:[#allocation50_spill] sm:$0xff] %v8272_v44  ;;  %v506_v45 = vsel %vm448_vm2, %v504_v24, %v505_v5  ;;  %v508_v23 = vsel %vm448_vm2, %v505_v5, %v507_v60  ;;  %v8280_v34 = vpack.i.bf16 %v8272_v44, %v8269_v58  ;;  %v519_v25 = vrot.slane %v8067_v6, 2  ;;  %v71_v44 = vld [vmem:[%s12715_s0 + $0xf8] sm:$0xff] }
  0x46   :  { %12971 = vst [vmem:[#allocation51_spill] sm:$0xff] %v8274_v16  ;;  %v8284_v8 = vpack.i.bf16 %v508_v23, %v506_v45  ;;  %v520_v19 = vrot.slane %v8064_v1, 2  ;;  %v522_v33 = vrot.slane %v8070_v7, 2  ;;  %v526_v24 = vsel %vm448_vm2, %v524_v56, %v525_v28 }
  0x47   :  { %6202 = vrot.lane.b32.xlu1 %v8223_v49, %s7699_s23  ;;  %v528_v50 = vsel %vm448_vm2, %v525_v28, %v527_v30  ;;  %v6251_v38 = vpack.i.bf16 %v7907_v14, %v7896_v2  ;;  %v8313_v45 = vpack.i.bf16 %v7795_v13, %v7803_v17  ;;  %v8317_v23 = vpack.i.bf16 %v7869_v52, %v7878_v55  ;;  %v12981_v14 = vld [vmem:[#allocation14_spill] sm:$0xff]  ;;  %v12982_v55 = vld [vmem:[#allocation23_spill] sm:$0xff] }
  0x48   :  { %v521_v3 = vsel %vm448_vm2, %v519_v25, %v520_v19  ;;  %v523_v5 = vsel %vm448_vm2, %v520_v19, %v522_v33  ;;  %v8302_v60 = vpack.i.bf16 %v528_v50, %v526_v24  ;;  %v8323_v56 = vpack.i.bf16 %v7811_v21, %v7827_v29  ;;  %v12987_v21 = vld [vmem:[#allocation17_spill] sm:$0xff] }
  0x49   :  { %6197 = vrot.lane.b32.xlu0 %v8229_v42, %s7699_s23  ;;  %v8305_v7 = vpack.i.bf16 %v523_v5, %v521_v3  ;;  %v8333_v30 = vpack.i.bf16 %v7960_v57, %v7944_v48  ;;  %v8337_v25 = vpack.i.bf16 %v7980_v22, %v7971_v63  ;;  %v8343_v19 = vpack.i.bf16 %v7858_v46, %v7849_v41  ;;  %v70_v5 = vld [vmem:[%s12715_s0 + $0xf0] sm:$0xff] }
  0x4a   :  { %12972 = vst [vmem:[#allocation52_spill] sm:$0xff] %v8302_v60  ;;  %v8353_v24 = vpack.i.bf16 %v8014_v53, %v8017_v59  ;;  %v8357_v50 = vpack.i.bf16 %v8048_v15, %v8051_v4  ;;  %v8379_v4 = vpack.i.bf16 %v8086_v35, %v8089_v61  ;;  %v153_v15 = vrot.slane %v70_v5, 7 }
  0x4b   :  { %12973 = vst [vmem:[#allocation53_spill] sm:$0xff] %v8305_v7  ;;  %v154_v59 = vrot.slane %v71_v44, 7  ;;  %v8383_v53 = vpack.i.bf16 %v8109_v37, %v8112_v36  ;;  %v8389_v63 = vpack.i.bf16 %v7990_v31, %v7995_v32  ;;  %v8419_v37 = vpack.i.bf16 %v8064_v1, %v8067_v6  ;;  %v12985_v1 = vld [vmem:[#allocation32_spill] sm:$0xff] }
  0x4c   :  { %6222 = vrot.lane.b32.xlu2 %v8243_v62, %s7699_s23  ;;  %v8395_v48 = vsel %vm105_vm0, 0.0, %v153_v15  ;;  %vm1213_vm3 = vcmask 31744   ;;  %vm1246_vm4 = vcmask 64512   ;;  %vm1566_vm5 = vcmask 1041408  }
  0x4d   :  { %v8392_v22 = vsel %vm105_vm0, %v153_v15, %v154_v59  ;;  %v8413_v15 = vpack.i.bf16 %v8151_v27, %v8158_v40  ;;  %v12979_v40 = vld [vmem:[#allocation19_spill] sm:$0xff]  ;;  %vm1279_vm6 = vcmask 97280   ;;  %vm1312_vm7 = vcmask 130048  }
  0x4e   :  { %v8407_v5 = vpack.i.bf16 %v8392_v22, %v8395_v48  ;;  %vm1345_vm8 = vcmask 162816   ;;  %vm1378_vm9 = vcmask 195584   ;;  %vm1411_vm10 = vcmask 228352  }
  0x4f   :  { %6217 = vrot.lane.b32.xlu1 %v8250_v47, %s7699_s23  ;;  %vm1444_vm11 = vcmask 261120   ;;  %vm1517_vm12 = vcmask 293888   ;;  %vm1947_vm13 = vcmask 1042432   ;;  %vm1956_vm14 = vcmask 1043456  }
  0x50   :  { %vm1965_vm15 = vcmask 1044480  }
  0x51   :  { %6212 = vrot.lane.b32.xlu0 %v8255_v12, %s7699_s23 }
  0x54   :  { %6237 = vrot.lane.b32.xlu2 %v8274_v16, %s7699_s23 }
  0x57   :  { %6232 = vrot.lane.b32.xlu1 %v8280_v34, %s7699_s23 }
  0x59   :  { %6227 = vrot.lane.b32.xlu0 %v8284_v8, %s7699_s23 }
  0x5c   :  { %6252 = vrot.lane.b32.xlu2 %v6251_v38, %s7700_s24  ;;  %v8363_v38 = vpack.i.bf16 %v7924_v26, %v7913_v20  ;;  %v13003_v26 = vld [vmem:[#allocation44_spill] sm:$0xff] }
  0x5f   :  { %6247 = vrot.lane.b32.xlu1 %v8302_v60, %s7699_s23 }
  0x61   :  { %6242 = vrot.lane.b32.xlu0 %v8305_v7, %s7699_s23 }
  0x64   :  { %6267 = vrot.lane.b32.xlu2 %v8313_v45, %s7700_s24 }
  0x65   :  { %v8325_v28 = vpop.permute.xlu2 %6112 }
  0x67   :  { %6262 = vrot.lane.b32.xlu1 %v8317_v23, %s7700_s24 }
  0x69   :  { %6257 = vrot.lane.b32.xlu0 %v8323_v56, %s7700_s24 }
  0x6c   :  { %6282 = vrot.lane.b32.xlu2 %v8333_v30, %s7700_s24 }
  0x6d   :  { %v8345_v33 = vpop.permute.xlu2 %6117 }
  0x6f   :  { %6277 = vrot.lane.b32.xlu1 %v8337_v25, %s7700_s24 }
  0x71   :  { %6272 = vrot.lane.b32.xlu0 %v8343_v19, %s7700_s24 }
  0x74   :  { %6297 = vrot.lane.b32.xlu2 %v8353_v24, %s7700_s24 }
  0x75   :  { %v8365_v3 = vpop.permute.xlu2 %6132 }
  0x77   :  { %6292 = vrot.lane.b32.xlu1 %v8357_v50, %s7700_s24 }
  0x79   :  { %6287 = vrot.lane.b32.xlu0 %v8363_v38, %s7700_s24 }
  0x7b   :  { %v8403_v44 = vpop.permute.xlu0 %6092 }
  0x7c   :  { %6312 = vrot.lane.b32.xlu2 %v8379_v4, %s7700_s24 }
  0x7d   :  { %v8397_v61 = vpop.permute.xlu2 %6147 }
  0x7e   :  { %12974 = vst [vmem:[#allocation54_spill] sm:$0xff] %v8397_v61  ;;  %v238_v61 = vsel %vm105_vm0, %v154_v59, 0.0 }
  0x7f   :  { %6307 = vrot.lane.b32.xlu1 %v8383_v53, %s7700_s24 }
  0x81   :  { %6302 = vrot.lane.b32.xlu0 %v8389_v63, %s7700_s24  ;;  %v8409_v36 = vpop.permute.xlu1 %6102 }
  0x82   :  { %12975 = vst [vmem:[#allocation55_spill] sm:$0xff] %v8409_v36 }
  0x84   :  { %6327 = vrot.lane.b32.xlu2 %v8407_v5, %s7700_s24 }
  0x86   :  { %v8421_v35 = vpop.permute.xlu2 %6162 }
  0x87   :  { %12976 = vst [vmem:[#allocation56_spill] sm:$0xff] %v8421_v35  ;;  %6322 = vrot.lane.b32.xlu1 %v8413_v15, %s7700_s24 }
  0x89   :  { %6317 = vrot.lane.b32.xlu0 %v8419_v37, %s7700_s24  ;;  %v8427_v57 = vpop.permute.xlu1 %6107 }
  0x8a   :  { %12977 = vst [vmem:[#allocation57_spill] sm:$0xff] %v8427_v57 }
  0x8b   :  { %v8429_v2 = vpop.permute.xlu0 %6097 }
  0x8c   :  { %12978 = vst [vmem:[#allocation58_spill] sm:$0xff] %v8429_v2  ;;  %6342 = vrot.lane.b32.xlu2 %v12979_v40, %s7701_s29 }
  0x8e   :  { %v8433_v27 = vpop.permute.xlu2 %6177 }
  0x8f   :  { %12980 = vst [vmem:[#allocation19_spill] sm:$0xff] %v8433_v27  ;;  %6337 = vrot.lane.b32.xlu1 %v12981_v14, %s7701_s29  ;;  %v12988_v27 = vld [vmem:[#allocation11_spill] sm:$0xff] }
  0x91   :  { %6332 = vrot.lane.b32.xlu0 %v12982_v55, %s7701_s29  ;;  %v8439_v52 = vpop.permute.xlu1 %6127  ;;  %v12991_v55 = vld [vmem:[#allocation41_spill] sm:$0xff] }
  0x92   :  { %12983 = vst [vmem:[#allocation14_spill] sm:$0xff] %v8439_v52 }
  0x93   :  { %v8441_v6 = vpop.permute.xlu0 %6122 }
  0x94   :  { %12984 = vst [vmem:[#allocation23_spill] sm:$0xff] %v8441_v6  ;;  %6357 = vrot.lane.b32.xlu2 %v12985_v1, %s7701_s29  ;;  %v12993_v6 = vld [vmem:[#allocation25_spill] sm:$0xff] }
  0x96   :  { %v8445_v29 = vpop.permute.xlu2 %6192 }
  0x97   :  { %12986 = vst [vmem:[#allocation32_spill] sm:$0xff] %v8445_v29  ;;  %6352 = vrot.lane.b32.xlu1 %v12987_v21, %s7701_s29  ;;  %v12994_v29 = vld [vmem:[#allocation29_spill] sm:$0xff] }
  0x99   :  { %6347 = vrot.lane.b32.xlu0 %v12988_v27, %s7701_s29  ;;  %v8451_v32 = vpop.permute.xlu1 %6142 }
  0x9a   :  { %12989 = vst [vmem:[#allocation17_spill] sm:$0xff] %v8451_v32 }
  0x9b   :  { %v8453_v31 = vpop.permute.xlu0 %6137 }
  0x9c   :  { %12990 = vst [vmem:[#allocation11_spill] sm:$0xff] %v8453_v31  ;;  %6372 = vrot.lane.b32.xlu2 %v12991_v55, %s7701_s29  ;;  %v12998_v31 = vld [vmem:[#allocation35_spill] sm:$0xff] }
  0x9e   :  { %v8457_v52 = vpop.permute.xlu2 %6207 }
  0x9f   :  { %12992 = vst [vmem:[#allocation41_spill] sm:$0xff] %v8457_v52  ;;  %6367 = vrot.lane.b32.xlu1 %v12993_v6, %s7701_s29  ;;  %v12999_v52 = vld [vmem:[#allocation38_spill] sm:$0xff] }
  0xa1   :  { %6362 = vrot.lane.b32.xlu0 %v12994_v29, %s7701_s29  ;;  %v8463_v2 = vpop.permute.xlu1 %6157 }
  0xa2   :  { %12995 = vst [vmem:[#allocation25_spill] sm:$0xff] %v8463_v2  ;;  %v724_v2 = vrot.slane %v8392_v22, 1 }
  0xa3   :  { %v8465_v57 = vpop.permute.xlu0 %6152 }
  0xa4   :  { %12996 = vst [vmem:[#allocation29_spill] sm:$0xff] %v8465_v57  ;;  %6387 = vrot.lane.b32.xlu2 %v8136_v51, %s7701_s29  ;;  %v723_v57 = vrot.slane %v8395_v48, 1 }
  0xa6   :  { %v8469_v32 = vpop.permute.xlu2 %6222  ;;  %v725_v59 = vsel %vm271_vm1, %v723_v57, %v724_v2 }
  0xa7   :  { %12997 = vst [vmem:[#allocation59_spill] sm:$0xff] %v8469_v32  ;;  %6382 = vrot.lane.b32.xlu1 %v12998_v31, %s7701_s29  ;;  %v726_v32 = vrot.slane %v238_v61, 1 }
  0xa9   :  { %6377 = vrot.lane.b32.xlu0 %v12999_v52, %s7701_s29  ;;  %v8475_v35 = vpop.permute.xlu1 %6172 }
  0xaa   :  { %13000 = vst [vmem:[#allocation35_spill] sm:$0xff] %v8475_v35 }
  0xab   :  { %v8477_v36 = vpop.permute.xlu0 %6167 }
  0xac   :  { %13001 = vst [vmem:[#allocation38_spill] sm:$0xff] %v8477_v36  ;;  %6402 = vrot.lane.b32.xlu2 %v8176_v18, %s7701_s29  ;;  %v727_v36 = vsel %vm271_vm1, %v724_v2, %v726_v32  ;;  %v824_v2 = vrot.slane %v8395_v48, 2  ;;  %v825_v32 = vrot.slane %v8392_v22, 2 }
  0xad   :  { %v8498_v46 = vpack.i.bf16 %v727_v36, %v725_v59  ;;  %v827_v36 = vrot.slane %v238_v61, 2 }
  0xae   :  { %v8484_v20 = vpop.permute.xlu2 %6237 }
  0xaf   :  { %13002 = vst [vmem:[#allocation60_spill] sm:$0xff] %v8484_v20  ;;  %6397 = vrot.lane.b32.xlu1 %v13003_v26, %s7701_s29 }
  0xb1   :  { %6392 = vrot.lane.b32.xlu0 %v8123_v39, %s7701_s29  ;;  %v8490_v35 = vpop.permute.xlu1 %6187 }
  0xb2   :  { %13004 = vst [vmem:[#allocation44_spill] sm:$0xff] %v8490_v35 }
  0xb3   :  { %v8494_v41 = vpop.permute.xlu0 %6182 }
  0xb4   :  { %6417 = vrot.lane.b32.xlu2 %v8198_v0, %s7702_s30 }
  0xb6   :  { %v8500_v20 = vpop.permute.xlu2 %6252 }
  0xb7   :  { %13005 = vst [vmem:[#allocation61_spill] sm:$0xff] %v8500_v20  ;;  %6412 = vrot.lane.b32.xlu1 %v8155_v43, %s7702_s30  ;;  %v826_v20 = vsel %vm448_vm2, %v824_v2, %v825_v32  ;;  %v828_v43 = vsel %vm448_vm2, %v825_v32, %v827_v36 }
  0xb9   :  { %6407 = vrot.lane.b32.xlu0 %v8498_v46, %s7701_s29  ;;  %v8506_v35 = vpop.permute.xlu1 %6202 }
  0xba   :  { %13006 = vst [vmem:[#allocation62_spill] sm:$0xff] %v8506_v35  ;;  %v8520_v35 = vpack.i.bf16 %v828_v43, %v826_v20 }
  0xbb   :  { %v8508_v57 = vpop.permute.xlu0 %6197 }
  0xbc   :  { %6432 = vrot.lane.b32.xlu2 %v8229_v42, %s7702_s30  ;;  %13007 = vst [vmem:[#allocation63_spill] sm:$0xff] %v8520_v35 }
  0xbe   :  { %v8514_v59 = vpop.permute.xlu2 %6267 }
  0xbf   :  { %6427 = vrot.lane.b32.xlu1 %v8189_v9, %s7702_s30 }
  0xc1   :  { %6422 = vrot.lane.b32.xlu0 %v8196_v11, %s7702_s30  ;;  %v8524_v48 = vpop.permute.xlu1 %6217 }
  0xc3   :  { %v8526_v22 = vpop.permute.xlu0 %6212 }
  0xc4   :  { %6447 = vrot.lane.b32.xlu2 %v8255_v12, %s7702_s30 }
  0xc6   :  { %v8530_v61 = vpop.permute.xlu2 %6282 }
  0xc7   :  { %6442 = vrot.lane.b32.xlu1 %v8216_v54, %s7702_s30 }
  0xc9   :  { %6437 = vrot.lane.b32.xlu0 %v8223_v49, %s7702_s30  ;;  %v8536_v20 = vpop.permute.xlu1 %6232 }
  0xca   :  { %13008 = vst [vmem:[#allocation64_spill] sm:$0xff] %v8536_v20 }
  0xcb   :  { %v8538_v2 = vpop.permute.xlu0 %6227 }
  0xcc   :  { %13009 = vst [vmem:[#allocation65_spill] sm:$0xff] %v8538_v2  ;;  %6462 = vrot.lane.b32.xlu2 %v8284_v8, %s7702_s30 }
  0xce   :  { %v8542_v32 = vpop.permute.xlu2 %6297 }
  0xcf   :  { %13010 = vst [vmem:[#allocation66_spill] sm:$0xff] %v8542_v32  ;;  %6457 = vrot.lane.b32.xlu1 %v8243_v62, %s7702_s30 }
  0xd1   :  { %6452 = vrot.lane.b32.xlu0 %v8250_v47, %s7702_s30  ;;  %v8548_v36 = vpop.permute.xlu1 %6247 }
  0xd2   :  { %13011 = vst [vmem:[#allocation67_spill] sm:$0xff] %v8548_v36  ;;  %v13123_v36 = vld [vmem:[#allocation24_spill] sm:$0xff] }
  0xd3   :  { %v8550_v43 = vpop.permute.xlu0 %6242 }
  0xd4   :  { %13012 = vst [vmem:[#allocation68_spill] sm:$0xff] %v8550_v43  ;;  %6477 = vrot.lane.b32.xlu2 %v8305_v7, %s7702_s30 }
  0xd6   :  { %v8554_v20 = vpop.permute.xlu2 %6312 }
  0xd7   :  { %13013 = vst [vmem:[#allocation69_spill] sm:$0xff] %v8554_v20  ;;  %6472 = vrot.lane.b32.xlu1 %v8274_v16, %s7702_s30 }
  0xd9   :  { %6467 = vrot.lane.b32.xlu0 %v8280_v34, %s7702_s30  ;;  %v8560_v32 = vpop.permute.xlu1 %6262 }
  0xda   :  { %13014 = vst [vmem:[#allocation70_spill] sm:$0xff] %v8560_v32 }
  0xdb   :  { %v8562_v2 = vpop.permute.xlu0 %6257 }
  0xdc   :  { %6492 = vrot.lane.b32.xlu2 %v8323_v56, %s7703_s12 }
  0xde   :  { %v8566_v43 = vpop.permute.xlu2 %6327 }
  0xdf   :  { %13015 = vst [vmem:[#allocation71_spill] sm:$0xff] %v8566_v43  ;;  %6487 = vrot.lane.b32.xlu1 %v8520_v35, %s7702_s30 }
  0xe1   :  { %6482 = vrot.lane.b32.xlu0 %v8302_v60, %s7702_s30  ;;  %v8572_v7 = vpop.permute.xlu1 %6277 }
  0xe2   :  { %13016 = vst [vmem:[#allocation72_spill] sm:$0xff] %v8572_v7  ;;  %v13125_v7 = vld [vmem:[#allocation28_spill] sm:$0xff] }
  0xe3   :  { %v8574_v16 = vpop.permute.xlu0 %6272 }
  0xe4   :  { %13017 = vst [vmem:[#allocation73_spill] sm:$0xff] %v8574_v16  ;;  %6507 = vrot.lane.b32.xlu2 %v8343_v19, %s7703_s12 }
  0xe6   :  { %v8578_v34 = vpop.permute.xlu2 %6342 }
  0xe7   :  { %13018 = vst [vmem:[#allocation74_spill] sm:$0xff] %v8578_v34  ;;  %6502 = vrot.lane.b32.xlu1 %v8313_v45, %s7703_s12 }
  0xe9   :  { %6497 = vrot.lane.b32.xlu0 %v8317_v23, %s7703_s12  ;;  %v8584_v56 = vpop.permute.xlu1 %6292 }
  0xea   :  { %13019 = vst [vmem:[#allocation75_spill] sm:$0xff] %v8584_v56 }
  0xeb   :  { %v8586_v35 = vpop.permute.xlu0 %6287 }
  0xec   :  { %13020 = vst [vmem:[#allocation76_spill] sm:$0xff] %v8586_v35  ;;  %6522 = vrot.lane.b32.xlu2 %v8363_v38, %s7703_s12 }
  0xee   :  { %v8590_v60 = vpop.permute.xlu2 %6357 }
  0xef   :  { %13021 = vst [vmem:[#allocation77_spill] sm:$0xff] %v8590_v60  ;;  %6517 = vrot.lane.b32.xlu1 %v8333_v30, %s7703_s12 }
  0xf1   :  { %6512 = vrot.lane.b32.xlu0 %v8337_v25, %s7703_s12  ;;  %v8596_v19 = vpop.permute.xlu1 %6307 }
  0xf2   :  { %13022 = vst [vmem:[#allocation78_spill] sm:$0xff] %v8596_v19 }
  0xf3   :  { %v8598_v45 = vpop.permute.xlu0 %6302 }
  0xf4   :  { %13023 = vst [vmem:[#allocation79_spill] sm:$0xff] %v8598_v45  ;;  %6537 = vrot.lane.b32.xlu2 %v8389_v63, %s7703_s12  ;;  %v13028_v63 = vld [vmem:[#allocation5_spill] sm:$0xff] }
  0xf6   :  { %v8602_v23 = vpop.permute.xlu2 %6372 }
  0xf7   :  { %13024 = vst [vmem:[#allocation80_spill] sm:$0xff] %v8602_v23  ;;  %6532 = vrot.lane.b32.xlu1 %v8353_v24, %s7703_s12  ;;  %v6566_v24 = vpack.i.bf16 %v13028_v63, %v7787_v10 }
  0xf9   :  { %6527 = vrot.lane.b32.xlu0 %v8357_v50, %s7703_s12  ;;  %v8608_v38 = vpop.permute.xlu1 %6322 }
  0xfa   :  { %13025 = vst [vmem:[#allocation81_spill] sm:$0xff] %v8608_v38 }
  0xfb   :  { %v8610_v30 = vpop.permute.xlu0 %6317 }
  0xfc   :  { %13026 = vst [vmem:[#allocation82_spill] sm:$0xff] %v8610_v30  ;;  %6552 = vrot.lane.b32.xlu2 %v8419_v37, %s7703_s12 }
  0xfe   :  { %v8614_v25 = vpop.permute.xlu2 %6387 }
  0xff   :  { %13027 = vst [vmem:[#allocation83_spill] sm:$0xff] %v8614_v25  ;;  %6547 = vrot.lane.b32.xlu1 %v8379_v4, %s7703_s12 }
 0x101   :  { %6542 = vrot.lane.b32.xlu0 %v8383_v53, %s7703_s12  ;;  %v8622_v45 = vpop.permute.xlu1 %6337 }
 0x102   :  { %13029 = vst [vmem:[#allocation5_spill] sm:$0xff] %v8622_v45 }
 0x103   :  { %v8624_v50 = vpop.permute.xlu0 %6332 }
 0x104   :  { %6567 = vrot.lane.b32.xlu2 %v6566_v24, %s7703_s12 }
 0x106   :  { %v8627_v30 = vpop.permute.xlu2 %6402 }
 0x107   :  { %13030 = vst [vmem:[#allocation84_spill] sm:$0xff] %v8627_v30  ;;  %6562 = vrot.lane.b32.xlu1 %v8407_v5, %s7703_s12 }
 0x109   :  { %6557 = vrot.lane.b32.xlu0 %v8413_v15, %s7703_s12  ;;  %v8633_v37 = vpop.permute.xlu1 %6352 }
 0x10a   :  { %13031 = vst [vmem:[#allocation85_spill] sm:$0xff] %v8633_v37 }
 0x10b   :  { %v8635_v53 = vpop.permute.xlu0 %6347 }
 0x10c   :  { %13032 = vst [vmem:[#allocation86_spill] sm:$0xff] %v8635_v53  ;;  %6582 = vrot.lane.b32.xlu2 %v12988_v27, %s7704_s13 }
 0x10e   :  { %v8639_v4 = vpop.permute.xlu2 %6417 }
 0x10f   :  { %13033 = vst [vmem:[#allocation87_spill] sm:$0xff] %v8639_v4  ;;  %6577 = vrot.lane.b32.xlu1 %v12979_v40, %s7704_s13 }
 0x111   :  { %6572 = vrot.lane.b32.xlu0 %v12981_v14, %s7704_s13  ;;  %v8645_v5 = vpop.permute.xlu1 %6367 }
 0x112   :  { %13034 = vst [vmem:[#allocation88_spill] sm:$0xff] %v8645_v5 }
 0x113   :  { %v8647_v24 = vpop.permute.xlu0 %6362 }
 0x114   :  { %13035 = vst [vmem:[#allocation89_spill] sm:$0xff] %v8647_v24  ;;  %6597 = vrot.lane.b32.xlu2 %v12994_v29, %s7704_s13  ;;  %v13082_v24 = vld [vmem:[#allocation13_spill] sm:$0xff] }
 0x116   :  { %v8651_v15 = vpop.permute.xlu2 %6432 }
 0x117   :  { %13036 = vst [vmem:[#allocation90_spill] sm:$0xff] %v8651_v15  ;;  %6592 = vrot.lane.b32.xlu1 %v12985_v1, %s7704_s13 }
 0x119   :  { %6587 = vrot.lane.b32.xlu0 %v12987_v21, %s7704_s13  ;;  %v8657_v27 = vpop.permute.xlu1 %6382 }
 0x11a   :  { %13037 = vst [vmem:[#allocation91_spill] sm:$0xff] %v8657_v27 }
 0x11b   :  { %v8659_v40 = vpop.permute.xlu0 %6377 }
 0x11c   :  { %13038 = vst [vmem:[#allocation92_spill] sm:$0xff] %v8659_v40  ;;  %6612 = vrot.lane.b32.xlu2 %v12999_v52, %s7704_s13 }
 0x11e   :  { %v8663_v14 = vpop.permute.xlu2 %6447 }
 0x11f   :  { %13039 = vst [vmem:[#allocation93_spill] sm:$0xff] %v8663_v14  ;;  %6607 = vrot.lane.b32.xlu1 %v12991_v55, %s7704_s13 }
 0x121   :  { %6602 = vrot.lane.b32.xlu0 %v12993_v6, %s7704_s13  ;;  %v8669_v29 = vpop.permute.xlu1 %6397 }
 0x122   :  { %13040 = vst [vmem:[#allocation94_spill] sm:$0xff] %v8669_v29 }
 0x123   :  { %v8671_v1 = vpop.permute.xlu0 %6392 }
 0x124   :  { %13041 = vst [vmem:[#allocation95_spill] sm:$0xff] %v8671_v1  ;;  %6627 = vrot.lane.b32.xlu2 %v8123_v39, %s7704_s13 }
 0x126   :  { %v8675_v21 = vpop.permute.xlu2 %6462 }
 0x127   :  { %13042 = vst [vmem:[#allocation96_spill] sm:$0xff] %v8675_v21  ;;  %6622 = vrot.lane.b32.xlu1 %v8136_v51, %s7704_s13 }
 0x129   :  { %6617 = vrot.lane.b32.xlu0 %v12998_v31, %s7704_s13  ;;  %v8681_v52 = vpop.permute.xlu1 %6412 }
 0x12b   :  { %v8683_v55 = vpop.permute.xlu0 %6407 }
 0x12c   :  { %13043 = vst [vmem:[#allocation97_spill] sm:$0xff] %v8683_v55  ;;  %6642 = vrot.lane.b32.xlu2 %v8498_v46, %s7704_s13  ;;  %v5615_v46 = vld [vmem:[%s12715_s0 + $0x110] sm:$0xff] }
 0x12e   :  { %v8687_v6 = vpop.permute.xlu2 %6477 }
 0x12f   :  { %13044 = vst [vmem:[#allocation98_spill] sm:$0xff] %v8687_v6  ;;  %6637 = vrot.lane.b32.xlu1 %v8176_v18, %s7704_s13  ;;  %v13047_v18 = vld [vmem:[#allocation9_spill] sm:$0xff] }
 0x131   :  { %6632 = vrot.lane.b32.xlu0 %v13003_v26, %s7704_s13  ;;  %v8693_v39 = vpop.permute.xlu1 %6427  ;;  %v5616_v26 = vld [vmem:[%s12715_s0 + $0x118] sm:$0xff] }
 0x132   :  { %13045 = vst [vmem:[#allocation99_spill] sm:$0xff] %v8693_v39  ;;  %v2609_v21 = vrot.slane %v5616_v26, 7 }
 0x133   :  { %v8695_v51 = vpop.permute.xlu0 %6422 }
 0x134   :  { %13046 = vst [vmem:[#allocation100_spill] sm:$0xff] %v8695_v51  ;;  %6657 = vrot.lane.b32.xlu2 %v8196_v11, %s7705_s15  ;;  %v2608_v11 = vrot.slane %v5615_v46, 7  ;;  %v5614_v46 = vld [vmem:[%s12715_s0 + $0x108] sm:$0xff] }
 0x135   :  { %v2606_v30 = vrot.slane %v5614_v46, 7 }
 0x136   :  { %v8699_v31 = vpop.permute.xlu2 %6492  ;;  %v8720_v1 = vsel %vm105_vm0, %v2608_v11, %v2609_v21  ;;  %v8723_v29 = vsel %vm105_vm0, 0.0, %v2608_v11 }
 0x137   :  { %6652 = vrot.lane.b32.xlu1 %v8198_v0, %s7705_s15  ;;  %13051 = vst [vmem:[#allocation103_spill] sm:$0xff] %v8720_v1  ;;  %v2932_v26 = vrot.slane %v8723_v29, 2  ;;  %v2933_v11 = vrot.slane %v8720_v1, 2 }
 0x138   :  { %13052 = vst [vmem:[#allocation104_spill] sm:$0xff] %v8723_v29 }
 0x139   :  { %6647 = vrot.lane.b32.xlu0 %v13047_v18, %s7704_s13  ;;  %v8711_v6 = vpop.permute.xlu1 %6442  ;;  %v5613_v18 = vld [vmem:[%s12715_s0 + $0x100] sm:$0xff]  ;;  %v8744_v25 = vsel %vm448_vm2, %v2932_v26, %v2933_v11 }
 0x13a   :  { %13048 = vst [vmem:[#allocation9_spill] sm:$0xff] %v8711_v6  ;;  %v6701_v46 = vpack.i.bf16 %v8744_v25, %v8269_v58 }
 0x13b   :  { %v8713_v55 = vpop.permute.xlu0 %6437 }
 0x13c   :  { %13049 = vst [vmem:[#allocation101_spill] sm:$0xff] %v8713_v55  ;;  %6672 = vrot.lane.b32.xlu2 %v8223_v49, %s7705_s15 }
 0x13e   :  { %v8717_v0 = vpop.permute.xlu2 %6507 }
 0x13f   :  { %13050 = vst [vmem:[#allocation102_spill] sm:$0xff] %v8717_v0  ;;  %6667 = vrot.lane.b32.xlu1 %v8229_v42, %s7705_s15  ;;  %v2605_v42 = vrot.slane %v5613_v18, 7  ;;  %v8763_v18 = vld [vmem:[%s12715_s0 + $0x128] sm:$0xff]  ;;  %v13104_v0 = vld [vmem:[#allocation39_spill] sm:$0xff] }
 0x140   :  { %v2612_v20 = vrot.slane %v8763_v18, 7 }
 0x141   :  { %6662 = vrot.lane.b32.xlu0 %v8189_v9, %s7705_s15  ;;  %v8735_v49 = vpop.permute.xlu1 %6457  ;;  %v8749_v9 = vsel %vm105_vm0, %v2605_v42, %v2606_v30  ;;  %v8752_v19 = vsel %vm105_vm0, 0.0, %v2605_v42 }
 0x142   :  { %13053 = vst [vmem:[#allocation105_spill] sm:$0xff] %v8735_v49  ;;  %v2716_v49 = vsel %vm105_vm0, %v2606_v30, 0.0  ;;  %v2927_v30 = vrot.slane %v8752_v19, 2 }
 0x143   :  { %v8739_v27 = vpop.permute.xlu0 %6452  ;;  %13056 = vst [vmem:[#allocation108_spill] sm:$0xff] %v8749_v9  ;;  %v2930_v42 = vrot.slane %v2716_v49, 2  ;;  %v2765_v23 = vrot.slane %v2716_v49, 1 }
 0x144   :  { %13054 = vst [vmem:[#allocation106_spill] sm:$0xff] %v8739_v27  ;;  %6687 = vrot.lane.b32.xlu2 %v8250_v47, %s7705_s15  ;;  %v5617_v47 = vld [vmem:[%s12715_s0 + $0x120] sm:$0xff]  ;;  %v2762_v27 = vrot.slane %v8752_v19, 1 }
 0x145   :  { %13057 = vst [vmem:[#allocation109_spill] sm:$0xff] %v8752_v19  ;;  %v2611_v40 = vrot.slane %v5617_v47, 7 }
 0x146   :  { %v8746_v38 = vpop.permute.xlu2 %6522 }
 0x147   :  { %13055 = vst [vmem:[#allocation107_spill] sm:$0xff] %v8746_v38  ;;  %6682 = vrot.lane.b32.xlu1 %v8255_v12, %s7705_s15  ;;  %v2928_v12 = vrot.slane %v8749_v9, 2  ;;  %v2717_v38 = vsel %vm105_vm0, %v2609_v21, 0.0  ;;  %v8788_v47 = vsel %vm105_vm0, 0.0, %v2611_v40 }
 0x148   :  { %13062 = vst [vmem:[#allocation114_spill] sm:$0xff] %v8788_v47  ;;  %v2935_v21 = vrot.slane %v2717_v38, 2 }
 0x149   :  { %6677 = vrot.lane.b32.xlu0 %v8216_v54, %s7705_s15  ;;  %v8769_v26 = vpop.permute.xlu1 %6472  ;;  %v2763_v54 = vrot.slane %v8749_v9, 1  ;;  %v2929_v58 = vsel %vm448_vm2, %v2927_v30, %v2928_v12 }
 0x14a   :  { %13058 = vst [vmem:[#allocation110_spill] sm:$0xff] %v8769_v26  ;;  %v2931_v26 = vsel %vm448_vm2, %v2928_v12, %v2930_v42  ;;  %v2937_v12 = vrot.slane %v8788_v47, 2 }
 0x14b   :  { %v8773_v43 = vpop.permute.xlu0 %6467  ;;  %v2764_v49 = vsel %vm271_vm1, %v2762_v27, %v2763_v54  ;;  %v2766_v18 = vsel %vm271_vm1, %v2763_v54, %v2765_v23  ;;  %v2768_v23 = vrot.slane %v8720_v1, 1  ;;  %v2770_v27 = vrot.slane %v2717_v38, 1 }
 0x14c   :  { %13059 = vst [vmem:[#allocation111_spill] sm:$0xff] %v8773_v43  ;;  %6702 = vrot.lane.b32.xlu2 %v6701_v46, %s7705_s15  ;;  %v8785_v43 = vsel %vm105_vm0, %v2611_v40, %v2612_v20  ;;  %v6716_v46 = vpack.i.bf16 %v2931_v26, %v2929_v58  ;;  %v2936_v26 = vsel %vm448_vm2, %v2933_v11, %v2935_v21 }
 0x14d   :  { %13061 = vst [vmem:[#allocation113_spill] sm:$0xff] %v8785_v43  ;;  %v2938_v42 = vrot.slane %v8785_v43, 2  ;;  %v6721_v21 = vpack.i.bf16 %v8720_v1, %v8723_v29 }
 0x14e   :  { %v8781_v56 = vpop.permute.xlu2 %6537 }
 0x14f   :  { %13060 = vst [vmem:[#allocation112_spill] sm:$0xff] %v8781_v56  ;;  %6697 = vrot.lane.b32.xlu1 %v8284_v8, %s7705_s15  ;;  %v6711_v56 = vpack.i.bf16 %v2766_v18, %v2764_v49  ;;  %v2767_v8 = vrot.slane %v8723_v29, 1  ;;  %v8809_v54 = vsel %vm448_vm2, %v2937_v12, %v2938_v42  ;;  %v2771_v18 = vsel %vm271_vm1, %v2768_v23, %v2770_v27 }
 0x150   :  { %v2773_v29 = vrot.slane %v8785_v43, 1 }
 0x151   :  { %6692 = vrot.lane.b32.xlu0 %v8243_v62, %s7705_s15  ;;  %v8796_v30 = vpop.permute.xlu1 %6487  ;;  %v6706_v62 = vpack.i.bf16 %v8749_v9, %v8752_v19  ;;  %v2769_v49 = vsel %vm271_vm1, %v2767_v8, %v2768_v23  ;;  %v5619_v23 = vld [vmem:[%s12715_s0 + $0x130] sm:$0xff] }
 0x152   :  { %13063 = vst [vmem:[#allocation115_spill] sm:$0xff] %v8796_v30  ;;  %v6726_v11 = vpack.i.bf16 %v2771_v18, %v2769_v49  ;;  %v2614_v27 = vrot.slane %v5619_v23, 7 }
 0x153   :  { %v8800_v40 = vpop.permute.xlu0 %6482 }
 0x154   :  { %13064 = vst [vmem:[#allocation116_spill] sm:$0xff] %v8800_v40  ;;  %6717 = vrot.lane.b32.xlu2 %v6716_v46, %s7702_s30  ;;  %v6731_v40 = vpack.i.bf16 %v8809_v54, %v2936_v26  ;;  %v8852_v6 = vsel %vm105_vm0, 0.0, %v2614_v27 }
 0x155   :  { %13074 = vst [vmem:[#allocation126_spill] sm:$0xff] %v8852_v6 }
 0x156   :  { %v8811_v58 = vpop.permute.xlu2 %6552 }
 0x157   :  { %13065 = vst [vmem:[#allocation117_spill] sm:$0xff] %v8811_v58  ;;  %6712 = vrot.lane.b32.xlu1 %v6711_v56, %s7701_s29 }
 0x159   :  { %6707 = vrot.lane.b32.xlu0 %v6706_v62, %s7700_s24  ;;  %v8818_v30 = vpop.permute.xlu1 %6502 }
 0x15a   :  { %13066 = vst [vmem:[#allocation118_spill] sm:$0xff] %v8818_v30 }
 0x15b   :  { %v8820_v38 = vpop.permute.xlu0 %6497 }
 0x15c   :  { %13067 = vst [vmem:[#allocation119_spill] sm:$0xff] %v8820_v38  ;;  %6732 = vrot.lane.b32.xlu2 %v6731_v40, %s7705_s15  ;;  %v5620_v40 = vld [vmem:[%s12715_s0 + $0x138] sm:$0xff] }
 0x15d   :  { %v2615_v49 = vrot.slane %v5620_v40, 7  ;;  %v6756_v40 = vpack.i.bf16 %v2936_v26, %v8744_v25 }
 0x15e   :  { %v8825_v12 = vpop.permute.xlu2 %6567 }
 0x15f   :  { %13068 = vst [vmem:[#allocation120_spill] sm:$0xff] %v8825_v12  ;;  %6727 = vrot.lane.b32.xlu1 %v6726_v11, %s7704_s13  ;;  %v6761_v12 = vpack.i.bf16 %v8785_v43, %v8788_v47  ;;  %v8849_v14 = vsel %vm105_vm0, %v2614_v27, %v2615_v49 }
 0x160   :  { %13073 = vst [vmem:[#allocation125_spill] sm:$0xff] %v8849_v14  ;;  %v12852_v1 = vrot.slane %v8849_v14, 2  ;;  %v13114_v51 = vrot.slane %v8849_v14, 2 }
 0x161   :  { %6722 = vrot.lane.b32.xlu0 %v6721_v21, %s7703_s12  ;;  %v8829_v62 = vpop.permute.xlu1 %6517 }
 0x162   :  { %13069 = vst [vmem:[#allocation121_spill] sm:$0xff] %v8829_v62 }
 0x163   :  { %v8831_v8 = vpop.permute.xlu0 %6512 }
 0x164   :  { %13070 = vst [vmem:[#allocation122_spill] sm:$0xff] %v8831_v8  ;;  %6747 = vrot.lane.b32.xlu2 %v6721_v21, %s7700_s24  ;;  %v2718_v21 = vsel %vm105_vm0, %v2612_v20, 0.0  ;;  %v13085_v8 = vld [vmem:[#allocation22_spill] sm:$0xff] }
 0x165   :  { %v2775_v62 = vrot.slane %v2718_v21, 1 }
 0x166   :  { %v8840_v18 = vpop.permute.xlu2 %6582 }
 0x167   :  { %13071 = vst [vmem:[#allocation123_spill] sm:$0xff] %v8840_v18  ;;  %6742 = vrot.lane.b32.xlu1 %v6716_v46, %s7699_s23  ;;  %v2942_v46 = vrot.slane %v8852_v6, 2  ;;  %v13100_v18 = vld [vmem:[#allocation8_spill] sm:$0xff] }
 0x169   :  { %6737 = vrot.lane.b32.xlu0 %v6711_v56, %s7698_s14  ;;  %v8846_v58 = vpop.permute.xlu1 %6532  ;;  %v2940_v56 = vrot.slane %v2718_v21, 2  ;;  %v8873_v25 = vsel %vm448_vm2, %v2942_v46, %v12852_v1  ;;  %v2776_v21 = vsel %vm271_vm1, %v2773_v29, %v2775_v62  ;;  %v8889_v46 = vsel %vm105_vm0, %v2615_v49, 0.0 }
 0x16a   :  { %13072 = vst [vmem:[#allocation124_spill] sm:$0xff] %v8846_v58  ;;  %v2772_v58 = vrot.slane %v8788_v47, 1  ;;  %v6120_v49 = vunpack.i.h.bf16 %v8345_v33  ;;  %v6119_v1 = vunpack.i.l.bf16 %v8345_v33  ;;  %v6094_v33 = vunpack.i.l.bf16 %v8403_v44 }
 0x16b   :  { %v8855_v23 = vpop.permute.xlu0 %6527  ;;  %v8868_v20 = vsel %vm448_vm2, %v2938_v42, %v2940_v56 }
 0x16c   :  { %13075 = vst [vmem:[#allocation127_spill] sm:$0xff] %v8855_v23  ;;  %6762 = vrot.lane.b32.xlu2 %v6761_v12, %s7703_s12  ;;  %v2774_v23 = vsel %vm271_vm1, %v2772_v58, %v2773_v29  ;;  %v6771_v43 = vpack.i.bf16 %v8873_v25, %v8868_v20  ;;  %v6115_v58 = vunpack.i.h.bf16 %v8325_v28  ;;  %v6114_v29 = vunpack.i.l.bf16 %v8325_v28 }
 0x16d   :  { %v8884_v42 = vpack.i.bf16 %v2776_v21, %v2774_v23  ;;  %v2778_v23 = vrot.slane %v8849_v14, 1  ;;  %v2780_v21 = vrot.slane %v8889_v46, 1  ;;  %v6095_v28 = vunpack.i.h.bf16 %v8403_v44  ;;  %v13083_v44 = vld [vmem:[#allocation12_spill] sm:$0xff] }
 0x16e   :  { %v8863_v27 = vpop.permute.xlu2 %6597  ;;  %v8931_v5 = vsel %vm1213_vm3, %v13082_v24, %v6120_v49  ;;  %v8935_v19 = vsel %vm1213_vm3, %v13083_v44, %v6119_v1  ;;  %v1497_v1 = vld [vmem:[%s12716_s1 + $0x10] sm:$0x3] }
 0x16f   :  { %13076 = vst [vmem:[#allocation128_spill] sm:$0xff] %v8863_v27  ;;  %6757 = vrot.lane.b32.xlu1 %v6756_v40, %s7702_s30  ;;  %v2781_v55 = vsel %vm271_vm1, %v2778_v23, %v2780_v21  ;;  %v8950_v24 = vsel %vm1213_vm3, %v13028_v63, %v6095_v28  ;;  %v13088_v21 = vld [vmem:[#allocation55_spill] sm:$0xff]  ;;  %v13089_v28 = vld [vmem:[#allocation56_spill] sm:$0xff] }
 0x170   :  { %v6105_v49 = vunpack.i.h.bf16 %v13088_v21  ;;  %v6165_v44 = vunpack.i.h.bf16 %v13089_v28 }
 0x171   :  { %6752 = vrot.lane.b32.xlu0 %v6726_v11, %s7701_s29  ;;  %v8875_v26 = vpop.permute.xlu1 %6547 }
 0x172   :  { %13077 = vst [vmem:[#allocation129_spill] sm:$0xff] %v8875_v26  ;;  %v6134_v26 = vunpack.i.l.bf16 %v8365_v3  ;;  %v9018_v30 = vsel %vm1213_vm3, %v13104_v0, %v6165_v44  ;;  %v5623_v0 = vld [vmem:[%s12715_s0 + $0x150] sm:$0xff]  ;;  %v9040_v44 = vld [vmem:[%s12715_s0 + $0x158] sm:$0xff] }
 0x173   :  { %v8879_v47 = vpop.permute.xlu0 %6542 }
 0x174   :  { %13078 = vst [vmem:[#allocation130_spill] sm:$0xff] %v8879_v47  ;;  %6777 = vrot.lane.b32.xlu2 %v6726_v11, %s7698_s14  ;;  %v2777_v11 = vrot.slane %v8852_v6, 1  ;;  %v6135_v47 = vunpack.i.h.bf16 %v8365_v3  ;;  %v8921_v3 = vsel %vm1213_vm3, %v7795_v13, %v6115_v58 }
 0x176   :  { %v8886_v56 = vpop.permute.xlu2 %6612  ;;  %v2779_v27 = vsel %vm271_vm1, %v2777_v11, %v2778_v23  ;;  %v1511_v23 = vunpack.c.l.b16 %v1497_v1  ;;  %v13094_v1 = vld [vmem:[#allocation57_spill] sm:$0xff] }
 0x177   :  { %13079 = vst [vmem:[#allocation131_spill] sm:$0xff] %v8886_v56  ;;  %6772 = vrot.lane.b32.xlu1 %v6771_v43, %s7705_s15  ;;  %v8914_v56 = vld [vmem:[%s12715_s0 + $0x148] sm:$0xff] }
 0x178   :  { %13105 = vst [vmem:[#allocation57_spill] sm:$0xff] %v9018_v30 }
 0x179   :  { %6767 = vrot.lane.b32.xlu0 %v8884_v42, %s7704_s13  ;;  %v8896_v62 = vpop.permute.xlu1 %6562 }
 0x17a   :  { %13080 = vst [vmem:[#allocation132_spill] sm:$0xff] %v8896_v62  ;;  %v5621_v62 = vld [vmem:[%s12715_s0 + $0x140] sm:$0xff] }
 0x17b   :  { %v8903_v43 = vpop.permute.xlu0 %6557  ;;  %v2617_v13 = vrot.slane %v5621_v62, 7  ;;  %v8958_v62 = vsel %vm1213_vm3, %v7787_v10, %v6094_v33  ;;  %v6164_v33 = vunpack.i.l.bf16 %v13089_v28  ;;  %v13091_v10 = vrot.slane %v8914_v56, 7  ;;  %v13095_v28 = vld [vmem:[#allocation58_spill] sm:$0xff] }
 0x17c   :  { %13081 = vst [vmem:[#allocation133_spill] sm:$0xff] %v8903_v43  ;;  %6792 = vrot.lane.b32.xlu2 %v8884_v42, %s7701_s29  ;;  %v8925_v43 = vsel %vm1213_vm3, %v7803_v17, %v6114_v29  ;;  %v8942_v17 = vsel %vm1213_vm3, %v13085_v8, %v6135_v47  ;;  %v13086_v29 = vld [vmem:[#allocation21_spill] sm:$0xff]  ;;  %v13087_v47 = vld [vmem:[#allocation54_spill] sm:$0xff]  ;;  %v6100_v60 = vunpack.i.h.bf16 %v13095_v28  ;;  %v6099_v15 = vunpack.i.l.bf16 %v13095_v28  ;;  %v13098_v28 = vld [vmem:[#allocation31_spill] sm:$0xff] }
 0x17d   :  { %v8946_v11 = vsel %vm1213_vm3, %v13086_v29, %v6134_v26  ;;  %v6150_v8 = vunpack.i.h.bf16 %v13087_v47  ;;  %v8962_v26 = vpack.i.bf16 %v2781_v55, %v2779_v27  ;;  %v6149_v63 = vunpack.i.l.bf16 %v13087_v47 }
 0x17e   :  { %v8937_v9 = vpop.permute.xlu2 %6627  ;;  %v8976_v55 = vsel %vm105_vm0, %v2617_v13, %v13091_v10  ;;  %v1514_v27 = vpack.c.b16 %v1511_v23, %v1511_v23  ;;  %v6110_v47 = vunpack.i.h.bf16 %v13094_v1  ;;  %v6796_v10 = vpack.i.bf16 %v8868_v20, %v8809_v54  ;;  %v13096_v23 = vld [vmem:[#allocation30_spill] sm:$0xff] }
 0x17f   :  { %13084 = vst [vmem:[#allocation13_spill] sm:$0xff] %v8937_v9  ;;  %6787 = vrot.lane.b32.xlu1 %v6761_v12, %s7700_s24  ;;  %v6104_v12 = vunpack.i.l.bf16 %v13088_v21  ;;  %v6109_v21 = vunpack.i.l.bf16 %v13094_v1  ;;  %v8985_v9 = vpack.i.bf16 %v8849_v14, %v8852_v6  ;;  %v8996_v1 = vsel %vm1213_vm3, %v13096_v23, %v6150_v8  ;;  %v13101_v20 = vld [vmem:[#allocation10_spill] sm:$0xff] }
 0x180   :  { %13092 = vst [vmem:[#allocation22_spill] sm:$0xff] %v8976_v55  ;;  %v2945_v6 = vrot.slane %v8889_v46, 2  ;;  %v9003_v39 = vsel %vm1213_vm3, %v13098_v28, %v6149_v63  ;;  %v9007_v54 = vsel %vm1213_vm3, %v13100_v18, %v6105_v49  ;;  %v13106_v63 = vld [vmem:[#allocation40_spill] sm:$0xff]  ;;  %v13108_v18 = vld [vmem:[#allocation15_spill] sm:$0xff]  ;;  %v13115_v35 = vrot.slane %v8976_v55, 2 }
 0x181   :  { %6782 = vrot.lane.b32.xlu0 %v6756_v40, %s7699_s23  ;;  %v8968_v29 = vpop.permute.xlu1 %6577  ;;  %v8979_v40 = vsel %vm105_vm0, 0.0, %v2617_v13  ;;  %v1568_v13 = vsel %vm1566_vm5, %v1514_v27, 0  ;;  %13097 = vst [vmem:[#allocation54_spill] sm:$0xff] %v8996_v1  ;;  %v9011_v8 = vsel %vm1213_vm3, %v13101_v20, %v6104_v12  ;;  %v13102_v27 = vld [vmem:[#allocation19_spill] sm:$0xff]  ;;  %v9022_v28 = vsel %vm1213_vm3, %v13106_v63, %v6164_v33  ;;  %v13109_v12 = vld [vmem:[#allocation16_spill] sm:$0xff]  ;;  %v5986_v33 = vld [vmem:[%s12716_s1 + $0x8] sm:$0xff] }
 0x182   :  { %13090 = vst [vmem:[#allocation12_spill] sm:$0xff] %v8968_v29  ;;  %v2947_v37 = vrot.slane %v8979_v40, 2  ;;  %1575 = vmatpush.bf16.msra.mxu0 %v1568_v13  ;;  %3983 = vmatpush.bf16.msra.mxu2 %v1568_v13  ;;  %v6179_v46 = vunpack.i.l.bf16 %v13102_v27  ;;  %v9026_v49 = vsel %vm1213_vm3, %v13108_v18, %v6110_v47  ;;  %v9030_v20 = vsel %vm1213_vm3, %v13109_v12, %v6109_v21  ;;  %v13110_v47 = vld [vmem:[#allocation20_spill] sm:$0xff]  ;;  %v13112_v12 = vld [vmem:[#allocation14_spill] sm:$0xff] }
 0x183   :  { %v8971_v58 = vpop.permute.xlu0 %6572  ;;  %13093 = vst [vmem:[#allocation21_spill] sm:$0xff] %v8979_v40  ;;  %6071 = vmatpush.bf16.msra.mxu1 %v1568_v13  ;;  %6074 = vmatpush.bf16.msra.mxu3 %v1568_v13  ;;  %v1217_v21 = vsel %vm1213_vm3, %v13110_v47, %v6100_v60  ;;  %v13111_v13 = vld [vmem:[#allocation18_spill] sm:$0xff]  ;;  %v6180_v18 = vunpack.i.h.bf16 %v13102_v27  ;;  %v2946_v53 = vsel %vm448_vm2, %v13114_v51, %v2945_v6  ;;  %v13117_v27 = vld [vmem:[#allocation23_spill] sm:$0xff]  ;;  %v13119_v51 = vld [vmem:[#allocation32_spill] sm:$0xff] }
 0x184   :  { %6807 = vrot.lane.b32.xlu2 %v8962_v26, %s7704_s13  ;;  %13099 = vst [vmem:[#allocation55_spill] sm:$0xff] %v9003_v39  ;;  %v1216_v63 = vsel %vm1213_vm3, %v13111_v13, %v6099_v15  ;;  %v9061_v60 = vsel %vm448_vm2, %v2947_v37, %v13115_v35  ;;  %v6125_v47 = vunpack.i.h.bf16 %v13117_v27  ;;  %v6124_v6 = vunpack.i.l.bf16 %v13117_v27  ;;  %v5985_v37 = vld [vmem:[%s12716_s1] sm:$0xff] }
 0x185   :  { %13107 = vst [vmem:[#allocation58_spill] sm:$0xff] %v9022_v28  ;;  %v6129_v28 = vunpack.i.l.bf16 %v13112_v12  ;;  %v9064_v15 = vsel %vm1246_vm4, %v1216_v63, %v6179_v46  ;;  %v6195_v14 = vunpack.i.h.bf16 %v13119_v51  ;;  %v6194_v35 = vunpack.i.l.bf16 %v13119_v51  ;;  %v13120_v46 = vld [vmem:[#allocation17_spill] sm:$0xff] }
 0x186   :  { %v9014_v23 = vpop.permute.xlu2 %6642  ;;  %1576 = vmatpush.bf16.msra.mxu0 %v5986_v33  ;;  %3984 = vmatpush.bf16.msra.mxu2 %v5986_v33  ;;  %13116 = vst [vmem:[#allocation31_spill] sm:$0xff] %v9064_v15  ;;  %v6145_v63 = vunpack.i.h.bf16 %v13120_v46  ;;  %v6144_v16 = vunpack.i.l.bf16 %v13120_v46  ;;  %v9086_v34 = vsel %vm1246_vm4, %v1217_v21, %v6180_v18  ;;  %v9090_v46 = vsel %vm1213_vm3, %v13125_v7, %v6125_v47  ;;  %v13134_v47 = vld [vmem:[#allocation33_spill] sm:$0xff]  ;;  %v13147_v15 = vld [vmem:[#allocation42_spill] sm:$0xff] }
 0x187   :  { %13103 = vst [vmem:[#allocation56_spill] sm:$0xff] %v9014_v23  ;;  %6802 = vrot.lane.b32.xlu1 %v8985_v9, %s7703_s12  ;;  %v6130_v23 = vunpack.i.h.bf16 %v13112_v12  ;;  %v2620_v12 = vrot.slane %v5623_v0, 7  ;;  %6072 = vmatpush.bf16.msra.mxu1 %v5986_v33  ;;  %v1228_v51 = vsel %vm1213_vm3, %v13123_v36, %v6129_v28  ;;  %v13131_v28 = vld [vmem:[#allocation27_spill] sm:$0xff]  ;;  %v9111_v21 = vsel %vm1246_vm4, %v8921_v3, %v6195_v14 }
 0x188   :  { %6075 = vmatpush.bf16.msra.mxu3 %v5986_v33  ;;  %v6811_v33 = vpack.i.bf16 %v9061_v60, %v2946_v53  ;;  %13124 = vst [vmem:[#allocation10_spill] sm:$0xff] %v9086_v34  ;;  %v9107_v7 = vsel %vm1213_vm3, %v13131_v28, %v6124_v6  ;;  %v9130_v14 = vpack.i.bf16 %v2946_v53, %v8873_v25  ;;  %v13139_v28 = vld [vmem:[#allocation25_spill] sm:$0xff]  ;;  %v13142_v25 = vld [vmem:[#allocation59_spill] sm:$0xff] }
 0x189   :  { %6797 = vrot.lane.b32.xlu0 %v6796_v10, %s7702_s30  ;;  %v9053_v30 = vpop.permute.xlu1 %6592  ;;  %v9103_v36 = vsel %vm105_vm0, 0.0, %v2620_v12  ;;  %13132 = vst [vmem:[#allocation15_spill] sm:$0xff] %v9111_v21  ;;  %v13146_v34 = vld [vmem:[#allocation37_spill] sm:$0xff] }
 0x18a   :  { %13113 = vst [vmem:[#allocation30_spill] sm:$0xff] %v9053_v30  ;;  %v13122_v30 = vld [vmem:[#allocation26_spill] sm:$0xff]  ;;  %1577 = vmatpush.bf16.msra.mxu0 %v5985_v37  ;;  %3985 = vmatpush.bf16.msra.mxu2 %v5985_v37 }
 0x18b   :  { %v9067_v13 = vpop.permute.xlu0 %6587  ;;  %v1229_v27 = vsel %vm1213_vm3, %v13122_v30, %v6130_v23  ;;  %v13128_v30 = vrot.slane %v9040_v44, 7  ;;  %13130 = vst [vmem:[#allocation40_spill] sm:$0xff] %v9103_v36  ;;  %6073 = vmatpush.bf16.msra.mxu1 %v5985_v37 }
 0x18c   :  { %13118 = vst [vmem:[#allocation8_spill] sm:$0xff] %v9067_v13  ;;  %v13121_v13 = vld [vmem:[#allocation11_spill] sm:$0xff]  ;;  %6822 = vrot.lane.b32.xlu2 %v6796_v10, %s7699_s23  ;;  %v13127_v10 = vrot.slane %v8914_v56, 7  ;;  %6076 = vmatpush.bf16.msra.mxu3 %v5985_v37  ;;  %v9115_v56 = vsel %vm1246_vm4, %v8925_v43, %v6194_v35  ;;  %v13135_v37 = vld [vmem:[#allocation34_spill] sm:$0xff]  ;;  %v13137_v43 = vld [vmem:[#allocation41_spill] sm:$0xff]  ;;  %v2952_v35 = vrot.slane %v9103_v36, 2 }
 0x18d   :  { %v6140_v0 = vunpack.i.h.bf16 %v13121_v13  ;;  %v9100_v23 = vsel %vm105_vm0, %v2620_v12, %v13128_v30  ;;  %13133 = vst [vmem:[#allocation16_spill] sm:$0xff] %v9115_v56  ;;  %v6139_v18 = vunpack.i.l.bf16 %v13121_v13  ;;  %v1235_v12 = vsel %vm1213_vm3, %v13134_v47, %v6145_v63 }
 0x18e   :  { %v9092_v32 = vpop.permute.xlu2 %6657  ;;  %v2720_v39 = vsel %vm105_vm0, %v13127_v10, 0.0  ;;  %13129 = vst [vmem:[#allocation39_spill] sm:$0xff] %v9100_v23  ;;  %v1234_v6 = vsel %vm1213_vm3, %v13135_v37, %v6144_v16  ;;  %v13136_v10 = vld [vmem:[#allocation36_spill] sm:$0xff]  ;;  %v6210_v3 = vunpack.i.h.bf16 %v13137_v43  ;;  %v6160_v16 = vunpack.i.h.bf16 %v13139_v28  ;;  %v13140_v37 = vld [vmem:[#allocation29_spill] sm:$0xff] }
 0x18f   :  { %13126 = vst [vmem:[#allocation19_spill] sm:$0xff] %v9092_v32  ;;  %6817 = vrot.lane.b32.xlu1 %v8884_v42, %s7698_s14  ;;  %v9126_v30 = vsel %vm1213_vm3, %v13136_v10, %v6140_v0  ;;  %v2950_v42 = vrot.slane %v2720_v39, 2  ;;  %v6159_v47 = vunpack.i.l.bf16 %v13139_v28  ;;  %v6209_v0 = vunpack.i.l.bf16 %v13137_v43  ;;  %v13143_v43 = vld [vmem:[#allocation35_spill] sm:$0xff] }
 0x190   :  { %v6154_v53 = vunpack.i.l.bf16 %v13140_v37  ;;  %v6225_v56 = vunpack.i.h.bf16 %v13142_v25  ;;  %v2782_v63 = vrot.slane %v8979_v40, 1  ;;  %v2783_v28 = vrot.slane %v8976_v55, 1 }
 0x191   :  { %6812 = vrot.lane.b32.xlu0 %v6811_v33, %s7705_s15  ;;  %v9133_v13 = vpop.permute.xlu1 %6607  ;;  %v6155_v33 = vunpack.i.h.bf16 %v13140_v37  ;;  %v2785_v21 = vrot.slane %v2720_v39, 1  ;;  %v6175_v1 = vunpack.i.h.bf16 %v13143_v43  ;;  %v6174_v32 = vunpack.i.l.bf16 %v13143_v43 }
 0x192   :  { %13138 = vst [vmem:[#allocation20_spill] sm:$0xff] %v9133_v13  ;;  %v6224_v13 = vunpack.i.l.bf16 %v13142_v25  ;;  %v13145_v25 = vrot.slane %v9100_v23, 2  ;;  %v9164_v38 = vsel %vm1213_vm3, %v13146_v34, %v6139_v18  ;;  %v1241_v39 = vsel %vm1213_vm3, %v13147_v15, %v6160_v16  ;;  %v13150_v34 = vld [vmem:[#allocation46_spill] sm:$0xff] }
 0x193   :  { %v9141_v10 = vpop.permute.xlu0 %6602  ;;  %v9169_v4 = vsel %vm1246_vm4, %v1229_v27, %v6210_v3  ;;  %v9172_v43 = vsel %vm1246_vm4, %v1228_v51, %v6209_v0  ;;  %v9184_v18 = vsel %vm1213_vm3, %v13150_v34, %v6154_v53  ;;  %v9187_v15 = vsel %vm1246_vm4, %v1235_v12, %v6225_v56  ;;  %v13159_v34 = vld [vmem:[#allocation62_spill] sm:$0xff] }
 0x194   :  { %13141 = vst [vmem:[#allocation18_spill] sm:$0xff] %v9141_v10  ;;  %6837 = vrot.lane.b32.xlu2 %v9130_v14, %s7702_s30  ;;  %v13144_v10 = vrot.slane %v8976_v55, 2  ;;  %v9160_v29 = vsel %vm448_vm2, %v2952_v35, %v13145_v25  ;;  %v13149_v35 = vld [vmem:[#allocation45_spill] sm:$0xff]  ;;  %v9192_v27 = vsel %vm1246_vm4, %v1234_v6, %v6224_v13  ;;  %v2784_v51 = vsel %vm271_vm1, %v2782_v63, %v2783_v28  ;;  %v13153_v6 = vld [vmem:[#allocation38_spill] sm:$0xff]  ;;  %v13155_v63 = vld [vmem:[#allocation44_spill] sm:$0xff] }
 0x195   :  { %v9180_v25 = vsel %vm1213_vm3, %v13149_v35, %v6155_v33  ;;  %13151 = vst [vmem:[#allocation14_spill] sm:$0xff] %v9187_v15  ;;  %v2786_v3 = vsel %vm271_vm1, %v2783_v28, %v2785_v21  ;;  %v9202_v56 = vsel %vm1246_vm4, %v8950_v24, %v6175_v1  ;;  %v9206_v12 = vsel %vm1246_vm4, %v8958_v62, %v6174_v32  ;;  %v13156_v33 = vld [vmem:[#allocation60_spill] sm:$0xff]  ;;  %v13158_v62 = vld [vmem:[#allocation61_spill] sm:$0xff] }
 0x196   :  { %v9155_v37 = vsel %vm448_vm2, %v13144_v10, %v2950_v42  ;;  %v9174_v42 = vpop.permute.xlu2 %6672  ;;  %v13148_v10 = vld [vmem:[#allocation43_spill] sm:$0xff]  ;;  %13152 = vst [vmem:[#allocation23_spill] sm:$0xff] %v9192_v27  ;;  %v6170_v13 = vunpack.i.h.bf16 %v13153_v6  ;;  %v6190_v0 = vunpack.i.h.bf16 %v13155_v63  ;;  %v6189_v21 = vunpack.i.l.bf16 %v13155_v63  ;;  %v13160_v27 = vld [vmem:[#allocation48_spill] sm:$0xff] }
 0x197   :  { %v1240_v45 = vsel %vm1213_vm3, %v13148_v10, %v6159_v47  ;;  %6832 = vrot.lane.b32.xlu1 %v8962_v26, %s7701_s29  ;;  %v6851_v16 = vpack.i.bf16 %v9160_v29, %v9155_v37  ;;  %v6169_v47 = vunpack.i.l.bf16 %v13153_v6  ;;  %v6240_v53 = vunpack.i.h.bf16 %v13156_v33 }
 0x198   :  { %v6239_v28 = vunpack.i.l.bf16 %v13156_v33  ;;  %v6185_v1 = vunpack.i.h.bf16 %v8494_v41  ;;  %v6184_v32 = vunpack.i.l.bf16 %v8494_v41  ;;  %v6255_v10 = vunpack.i.h.bf16 %v13158_v62 }
 0x199   :  { %6827 = vrot.lane.b32.xlu0 %v8985_v9, %s7700_s24  ;;  %v9210_v9 = vpop.permute.xlu1 %6622  ;;  %v9221_v35 = vpack.i.bf16 %v2786_v3, %v2784_v51  ;;  %v6205_v6 = vunpack.i.h.bf16 %v13159_v34  ;;  %v6254_v63 = vunpack.i.l.bf16 %v13158_v62  ;;  %v6841_v33 = vpack.i.bf16 %v8976_v55, %v8979_v40 }
 0x19a   :  { %13154 = vst [vmem:[#allocation32_spill] sm:$0xff] %v9210_v9  ;;  %v6204_v9 = vunpack.i.l.bf16 %v13159_v34  ;;  %v9231_v15 = vsel %vm1213_vm3, %v13160_v27, %v6170_v13  ;;  %v6200_v41 = vunpack.i.h.bf16 %v8508_v57  ;;  %v6199_v51 = vunpack.i.l.bf16 %v8508_v57 }
 0x19b   :  { %v9216_v24 = vpop.permute.xlu0 %6617  ;;  %v6270_v3 = vunpack.i.h.bf16 %v8514_v59  ;;  %v9245_v62 = vsel %vm1246_vm4, %v1241_v39, %v6240_v53  ;;  %v9248_v27 = vsel %vm1246_vm4, %v1240_v45, %v6239_v28  ;;  %v1254_v57 = vsel %vm1246_vm4, %v9026_v49, %v6190_v0  ;;  %v5625_v0 = vld [vmem:[%s12715_s0 + $0x160] sm:$0xff] }
 0x19c   :  { %13157 = vst [vmem:[#allocation17_spill] sm:$0xff] %v9216_v24  ;;  %6852 = vrot.lane.b32.xlu2 %v6851_v16, %s7705_s15  ;;  %v13161_v24 = vld [vmem:[#allocation49_spill] sm:$0xff]  ;;  %v9242_v16 = vsel %vm1246_vm4, %v9030_v20, %v6189_v21  ;;  %v9256_v55 = vsel %vm1246_vm4, %v9007_v54, %v6185_v1  ;;  %v1281_v20 = vsel %vm1279_vm6, %v9202_v56, %v6255_v10  ;;  %v6220_v21 = vunpack.i.h.bf16 %v8524_v48 }
 0x19d   :  { %v9238_v34 = vsel %vm1213_vm3, %v13161_v24, %v6169_v47  ;;  %13162 = vst [vmem:[#allocation11_spill] sm:$0xff] %v9245_v62  ;;  %v9260_v47 = vsel %vm1246_vm4, %v9011_v8, %v6184_v32  ;;  %v9268_v45 = vsel %vm1246_vm4, %v9107_v7, %v6204_v9  ;;  %v9272_v49 = vsel %vm1246_vm4, %v9090_v46, %v6205_v6 }
 0x19e   :  { %13163 = vst [vmem:[#allocation26_spill] sm:$0xff] %v9248_v27  ;;  %v9250_v13 = vpop.permute.xlu2 %6687  ;;  %v1280_v54 = vsel %vm1279_vm6, %v9206_v12, %v6254_v63  ;;  %v9279_v8 = vsel %vm1246_vm4, %v8931_v5, %v6200_v41  ;;  %v9283_v39 = vsel %vm1246_vm4, %v8935_v19, %v6199_v51  ;;  %v9286_v7 = vsel %vm1279_vm6, %v1254_v57, %v6270_v3 }
 0x19f   :  { %6847 = vrot.lane.b32.xlu1 %v9221_v35, %s7704_s13  ;;  %v6269_v9 = vunpack.i.l.bf16 %v8514_v59  ;;  %v6219_v5 = vunpack.i.l.bf16 %v8524_v48  ;;  %v6335_v53 = vunpack.i.h.bf16 %v8624_v50  ;;  %v6334_v19 = vunpack.i.l.bf16 %v8624_v50  ;;  %v9303_v59 = vld [vmem:[%s12715_s0 + $0x168] sm:$0xff] }
 0x1a0   :  { %v6215_v24 = vunpack.i.h.bf16 %v8526_v22  ;;  %v6415_v1 = vunpack.i.h.bf16 %v8681_v52  ;;  %v6414_v32 = vunpack.i.l.bf16 %v8681_v52  ;;  %v6495_v10 = vunpack.i.h.bf16 %v8699_v31 }
 0x1a1   :  { %6842 = vrot.lane.b32.xlu0 %v6841_v33, %s7703_s12  ;;  %v9289_v46 = vpop.permute.xlu1 %6637  ;;  %v6494_v48 = vunpack.i.l.bf16 %v8699_v31  ;;  %v2623_v50 = vrot.slane %v5625_v0, 7  ;;  %v12899_v6 = vrot.slane %v9303_v59, 7  ;;  %v1314_v63 = vsel %vm1312_vm7, %v1281_v20, %v6335_v53 }
 0x1a2   :  { %13164 = vst [vmem:[#allocation24_spill] sm:$0xff] %v9289_v46  ;;  %v1313_v41 = vsel %vm1312_vm7, %v1280_v54, %v6334_v19  ;;  %v6575_v51 = vunpack.i.h.bf16 %v8971_v58  ;;  %v6574_v52 = vunpack.i.l.bf16 %v8971_v58  ;;  %v6214_v31 = vunpack.i.l.bf16 %v8526_v22 }
 0x1a3   :  { %v9298_v28 = vpop.permute.xlu0 %6632  ;;  %v1346_v57 = vsel %vm1345_vm8, %v1313_v41, %v6414_v32  ;;  %v1347_v0 = vsel %vm1345_vm8, %v1314_v63, %v6415_v1  ;;  %v9330_v58 = vpack.i.bf16 %v9100_v23, %v9103_v36  ;;  %v9333_v22 = vsel %vm105_vm0, 0.0, %v2623_v50 }
 0x1a4   :  { %13165 = vst [vmem:[#allocation28_spill] sm:$0xff] %v9298_v28  ;;  %6867 = vrot.lane.b32.xlu2 %v6841_v33, %s7700_s24  ;;  %v6284_v33 = vunpack.i.l.bf16 %v8530_v61  ;;  %v1379_v20 = vsel %vm1378_vm9, %v1346_v57, %v6494_v48  ;;  %v1380_v54 = vsel %vm1378_vm9, %v1347_v0, %v6495_v10  ;;  %v13169_v19 = vrot.slane %v9040_v44, 7 }
 0x1a5   :  { %13167 = vst [vmem:[#allocation33_spill] sm:$0xff] %v9333_v22  ;;  %v1412_v48 = vsel %vm1411_vm10, %v1379_v20, %v6574_v52  ;;  %v1413_v63 = vsel %vm1411_vm10, %v1380_v54, %v6575_v51  ;;  %v9349_v41 = vpack.i.bf16 %v9155_v37, %v9061_v60  ;;  %v2787_v51 = vrot.slane %v9103_v36, 1 }
 0x1a6   :  { %v9316_v3 = vpop.permute.xlu2 %6702  ;;  %v2721_v1 = vsel %vm105_vm0, %v13169_v19, 0.0  ;;  %v2788_v20 = vrot.slane %v9100_v23, 1  ;;  %v9361_v37 = vsel %vm1246_vm4, %v9164_v38, %v6219_v5  ;;  %v9365_v54 = vsel %vm1246_vm4, %v9126_v30, %v6220_v21 }
 0x1a7   :  { %13166 = vst [vmem:[#allocation27_spill] sm:$0xff] %v9316_v3  ;;  %6862 = vrot.lane.b32.xlu1 %v9130_v14, %s7699_s23  ;;  %v9338_v14 = vsel %vm105_vm0, %v2623_v50, %v12899_v6  ;;  %v2957_v50 = vrot.slane %v9333_v22, 2  ;;  %v2955_v0 = vrot.slane %v2721_v1, 2  ;;  %v2790_v60 = vrot.slane %v2721_v1, 1 }
 0x1a8   :  { %13168 = vst [vmem:[#allocation34_spill] sm:$0xff] %v9338_v14  ;;  %v9369_v19 = vsel %vm1279_vm6, %v9242_v16, %v6269_v9  ;;  %v9380_v38 = vsel %vm1246_vm4, %v8946_v11, %v6214_v31  ;;  %v9384_v30 = vsel %vm1279_vm6, %v9268_v45, %v6284_v33  ;;  %v6259_v21 = vunpack.i.l.bf16 %v8562_v2  ;;  %v13172_v45 = vld [vmem:[#allocation5_spill] sm:$0xff]  ;;  %v13173_v33 = vld [vmem:[#allocation64_spill] sm:$0xff] }
 0x1a9   :  { %6857 = vrot.lane.b32.xlu0 %v8962_v26, %s7698_s14  ;;  %v6653_v53 = vpop.permute.xlu1 %6652  ;;  %v6340_v9 = vunpack.i.h.bf16 %v13172_v45  ;;  %v6339_v5 = vunpack.i.l.bf16 %v13172_v45  ;;  %v2791_v31 = vsel %vm271_vm1, %v2788_v20, %v2790_v60  ;;  %v6235_v1 = vunpack.i.h.bf16 %v13173_v33  ;;  %v13177_v60 = vld [vmem:[#allocation10_spill] sm:$0xff] }
 0x1aa   :  { %v6655_v26 = vunpack.i.h.bf16 %v6653_v53  ;;  %v6654_v32 = vunpack.i.l.bf16 %v6653_v53  ;;  %v12898_v53 = vrot.slane %v9338_v14, 2 }
 0x1ab   :  { %v9343_v10 = vpop.permute.xlu0 %6647 }
 0x1ac   :  { %13170 = vst [vmem:[#allocation36_spill] sm:$0xff] %v9343_v10  ;;  %6882 = vrot.lane.b32.xlu2 %v9330_v58, %s7703_s12  ;;  %v1445_v44 = vsel %vm1444_vm11, %v1412_v48, %v6654_v32  ;;  %v1446_v57 = vsel %vm1444_vm11, %v1413_v63, %v6655_v26  ;;  %v6285_v26 = vunpack.i.h.bf16 %v8530_v61  ;;  %v9376_v48 = vsel %vm1246_vm4, %v8942_v17, %v6215_v24 }
 0x1ad   :  { %v1477_v52 = vpack.c.bf16 %v1446_v57, %v1445_v44  ;;  %v6260_v61 = vunpack.i.h.bf16 %v8562_v2  ;;  %v13171_v17 = vrot.slane %v9100_v23, 2  ;;  %v9401_v16 = vsel %vm448_vm2, %v2957_v50, %v12898_v53  ;;  %v13174_v50 = vld [vmem:[#allocation87_spill] sm:$0xff] }
 0x1ae   :  { %v9372_v32 = vpop.permute.xlu2 %6717  ;;  %v2789_v2 = vsel %vm271_vm1, %v2787_v51, %v2788_v20  ;;  %v6234_v63 = vunpack.i.l.bf16 %v13173_v33  ;;  %v9413_v44 = vsel %vm1279_vm6, %v9272_v49, %v6285_v26  ;;  %v6419_v57 = vunpack.i.l.bf16 %v13174_v50  ;;  %v13176_v51 = vld [vmem:[#allocation119_spill] sm:$0xff]  ;;  %v13178_v26 = vld [vmem:[#allocation12_spill] sm:$0xff] }
 0x1af   :  { %6877 = vrot.lane.b32.xlu1 %v9349_v41, %s7702_s30  ;;  %5577 = vmatmul.msk.bf16.vlgmr.msra.gmra.mxu0 %vm1517_vm12, %v1477_v52  ;;  %v9396_v11 = vsel %vm448_vm2, %v13171_v17, %v2955_v0  ;;  %v13175_v52 = vld [vmem:[#allocation31_spill] sm:$0xff]  ;;  %v6420_v45 = vunpack.i.h.bf16 %v13174_v50  ;;  %v6499_v53 = vunpack.i.l.bf16 %v13176_v51  ;;  %v1283_v33 = vsel %vm1279_vm6, %v13177_v60, %v6260_v61 }
 0x1b0   :  { %v1282_v17 = vsel %vm1279_vm6, %v13175_v52, %v6259_v21  ;;  %v6891_v20 = vpack.i.bf16 %v9401_v16, %v9396_v11  ;;  %v6500_v49 = vunpack.i.h.bf16 %v13176_v51  ;;  %v6579_v6 = vunpack.i.l.bf16 %v13178_v26  ;;  %v13179_v21 = vld [vmem:[#allocation65_spill] sm:$0xff]  ;;  %v13180_v61 = vld [vmem:[#allocation19_spill] sm:$0xff] }
 0x1b1   :  { %6872 = vrot.lane.b32.xlu0 %v9221_v35, %s7701_s29  ;;  %v9405_v24 = vpop.permute.xlu1 %6667  ;;  %v9430_v10 = vpack.i.bf16 %v2791_v31, %v2789_v2  ;;  %v6230_v52 = vunpack.i.h.bf16 %v13179_v21  ;;  %v1315_v50 = vsel %vm1312_vm7, %v1282_v17, %v6339_v5  ;;  %v1316_v28 = vsel %vm1312_vm7, %v1283_v33, %v6340_v9 }
 0x1b2   :  { %v6580_v46 = vunpack.i.h.bf16 %v13178_v26  ;;  %v1348_v27 = vsel %vm1345_vm8, %v1315_v50, %v6419_v57  ;;  %v6660_v60 = vunpack.i.h.bf16 %v13180_v61  ;;  %v6659_v51 = vunpack.i.l.bf16 %v13180_v61  ;;  %v13189_v61 = vld [vmem:[#allocation70_spill] sm:$0xff] }
 0x1b3   :  { %v9416_v0 = vpop.permute.xlu0 %6662  ;;  %v9448_v5 = vsel %vm1246_vm4, %v9184_v18, %v6234_v63  ;;  %v6229_v9 = vunpack.i.l.bf16 %v13179_v21  ;;  %v1349_v31 = vsel %vm1345_vm8, %v1316_v28, %v6420_v45  ;;  %v1381_v57 = vsel %vm1378_vm9, %v1348_v27, %v6499_v53  ;;  %v13184_v45 = vld [vmem:[#allocation54_spill] sm:$0xff]  ;;  %v13187_v21 = vld [vmem:[#allocation55_spill] sm:$0xff] }
 0x1b4   :  { %6897 = vrot.lane.b32.xlu2 %v9221_v35, %s7698_s14  ;;  %v13181_v35 = vrot.slane %v9303_v59, 7  ;;  %13182 = vst [vmem:[#allocation41_spill] sm:$0xff] %v9448_v5  ;;  %v9456_v17 = vsel %vm1246_vm4, %v9180_v25, %v6235_v1  ;;  %v1382_v59 = vsel %vm1378_vm9, %v1349_v31, %v6500_v49  ;;  %v1414_v18 = vsel %vm1411_vm10, %v1381_v57, %v6579_v6  ;;  %v13186_v1 = vld [vmem:[#allocation66_spill] sm:$0xff]  ;;  %v9489_v31 = vld [vmem:[%s12715_s0 + $0x178] sm:$0xff] }
 0x1b5   :  { %13183 = vst [vmem:[#allocation25_spill] sm:$0xff] %v9456_v17  ;;  %v1415_v33 = vsel %vm1411_vm10, %v1382_v59, %v6580_v46  ;;  %v2792_v28 = vrot.slane %v9333_v22, 1  ;;  %v2793_v27 = vrot.slane %v9338_v14, 1  ;;  %v9470_v25 = vsel %vm1246_vm4, %v13184_v45, %v6230_v52  ;;  %v5627_v52 = vld [vmem:[%s12715_s0 + $0x170] sm:$0xff] }
 0x1b6   :  { %v9439_v62 = vpop.permute.xlu2 %6732  ;;  %v9444_v2 = vsel %vm105_vm0, %v13181_v35, 0.0  ;;  %13185 = vst [vmem:[#allocation29_spill] sm:$0xff] %v9470_v25  ;;  %v1447_v6 = vsel %vm1444_vm11, %v1414_v18, %v6659_v51  ;;  %v1448_v26 = vsel %vm1444_vm11, %v1415_v33, %v6660_v60  ;;  %v9479_v46 = vsel %vm1246_vm4, %v13187_v21, %v6229_v9  ;;  %v13190_v60 = vld [vmem:[#allocation72_spill] sm:$0xff]  ;;  %v13191_v59 = vld [vmem:[#allocation74_spill] sm:$0xff]  ;;  %v13192_v25 = vld [vmem:[#allocation67_spill] sm:$0xff] }
 0x1b7   :  { %6892 = vrot.lane.b32.xlu1 %v6891_v20, %s7705_s15  ;;  %v2795_v53 = vrot.slane %v9444_v2, 1  ;;  %v6299_v20 = vunpack.i.l.bf16 %v13186_v1  ;;  %13188 = vst [vmem:[#allocation59_spill] sm:$0xff] %v9479_v46  ;;  %v6300_v50 = vunpack.i.h.bf16 %v13186_v1  ;;  %v6265_v35 = vunpack.i.h.bf16 %v13189_v61 }
 0x1b8   :  { %v6264_v51 = vunpack.i.l.bf16 %v13189_v61  ;;  %v6280_v57 = vunpack.i.h.bf16 %v13190_v60  ;;  %v6279_v9 = vunpack.i.l.bf16 %v13190_v60  ;;  %v6344_v18 = vunpack.i.l.bf16 %v13191_v59 }
 0x1b9   :  { %6887 = vrot.lane.b32.xlu0 %v9430_v10, %s7704_s13  ;;  %v9462_v63 = vpop.permute.xlu1 %6682  ;;  %v1478_v33 = vpack.c.bf16 %v1448_v26, %v1447_v6  ;;  %v2794_v45 = vsel %vm271_vm1, %v2792_v28, %v2793_v27  ;;  %v2796_v1 = vsel %vm271_vm1, %v2793_v27, %v2795_v53  ;;  %v9501_v21 = vsel %vm1279_vm6, %v9361_v37, %v6299_v20  ;;  %v13194_v27 = vld [vmem:[#allocation68_spill] sm:$0xff]  ;;  %v13195_v6 = vld [vmem:[#allocation73_spill] sm:$0xff]  ;;  %v13201_v53 = vld [vmem:[#allocation123_spill] sm:$0xff] }
 0x1ba   :  { %v6345_v61 = vunpack.i.h.bf16 %v13191_v59  ;;  %v2626_v23 = vrot.slane %v5627_v52, 7  ;;  %v12905_v60 = vrot.slane %v9489_v31, 7  ;;  %v9511_v28 = vsel %vm1279_vm6, %v9365_v54, %v6300_v50 }
 0x1bb   :  { %v9473_v49 = vpop.permute.xlu0 %6677  ;;  %13193 = vst [vmem:[#allocation35_spill] sm:$0xff] %v9511_v28  ;;  %v1284_v37 = vsel %vm1279_vm6, %v9260_v47, %v6264_v51  ;;  %v1285_v20 = vsel %vm1279_vm6, %v9256_v55, %v6265_v35  ;;  %v9524_v54 = vpack.i.bf16 %v2796_v1, %v2794_v45  ;;  %v9528_v50 = vsel %vm1279_vm6, %v9283_v39, %v6279_v9  ;;  %v13197_v51 = vld [vmem:[#allocation76_spill] sm:$0xff] }
 0x1bc   :  { %6912 = vrot.lane.b32.xlu2 %v9430_v10, %s7701_s29  ;;  %v1317_v52 = vsel %vm1312_vm7, %v1284_v37, %v6344_v18  ;;  %v1318_v35 = vsel %vm1312_vm7, %v1285_v20, %v6345_v61  ;;  %v9545_v39 = vsel %vm105_vm0, %v2626_v23, %v12905_v60  ;;  %v9555_v1 = vpack.i.bf16 %v9338_v14, %v9333_v22  ;;  %v13200_v61 = vld [vmem:[#allocation118_spill] sm:$0xff] }
 0x1bd   :  { %v6505_v37 = vunpack.i.h.bf16 %v13200_v61  ;;  %v6504_v20 = vunpack.i.l.bf16 %v13200_v61  ;;  %v6585_v46 = vunpack.i.h.bf16 %v13201_v53  ;;  %v6584_v17 = vunpack.i.l.bf16 %v13201_v53 }
 0x1be   :  { %v9504_v36 = vpop.permute.xlu2 %6747  ;;  %v12910_v47 = vrot.slane %v9545_v39, 2  ;;  %v6665_v60 = vunpack.i.h.bf16 %v9416_v0  ;;  %v6664_v22 = vunpack.i.l.bf16 %v9416_v0  ;;  %v9587_v0 = vld [vmem:[%s12715_s0 + $0x188] sm:$0xff] }
 0x1bf   :  { %6907 = vrot.lane.b32.xlu1 %v9330_v58, %s7700_s24  ;;  %5578 = vmatmul.msk.bf16.gmra.mxu0 %vm1517_vm12, %v1478_v33  ;;  %v9532_v58 = vsel %vm1279_vm6, %v9279_v8, %v6280_v57  ;;  %v9548_v8 = vsel %vm105_vm0, 0.0, %v2626_v23  ;;  %v13198_v57 = vld [vmem:[#allocation86_spill] sm:$0xff]  ;;  %v13199_v33 = vld [vmem:[#allocation100_spill] sm:$0xff]  ;;  %v6916_v23 = vpack.i.bf16 %v9396_v11, %v9160_v29  ;;  %v13202_v11 = vld [vmem:[#allocation99_spill] sm:$0xff] }
 0x1c0   :  { %v6350_v9 = vunpack.i.h.bf16 %v13198_v57  ;;  %v6425_v18 = vunpack.i.h.bf16 %v13199_v33  ;;  %v6424_v45 = vunpack.i.l.bf16 %v13199_v33  ;;  %v2960_v33 = vrot.slane %v9444_v2, 2 }
 0x1c1   :  { %6902 = vrot.lane.b32.xlu0 %v9349_v41, %s7699_s23  ;;  %v9536_v55 = vpop.permute.xlu1 %6697  ;;  %v2962_v41 = vrot.slane %v9548_v8, 2  ;;  %v6349_v61 = vunpack.i.l.bf16 %v13198_v57  ;;  %v6430_v53 = vunpack.i.h.bf16 %v13202_v11  ;;  %v5629_v57 = vld [vmem:[%s12715_s0 + $0x180] sm:$0xff] }
 0x1c2   :  { %13196 = vst [vmem:[#allocation37_spill] sm:$0xff] %v9536_v55  ;;  %v1320_v29 = vsel %vm1312_vm7, %v9286_v7, %v6350_v9  ;;  %v1350_v2 = vsel %vm1345_vm8, %v1317_v52, %v6424_v45  ;;  %v1351_v40 = vsel %vm1345_vm8, %v1318_v35, %v6425_v18  ;;  %v6429_v7 = vunpack.i.l.bf16 %v13202_v11 }
 0x1c3   :  { %v9540_v59 = vpop.permute.xlu0 %6692  ;;  %v1383_v9 = vsel %vm1378_vm9, %v1350_v2, %v6504_v20  ;;  %v1384_v52 = vsel %vm1378_vm9, %v1351_v40, %v6505_v37  ;;  %v13203_v18 = vrot.slane %v9338_v14, 2  ;;  %v9599_v26 = vsel %vm448_vm2, %v2962_v41, %v12910_v47 }
 0x1c4   :  { %6927 = vrot.lane.b32.xlu2 %v9524_v54, %s7704_s13  ;;  %v1416_v55 = vsel %vm1411_vm10, %v1383_v9, %v6584_v17  ;;  %v1417_v11 = vsel %vm1411_vm10, %v1384_v52, %v6585_v46  ;;  %v2629_v37 = vrot.slane %v5629_v57, 7  ;;  %v12911_v2 = vrot.slane %v9587_v0, 7  ;;  %v13204_v17 = vld [vmem:[#allocation102_spill] sm:$0xff] }
 0x1c5   :  { %v2961_v45 = vsel %vm448_vm2, %v13203_v18, %v2960_v33  ;;  %v1449_v20 = vsel %vm1444_vm11, %v1416_v55, %v6664_v22  ;;  %v1450_v40 = vsel %vm1444_vm11, %v1417_v11, %v6665_v60  ;;  %v1319_v33 = vsel %vm1312_vm7, %v9369_v19, %v6349_v61 }
 0x1c6   :  { %v9572_v5 = vpop.permute.xlu2 %6762  ;;  %v1352_v41 = vsel %vm1345_vm8, %v1319_v33, %v6429_v7  ;;  %v1353_v47 = vsel %vm1345_vm8, %v1320_v29, %v6430_v53  ;;  %v6510_v9 = vunpack.i.h.bf16 %v13204_v17  ;;  %v6931_v22 = vpack.i.bf16 %v9599_v26, %v2961_v45  ;;  %v13206_v53 = vld [vmem:[#allocation8_spill] sm:$0xff] }
 0x1c7   :  { %6922 = vrot.lane.b32.xlu1 %v9555_v1, %s7703_s12  ;;  %v1479_v55 = vpack.c.bf16 %v1450_v40, %v1449_v20  ;;  %v13205_v57 = vrot.slane %v9489_v31, 7  ;;  %v9628_v29 = vsel %vm105_vm0, 0.0, %v2629_v37  ;;  %v6509_v31 = vunpack.i.l.bf16 %v13204_v17 }
 0x1c8   :  { %v6590_v7 = vunpack.i.h.bf16 %v13206_v53  ;;  %v9641_v11 = vpack.i.bf16 %v2961_v45, %v9401_v16  ;;  %v2797_v16 = vrot.slane %v9548_v8, 1 }
 0x1c9   :  { %6917 = vrot.lane.b32.xlu0 %v6916_v23, %s7702_s30  ;;  %v6713_v35 = vpop.permute.xlu1 %6712  ;;  %v2723_v52 = vsel %vm105_vm0, %v13205_v57, 0.0 }
 0x1ca   :  { %v6715_v46 = vunpack.i.h.bf16 %v6713_v35  ;;  %v6714_v60 = vunpack.i.l.bf16 %v6713_v35  ;;  %v6589_v35 = vunpack.i.l.bf16 %v13206_v53  ;;  %v2965_v20 = vrot.slane %v2723_v52, 2 }
 0x1cb   :  { %v6708_v28 = vpop.permute.xlu0 %6707 }
 0x1cc   :  { %v6710_v18 = vunpack.i.h.bf16 %v6708_v28  ;;  %v6709_v14 = vunpack.i.l.bf16 %v6708_v28  ;;  %6942 = vrot.lane.b32.xlu2 %v6916_v23, %s7699_s23  ;;  %v9625_v23 = vsel %vm105_vm0, %v2629_v37, %v12911_v2  ;;  %v13207_v2 = vrot.slane %v9545_v39, 2 }
 0x1ce   :  { %v3723_v19 = vsel %vm1279_vm6, %v9202_v56, %v6710_v18  ;;  %v3722_v28 = vsel %vm1279_vm6, %v9206_v12, %v6709_v14  ;;  %v9620_v61 = vpop.permute.xlu2 %6777  ;;  %v6705_v56 = vunpack.i.h.bf16 %v9316_v3  ;;  %v6720_v12 = vunpack.i.h.bf16 %v9372_v32 }
 0x1cf   :  { %6937 = vrot.lane.b32.xlu1 %v9430_v10, %s7698_s14  ;;  %5579 = vmatmul.msk.bf16.gmra.mxu0 %vm1517_vm12, %v1479_v55  ;;  %v6719_v14 = vunpack.i.l.bf16 %v9372_v32  ;;  %v3755_v40 = vsel %vm1312_vm7, %v3723_v19, %v6715_v46  ;;  %v3754_v37 = vsel %vm1312_vm7, %v3722_v28, %v6714_v60  ;;  %v2967_v18 = vrot.slane %v9628_v29, 2 }
 0x1d0   :  { %v12912_v10 = vrot.slane %v9625_v23, 2  ;;  %v6734_v32 = vunpack.i.l.bf16 %v9439_v62  ;;  %v3787_v46 = vsel %vm1345_vm8, %v3755_v40, %v6720_v12  ;;  %v2798_v60 = vrot.slane %v9545_v39, 1 }
 0x1d1   :  { %6932 = vrot.lane.b32.xlu0 %v6931_v22, %s7705_s15  ;;  %v6728_v33 = vpop.permute.xlu1 %6727  ;;  %v3786_v45 = vsel %vm1345_vm8, %v3754_v37, %v6719_v14  ;;  %v2800_v19 = vrot.slane %v2723_v52, 1  ;;  %v6670_v12 = vunpack.i.h.bf16 %v9405_v24  ;;  %v6669_v40 = vunpack.i.l.bf16 %v9405_v24 }
 0x1d2   :  { %v6730_v17 = vunpack.i.h.bf16 %v6728_v33  ;;  %v6729_v55 = vunpack.i.l.bf16 %v6728_v33  ;;  %v9664_v14 = vsel %vm448_vm2, %v2967_v18, %v12912_v10  ;;  %v13220_v10 = vld [vmem:[#allocation109_spill] sm:$0xff] }
 0x1d3   :  { %v6723_v57 = vpop.permute.xlu0 %6722 }
 0x1d4   :  { %v6725_v53 = vunpack.i.h.bf16 %v6723_v57  ;;  %v6724_v22 = vunpack.i.l.bf16 %v6723_v57  ;;  %6957 = vrot.lane.b32.xlu2 %v9641_v11, %s7702_s30  ;;  %v9659_v57 = vsel %vm448_vm2, %v13207_v2, %v2965_v20  ;;  %v1386_v2 = vsel %vm1378_vm9, %v1353_v47, %v6510_v9  ;;  %v13209_v9 = vld [vmem:[#allocation15_spill] sm:$0xff] }
 0x1d5   :  { %v13208_v47 = vunpack.i.h.bf16 %v13195_v6 }
 0x1d6   :  { %v3818_v28 = vsel %vm1378_vm9, %v3786_v45, %v6724_v22  ;;  %v3819_v33 = vsel %vm1378_vm9, %v3787_v46, %v6725_v53  ;;  %v9668_v37 = vpop.permute.xlu2 %6792  ;;  %v1385_v22 = vsel %vm1378_vm9, %v1352_v41, %v6509_v31  ;;  %v2799_v45 = vsel %vm271_vm1, %v2797_v16, %v2798_v60 }
 0x1d7   :  { %v3850_v52 = vsel %vm1411_vm10, %v3818_v28, %v6729_v55  ;;  %v3851_v53 = vsel %vm1411_vm10, %v3819_v33, %v6730_v17  ;;  %6952 = vrot.lane.b32.xlu1 %v9524_v54, %s7701_s29  ;;  %v2801_v55 = vsel %vm271_vm1, %v2798_v60, %v2800_v19  ;;  %v6971_v41 = vpack.i.bf16 %v9664_v14, %v9659_v57  ;;  %v13211_v17 = vld [vmem:[#allocation16_spill] sm:$0xff]  ;;  %v13213_v28 = vld [vmem:[#allocation85_spill] sm:$0xff] }
 0x1d8   :  { %v3882_v20 = vsel %vm1444_vm11, %v3850_v52, %v6705_v56  ;;  %v3883_v18 = vsel %vm1444_vm11, %v3851_v53, %v6734_v32  ;;  %v1289_v31 = vsel %vm1279_vm6, %v13209_v9, %v13208_v47  ;;  %v13210_v56 = vunpack.i.l.bf16 %v13195_v6 }
 0x1d9   :  { %6947 = vrot.lane.b32.xlu0 %v9555_v1, %s7700_s24  ;;  %v3914_v24 = vpack.c.bf16 %v3883_v18, %v3882_v20  ;;  %v6743_v46 = vpop.permute.xlu1 %6742  ;;  %v1418_v1 = vsel %vm1411_vm10, %v1385_v22, %v6589_v35  ;;  %v1419_v16 = vsel %vm1411_vm10, %v1386_v2, %v6590_v7  ;;  %v13212_v60 = vunpack.i.h.bf16 %v13197_v51  ;;  %v13215_v18 = vld [vmem:[#allocation90_spill] sm:$0xff] }
 0x1da   :  { %v1288_v32 = vsel %vm1279_vm6, %v13211_v17, %v13210_v56  ;;  %v6354_v33 = vunpack.i.l.bf16 %v13213_v28  ;;  %v1451_v6 = vsel %vm1444_vm11, %v1418_v1, %v6669_v40  ;;  %v1452_v53 = vsel %vm1444_vm11, %v1419_v16, %v6670_v12  ;;  %v13216_v40 = vld [vmem:[#allocation77_spill] sm:$0xff]  ;;  %v13217_v56 = vld [vmem:[#allocation122_spill] sm:$0xff] }
 0x1db   :  { %v9698_v19 = vsel %vm1279_vm6, %v9169_v4, %v13212_v60  ;;  %v6738_v52 = vpop.permute.xlu0 %6737  ;;  %5645 = vmatmul.msk.bf16.vlgmr.msra.gmra.mxu2 %vm1517_vm12, %v3914_v24  ;;  %v6355_v20 = vunpack.i.h.bf16 %v13213_v28  ;;  %v9705_v7 = vpack.i.bf16 %v2801_v55, %v2799_v45  ;;  %v13214_v2 = vunpack.i.l.bf16 %v13197_v51  ;;  %v13218_v28 = vld [vmem:[#allocation30_spill] sm:$0xff] }
 0x1dc   :  { %v6740_v35 = vunpack.i.h.bf16 %v6738_v52  ;;  %v6739_v22 = vunpack.i.l.bf16 %v6738_v52  ;;  %v6435_v47 = vunpack.i.h.bf16 %v13215_v18  ;;  %v6434_v24 = vunpack.i.l.bf16 %v13215_v18  ;;  %6972 = vrot.lane.b32.xlu2 %v6971_v41, %s7705_s15 }
 0x1dd   :  { %v9711_v4 = vsel %vm1279_vm6, %v9172_v43, %v13214_v2  ;;  %v6961_v12 = vpack.i.bf16 %v9545_v39, %v9548_v8  ;;  %v6360_v9 = vunpack.i.h.bf16 %v13216_v40  ;;  %v6515_v45 = vunpack.i.h.bf16 %v13217_v56  ;;  %v13219_v2 = vld [vmem:[#allocation108_spill] sm:$0xff] }
 0x1de   :  { %v6514_v55 = vunpack.i.l.bf16 %v13217_v56  ;;  %v1480_v51 = vpack.c.bf16 %v1452_v53, %v1451_v6  ;;  %v6359_v17 = vunpack.i.l.bf16 %v13216_v40  ;;  %v1321_v43 = vsel %vm1312_vm7, %v1288_v32, %v6354_v33  ;;  %v9723_v60 = vpop.permute.xlu2 %6807 }
 0x1df   :  { %v6745_v1 = vunpack.i.h.bf16 %v6743_v46  ;;  %v6744_v16 = vunpack.i.l.bf16 %v6743_v46  ;;  %v1322_v41 = vsel %vm1312_vm7, %v1289_v31, %v6355_v20  ;;  %v6594_v52 = vunpack.i.l.bf16 %v13218_v28  ;;  %6967 = vrot.lane.b32.xlu1 %v9705_v7, %s7704_s13 }
 0x1e0   :  { %v3663_v18 = vsel %vm1213_vm3, %v13219_v2, %v6740_v35  ;;  %v3662_v3 = vsel %vm1213_vm3, %v13220_v10, %v6739_v22  ;;  %5580 = vmatmul.msk.bf16.gmra.mxu0 %vm1517_vm12, %v1480_v51  ;;  %v1354_v32 = vsel %vm1345_vm8, %v1321_v43, %v6434_v24  ;;  %v1355_v46 = vsel %vm1345_vm8, %v1322_v41, %v6435_v47  ;;  %v5631_v35 = vld [vmem:[%s12715_s0 + $0x190] sm:$0xff]  ;;  %v9748_v22 = vld [vmem:[%s12715_s0 + $0x198] sm:$0xff] }
 0x1e1   :  { %v6595_v33 = vunpack.i.h.bf16 %v13218_v28  ;;  %6962 = vrot.lane.b32.xlu0 %v6961_v12, %s7703_s12  ;;  %v1387_v31 = vsel %vm1378_vm9, %v1354_v32, %v6514_v55  ;;  %v1388_v6 = vsel %vm1378_vm9, %v1355_v46, %v6515_v45  ;;  %v6750_v53 = vunpack.i.h.bf16 %v9504_v36  ;;  %v6758_v20 = vpop.permute.xlu1 %6757 }
 0x1e2   :  { %v6749_v10 = vunpack.i.l.bf16 %v9504_v36  ;;  %v6675_v47 = vunpack.i.h.bf16 %v9174_v42  ;;  %v6674_v24 = vunpack.i.l.bf16 %v9174_v42  ;;  %v3693_v40 = vsel %vm1246_vm4, %v3663_v18, %v6745_v1 }
 0x1e3   :  { %v3692_v56 = vsel %vm1246_vm4, %v3662_v3, %v6744_v16  ;;  %v6753_v45 = vpop.permute.xlu0 %6752  ;;  %v1420_v51 = vsel %vm1411_vm10, %v1387_v31, %v6594_v52  ;;  %v1421_v43 = vsel %vm1411_vm10, %v1388_v6, %v6595_v33  ;;  %v2632_v41 = vrot.slane %v5631_v35, 7  ;;  %v13221_v31 = vld [vmem:[#allocation88_spill] sm:$0xff] }
 0x1e4   :  { %v6755_v36 = vunpack.i.h.bf16 %v6753_v45  ;;  %v6754_v55 = vunpack.i.l.bf16 %v6753_v45  ;;  %6987 = vrot.lane.b32.xlu2 %v6961_v12, %s7700_s24  ;;  %v12915_v28 = vrot.slane %v9748_v22, 7  ;;  %v6760_v2 = vunpack.i.h.bf16 %v6758_v20 }
 0x1e5   :  { %v6759_v32 = vunpack.i.l.bf16 %v6758_v20  ;;  %v3724_v42 = vsel %vm1279_vm6, %v3692_v56, %v6749_v10  ;;  %v3725_v1 = vsel %vm1279_vm6, %v3693_v40, %v6750_v53  ;;  %v1453_v52 = vsel %vm1444_vm11, %v1420_v51, %v6674_v24 }
 0x1e6   :  { %v3756_v3 = vsel %vm1312_vm7, %v3724_v42, %v6754_v55  ;;  %v3757_v16 = vsel %vm1312_vm7, %v3725_v1, %v6755_v36  ;;  %v9762_v18 = vpop.permute.xlu2 %6822  ;;  %v1454_v12 = vsel %vm1444_vm11, %v1421_v43, %v6675_v47  ;;  %v9768_v46 = vsel %vm1312_vm7, %v9528_v50, %v6359_v17  ;;  %v13223_v1 = vld [vmem:[#allocation89_spill] sm:$0xff] }
 0x1e7   :  { %v9772_v33 = vsel %vm1312_vm7, %v9532_v58, %v6360_v9  ;;  %v6765_v53 = vunpack.i.h.bf16 %v9572_v5  ;;  %6982 = vrot.lane.b32.xlu1 %v9641_v11, %s7699_s23  ;;  %v6764_v10 = vunpack.i.l.bf16 %v9572_v5  ;;  %v9783_v50 = vpack.i.bf16 %v9625_v23, %v9628_v29 }
 0x1e8   :  { %v9786_v17 = vsel %vm105_vm0, 0.0, %v2632_v41  ;;  %v13222_v58 = vrot.slane %v9587_v0, 7  ;;  %v3788_v20 = vsel %vm1345_vm8, %v3756_v3, %v6759_v32  ;;  %v3789_v11 = vsel %vm1345_vm8, %v3757_v16, %v6760_v2 }
 0x1e9   :  { %6977 = vrot.lane.b32.xlu0 %v9524_v54, %s7698_s14  ;;  %v9793_v35 = vpop.permute.xlu1 %6772  ;;  %v1481_v5 = vpack.c.bf16 %v1454_v12, %v1453_v52  ;;  %v9798_v54 = vsel %vm105_vm0, %v2632_v41, %v12915_v28  ;;  %v6735_v47 = vunpack.i.h.bf16 %v9439_v62  ;;  %v9804_v0 = vpack.i.bf16 %v9659_v57, %v9599_v26 }
 0x1ea   :  { %v2724_v9 = vsel %vm105_vm0, %v13222_v58, 0.0  ;;  %v6774_v24 = vunpack.i.l.bf16 %v9793_v35  ;;  %v2972_v55 = vrot.slane %v9786_v17, 2  ;;  %v3820_v51 = vsel %vm1378_vm9, %v3788_v20, %v6764_v10 }
 0x1eb   :  { %v6768_v40 = vpop.permute.xlu0 %6767  ;;  %v2970_v36 = vrot.slane %v2724_v9, 2  ;;  %v3821_v43 = vsel %vm1378_vm9, %v3789_v11, %v6765_v53  ;;  %v12914_v62 = vrot.slane %v9798_v54, 2  ;;  %v2802_v41 = vrot.slane %v9628_v29, 1  ;;  %v13224_v53 = vld [vmem:[#allocation101_spill] sm:$0xff] }
 0x1ec   :  { %v6770_v56 = vunpack.i.h.bf16 %v6768_v40  ;;  %v6769_v45 = vunpack.i.l.bf16 %v6768_v40  ;;  %7002 = vrot.lane.b32.xlu2 %v9783_v50, %s7703_s12  ;;  %v2803_v57 = vrot.slane %v9625_v23, 1  ;;  %v2805_v32 = vrot.slane %v2724_v9, 1 }
 0x1ed   :  { %v6369_v42 = vunpack.i.l.bf16 %v13221_v31  ;;  %v6440_v10 = vunpack.i.h.bf16 %v13224_v53  ;;  %v6439_v58 = vunpack.i.l.bf16 %v13224_v53  ;;  %v6779_v20 = vunpack.i.l.bf16 %v9620_v61  ;;  %v13228_v53 = vld [vmem:[#allocation104_spill] sm:$0xff] }
 0x1ee   :  { %v3852_v2 = vsel %vm1411_vm10, %v3820_v51, %v6769_v45  ;;  %v3853_v26 = vsel %vm1411_vm10, %v3821_v43, %v6770_v56  ;;  %v9820_v12 = vpop.permute.xlu2 %6837  ;;  %v6780_v11 = vunpack.i.h.bf16 %v9620_v61  ;;  %v9839_v40 = vsel %vm448_vm2, %v2972_v55, %v12914_v62  ;;  %v13226_v56 = vld [vmem:[#allocation121_spill] sm:$0xff] }
 0x1ef   :  { %v3884_v16 = vsel %vm1444_vm11, %v3852_v2, %v6735_v47  ;;  %v3885_v52 = vsel %vm1444_vm11, %v3853_v26, %v6774_v24  ;;  %6997 = vrot.lane.b32.xlu1 %v9804_v0, %s7702_s30  ;;  %v13225_v47 = vrot.slane %v9625_v23, 2  ;;  %v6520_v45 = vunpack.i.h.bf16 %v13226_v56 }
 0x1f0   :  { %5581 = vmatmul.msk.bf16.gmra.mxu0 %vm1517_vm12, %v1481_v5  ;;  %v3915_v9 = vpack.c.bf16 %v3885_v52, %v3884_v16  ;;  %v6519_v5 = vunpack.i.l.bf16 %v13226_v56  ;;  %v2804_v51 = vsel %vm271_vm1, %v2802_v41, %v2803_v57  ;;  %v2806_v43 = vsel %vm271_vm1, %v2803_v57, %v2805_v32  ;;  %v13229_v32 = vld [vmem:[#allocation103_spill] sm:$0xff] }
 0x1f1   :  { %6992 = vrot.lane.b32.xlu0 %v9705_v7, %s7701_s29  ;;  %v9834_v24 = vsel %vm448_vm2, %v13225_v47, %v2970_v36  ;;  %v6788_v61 = vpop.permute.xlu1 %6787  ;;  %v6364_v2 = vunpack.i.l.bf16 %v13223_v1  ;;  %v13227_v36 = vld [vmem:[#allocation128_spill] sm:$0xff]  ;;  %v6679_v55 = vunpack.i.l.bf16 %v9473_v49  ;;  %v3664_v47 = vsel %vm1213_vm3, %v13228_v53, %v6779_v20 }
 0x1f2   :  { %5646 = vmatmul.msk.bf16.gmra.mxu2 %vm1517_vm12, %v3915_v9  ;;  %v6600_v26 = vunpack.i.h.bf16 %v13227_v36  ;;  %v6599_v16 = vunpack.i.l.bf16 %v13227_v36  ;;  %v7011_v9 = vpack.i.bf16 %v9839_v40, %v9834_v24  ;;  %v1356_v41 = vsel %vm1345_vm8, %v9768_v46, %v6439_v58 }
 0x1f3   :  { %v6783_v52 = vpop.permute.xlu0 %6782  ;;  %v1357_v57 = vsel %vm1345_vm8, %v9772_v33, %v6440_v10  ;;  %v3665_v36 = vsel %vm1213_vm3, %v13229_v32, %v6780_v11  ;;  %v9862_v3 = vpack.i.bf16 %v2806_v43, %v2804_v51  ;;  %v1389_v20 = vsel %vm1378_vm9, %v1356_v41, %v6519_v5 }
 0x1f4   :  { %v6785_v56 = vunpack.i.h.bf16 %v6783_v52  ;;  %v6784_v62 = vunpack.i.l.bf16 %v6783_v52  ;;  %7017 = vrot.lane.b32.xlu2 %v9705_v7, %s7698_s14  ;;  %v1390_v52 = vsel %vm1378_vm9, %v1357_v57, %v6520_v45  ;;  %v6680_v53 = vunpack.i.h.bf16 %v9473_v49 }
 0x1f5   :  { %v6789_v6 = vunpack.i.l.bf16 %v6788_v61  ;;  %v6790_v28 = vunpack.i.h.bf16 %v6788_v61  ;;  %v1422_v33 = vsel %vm1411_vm10, %v1389_v20, %v6599_v16  ;;  %v13230_v10 = vrot.slane %v9748_v22, 7 }
 0x1f6   :  { %v3694_v46 = vsel %vm1246_vm4, %v3664_v47, %v6784_v62  ;;  %v9868_v58 = vpop.permute.xlu2 %6852  ;;  %v9878_v11 = vsel %vm1312_vm7, %v9711_v4, %v6369_v42  ;;  %v3695_v45 = vsel %vm1246_vm4, %v3665_v36, %v6785_v56  ;;  %v1423_v49 = vsel %vm1411_vm10, %v1390_v52, %v6600_v26  ;;  %v13232_v56 = vld [vmem:[#allocation9_spill] sm:$0xff] }
 0x1f7   :  { %v9874_v7 = vsel %vm105_vm0, %v13230_v10, 0.0  ;;  %7012 = vrot.lane.b32.xlu1 %v7011_v9, %s7705_s15  ;;  %v1455_v62 = vsel %vm1444_vm11, %v1422_v33, %v6679_v55  ;;  %v6794_v5 = vunpack.i.l.bf16 %v9668_v37  ;;  %v2807_v22 = vrot.slane %v9786_v17, 1  ;;  %v5633_v36 = vld [vmem:[%s12715_s0 + $0x1a0] sm:$0xff] }
 0x1f8   :  { %v2808_v61 = vrot.slane %v9798_v54, 1  ;;  %v6795_v4 = vunpack.i.h.bf16 %v9668_v37  ;;  %v3726_v42 = vsel %vm1279_vm6, %v3694_v46, %v6789_v6  ;;  %v1456_v43 = vsel %vm1444_vm11, %v1423_v49, %v6680_v53 }
 0x1f9   :  { %7007 = vrot.lane.b32.xlu0 %v9862_v3, %s7704_s13  ;;  %v6803_v51 = vpop.permute.xlu1 %6802  ;;  %v2810_v26 = vrot.slane %v9874_v7, 1  ;;  %v13231_v16 = vunpack.i.h.bf16 %v13221_v31  ;;  %v1325_v47 = vsel %vm1312_vm7, %v9384_v30, %v6364_v2  ;;  %v6444_v9 = vunpack.i.l.bf16 %v13232_v56 }
 0x1fa   :  { %v3727_v37 = vsel %vm1279_vm6, %v3695_v45, %v6790_v28  ;;  %v6804_v6 = vunpack.i.l.bf16 %v6803_v51  ;;  %v3758_v31 = vsel %vm1312_vm7, %v3726_v42, %v6794_v5  ;;  %v1482_v30 = vpack.c.bf16 %v1456_v43, %v1455_v62  ;;  %v13235_v43 = vld [vmem:[#allocation107_spill] sm:$0xff] }
 0x1fb   :  { %v9897_v55 = vsel %vm1312_vm7, %v9698_v19, %v13231_v16  ;;  %v6798_v41 = vpop.permute.xlu0 %6797  ;;  %v9909_v19 = vld [vmem:[%s12715_s0 + $0x1a8] sm:$0xff]  ;;  %v2809_v28 = vsel %vm271_vm1, %v2807_v22, %v2808_v61  ;;  %v6805_v2 = vunpack.i.h.bf16 %v6803_v51  ;;  %v3759_v20 = vsel %vm1312_vm7, %v3727_v37, %v6795_v4 }
 0x1fc   :  { %v6800_v57 = vunpack.i.h.bf16 %v6798_v41  ;;  %v6799_v32 = vunpack.i.l.bf16 %v6798_v41  ;;  %7032 = vrot.lane.b32.xlu2 %v9862_v3, %s7701_s29  ;;  %v2811_v53 = vsel %vm271_vm1, %v2808_v61, %v2810_v26  ;;  %v6809_v46 = vunpack.i.l.bf16 %v9723_v60  ;;  %v13234_v22 = vld [vmem:[#allocation93_spill] sm:$0xff] }
 0x1fd   :  { %v2635_v45 = vrot.slane %v5633_v36, 7  ;;  %v2636_v49 = vrot.slane %v9909_v19, 7  ;;  %v13233_v62 = vunpack.i.h.bf16 %v13223_v1  ;;  %v6450_v4 = vunpack.i.h.bf16 %v13234_v22 }
 0x1fe   :  { %v3790_v52 = vsel %vm1345_vm8, %v3758_v31, %v6799_v32  ;;  %v3791_v33 = vsel %vm1345_vm8, %v3759_v20, %v6800_v57  ;;  %v9920_v10 = vpop.permute.xlu2 %6867  ;;  %v6445_v42 = vunpack.i.h.bf16 %v13232_v56  ;;  %v1358_v51 = vsel %vm1345_vm8, %v1325_v47, %v6444_v9  ;;  %v13236_v56 = vld [vmem:[#allocation18_spill] sm:$0xff] }
 0x1ff   :  { %v1326_v5 = vsel %vm1312_vm7, %v9413_v44, %v13233_v62  ;;  %7027 = vrot.lane.b32.xlu1 %v9783_v50, %s7700_s24  ;;  %v3822_v61 = vsel %vm1378_vm9, %v3790_v52, %v6804_v6  ;;  %v6525_v26 = vunpack.i.h.bf16 %v13235_v43  ;;  %v6810_v1 = vunpack.i.h.bf16 %v9723_v60 }
 0x200   :  { %5582 = vmatmul.msk.bf16.gmra.mxu0 %vm1517_vm12, %v1482_v30  ;;  %v9938_v44 = vpack.i.bf16 %v2811_v53, %v2809_v28  ;;  %v6524_v16 = vunpack.i.l.bf16 %v13235_v43  ;;  %v6605_v37 = vunpack.i.h.bf16 %v13236_v56  ;;  %v6604_v50 = vunpack.i.l.bf16 %v13236_v56 }
 0x201   :  { %7022 = vrot.lane.b32.xlu0 %v9804_v0, %s7699_s23  ;;  %v6818_v41 = vpop.permute.xlu1 %6817  ;;  %v3823_v6 = vsel %vm1378_vm9, %v3791_v33, %v6805_v2  ;;  %v6684_v47 = vunpack.i.l.bf16 %v9462_v63  ;;  %v3854_v60 = vsel %vm1411_vm10, %v3822_v61, %v6809_v46  ;;  %v9951_v0 = vsel %vm105_vm0, %v2635_v45, %v2636_v49 }
 0x202   :  { %13237 = vst [vmem:[#allocation42_spill] sm:$0xff] %v9951_v0  ;;  %v9954_v57 = vsel %vm105_vm0, 0.0, %v2635_v45  ;;  %v6775_v32 = vunpack.i.h.bf16 %v9793_v35  ;;  %v9960_v31 = vpack.i.bf16 %v9798_v54, %v9786_v17  ;;  %v7036_v30 = vpack.i.bf16 %v9834_v24, %v9664_v14 }
 0x203   :  { %v9945_v9 = vpop.permute.xlu0 %6812  ;;  %v6820_v28 = vunpack.i.h.bf16 %v6818_v41  ;;  %v6819_v2 = vunpack.i.l.bf16 %v6818_v41  ;;  %v3855_v20 = vsel %vm1411_vm10, %v3823_v6, %v6810_v1  ;;  %v2975_v52 = vrot.slane %v9874_v7, 2 }
 0x204   :  { %v6814_v36 = vunpack.i.l.bf16 %v9945_v9  ;;  %7047 = vrot.lane.b32.xlu2 %v9938_v44, %s7704_s13  ;;  %v3886_v35 = vsel %vm1444_vm11, %v3854_v60, %v6775_v32  ;;  %v2977_v46 = vrot.slane %v9954_v57, 2  ;;  %v2978_v33 = vrot.slane %v9951_v0, 2 }
 0x205   :  { %v1359_v45 = vsel %vm1345_vm8, %v1326_v5, %v6445_v42  ;;  %v1391_v14 = vsel %vm1378_vm9, %v1358_v51, %v6524_v16  ;;  %v6685_v24 = vunpack.i.h.bf16 %v9462_v63  ;;  %v6825_v7 = vunpack.i.h.bf16 %v9762_v18  ;;  %v5635_v5 = vld [vmem:[%s12715_s0 + $0x1b0] sm:$0xff]  ;;  %v9989_v63 = vld [vmem:[%s12715_s0 + $0x1b8] sm:$0xff]  ;;  %v13238_v51 = vld [vmem:[#allocation113_spill] sm:$0xff] }
 0x206   :  { %v3887_v53 = vsel %vm1444_vm11, %v3855_v20, %v6814_v36  ;;  %v9975_v61 = vpop.permute.xlu2 %6882  ;;  %v1392_v43 = vsel %vm1378_vm9, %v1359_v45, %v6525_v26  ;;  %v6824_v1 = vunpack.i.l.bf16 %v9762_v18  ;;  %v1424_v56 = vsel %vm1411_vm10, %v1391_v14, %v6604_v50  ;;  %v13239_v18 = vld [vmem:[#allocation114_spill] sm:$0xff] }
 0x207   :  { %v3916_v62 = vpack.c.bf16 %v3887_v53, %v3886_v35  ;;  %7042 = vrot.lane.b32.xlu1 %v9960_v31, %s7703_s12  ;;  %v6449_v42 = vunpack.i.l.bf16 %v13234_v22  ;;  %v3667_v26 = vsel %vm1213_vm3, %v13238_v51, %v6820_v28  ;;  %v3666_v16 = vsel %vm1213_vm3, %v13239_v18, %v6819_v2 }
 0x208   :  { %v13240_v41 = vrot.slane %v9798_v54, 2  ;;  %v10004_v60 = vsel %vm448_vm2, %v2977_v46, %v2978_v33  ;;  %v1425_v32 = vsel %vm1411_vm10, %v1392_v43, %v6605_v37  ;;  %v1457_v36 = vsel %vm1444_vm11, %v1424_v56, %v6684_v47  ;;  %v13241_v47 = vld [vmem:[#allocation127_spill] sm:$0xff] }
 0x209   :  { %7037 = vrot.lane.b32.xlu0 %v7036_v30, %s7702_s30  ;;  %5647 = vmatmul.msk.bf16.gmra.mxu2 %vm1517_vm12, %v3916_v62  ;;  %v6833_v50 = vpop.permute.xlu1 %6832  ;;  %v1458_v2 = vsel %vm1444_vm11, %v1425_v32, %v6685_v24  ;;  %v2638_v20 = vrot.slane %v5635_v5, 7  ;;  %v2639_v35 = vrot.slane %v9989_v63, 7  ;;  %v3696_v53 = vsel %vm1246_vm4, %v3666_v16, %v6824_v1 }
 0x20a   :  { %v2976_v6 = vsel %vm448_vm2, %v13240_v41, %v2975_v52  ;;  %v3697_v45 = vsel %vm1246_vm4, %v3667_v26, %v6825_v7  ;;  %v1360_v46 = vsel %vm1345_vm8, %v9878_v11, %v6449_v42  ;;  %v1361_v37 = vsel %vm1345_vm8, %v9897_v55, %v6450_v4  ;;  %v13244_v42 = vld [vmem:[#allocation20_spill] sm:$0xff] }
 0x20b   :  { %v6828_v28 = vpop.permute.xlu0 %6827  ;;  %v6530_v62 = vunpack.i.h.bf16 %v13241_v47  ;;  %v7051_v24 = vpack.i.bf16 %v10004_v60, %v2976_v6  ;;  %v6835_v43 = vunpack.i.h.bf16 %v6833_v50  ;;  %v6834_v1 = vunpack.i.l.bf16 %v6833_v50 }
 0x20c   :  { %v6830_v52 = vunpack.i.h.bf16 %v6828_v28  ;;  %v6829_v14 = vunpack.i.l.bf16 %v6828_v28  ;;  %7062 = vrot.lane.b32.xlu2 %v7036_v30, %s7699_s23  ;;  %v1483_v56 = vpack.c.bf16 %v1458_v2, %v1457_v36  ;;  %v2726_v7 = vsel %vm105_vm0, %v2636_v49, 0.0 }
 0x20d   :  { %v10031_v55 = vsel %vm105_vm0, %v2638_v20, %v2639_v35  ;;  %v10034_v4 = vsel %vm105_vm0, 0.0, %v2638_v20  ;;  %v6529_v30 = vunpack.i.l.bf16 %v13241_v47  ;;  %v6610_v19 = vunpack.i.h.bf16 %v13244_v42 }
 0x20e   :  { %v3729_v11 = vsel %vm1279_vm6, %v3697_v45, %v6830_v52  ;;  %v3728_v22 = vsel %vm1279_vm6, %v3696_v53, %v6829_v14  ;;  %v10026_v5 = vpop.permute.xlu2 %6897  ;;  %13242 = vst [vmem:[#allocation43_spill] sm:$0xff] %v10031_v55  ;;  %v6609_v49 = vunpack.i.l.bf16 %v13244_v42  ;;  %v6840_v51 = vunpack.i.h.bf16 %v9820_v12 }
 0x20f   :  { %13243 = vst [vmem:[#allocation45_spill] sm:$0xff] %v10034_v4  ;;  %7057 = vrot.lane.b32.xlu1 %v9862_v3, %s7698_s14  ;;  %v6839_v26 = vunpack.i.l.bf16 %v9820_v12  ;;  %v10046_v18 = vpack.i.bf16 %v2976_v6, %v9839_v40  ;;  %v2980_v16 = vrot.slane %v2726_v7, 2  ;;  %v3761_v50 = vsel %vm1312_vm7, %v3729_v11, %v6835_v43 }
 0x210   :  { %5583 = vmatmul.msk.bf16.gmra.mxu0 %vm1517_vm12, %v1483_v56  ;;  %v3760_v41 = vsel %vm1312_vm7, %v3728_v22, %v6834_v1  ;;  %v2982_v36 = vrot.slane %v10034_v4, 2  ;;  %v2983_v28 = vrot.slane %v10031_v55, 2  ;;  %v6854_v3 = vunpack.i.l.bf16 %v9868_v58 }
 0x211   :  { %7052 = vrot.lane.b32.xlu0 %v7051_v24, %s7705_s15  ;;  %v6848_v32 = vpop.permute.xlu1 %6847  ;;  %v2812_v40 = vrot.slane %v9954_v57, 1  ;;  %v2813_v6 = vrot.slane %v9951_v0, 1  ;;  %v6815_v52 = vunpack.i.h.bf16 %v9945_v9  ;;  %v3792_v14 = vsel %vm1345_vm8, %v3760_v41, %v6839_v26 }
 0x212   :  { %v6850_v2 = vunpack.i.h.bf16 %v6848_v32  ;;  %v6849_v20 = vunpack.i.l.bf16 %v6848_v32  ;;  %v3793_v47 = vsel %vm1345_vm8, %v3761_v50, %v6840_v51  ;;  %v2815_v24 = vrot.slane %v2726_v7, 1 }
 0x213   :  { %v6843_v12 = vpop.permute.xlu0 %6842  ;;  %v10065_v56 = vsel %vm448_vm2, %v2978_v33, %v2980_v16  ;;  %v10070_v9 = vsel %vm448_vm2, %v2982_v36, %v2983_v28  ;;  %v6690_v11 = vunpack.i.h.bf16 %v9250_v13  ;;  %v6689_v22 = vunpack.i.l.bf16 %v9250_v13 }
 0x214   :  { %v6845_v53 = vunpack.i.h.bf16 %v6843_v12  ;;  %v6844_v45 = vunpack.i.l.bf16 %v6843_v12  ;;  %7077 = vrot.lane.b32.xlu2 %v10046_v18, %s7702_s30  ;;  %v1393_v26 = vsel %vm1378_vm9, %v1360_v46, %v6529_v30  ;;  %v1394_v33 = vsel %vm1378_vm9, %v1361_v37, %v6530_v62  ;;  %v13245_v62 = vld [vmem:[#allocation75_spill] sm:$0xff] }
 0x215   :  { %v2814_v41 = vsel %vm271_vm1, %v2812_v40, %v2813_v6  ;;  %v2816_v32 = vsel %vm271_vm1, %v2813_v6, %v2815_v24  ;;  %v7091_v46 = vpack.i.bf16 %v10070_v9, %v10065_v56  ;;  %v6244_v37 = vunpack.i.l.bf16 %v13194_v27 }
 0x216   :  { %v3824_v43 = vsel %vm1378_vm9, %v3792_v14, %v6844_v45  ;;  %v3825_v1 = vsel %vm1378_vm9, %v3793_v47, %v6845_v53  ;;  %v10074_v42 = vpop.permute.xlu2 %6912  ;;  %v6294_v30 = vunpack.i.l.bf16 %v13245_v62  ;;  %v10100_v47 = vpack.i.bf16 %v2816_v32, %v2814_v41  ;;  %v13252_v32 = vld [vmem:[#allocation69_spill] sm:$0xff] }
 0x217   :  { %v3856_v7 = vsel %vm1411_vm10, %v3824_v43, %v6849_v20  ;;  %v3857_v51 = vsel %vm1411_vm10, %v3825_v1, %v6850_v2  ;;  %7072 = vrot.lane.b32.xlu1 %v9938_v44, %s7701_s29  ;;  %v1426_v2 = vsel %vm1411_vm10, %v1393_v26, %v6609_v49  ;;  %v6295_v20 = vunpack.i.h.bf16 %v13245_v62  ;;  %v13249_v1 = vld [vmem:[#allocation106_spill] sm:$0xff] }
 0x218   :  { %v3888_v16 = vsel %vm1444_vm11, %v3856_v7, %v6815_v52  ;;  %v3889_v50 = vsel %vm1444_vm11, %v3857_v51, %v6854_v3  ;;  %v1427_v3 = vsel %vm1411_vm10, %v1394_v33, %v6610_v19  ;;  %v1459_v45 = vsel %vm1444_vm11, %v1426_v2, %v6689_v22  ;;  %v13251_v51 = vld [vmem:[#allocation57_spill] sm:$0xff] }
 0x219   :  { %7067 = vrot.lane.b32.xlu0 %v9960_v31, %s7700_s24  ;;  %v3917_v13 = vpack.c.bf16 %v3889_v50, %v3888_v16  ;;  %v6863_v36 = vpop.permute.xlu1 %6862  ;;  %v13246_v31 = vld [vmem:[#allocation80_spill] sm:$0xff]  ;;  %v1460_v40 = vsel %vm1444_vm11, %v1427_v3, %v6690_v11  ;;  %v13247_v49 = vunpack.i.l.bf16 %v13192_v25  ;;  %v13248_v24 = vunpack.i.h.bf16 %v13192_v25  ;;  %v13253_v2 = vld [vmem:[#allocation125_spill] sm:$0xff] }
 0x21a   :  { %v6374_v12 = vunpack.i.l.bf16 %v13246_v31  ;;  %v6375_v6 = vunpack.i.h.bf16 %v13246_v31  ;;  %v6454_v11 = vunpack.i.l.bf16 %v13249_v1  ;;  %v7081_v22 = vpack.i.bf16 %v9951_v0, %v9954_v57 }
 0x21b   :  { %v6858_v53 = vpop.permute.xlu0 %6857  ;;  %5648 = vmatmul.msk.bf16.gmra.mxu2 %vm1517_vm12, %v3917_v13  ;;  %v10106_v19 = vsel %vm1246_vm4, %v9238_v34, %v13247_v49  ;;  %v10112_v43 = vsel %vm1246_vm4, %v9231_v15, %v13248_v24  ;;  %v13250_v7 = vunpack.i.h.bf16 %v13194_v27  ;;  %v1296_v34 = vsel %vm1279_vm6, %v9380_v38, %v6294_v30  ;;  %v13254_v38 = vld [vmem:[#allocation126_spill] sm:$0xff]  ;;  %v13273_v27 = vld [vmem:[#allocation25_spill] sm:$0xff] }
 0x21c   :  { %v6860_v52 = vunpack.i.h.bf16 %v6858_v53  ;;  %v6859_v14 = vunpack.i.l.bf16 %v6858_v53  ;;  %7092 = vrot.lane.b32.xlu2 %v7091_v46, %s7705_s15  ;;  %v6455_v25 = vunpack.i.h.bf16 %v13249_v1  ;;  %v1484_v15 = vpack.c.bf16 %v1460_v40, %v1459_v45  ;;  %v13256_v53 = vld [vmem:[#allocation131_spill] sm:$0xff] }
 0x21d   :  { %v10122_v26 = vsel %vm1246_vm4, %v13251_v51, %v13250_v7  ;;  %v1297_v33 = vsel %vm1279_vm6, %v9376_v48, %v6295_v20  ;;  %v1329_v16 = vsel %vm1312_vm7, %v1296_v34, %v6374_v12  ;;  %v6865_v50 = vunpack.i.h.bf16 %v6863_v36 }
 0x21e   :  { %v6864_v13 = vunpack.i.l.bf16 %v6863_v36  ;;  %v10130_v41 = vpop.permute.xlu2 %6927  ;;  %v6315_v46 = vunpack.i.h.bf16 %v13252_v32  ;;  %v1330_v62 = vsel %vm1312_vm7, %v1297_v33, %v6375_v6  ;;  %v3669_v3 = vsel %vm1213_vm3, %v13253_v2, %v6860_v52  ;;  %v13255_v36 = vld [vmem:[#allocation124_spill] sm:$0xff] }
 0x21f   :  { %v3668_v30 = vsel %vm1213_vm3, %v13254_v38, %v6859_v14  ;;  %7087 = vrot.lane.b32.xlu1 %v10100_v47, %s7704_s13  ;;  %v1362_v48 = vsel %vm1345_vm8, %v1329_v16, %v6454_v11  ;;  %v6535_v20 = vunpack.i.h.bf16 %v13255_v36  ;;  %v6534_v31 = vunpack.i.l.bf16 %v13255_v36  ;;  %v13258_v36 = vld [vmem:[#allocation71_spill] sm:$0xff] }
 0x220   :  { %5584 = vmatmul.msk.bf16.gmra.mxu0 %vm1517_vm12, %v1484_v15  ;;  %v1363_v12 = vsel %vm1345_vm8, %v1330_v62, %v6455_v25  ;;  %v6615_v45 = vunpack.i.h.bf16 %v13256_v53  ;;  %v6870_v40 = vunpack.i.h.bf16 %v9920_v10  ;;  %v6869_v6 = vunpack.i.l.bf16 %v9920_v10  ;;  %v13257_v25 = vld [vmem:[#allocation92_spill] sm:$0xff] }
 0x221   :  { %7082 = vrot.lane.b32.xlu0 %v7081_v22, %s7703_s12  ;;  %v6878_v52 = vpop.permute.xlu1 %6877  ;;  %v6614_v14 = vunpack.i.l.bf16 %v13256_v53  ;;  %v6695_v49 = vunpack.i.h.bf16 %v9540_v59  ;;  %v3699_v24 = vsel %vm1246_vm4, %v3669_v3, %v6865_v50  ;;  %v3698_v1 = vsel %vm1246_vm4, %v3668_v30, %v6864_v13 }
 0x222   :  { %v6694_v7 = vunpack.i.l.bf16 %v9540_v59  ;;  %v6379_v15 = vunpack.i.l.bf16 %v13257_v25  ;;  %v1395_v33 = vsel %vm1378_vm9, %v1362_v48, %v6534_v31  ;;  %v1396_v10 = vsel %vm1378_vm9, %v1363_v12, %v6535_v20 }
 0x223   :  { %v6873_v11 = vpop.permute.xlu0 %6872  ;;  %v6880_v16 = vunpack.i.h.bf16 %v6878_v52  ;;  %v6879_v62 = vunpack.i.l.bf16 %v6878_v52  ;;  %v3730_v2 = vsel %vm1279_vm6, %v3698_v1, %v6869_v6  ;;  %v3731_v50 = vsel %vm1279_vm6, %v3699_v24, %v6870_v40 }
 0x224   :  { %v6875_v51 = vunpack.i.h.bf16 %v6873_v11  ;;  %v6874_v34 = vunpack.i.l.bf16 %v6873_v11  ;;  %7107 = vrot.lane.b32.xlu2 %v7081_v22, %s7700_s24  ;;  %v1428_v38 = vsel %vm1411_vm10, %v1395_v33, %v6614_v14  ;;  %v1429_v30 = vsel %vm1411_vm10, %v1396_v10, %v6615_v45 }
 0x225   :  { %v6314_v48 = vunpack.i.l.bf16 %v13252_v32  ;;  %v6330_v22 = vunpack.i.h.bf16 %v13258_v36  ;;  %v1461_v20 = vsel %vm1444_vm11, %v1428_v38, %v6694_v7  ;;  %v1462_v31 = vsel %vm1444_vm11, %v1429_v30, %v6695_v49  ;;  %v13259_v49 = vld [vmem:[#allocation105_spill] sm:$0xff] }
 0x226   :  { %v3762_v13 = vsel %vm1312_vm7, %v3730_v2, %v6874_v34  ;;  %v3763_v59 = vsel %vm1312_vm7, %v3731_v50, %v6875_v51  ;;  %v10162_v3 = vpop.permute.xlu2 %6942  ;;  %v6380_v12 = vunpack.i.h.bf16 %v13257_v25  ;;  %v6885_v53 = vunpack.i.h.bf16 %v9975_v61  ;;  %v5638_v38 = vld [vmem:[%s12715_s0 + $0x1c8] sm:$0xff] }
 0x227   :  { %7102 = vrot.lane.b32.xlu1 %v10046_v18, %s7699_s23  ;;  %v6884_v40 = vunpack.i.l.bf16 %v9975_v61  ;;  %v10179_v45 = vpack.i.bf16 %v10031_v55, %v10034_v4  ;;  %v1331_v18 = vsel %vm1312_vm7, %v9501_v21, %v6379_v15  ;;  %v3794_v6 = vsel %vm1345_vm8, %v3762_v13, %v6879_v62  ;;  %v13260_v62 = vld [vmem:[#allocation35_spill] sm:$0xff] }
 0x228   :  { %v3795_v52 = vsel %vm1345_vm8, %v3763_v59, %v6880_v16  ;;  %v2727_v61 = vsel %vm105_vm0, %v2639_v35, 0.0  ;;  %v6459_v24 = vunpack.i.l.bf16 %v13259_v49  ;;  %v1485_v7 = vpack.c.bf16 %v1462_v31, %v1461_v20  ;;  %v5637_v59 = vld [vmem:[%s12715_s0 + $0x1c0] sm:$0xff] }
 0x229   :  { %7097 = vrot.lane.b32.xlu0 %v9938_v44, %s7698_s14  ;;  %v10185_v14 = vpop.permute.xlu1 %6892  ;;  %v6855_v44 = vunpack.i.h.bf16 %v9868_v58  ;;  %v10195_v34 = vpack.i.bf16 %v10065_v56, %v10004_v60  ;;  %v3826_v63 = vsel %vm1378_vm9, %v3794_v6, %v6884_v40  ;;  %v3827_v35 = vsel %vm1378_vm9, %v3795_v52, %v6885_v53  ;;  %v13261_v20 = vld [vmem:[#allocation112_spill] sm:$0xff] }
 0x22a   :  { %v6894_v1 = vunpack.i.l.bf16 %v10185_v14  ;;  %v2985_v25 = vrot.slane %v2727_v61, 2  ;;  %v2817_v58 = vrot.slane %v10034_v4, 1  ;;  %v2818_v10 = vrot.slane %v10031_v55, 1 }
 0x22b   :  { %v6888_v11 = vpop.permute.xlu0 %6887  ;;  %v2820_v16 = vrot.slane %v2727_v61, 1  ;;  %v1332_v60 = vsel %vm1312_vm7, %v13260_v62, %v6380_v12  ;;  %v6460_v56 = vunpack.i.h.bf16 %v13259_v49  ;;  %v1364_v30 = vsel %vm1345_vm8, %v1331_v18, %v6459_v24  ;;  %v13266_v62 = vld [vmem:[#allocation22_spill] sm:$0xff] }
 0x22c   :  { %v6890_v51 = vunpack.i.h.bf16 %v6888_v11  ;;  %v6889_v21 = vunpack.i.l.bf16 %v6888_v11  ;;  %7122 = vrot.lane.b32.xlu2 %v10179_v45, %s7703_s12  ;;  %v6540_v31 = vunpack.i.h.bf16 %v13261_v20  ;;  %v6899_v12 = vunpack.i.l.bf16 %v10026_v5 }
 0x22d   :  { %v6539_v40 = vunpack.i.l.bf16 %v13261_v20  ;;  %v6900_v6 = vunpack.i.h.bf16 %v10026_v5  ;;  %v10231_v18 = vsel %vm448_vm2, %v2983_v28, %v2985_v25  ;;  %v2819_v61 = vsel %vm271_vm1, %v2817_v58, %v2818_v10  ;;  %v13262_v5 = vld [vmem:[#allocation17_spill] sm:$0xff]  ;;  %v13265_v58 = vld [vmem:[#allocation50_spill] sm:$0xff] }
 0x22e   :  { %v3858_v15 = vsel %vm1411_vm10, %v3826_v63, %v6889_v21  ;;  %v3859_v33 = vsel %vm1411_vm10, %v3827_v35, %v6890_v51  ;;  %v10210_v13 = vpop.permute.xlu2 %6957  ;;  %v2821_v49 = vsel %vm271_vm1, %v2818_v10, %v2820_v16  ;;  %v2641_v24 = vrot.slane %v5637_v59, 7  ;;  %v13263_v51 = vld [vmem:[#allocation37_spill] sm:$0xff] }
 0x22f   :  { %v3890_v2 = vsel %vm1444_vm11, %v3858_v15, %v6855_v44  ;;  %v3891_v50 = vsel %vm1444_vm11, %v3859_v33, %v6894_v1  ;;  %7117 = vrot.lane.b32.xlu1 %v10195_v34, %s7702_s30  ;;  %v2642_v44 = vrot.slane %v5638_v38, 7  ;;  %v1365_v1 = vsel %vm1345_vm8, %v1332_v60, %v6460_v56  ;;  %v13264_v28 = vld [vmem:[#allocation21_spill] sm:$0xff] }
 0x230   :  { %5585 = vmatmul.msk.bf16.gmra.mxu0 %vm1517_vm12, %v1485_v7  ;;  %v3918_v53 = vpack.c.bf16 %v3891_v50, %v3890_v2  ;;  %v6620_v11 = vunpack.i.h.bf16 %v13262_v5  ;;  %v6619_v7 = vunpack.i.l.bf16 %v13262_v5  ;;  %v6699_v21 = vunpack.i.l.bf16 %v13263_v51 }
 0x231   :  { %7112 = vrot.lane.b32.xlu0 %v10100_v47, %s7701_s29  ;;  %v6908_v52 = vpop.permute.xlu1 %6907  ;;  %v3670_v35 = vsel %vm1213_vm3, %v13264_v28, %v6899_v12  ;;  %v7131_v33 = vpack.i.bf16 %v13265_v58, %v10231_v18  ;;  %v1397_v10 = vsel %vm1378_vm9, %v1364_v30, %v6539_v40  ;;  %v1398_v16 = vsel %vm1378_vm9, %v1365_v1, %v6540_v31  ;;  %v13270_v28 = vld [vmem:[#allocation79_spill] sm:$0xff] }
 0x232   :  { %5649 = vmatmul.msk.bf16.gmra.mxu2 %vm1517_vm12, %v3918_v53  ;;  %v3671_v60 = vsel %vm1213_vm3, %v13266_v62, %v6900_v6  ;;  %v10250_v56 = vpack.i.bf16 %v2821_v49, %v2819_v61  ;;  %v6700_v2 = vunpack.i.h.bf16 %v13263_v51  ;;  %v6909_v50 = vunpack.i.l.bf16 %v6908_v52  ;;  %v13269_v51 = vld [vmem:[#allocation78_spill] sm:$0xff] }
 0x233   :  { %v6903_v63 = vpop.permute.xlu0 %6902  ;;  %v10254_v59 = vsel %vm105_vm0, %v2641_v24, %v2642_v44  ;;  %v10257_v38 = vsel %vm105_vm0, 0.0, %v2641_v24  ;;  %v6910_v30 = vunpack.i.h.bf16 %v6908_v52  ;;  %v1430_v12 = vsel %vm1411_vm10, %v1397_v10, %v6619_v7 }
 0x234   :  { %v6905_v25 = vunpack.i.h.bf16 %v6903_v63  ;;  %v6904_v15 = vunpack.i.l.bf16 %v6903_v63  ;;  %7137 = vrot.lane.b32.xlu2 %v10100_v47, %s7698_s14  ;;  %13267 = vst [vmem:[#allocation46_spill] sm:$0xff] %v10254_v59  ;;  %v10264_v47 = vsel %vm105_vm0, %v2642_v44, 0.0  ;;  %v6329_v53 = vunpack.i.l.bf16 %v13258_v36 }
 0x235   :  { %13268 = vst [vmem:[#allocation38_spill] sm:$0xff] %v10257_v38  ;;  %v1431_v6 = vsel %vm1411_vm10, %v1398_v16, %v6620_v11  ;;  %v1463_v61 = vsel %vm1444_vm11, %v1430_v12, %v6699_v21  ;;  %v6914_v52 = vunpack.i.l.bf16 %v10074_v42  ;;  %v2822_v49 = vrot.slane %v10257_v38, 1 }
 0x236   :  { %v3700_v20 = vsel %vm1246_vm4, %v3670_v35, %v6904_v15  ;;  %v10260_v31 = vpop.permute.xlu2 %6972  ;;  %v3701_v40 = vsel %vm1246_vm4, %v3671_v60, %v6905_v25  ;;  %v2823_v24 = vrot.slane %v10254_v59, 1  ;;  %v6915_v44 = vunpack.i.h.bf16 %v10074_v42 }
 0x237   :  { %7132 = vrot.lane.b32.xlu1 %v7131_v33, %s7705_s15  ;;  %v3732_v1 = vsel %vm1279_vm6, %v3700_v20, %v6909_v50  ;;  %v1464_v7 = vsel %vm1444_vm11, %v1431_v6, %v6700_v2  ;;  %v2825_v11 = vrot.slane %v10264_v47, 1  ;;  %v6310_v21 = vunpack.i.h.bf16 %v13269_v51 }
 0x238   :  { %v6309_v63 = vunpack.i.l.bf16 %v13269_v51  ;;  %v6305_v35 = vunpack.i.h.bf16 %v13270_v28  ;;  %v3733_v25 = vsel %vm1279_vm6, %v3701_v40, %v6910_v30  ;;  %v3764_v42 = vsel %vm1312_vm7, %v3732_v1, %v6914_v52  ;;  %v13271_v30 = vld [vmem:[#allocation58_spill] sm:$0xff] }
 0x239   :  { %7127 = vrot.lane.b32.xlu0 %v10250_v56, %s7704_s13  ;;  %v6923_v5 = vpop.permute.xlu1 %6922  ;;  %v1486_v16 = vpack.c.bf16 %v1464_v7, %v1463_v61  ;;  %v2824_v62 = vsel %vm271_vm1, %v2822_v49, %v2823_v24  ;;  %v3765_v2 = vsel %vm1312_vm7, %v3733_v25, %v6915_v44  ;;  %v2826_v20 = vsel %vm271_vm1, %v2823_v24, %v2825_v11  ;;  %v13272_v49 = vld [vmem:[#allocation41_spill] sm:$0xff] }
 0x23a   :  { %v6924_v58 = vunpack.i.l.bf16 %v6923_v5  ;;  %v6925_v60 = vunpack.i.h.bf16 %v6923_v5  ;;  %v1275_v12 = vsel %vm1246_vm4, %v13271_v30, %v6244_v37  ;;  %v6304_v40 = vunpack.i.l.bf16 %v13270_v28  ;;  %v13275_v7 = vld [vmem:[#allocation29_spill] sm:$0xff] }
 0x23b   :  { %v6918_v15 = vpop.permute.xlu0 %6917  ;;  %v6929_v6 = vunpack.i.l.bf16 %v10130_v41  ;;  %v10304_v44 = vsel %vm1279_vm6, %v13272_v49, %v6314_v48  ;;  %v10310_v24 = vsel %vm1279_vm6, %v13273_v27, %v6315_v46  ;;  %v10318_v1 = vsel %vm1279_vm6, %v10106_v19, %v6329_v53  ;;  %v13276_v53 = vld [vmem:[#allocation14_spill] sm:$0xff] }
 0x23c   :  { %v6920_v33 = vunpack.i.h.bf16 %v6918_v15  ;;  %v6919_v10 = vunpack.i.l.bf16 %v6918_v15  ;;  %7152 = vrot.lane.b32.xlu2 %v10250_v56, %s7701_s29  ;;  %v10324_v32 = vsel %vm1279_vm6, %v10112_v43, %v6330_v22  ;;  %v6930_v46 = vunpack.i.h.bf16 %v10130_v41  ;;  %v13277_v22 = vld [vmem:[#allocation23_spill] sm:$0xff] }
 0x23d   :  { %v10329_v48 = vpack.i.bf16 %v2826_v20, %v2824_v62  ;;  %v1303_v19 = vsel %vm1279_vm6, %v13275_v7, %v6310_v21  ;;  %v10337_v36 = vsel %vm1279_vm6, %v13276_v53, %v6305_v35  ;;  %v10342_v41 = vsel %vm1279_vm6, %v13277_v22, %v6304_v40  ;;  %v13282_v53 = vld [vmem:[#allocation40_spill] sm:$0xff] }
 0x23e   :  { %v3796_v50 = vsel %vm1345_vm8, %v3764_v42, %v6919_v10  ;;  %v3797_v61 = vsel %vm1345_vm8, %v3765_v2, %v6920_v33  ;;  %v10298_v52 = vpop.permute.xlu2 %6987  ;;  %v6895_v21 = vunpack.i.h.bf16 %v10185_v14  ;;  %v10353_v15 = vpack.i.bf16 %v10254_v59, %v10257_v38 }
 0x23f   :  { %7147 = vrot.lane.b32.xlu1 %v10179_v45, %s7700_s24  ;;  %v3828_v37 = vsel %vm1378_vm9, %v3796_v50, %v6924_v58  ;;  %v13274_v45 = vld [vmem:[#allocation59_spill] sm:$0xff]  ;;  %v3829_v43 = vsel %vm1378_vm9, %v3797_v61, %v6925_v60  ;;  %v7156_v58 = vpack.i.bf16 %v10231_v18, %v10070_v9  ;;  %v2988_v60 = vrot.slane %v10254_v59, 2  ;;  %v13279_v9 = vld [vmem:[#allocation82_spill] sm:$0xff] }
 0x240   :  { %5586 = vmatmul.msk.bf16.gmra.mxu0 %vm1517_vm12, %v1486_v16  ;;  %v1302_v5 = vsel %vm1279_vm6, %v13274_v45, %v6309_v63  ;;  %v3860_v63 = vsel %vm1411_vm10, %v3828_v37, %v6929_v6  ;;  %v3861_v42 = vsel %vm1411_vm10, %v3829_v43, %v6930_v46  ;;  %v2987_v16 = vrot.slane %v10257_v38, 2  ;;  %v5639_v6 = vld [vmem:[%s12715_s0 + $0x1d0] sm:$0xff]  ;;  %v5640_v61 = vld [vmem:[%s12715_s0 + $0x1d8] sm:$0xff] }
 0x241   :  { %7142 = vrot.lane.b32.xlu0 %v10195_v34, %s7699_s23  ;;  %v6938_v11 = vpop.permute.xlu1 %6937  ;;  %v13278_v34 = vld [vmem:[#allocation81_spill] sm:$0xff]  ;;  %v3892_v14 = vsel %vm1444_vm11, %v3860_v63, %v6895_v21  ;;  %v2990_v2 = vrot.slane %v10264_v47, 2  ;;  %v6320_v18 = vunpack.i.h.bf16 %v13279_v9  ;;  %v6319_v20 = vunpack.i.l.bf16 %v13279_v9  ;;  %v13281_v45 = vld [vmem:[#allocation39_spill] sm:$0xff]  ;;  %v13284_v63 = vld [vmem:[#allocation26_spill] sm:$0xff] }
 0x242   :  { %v6325_v51 = vunpack.i.h.bf16 %v13278_v34  ;;  %v6324_v28 = vunpack.i.l.bf16 %v13278_v34  ;;  %v6940_v33 = vunpack.i.h.bf16 %v6938_v11  ;;  %v6939_v10 = vunpack.i.l.bf16 %v6938_v11 }
 0x243   :  { %v10346_v25 = vpop.permute.xlu0 %6932  ;;  %v6945_v27 = vunpack.i.h.bf16 %v10162_v3  ;;  %v6944_v37 = vunpack.i.l.bf16 %v10162_v3  ;;  %v2989_v43 = vsel %vm448_vm2, %v2987_v16, %v2988_v60  ;;  %v2991_v3 = vsel %vm448_vm2, %v2988_v60, %v2990_v2 }
 0x244   :  { %v6934_v35 = vunpack.i.l.bf16 %v10346_v25  ;;  %7167 = vrot.lane.b32.xlu2 %v10329_v48, %s7704_s13  ;;  %v1308_v50 = vsel %vm1279_vm6, %v1275_v12, %v6324_v28  ;;  %v10378_v47 = vsel %vm1279_vm6, %v10122_v26, %v6325_v51  ;;  %v13280_v12 = vld [vmem:[#allocation83_spill] sm:$0xff]  ;;  %v3673_v7 = vsel %vm1213_vm3, %v13281_v45, %v6940_v33 }
 0x245   :  { %v6390_v49 = vunpack.i.h.bf16 %v13280_v12  ;;  %v6389_v46 = vunpack.i.l.bf16 %v13280_v12  ;;  %v3672_v11 = vsel %vm1213_vm3, %v13282_v53, %v6939_v10  ;;  %v2644_v22 = vrot.slane %v5639_v6, 7  ;;  %v13283_v51 = vld [vmem:[#allocation11_spill] sm:$0xff] }
 0x246   :  { %v3893_v62 = vsel %vm1444_vm11, %v3861_v42, %v6934_v35  ;;  %v10368_v40 = vpop.permute.xlu2 %7002  ;;  %v2645_v34 = vrot.slane %v5640_v61, 7  ;;  %v10396_v28 = vsel %vm1279_vm6, %v13283_v51, %v6320_v18  ;;  %v10400_v21 = vsel %vm1279_vm6, %v13284_v63, %v6319_v20  ;;  %v13285_v35 = vld [vmem:[#allocation84_spill] sm:$0xff]  ;;  %v10415_v20 = vpop.f32.mrf.mxu0 }
 0x247   :  { %v3919_v30 = vpack.c.bf16 %v3893_v62, %v3892_v14  ;;  %7162 = vrot.lane.b32.xlu1 %v10353_v15, %s7703_s12  ;;  %v6404_v33 = vunpack.i.l.bf16 %v13285_v35  ;;  %v3702_v42 = vsel %vm1246_vm4, %v3672_v11, %v6944_v37  ;;  %v3703_v14 = vsel %vm1246_vm4, %v3673_v7, %v6945_v27  ;;  %v13289_v37 = vld [vmem:[#allocation91_spill] sm:$0xff]  ;;  %v13290_v7 = vld [vmem:[#allocation94_spill] sm:$0xff] }
 0x248   :  { %v10406_v60 = vsel %vm1312_vm7, %v1302_v5, %v6389_v46  ;;  %v10409_v2 = vsel %vm1312_vm7, %v1303_v19, %v6390_v49  ;;  %v6405_v9 = vunpack.i.h.bf16 %v13285_v35  ;;  %v10413_v18 = vpack.i.bf16 %v2991_v3, %v2989_v43  ;;  %v13291_v35 = vld [vmem:[#allocation95_spill] sm:$0xff] }
 0x249   :  { %7157 = vrot.lane.b32.xlu0 %v7156_v58, %s7702_s30  ;;  %5650 = vmatmul.msk.bf16.gmra.mxu2 %vm1517_vm12, %v3919_v30  ;;  %v6953_v26 = vpop.permute.xlu1 %6952  ;;  %v10418_v61 = vsel %vm105_vm0, %v2644_v22, %v2645_v34  ;;  %v10421_v12 = vsel %vm105_vm0, 0.0, %v2644_v22  ;;  %v10424_v5 = vsel %vm1312_vm7, %v1308_v50, %v6404_v33  ;;  %v10431_v27 = vsel %vm105_vm0, %v2645_v34, 0.0 }
 0x24a   :  { %v6955_v30 = vunpack.i.h.bf16 %v6953_v26  ;;  %v6954_v6 = vunpack.i.l.bf16 %v6953_v26  ;;  %13286 = vst [vmem:[#allocation44_spill] sm:$0xff] %v10418_v61  ;;  %v6385_v46 = vunpack.i.h.bf16 %v13289_v37  ;;  %v6384_v45 = vunpack.i.l.bf16 %v13289_v37 }
 0x24b   :  { %v6948_v10 = vpop.permute.xlu0 %6947  ;;  %13287 = vst [vmem:[#allocation60_spill] sm:$0xff] %v10421_v12  ;;  %v6400_v53 = vunpack.i.h.bf16 %v13290_v7  ;;  %v6960_v11 = vunpack.i.h.bf16 %v10210_v13  ;;  %v6959_v50 = vunpack.i.l.bf16 %v10210_v13  ;;  %v2827_v26 = vrot.slane %v10421_v12, 1 }
 0x24c   :  { %v6950_v16 = vunpack.i.h.bf16 %v6948_v10  ;;  %v6949_v62 = vunpack.i.l.bf16 %v6948_v10  ;;  %7182 = vrot.lane.b32.xlu2 %v7156_v58, %s7699_s23  ;;  %13288 = vst [vmem:[#allocation61_spill] sm:$0xff] %v10424_v5  ;;  %v2828_v43 = vrot.slane %v10418_v61, 1  ;;  %v6399_v3 = vunpack.i.l.bf16 %v13290_v7 }
 0x24d   :  { %v2830_v63 = vrot.slane %v10431_v27, 1  ;;  %v6394_v13 = vunpack.i.l.bf16 %v13291_v35 }
 0x24e   :  { %v3735_v19 = vsel %vm1279_vm6, %v3703_v14, %v6950_v16  ;;  %v3734_v49 = vsel %vm1279_vm6, %v3702_v42, %v6949_v62  ;;  %v10428_v58 = vpop.permute.xlu2 %7017  ;;  %v6974_v14 = vunpack.i.l.bf16 %v10260_v31 }
 0x24f   :  { %7177 = vrot.lane.b32.xlu1 %v10250_v56, %s7698_s14  ;;  %v3767_v22 = vsel %vm1312_vm7, %v3735_v19, %v6955_v30  ;;  %v3766_v34 = vsel %vm1312_vm7, %v3734_v49, %v6954_v6  ;;  %v6395_v56 = vunpack.i.h.bf16 %v13291_v35  ;;  %v2829_v6 = vsel %vm271_vm1, %v2827_v26, %v2828_v43  ;;  %v13292_v35 = vld [vmem:[#allocation96_spill] sm:$0xff] }
 0x250   :  { %v3798_v37 = vsel %vm1345_vm8, %v3766_v34, %v6959_v50  ;;  %v3799_v30 = vsel %vm1345_vm8, %v3767_v22, %v6960_v11  ;;  %v6935_v19 = vunpack.i.h.bf16 %v10346_v25  ;;  %v6465_v5 = vunpack.i.h.bf16 %v13292_v35  ;;  %v10474_v34 = vpop.f32.mrf.mxu0 }
 0x251   :  { %7172 = vrot.lane.b32.xlu0 %v10413_v18, %s7705_s15  ;;  %v6968_v51 = vpop.permute.xlu1 %6967  ;;  %v10468_v26 = vsel %vm1312_vm7, %v10378_v47, %v6405_v9  ;;  %v1333_v25 = vsel %vm1312_vm7, %v10342_v41, %v6384_v45  ;;  %v1337_v9 = vsel %vm1312_vm7, %v10304_v44, %v6394_v13  ;;  %v10505_v13 = vpack.i.bf16 %v10418_v61, %v10421_v12 }
 0x252   :  { %v6970_v33 = vunpack.i.h.bf16 %v6968_v51  ;;  %v6969_v10 = vunpack.i.l.bf16 %v6968_v51  ;;  %v2831_v51 = vsel %vm271_vm1, %v2828_v43, %v2830_v63  ;;  %13293 = vst [vmem:[#allocation62_spill] sm:$0xff] %v10468_v26  ;;  %v1334_v43 = vsel %vm1312_vm7, %v10337_v36, %v6385_v46 }
 0x253   :  { %v6963_v42 = vpop.permute.xlu0 %6962  ;;  %v10485_v47 = vpack.i.bf16 %v2831_v51, %v2829_v6  ;;  %v1340_v36 = vsel %vm1312_vm7, %v10396_v28, %v6400_v53  ;;  %v2995_v51 = vrot.slane %v10431_v27, 2  ;;  %v7020_v55 = vunpack.i.h.bf16 %v10428_v58 }
 0x254   :  { %v6965_v16 = vunpack.i.h.bf16 %v6963_v42  ;;  %v6964_v62 = vunpack.i.l.bf16 %v6963_v42  ;;  %7197 = vrot.lane.b32.xlu2 %v10413_v18, %s7702_s30  ;;  %v6464_v42 = vunpack.i.l.bf16 %v13292_v35 }
 0x256   :  { %v3830_v49 = vsel %vm1378_vm9, %v3798_v37, %v6964_v62  ;;  %v3831_v7 = vsel %vm1378_vm9, %v3799_v30, %v6965_v16  ;;  %v10462_v50 = vpop.permute.xlu2 %7032 }
 0x257   :  { %v3862_v11 = vsel %vm1411_vm10, %v3830_v49, %v6969_v10  ;;  %v3863_v22 = vsel %vm1411_vm10, %v3831_v7, %v6970_v33  ;;  %7192 = vrot.lane.b32.xlu1 %v10329_v48, %s7701_s29  ;;  %v1339_v33 = vsel %vm1312_vm7, %v10400_v21, %v6399_v3  ;;  %v13294_v10 = vld [vmem:[#allocation97_spill] sm:$0xff]  ;;  %v1338_v21 = vsel %vm1312_vm7, %v10310_v24, %v6395_v56  ;;  %v13296_v56 = vld [vmem:[#allocation110_spill] sm:$0xff] }
 0x258   :  { %v3894_v63 = vsel %vm1444_vm11, %v3862_v11, %v6935_v19  ;;  %v6409_v16 = vunpack.i.l.bf16 %v13294_v10  ;;  %v3895_v41 = vsel %vm1444_vm11, %v3863_v22, %v6974_v14  ;;  %v6410_v46 = vunpack.i.h.bf16 %v13294_v10  ;;  %v13295_v14 = vld [vmem:[#allocation98_spill] sm:$0xff] }
 0x259   :  { %7187 = vrot.lane.b32.xlu0 %v10353_v15, %s7700_s24  ;;  %v6983_v45 = vpop.permute.xlu1 %6982  ;;  %v3920_v62 = vpack.c.bf16 %v3895_v41, %v3894_v63  ;;  %v10495_v3 = vsel %vm1345_vm8, %v1333_v25, %v6464_v42  ;;  %v10498_v15 = vsel %vm1345_vm8, %v1334_v43, %v6465_v5  ;;  %v6479_v37 = vunpack.i.l.bf16 %v13295_v14  ;;  %v13297_v42 = vld [vmem:[#allocation111_spill] sm:$0xff]  ;;  %v13298_v10 = vld [vmem:[#allocation34_spill] sm:$0xff] }
 0x25a   :  { %v6480_v28 = vunpack.i.h.bf16 %v13295_v14  ;;  %v10509_v24 = vsel %vm1312_vm7, %v10318_v1, %v6409_v16  ;;  %v6475_v5 = vunpack.i.h.bf16 %v13296_v56  ;;  %v6474_v6 = vunpack.i.l.bf16 %v13296_v56  ;;  %v5641_v1 = vld [vmem:[%s12715_s0 + $0x1e0] sm:$0xff]  ;;  %v10552_v14 = vpop.f32.mrf.mxu0 }
 0x25b   :  { %v6978_v30 = vpop.permute.xlu0 %6977  ;;  %5651 = vmatmul.msk.bf16.gmra.mxu2 %vm1517_vm12, %v3920_v62  ;;  %v10517_v19 = vsel %vm1312_vm7, %v10324_v32, %v6410_v46  ;;  %v2992_v49 = vrot.slane %v10421_v12, 2  ;;  %v2993_v7 = vrot.slane %v10418_v61, 2  ;;  %v10526_v35 = vsel %vm1345_vm8, %v1339_v33, %v6479_v37  ;;  %v13299_v16 = vld [vmem:[#allocation33_spill] sm:$0xff] }
 0x25c   :  { %v6980_v53 = vunpack.i.h.bf16 %v6978_v30  ;;  %v6979_v44 = vunpack.i.l.bf16 %v6978_v30  ;;  %7212 = vrot.lane.b32.xlu2 %v10485_v47, %s7704_s13  ;;  %v6469_v11 = vunpack.i.l.bf16 %v13297_v42  ;;  %v6985_v22 = vunpack.i.h.bf16 %v6983_v45  ;;  %v5642_v33 = vld [vmem:[%s12715_s0 + $0x1e8] sm:$0xff] }
 0x25d   :  { %v6984_v25 = vunpack.i.l.bf16 %v6983_v45  ;;  %v10532_v32 = vsel %vm1345_vm8, %v1340_v36, %v6480_v28  ;;  %v6470_v63 = vunpack.i.h.bf16 %v13297_v42  ;;  %v10545_v46 = vsel %vm1345_vm8, %v1337_v9, %v6474_v6  ;;  %v13300_v45 = vld [vmem:[#allocation51_spill] sm:$0xff] }
 0x25e   :  { %v10529_v43 = vpop.permute.xlu2 %7047  ;;  %v3675_v27 = vsel %vm1213_vm3, %v13298_v10, %v6980_v53  ;;  %v3674_v41 = vsel %vm1213_vm3, %v13299_v16, %v6979_v44  ;;  %v10548_v36 = vsel %vm1345_vm8, %v1338_v21, %v6475_v5  ;;  %v2647_v62 = vrot.slane %v5641_v1, 7  ;;  %v10564_v5 = vpop.f32.mrf.mxu2  ;;  %v13301_v10 = vld [vmem:[#allocation115_spill] sm:$0xff] }
 0x25f   :  { %7207 = vrot.lane.b32.xlu1 %v10505_v13, %s7703_s12  ;;  %v6990_v37 = vunpack.i.h.bf16 %v10298_v52  ;;  %v6989_v30 = vunpack.i.l.bf16 %v10298_v52  ;;  %v2994_v53 = vsel %vm448_vm2, %v2992_v49, %v2993_v7  ;;  %v2996_v44 = vsel %vm448_vm2, %v2993_v7, %v2995_v51 }
 0x260   :  { %v10560_v9 = vsel %vm1345_vm8, %v10406_v60, %v6469_v11  ;;  %v3705_v21 = vsel %vm1246_vm4, %v3675_v27, %v6985_v22  ;;  %v3704_v56 = vsel %vm1246_vm4, %v3674_v41, %v6984_v25  ;;  %v2648_v1 = vrot.slane %v5642_v33, 7 }
 0x261   :  { %7202 = vrot.lane.b32.xlu0 %v13300_v45, %s7705_s15  ;;  %v6998_v28 = vpop.permute.xlu1 %6997  ;;  %v10568_v52 = vsel %vm1345_vm8, %v10409_v2, %v6470_v63  ;;  %v6490_v7 = vunpack.i.h.bf16 %v13301_v10  ;;  %v6489_v51 = vunpack.i.l.bf16 %v13301_v10  ;;  %v10574_v60 = vpack.i.bf16 %v2996_v44, %v2994_v53  ;;  %v13302_v45 = vld [vmem:[#allocation116_spill] sm:$0xff]  ;;  %v13303_v44 = vld [vmem:[#allocation117_spill] sm:$0xff]  ;;  %v13306_v53 = vld [vmem:[#allocation130_spill] sm:$0xff] }
 0x262   :  { %v10577_v11 = vsel %vm105_vm0, 0.0, %v2647_v62  ;;  %v7000_v22 = vunpack.i.h.bf16 %v6998_v28  ;;  %v6999_v25 = vunpack.i.l.bf16 %v6998_v28  ;;  %v3736_v27 = vsel %vm1279_vm6, %v3704_v56, %v6989_v30  ;;  %v13304_v56 = vld [vmem:[#allocation120_spill] sm:$0xff] }
 0x263   :  { %v6993_v6 = vpop.permute.xlu0 %6992  ;;  %v3737_v2 = vsel %vm1279_vm6, %v3705_v21, %v6990_v37  ;;  %v10586_v33 = vsel %vm105_vm0, %v2647_v62, %v2648_v1  ;;  %v6555_v28 = vunpack.i.h.bf16 %v13303_v44  ;;  %v6554_v30 = vunpack.i.l.bf16 %v13303_v44 }
 0x264   :  { %v6995_v42 = vunpack.i.h.bf16 %v6993_v6  ;;  %v6994_v49 = vunpack.i.l.bf16 %v6993_v6  ;;  %7227 = vrot.lane.b32.xlu2 %v10413_v18, %s7699_s23  ;;  %v10589_v18 = vsel %vm105_vm0, %v2648_v1, 0.0  ;;  %v7005_v21 = vunpack.i.h.bf16 %v10368_v40 }
 0x265   :  { %v7004_v6 = vunpack.i.l.bf16 %v10368_v40  ;;  %v2832_v62 = vrot.slane %v10577_v11, 1  ;;  %v2833_v10 = vrot.slane %v10586_v33, 1  ;;  %v6545_v37 = vunpack.i.h.bf16 %v13306_v53 }
 0x266   :  { %v3768_v63 = vsel %vm1312_vm7, %v3736_v27, %v6994_v49  ;;  %v3769_v16 = vsel %vm1312_vm7, %v3737_v2, %v6995_v42  ;;  %v10583_v41 = vpop.permute.xlu2 %7062  ;;  %v2835_v27 = vrot.slane %v10589_v18, 1  ;;  %v13305_v2 = vld [vmem:[#allocation129_spill] sm:$0xff]  ;;  %v3989_v26 = vpop.f32.mrf.mxu2 }
 0x267   :  { %7222 = vrot.lane.b32.xlu1 %v10329_v48, %s7698_s14  ;;  %v3800_v1 = vsel %vm1345_vm8, %v3768_v63, %v6999_v25  ;;  %v3801_v42 = vsel %vm1345_vm8, %v3769_v16, %v7000_v22  ;;  %v6550_v44 = vunpack.i.h.bf16 %v13305_v2  ;;  %v6549_v40 = vunpack.i.l.bf16 %v13305_v2  ;;  %v10614_v16 = vpop.f32.mrf.mxu0 }
 0x268   :  { %v6975_v22 = vunpack.i.h.bf16 %v10260_v31  ;;  %v3832_v38 = vsel %vm1378_vm9, %v3800_v1, %v7004_v6  ;;  %v3833_v48 = vsel %vm1378_vm9, %v3801_v42, %v7005_v21  ;;  %v2834_v4 = vsel %vm271_vm1, %v2832_v62, %v2833_v10  ;;  %v10636_v62 = vld [vmem:[%s12717_s2] ss:$0 sm:$0xff] }
 0x269   :  { %7217 = vrot.lane.b32.xlu0 %v10574_v60, %s7705_s15  ;;  %v10604_v49 = vpop.permute.xlu1 %7012  ;;  %v6544_v31 = vunpack.i.l.bf16 %v13306_v53  ;;  %v1376_v1 = vsel %vm1345_vm8, %v10509_v24, %v6489_v51  ;;  %v7019_v53 = vunpack.i.l.bf16 %v10428_v58  ;;  %v10649_v24 = vsel %vm1378_vm9, %v10548_v36, %v6555_v28 }
 0x26a   :  { %v7014_v61 = vunpack.i.l.bf16 %v10604_v49  ;;  %v13307_v58 = vunpack.i.l.bf16 %v13304_v56  ;;  %v3988_v36 = vadd.f32 %v10636_v62, %v10564_v5 }
 0x26b   :  { %v7008_v12 = vpop.permute.xlu0 %7007  ;;  %v10678_v28 = vsel %vm1378_vm9, %v10495_v3, %v6544_v31  ;;  %v3676_v5 = vsel %vm1213_vm3, %v9548_v8, %v7019_v53  ;;  %v2997_v3 = vrot.slane %v10577_v11, 2 }
 0x26c   :  { %v7010_v25 = vunpack.i.h.bf16 %v7008_v12  ;;  %v7009_v63 = vunpack.i.l.bf16 %v7008_v12  ;;  %7242 = vrot.lane.b32.xlu2 %v10574_v60, %s7702_s30  ;;  %v2836_v12 = vsel %vm271_vm1, %v2833_v10, %v2835_v27 }
 0x26d   :  { %v10653_v51 = vpack.i.bf16 %v2836_v12, %v2834_v4 }
 0x26e   :  { %v3864_v2 = vsel %vm1411_vm10, %v3832_v38, %v7009_v63  ;;  %v3865_v59 = vsel %vm1411_vm10, %v3833_v48, %v7010_v25  ;;  %v10628_v21 = vpop.permute.xlu2 %7077  ;;  %v5643_v63 = vld [vmem:[%s12715_s0 + $0x1f0] sm:$0xff] }
 0x26f   :  { %v3896_v0 = vsel %vm1444_vm11, %v3864_v2, %v6975_v22  ;;  %v3897_v6 = vsel %vm1444_vm11, %v3865_v59, %v7014_v61  ;;  %7237 = vrot.lane.b32.xlu1 %v10485_v47, %s7701_s29  ;;  %v1377_v59 = vsel %vm1345_vm8, %v10517_v19, %v6490_v7  ;;  %v10645_v61 = vsel %vm1378_vm9, %v10545_v46, %v6554_v30  ;;  %v10710_v12 = vpop.f32.mrf.mxu0 }
 0x270   :  { %v3921_v42 = vpack.c.bf16 %v3897_v6, %v3896_v0  ;;  %v10658_v0 = vsel %vm1378_vm9, %v1376_v1, %v13307_v58  ;;  %v13308_v19 = vunpack.i.h.bf16 %v13304_v56  ;;  %v10667_v46 = vsel %vm1378_vm9, %v10560_v9, %v6549_v40 }
 0x271   :  { %7232 = vrot.lane.b32.xlu0 %v10505_v13, %s7700_s24  ;;  %v7028_v4 = vpop.permute.xlu1 %7027  ;;  %v10674_v13 = vsel %vm1378_vm9, %v10568_v52, %v6550_v44  ;;  %v10682_v30 = vsel %vm1378_vm9, %v10498_v15, %v6545_v37  ;;  %v3677_v9 = vsel %vm1213_vm3, %v9545_v39, %v7020_v55  ;;  %v10690_v52 = vpack.i.bf16 %v10586_v33, %v10577_v11  ;;  %v13309_v55 = vld [vmem:[#allocation133_spill] sm:$0xff] }
 0x272   :  { %v10663_v7 = vsel %vm1378_vm9, %v1377_v59, %v13308_v19  ;;  %5652 = vmatmul.msk.bf16.gmra.mxu2 %vm1517_vm12, %v3921_v42  ;;  %v2998_v15 = vrot.slane %v10586_v33, 2  ;;  %v3000_v39 = vrot.slane %v10589_v18, 2  ;;  %v4067_v40 = vmax.f32 %v3988_v36, 0.0  ;;  %v13310_v59 = vld [vmem:[#allocation53_spill] sm:$0xff] }
 0x273   :  { %v7023_v10 = vpop.permute.xlu0 %7022  ;;  %v7029_v8 = vunpack.i.l.bf16 %v7028_v4  ;;  %v10704_v22 = vadd.f32 %v10636_v62, %v10415_v20  ;;  %v10708_v2 = vadd.f32 %v10636_v62, %v10552_v14  ;;  %v7030_v18 = vunpack.i.h.bf16 %v7028_v4  ;;  %v5644_v20 = vld [vmem:[%s12715_s0 + $0x1f8] sm:$0xff]  ;;  %s7706_s0 = smov 40  }
 0x274   :  { %v7025_v27 = vunpack.i.h.bf16 %v7023_v10  ;;  %v7024_v48 = vunpack.i.l.bf16 %v7023_v10  ;;  %7257 = vrot.lane.b32.xlu2 %v10653_v51, %s7704_s13  ;;  %v7034_v1 = vunpack.i.l.bf16 %v10462_v50  ;;  %v3990_v14 = vadd.f32 %v10636_v62, %v3989_v26 }
 0x275   :  { %v3992_v44 = vpop.f32.mrf.mxu2  ;;  %v2999_v58 = vsel %vm448_vm2, %v2997_v3, %v2998_v15  ;;  %v3001_v19 = vsel %vm448_vm2, %v2998_v15, %v3000_v39  ;;  %v2650_v36 = vrot.slane %v5643_v63, 7  ;;  %v7035_v4 = vunpack.i.h.bf16 %v10462_v50 }
 0x276   :  { %v3993_v25 = vadd.f32 %v10636_v62, %v3992_v44  ;;  %v3706_v31 = vsel %vm1246_vm4, %v3676_v5, %v7024_v48  ;;  %v10713_v6 = vpop.permute.xlu2 %7092  ;;  %v3707_v53 = vsel %vm1246_vm4, %v3677_v9, %v7025_v27  ;;  %v4099_v9 = vsel %vm1246_vm4, %v4067_v40, -inf }
 0x277   :  { %7252 = vrot.lane.b32.xlu1 %v10690_v52, %s7703_s12  ;;  %v3738_v10 = vsel %vm1279_vm6, %v3706_v31, %v7029_v8  ;;  %v3739_v48 = vsel %vm1279_vm6, %v3707_v53, %v7030_v18  ;;  %v10732_v37 = vpack.i.bf16 %v3001_v19, %v2999_v58  ;;  %v4068_v15 = vmax.f32 %v3990_v14, 0.0 }
 0x278   :  { %v4069_v42 = vmax.f32 %v3993_v25, 0.0  ;;  %v2651_v25 = vrot.slane %v5644_v20, 7  ;;  %v3770_v50 = vsel %vm1312_vm7, %v3738_v10, %v7034_v1  ;;  %v10738_v8 = vsel %vm105_vm0, 0.0, %v2650_v36 }
 0x279   :  { %7247 = vrot.lane.b32.xlu0 %v13310_v59, %s7705_s15  ;;  %v7043_v27 = vpop.permute.xlu1 %7042  ;;  %v3771_v18 = vsel %vm1312_vm7, %v3739_v48, %v7035_v4  ;;  %v1659_v19 = vmax.f32 %v10704_v22, 0.0 }
 0x27a   :  { %v4100_v5 = vsel %vm1246_vm4, %v4069_v42, -inf  ;;  %v7044_v59 = vunpack.i.l.bf16 %v7043_v27  ;;  %v7045_v63 = vunpack.i.h.bf16 %v7043_v27  ;;  %v7049_v42 = vunpack.i.l.bf16 %v10529_v43 }
 0x27b   :  { %v4101_v26 = vmax.f32 %v4099_v9, %v4100_v5  ;;  %v7038_v44 = vpop.permute.xlu0 %7037  ;;  %v10748_v1 = vsel %vm105_vm0, %v2650_v36, %v2651_v25  ;;  %v10751_v58 = vsel %vm105_vm0, %v2651_v25, 0.0  ;;  %v10759_v5 = vpop.f32.mrf.mxu0  ;;  %v4102_v36 = vsel %vm1246_vm4, %v4068_v15, -inf }
 0x27c   :  { %v7040_v38 = vunpack.i.h.bf16 %v7038_v44  ;;  %v7039_v3 = vunpack.i.l.bf16 %v7038_v44  ;;  %7272 = vrot.lane.b32.xlu2 %v10653_v51, %s7698_s14  ;;  %v3190_v27 = vrot.slane %v10738_v8, 1  ;;  %v3191_v44 = vrot.slane %v10748_v1, 1 }
 0x27d   :  { %v4155_v39 = vrot.slane %v4101_v26, 1  ;;  %v3994_v40 = vpop.f32.mrf.mxu2  ;;  %v1661_v25 = vmax.f32 %v10708_v2, 0.0  ;;  %v7015_v15 = vunpack.i.h.bf16 %v10604_v49 }
 0x27e   :  { %v3802_v31 = vsel %vm1345_vm8, %v3770_v50, %v7039_v3  ;;  %v3995_v53 = vadd.f32 %v10636_v62, %v3994_v40  ;;  %v3803_v20 = vsel %vm1345_vm8, %v3771_v18, %v7040_v38  ;;  %v10745_v14 = vpop.permute.xlu2 %7107  ;;  %v7050_v38 = vunpack.i.h.bf16 %v10529_v43 }
 0x27f   :  { %v10754_v9 = vmax.f32 %v4101_v26, %v4155_v39  ;;  %v3834_v4 = vsel %vm1378_vm9, %v3802_v31, %v7044_v59  ;;  %7267 = vrot.lane.b32.xlu1 %v10485_v47, %s7698_s14  ;;  %v3835_v22 = vsel %vm1378_vm9, %v3803_v20, %v7045_v63  ;;  %v3193_v47 = vrot.slane %v10751_v58, 1  ;;  %s7707_s14 = smov 48  }
 0x280   :  { %v4070_v10 = vmax.f32 %v3995_v53, 0.0  ;;  %v3866_v3 = vsel %vm1411_vm10, %v3834_v4, %v7049_v42  ;;  %v3867_v31 = vsel %vm1411_vm10, %v3835_v22, %v7050_v38  ;;  %v3192_v42 = vsel %vm271_vm1, %v3190_v27, %v3191_v44 }
 0x281   :  { %7262 = vrot.lane.b32.xlu0 %v10732_v37, %s7705_s15  ;;  %v7058_v26 = vpop.permute.xlu1 %7057  ;;  %v4219_v39 = vrot.slane %v10754_v9, 1  ;;  %v3898_v2 = vsel %vm1444_vm11, %v3866_v3, %v7015_v15  ;;  %v3194_v49 = vsel %vm271_vm1, %v3191_v44, %v3193_v47  ;;  %v1692_v20 = vsel %vm1246_vm4, %v1661_v25, -inf }
 0x282   :  { %v4103_v48 = vsel %vm1246_vm4, %v4070_v10, -inf  ;;  %v7060_v63 = vunpack.i.h.bf16 %v7058_v26  ;;  %v7059_v18 = vunpack.i.l.bf16 %v7058_v26  ;;  %v4235_v4 = vrot.slane %v10754_v9, 2 }
 0x283   :  { %v4104_v59 = vmax.f32 %v4102_v36, %v4103_v48  ;;  %v10771_v43 = vpop.permute.xlu0 %7052  ;;  %v7064_v38 = vunpack.i.l.bf16 %v10583_v41  ;;  %v4339_v22 = vsel %vm105_vm0, %v10754_v9, %v4219_v39  ;;  %v1691_v27 = vsel %vm1246_vm4, %v1659_v19, -inf }
 0x284   :  { %v7054_v50 = vunpack.i.l.bf16 %v10771_v43  ;;  %7287 = vrot.lane.b32.xlu2 %v10690_v52, %s7700_s24  ;;  %v7065_v52 = vunpack.i.h.bf16 %v10583_v41  ;;  %v3679_v26 = vsel %vm1213_vm3, %v9625_v23, %v7060_v63  ;;  %v3678_v44 = vsel %vm1213_vm3, %v9628_v29, %v7059_v18 }
 0x285   :  { %v4187_v40 = vrot.slane %v4104_v59, 1  ;;  %v10804_v41 = vpack.i.bf16 %v3194_v49, %v3192_v42  ;;  %v10808_v47 = vadd.f32 %v10636_v62, %v10474_v34  ;;  %v1693_v25 = vmax.f32 %v1691_v27, %v1692_v20 }
 0x286   :  { %v3899_v53 = vsel %vm1444_vm11, %v3867_v31, %v7054_v50  ;;  %v10788_v48 = vpop.permute.xlu2 %7122  ;;  %v10812_v19 = vadd.f32 %v10636_v62, %v10614_v16  ;;  %v4251_v29 = vrot.slane %v10754_v9, 3  ;;  %v3708_v39 = vsel %vm1246_vm4, %v3678_v44, %v7064_v38 }
 0x287   :  { %v10786_v10 = vmax.f32 %v4104_v59, %v4187_v40  ;;  %v3922_v36 = vpack.c.bf16 %v3899_v53, %v3898_v2  ;;  %7282 = vrot.lane.b32.xlu1 %v10732_v37, %s7699_s23  ;;  %v10814_v59 = vpop.f32.mrf.mxu0  ;;  %v3709_v34 = vsel %vm1246_vm4, %v3679_v26, %v7065_v52  ;;  %v10827_v16 = vpack.i.bf16 %v10748_v1, %v10738_v8 }
 0x288   :  { %v3291_v9 = vrot.slane %v10738_v8, 2  ;;  %v3292_v18 = vrot.slane %v10748_v1, 2  ;;  %v3294_v31 = vrot.slane %v10751_v58, 2  ;;  %v6559_v20 = vunpack.i.l.bf16 %v13309_v55 }
 0x289   :  { %7277 = vrot.lane.b32.xlu0 %v10574_v60, %s7699_s23  ;;  %5653 = vmatmul.msk.bf16.gmra.mxu2 %vm1517_vm12, %v3922_v36  ;;  %v7073_v23 = vpop.permute.xlu1 %7072  ;;  %v4347_v60 = vsel %vm1566_vm5, %v4339_v22, %v4235_v4  ;;  %v4275_v3 = vrot.slane %v10786_v10, 4  ;;  %v4291_v53 = vrot.slane %v10786_v10, 5  ;;  %v1660_v8 = vmax.f32 %v10808_v47, 0.0 }
 0x28a   :  { %v4355_v2 = vsel %vm1947_vm13, %v4347_v60, %v4251_v29  ;;  %v7075_v42 = vunpack.i.h.bf16 %v7073_v23  ;;  %v7074_v49 = vunpack.i.l.bf16 %v7073_v23  ;;  %v1747_v1 = vrot.slane %v1693_v25, 1 }
 0x28b   :  { %v7068_v15 = vpop.permute.xlu0 %7067  ;;  %v4363_v4 = vsel %vm1956_vm14, %v4355_v2, %v4275_v3  ;;  %v7080_v58 = vunpack.i.h.bf16 %v10628_v21  ;;  %v7079_v22 = vunpack.i.l.bf16 %v10628_v21  ;;  %v3293_v27 = vsel %vm448_vm2, %v3291_v9, %v3292_v18  ;;  %v13311_v2 = vld [vmem:[#allocation52_spill] sm:$0xff] }
 0x28c   :  { %v7070_v50 = vunpack.i.h.bf16 %v7068_v15  ;;  %v7069_v40 = vunpack.i.l.bf16 %v7068_v15  ;;  %v10821_v63 = vpop.f32.mrf.mxu2  ;;  %7302 = vrot.lane.b32.xlu2 %v10804_v41, %s7701_s29  ;;  %v3295_v26 = vsel %vm448_vm2, %v3292_v18, %v3294_v31  ;;  %v1662_v44 = vmax.f32 %v10812_v19, 0.0 }
 0x28d   :  { %v4371_v47 = vsel %vm1965_vm15, %v4363_v4, %v4291_v53  ;;  %v4307_v21 = vrot.slane %v10786_v10, 6  ;;  %v10856_v9 = vpack.i.bf16 %v3295_v26, %v3293_v27 }
 0x28e   :  { %v3741_v36 = vsel %vm1279_vm6, %v3709_v34, %v7070_v50  ;;  %v3740_v52 = vsel %vm1279_vm6, %v3708_v39, %v7069_v40  ;;  %v10838_v38 = vpop.permute.xlu2 %7137  ;;  %v4323_v34 = vrot.slane %v10786_v10, 7 }
 0x28f   :  { %7297 = vrot.lane.b32.xlu1 %v10653_v51, %s7701_s29  ;;  %v3773_v23 = vsel %vm1312_vm7, %v3741_v36, %v7075_v42  ;;  %v3772_v29 = vsel %vm1312_vm7, %v3740_v52, %v7074_v49  ;;  %v7094_v51 = vunpack.i.l.bf16 %v10713_v6  ;;  %v10858_v19 = vpop.f32.mrf.mxu0  ;;  %v4379_v53 = vsel %vm448_vm2, %v4371_v47, %v4307_v21 }
 0x290   :  { %v3804_v18 = vsel %vm1345_vm8, %v3772_v29, %v7079_v22  ;;  %v3805_v31 = vsel %vm1345_vm8, %v3773_v23, %v7080_v58  ;;  %v7055_v42 = vunpack.i.h.bf16 %v10771_v43  ;;  %v4387_v36 = vsel %vm271_vm1, %v4379_v53, %v4323_v34  ;;  %v13312_v43 = vld [vmem:[#allocation13_spill] sm:$0xff] }
 0x291   :  { %7292 = vrot.lane.b32.xlu0 %v10827_v16, %s7700_s24  ;;  %v7088_v60 = vpop.permute.xlu1 %7087  ;;  %v10869_v52 = vmax.f32 %v1693_v25, %v1747_v1  ;;  %v4403_v26 = vrot.slane %v4387_v36, 7  ;;  %v10877_v47 = vsel %vm1378_vm9, %v10526_v35, %v6559_v20  ;;  %v6630_v23 = vunpack.i.h.bf16 %v13312_v43  ;;  %s7708_s24 = smov 64  }
 0x292   :  { %v7090_v3 = vunpack.i.h.bf16 %v7088_v60  ;;  %v7089_v15 = vunpack.i.l.bf16 %v7088_v60  ;;  %v6629_v29 = vunpack.i.l.bf16 %v13312_v43  ;;  %v1695_v1 = vsel %vm1246_vm4, %v1662_v44, -inf }
 0x293   :  { %v7083_v39 = vpop.permute.xlu0 %7082  ;;  %v10889_v21 = vsel %vm105_vm0, 0.0, %v4403_v26  ;;  %v10892_v35 = vsel %vm105_vm0, %v4403_v26, 0.0  ;;  %v13313_v20 = vunpack.i.h.bf16 %v13309_v55 }
 0x294   :  { %v7085_v50 = vunpack.i.h.bf16 %v7083_v39  ;;  %v7084_v40 = vunpack.i.l.bf16 %v7083_v39  ;;  %7317 = vrot.lane.b32.xlu2 %v13311_v2, %s7705_s15  ;;  %v3999_v4 = vpop.f32.mrf.mxu2  ;;  %v4450_v53 = vrot.slane %v10892_v35, 1 }
 0x296   :  { %v3836_v49 = vsel %vm1378_vm9, %v3804_v18, %v7084_v40  ;;  %v3837_v10 = vsel %vm1378_vm9, %v3805_v31, %v7085_v50  ;;  %v10871_v27 = vpop.permute.xlu2 %7152  ;;  %v13315_v50 = vld [vmem:[#allocation27_spill] sm:$0xff]  ;;  %v1694_v40 = vsel %vm1246_vm4, %v1660_v8, -inf  ;;  %v1811_v18 = vrot.slane %v10869_v52, 1 }
 0x297   :  { %v3868_v58 = vsel %vm1411_vm10, %v3836_v49, %v7089_v15  ;;  %v3869_v22 = vsel %vm1411_vm10, %v3837_v10, %v7090_v3  ;;  %7312 = vrot.lane.b32.xlu1 %v10856_v9, %s7702_s30  ;;  %v10898_v3 = vsel %vm1378_vm9, %v10532_v32, %v13313_v20  ;;  %v13314_v15 = vld [vmem:[#allocation32_spill] sm:$0xff]  ;;  %v3998_v31 = vadd.f32 %v10636_v62, %v10821_v63  ;;  %v13316_v49 = vld [vmem:[#allocation47_spill] sm:$0xff]  ;;  %v13319_v20 = vld [vmem:[#allocation6_spill] sm:$0xff] }
 0x298   :  { %v3900_v25 = vsel %vm1444_vm11, %v3868_v58, %v7055_v42  ;;  %v3901_v60 = vsel %vm1444_vm11, %v3869_v22, %v7094_v51  ;;  %v6625_v39 = vunpack.i.h.bf16 %v13314_v15  ;;  %v6624_v44 = vunpack.i.l.bf16 %v13314_v15 }
 0x299   :  { %7307 = vrot.lane.b32.xlu0 %v10732_v37, %s7702_s30  ;;  %v7103_v34 = vpop.permute.xlu1 %7102  ;;  %v3923_v37 = vpack.c.bf16 %v3901_v60, %v3900_v25  ;;  %v6704_v51 = vunpack.i.l.bf16 %v13315_v50  ;;  %v1696_v2 = vmax.f32 %v1694_v40, %v1695_v1  ;;  %v4449_v32 = vrot.slane %v10889_v21, 1  ;;  %s7709_s30 = smov 56  }
 0x29a   :  { %v10914_v8 = vsel %vm1411_vm10, %v10667_v46, %v6629_v29  ;;  %v10918_v10 = vsel %vm1411_vm10, %v10674_v13, %v6630_v23  ;;  %v1827_v63 = vrot.slane %v10869_v52, 2  ;;  %v1432_v22 = vsel %vm1411_vm10, %v10678_v28, %v6624_v44  ;;  %v10929_v46 = vpop.f32.mrf.mxu0  ;;  %v13317_v28 = vld [vmem:[#allocation7_spill] sm:$0xff] }
 0x29b   :  { %v7098_v55 = vpop.permute.xlu0 %7097  ;;  %5654 = vmatmul.msk.bf16.gmra.mxu2 %vm1517_vm12, %v3923_v37  ;;  %v10925_v26 = vsel %vm1411_vm10, %v10682_v30, %v6625_v39  ;;  %v1931_v43 = vsel %vm105_vm0, %v10869_v52, %v1811_v18  ;;  %v4071_v29 = vmax.f32 %v3998_v31, 0.0  ;;  %v10935_v25 = vsel %vm1444_vm11, %v1432_v22, %v6704_v51 }
 0x29c   :  { %v7099_v42 = vunpack.i.l.bf16 %v7098_v55  ;;  %7332 = vrot.lane.b32.xlu2 %v13316_v49, %s7705_s15  ;;  %v7100_v36 = vunpack.i.h.bf16 %v7098_v55  ;;  %v1779_v1 = vrot.slane %v1696_v2, 1  ;;  %v7104_v60 = vunpack.i.l.bf16 %v7103_v34 }
 0x29d   :  { %v13318_v30 = vrot.slane %v13317_v28, 1  ;;  %v13320_v15 = vrot.slane %v13319_v20, 1  ;;  %v10947_v44 = vsel %vm271_vm1, %v4449_v32, %v4450_v53  ;;  %v1843_v37 = vrot.slane %v10869_v52, 3 }
 0x29e   :  { %v4002_v58 = vpop.f32.mrf.mxu2  ;;  %v10932_v23 = vpop.permute.xlu2 %7167  ;;  %v7105_v50 = vunpack.i.h.bf16 %v7103_v34  ;;  %v3680_v51 = vsel %vm1213_vm3, %v9786_v17, %v7099_v42  ;;  %v10959_v18 = vadd.f32 %v10636_v62, %v10710_v12  ;;  %v4000_v31 = vadd.f32 %v10636_v62, %v3999_v4 }
 0x29f   :  { %v4003_v13 = vadd.f32 %v10636_v62, %v4002_v58  ;;  %7327 = vrot.lane.b32.xlu1 %v10804_v41, %s7704_s13  ;;  %v10944_v39 = vsel %vm271_vm1, %v13320_v15, %v13318_v30  ;;  %v10955_v41 = vsel %vm1566_vm5, %v1931_v43, %v1827_v63  ;;  %v3681_v55 = vsel %vm1213_vm3, %v9798_v54, %v7100_v36 }
 0x2a0   :  { %v7109_v32 = vunpack.i.l.bf16 %v10745_v14  ;;  %v4105_v17 = vsel %vm1246_vm4, %v4071_v29, -inf  ;;  %v7346_v42 = vpack.i.bf16 %v10947_v44, %v10944_v39  ;;  %v10969_v49 = vmax.f32 %v1696_v2, %v1779_v1 }
 0x2a1   :  { %v4073_v40 = vmax.f32 %v4003_v13, 0.0  ;;  %7322 = vrot.lane.b32.xlu0 %v10827_v16, %s7703_s12  ;;  %v7118_v34 = vpop.permute.xlu1 %7117  ;;  %v7110_v12 = vunpack.i.h.bf16 %v10745_v14  ;;  %v3710_v4 = vsel %vm1246_vm4, %v3680_v51, %v7104_v60  ;;  %v3711_v54 = vsel %vm1246_vm4, %v3681_v55, %v7105_v50 }
 0x2a2   :  { %v1663_v22 = vmax.f32 %v10959_v18, 0.0  ;;  %v1595_v43 = vadd.f32 %v10636_v62, %v10814_v59  ;;  %v4072_v29 = vmax.f32 %v4000_v31, 0.0  ;;  %v3742_v1 = vsel %vm1279_vm6, %v3710_v4, %v7109_v32  ;;  %v13321_v59 = vld [vmem:[#allocation63_spill] sm:$0xff]  ;;  %v10987_v31 = vpop.f32.mrf.mxu0 }
 0x2a3   :  { %v4106_v53 = vsel %vm1246_vm4, %v4073_v40, -inf  ;;  %v7113_v16 = vpop.permute.xlu0 %7112  ;;  %v4491_v30 = vrot.slane %v10889_v21, 2  ;;  %v4492_v15 = vrot.slane %v10892_v35, 2  ;;  %v7120_v51 = vunpack.i.h.bf16 %v7118_v34 }
 0x2a4   :  { %v4107_v63 = vmax.f32 %v4105_v17, %v4106_v53  ;;  %v7115_v36 = vunpack.i.h.bf16 %v7113_v16  ;;  %v7114_v58 = vunpack.i.l.bf16 %v7113_v16  ;;  %7347 = vrot.lane.b32.xlu2 %v7346_v42, %s7699_s23  ;;  %v7119_v40 = vunpack.i.l.bf16 %v7118_v34 }
 0x2a5   :  { %v3743_v18 = vsel %vm1279_vm6, %v3711_v54, %v7110_v12  ;;  %v13322_v35 = vrot.slane %v13317_v28, 2  ;;  %v13323_v53 = vrot.slane %v13319_v20, 2  ;;  %v7125_v16 = vunpack.i.h.bf16 %v10788_v48 }
 0x2a6   :  { %v4156_v13 = vrot.slane %v4107_v63, 1  ;;  %v4004_v2 = vpop.f32.mrf.mxu2  ;;  %v10980_v60 = vpop.permute.xlu2 %7182  ;;  %v3774_v55 = vsel %vm1312_vm7, %v3742_v1, %v7114_v58  ;;  %v3775_v32 = vsel %vm1312_vm7, %v3743_v18, %v7115_v36  ;;  %v7124_v42 = vunpack.i.l.bf16 %v10788_v48 }
 0x2a7   :  { %v4005_v14 = vadd.f32 %v10636_v62, %v4004_v2  ;;  %7342 = vrot.lane.b32.xlu1 %v13321_v59, %s7705_s15  ;;  %v10998_v34 = vsel %vm448_vm2, %v13323_v53, %v13322_v35  ;;  %v4108_v12 = vsel %vm1246_vm4, %v4072_v29, -inf  ;;  %v11005_v28 = vsel %vm448_vm2, %v4491_v30, %v4492_v15 }
 0x2a8   :  { %v4172_v50 = vmax.f32 %v4107_v63, %v4156_v13  ;;  %v3806_v2 = vsel %vm1345_vm8, %v3774_v55, %v7119_v40  ;;  %v3807_v1 = vsel %vm1345_vm8, %v3775_v32, %v7120_v51  ;;  %v1867_v48 = vrot.slane %v10969_v49, 4 }
 0x2a9   :  { %v4074_v17 = vmax.f32 %v4005_v14, 0.0  ;;  %7337 = vrot.lane.b32.xlu0 %v10856_v9, %s7705_s15  ;;  %v7133_v63 = vpop.permute.xlu1 %7132  ;;  %v1665_v29 = vmax.f32 %v1595_v43, 0.0  ;;  %v1597_v18 = vadd.f32 %v10636_v62, %v10858_v19  ;;  %v7351_v30 = vpack.i.bf16 %v11005_v28, %v10998_v34 }
 0x2aa   :  { %v4220_v4 = vrot.slane %v4172_v50, 1  ;;  %v4236_v54 = vrot.slane %v4172_v50, 2  ;;  %v7135_v58 = vunpack.i.h.bf16 %v7133_v63  ;;  %v7134_v35 = vunpack.i.l.bf16 %v7133_v63 }
 0x2ab   :  { %v4109_v36 = vsel %vm1246_vm4, %v4074_v17, -inf  ;;  %v7128_v9 = vpop.permute.xlu0 %7127  ;;  %v3838_v40 = vsel %vm1378_vm9, %v3806_v2, %v7124_v42  ;;  %v3839_v51 = vsel %vm1378_vm9, %v3807_v1, %v7125_v16  ;;  %v1698_v63 = vsel %vm1246_vm4, %v1665_v29, -inf  ;;  %v1604_v2 = vpop.f32.mrf.mxu0 }
 0x2ac   :  { %v4340_v13 = vsel %vm105_vm0, %v4172_v50, %v4220_v4  ;;  %v4110_v14 = vmax.f32 %v4108_v12, %v4109_v36  ;;  %v7130_v59 = vunpack.i.h.bf16 %v7128_v9  ;;  %v7129_v53 = vunpack.i.l.bf16 %v7128_v9 }
 0x2ad   :  { %v4348_v15 = vsel %vm1566_vm5, %v4340_v13, %v4236_v54  ;;  %v1466_v55 = vsel %vm1444_vm11, %v10925_v26, %v7135_v58  ;;  %v7095_v54 = vunpack.i.h.bf16 %v10713_v6  ;;  %v7139_v42 = vunpack.i.l.bf16 %v10838_v38 }
 0x2ae   :  { %v4188_v17 = vrot.slane %v4110_v14, 1  ;;  %v11020_v43 = vpop.permute.xlu2 %7197  ;;  %v3870_v19 = vsel %vm1411_vm10, %v3838_v40, %v7129_v53  ;;  %v3871_v12 = vsel %vm1411_vm10, %v3839_v51, %v7130_v59  ;;  %v1487_v4 = vpack.c.bf16 %v1466_v55, %v10935_v25  ;;  %v13324_v40 = vld [vmem:[#allocation42_spill] sm:$0xff] }
 0x2af   :  { %v4252_v36 = vrot.slane %v4172_v50, 3  ;;  %v1697_v26 = vsel %vm1246_vm4, %v1663_v22, -inf  ;;  %v7140_v16 = vunpack.i.h.bf16 %v10838_v38  ;;  %v1592_v25 = vadd.f32 %v10636_v62, %v10759_v5 }
 0x2b0   :  { %v4204_v32 = vmax.f32 %v4110_v14, %v4188_v17  ;;  %5587 = vmatmul.msk.bf16.gmra.mxu0 %vm1517_vm12, %v1487_v4  ;;  %v3902_v1 = vsel %vm1444_vm11, %v3870_v19, %v7095_v54  ;;  %v3903_v50 = vsel %vm1444_vm11, %v3871_v12, %v7134_v35  ;;  %v1699_v29 = vmax.f32 %v1697_v26, %v1698_v63 }
 0x2b1   :  { %7352 = vrot.lane.b32.xlu0 %v7351_v30, %s7701_s29  ;;  %v7148_v13 = vpop.permute.xlu1 %7147  ;;  %v4356_v6 = vsel %vm1947_vm13, %v4348_v15, %v4252_v36  ;;  %v1666_v22 = vmax.f32 %v1597_v18, 0.0  ;;  %v3924_v59 = vpack.c.bf16 %v3903_v50, %v3902_v1  ;;  %v1600_v17 = vadd.f32 %v10636_v62, %v10929_v46 }
 0x2b2   :  { %v4276_v58 = vrot.slane %v4204_v32, 4  ;;  %v4292_v9 = vrot.slane %v4204_v32, 5  ;;  %v3682_v53 = vsel %vm1213_vm3, %v9954_v57, %v7139_v42  ;;  %v4308_v5 = vrot.slane %v4204_v32, 6 }
 0x2b3   :  { %v7143_v14 = vpop.permute.xlu0 %7142  ;;  %v1605_v15 = vadd.f32 %v10636_v62, %v1604_v2  ;;  %v3683_v35 = vsel %vm1213_vm3, %v13324_v40, %v7140_v16  ;;  %5655 = vmatmul.msk.bf16.gmra.mxu2 %vm1517_vm12, %v3924_v59  ;;  %v1948_v46 = vsel %vm1947_vm13, %v10955_v41, %v1843_v37  ;;  %v1664_v55 = vmax.f32 %v1592_v25, 0.0 }
 0x2b4   :  { %v4364_v38 = vsel %vm1956_vm14, %v4356_v6, %v4276_v58  ;;  %v7145_v18 = vunpack.i.h.bf16 %v7143_v14  ;;  %v7144_v51 = vunpack.i.l.bf16 %v7143_v14  ;;  %v7149_v19 = vunpack.i.l.bf16 %v7148_v13 }
 0x2b5   :  { %v4372_v30 = vsel %vm1965_vm15, %v4364_v38, %v4292_v9  ;;  %v1748_v4 = vrot.slane %v1699_v29, 1  ;;  %v4324_v63 = vrot.slane %v4204_v32, 7  ;;  %v7150_v54 = vunpack.i.h.bf16 %v7148_v13  ;;  %v11060_v9 = vpop.f32.mrf.mxu2 }
 0x2b6   :  { %v11051_v57 = vpop.permute.xlu2 %7212  ;;  %v4380_v12 = vsel %vm448_vm2, %v4372_v30, %v4308_v5  ;;  %v3712_v42 = vsel %vm1246_vm4, %v3682_v53, %v7144_v51  ;;  %v1883_v36 = vrot.slane %v10969_v49, 5  ;;  %v1957_v26 = vsel %vm1956_vm14, %v1948_v46, %v1867_v48 }
 0x2b7   :  { %v1667_v16 = vmax.f32 %v1600_v17, 0.0  ;;  %v3713_v52 = vsel %vm1246_vm4, %v3683_v35, %v7145_v18  ;;  %v1701_v37 = vsel %vm1246_vm4, %v1666_v22, -inf  ;;  %v1669_v41 = vmax.f32 %v1605_v15, 0.0 }
 0x2b8   :  { %v7154_v58 = vunpack.i.l.bf16 %v10871_v27  ;;  %v4388_v32 = vsel %vm271_vm1, %v4380_v12, %v4324_v63  ;;  %v1700_v13 = vsel %vm1246_vm4, %v1664_v55, -inf  ;;  %v7155_v2 = vunpack.i.h.bf16 %v10871_v27 }
 0x2b9   :  { %v7163_v25 = vpop.permute.xlu1 %7162  ;;  %v3744_v6 = vsel %vm1279_vm6, %v3712_v42, %v7149_v19  ;;  %v4404_v1 = vrot.slane %v4388_v32, 7  ;;  %v11066_v50 = vmax.f32 %v1699_v29, %v1748_v4  ;;  %v3745_v14 = vsel %vm1279_vm6, %v3713_v52, %v7150_v54 }
 0x2ba   :  { %v1702_v59 = vmax.f32 %v1700_v13, %v1701_v37  ;;  %v1703_v17 = vsel %vm1246_vm4, %v1667_v16, -inf  ;;  %v1704_v27 = vsel %vm1246_vm4, %v1669_v41, -inf  ;;  %v7164_v30 = vunpack.i.l.bf16 %v7163_v25  ;;  %v1606_v16 = vpop.f32.mrf.mxu0 }
 0x2bb   :  { %v7158_v48 = vpop.permute.xlu0 %7157  ;;  %v11071_v53 = vsel %vm105_vm0, 0.0, %v4404_v1  ;;  %v4428_v5 = vsel %vm105_vm0, %v4404_v1, 0.0  ;;  %v3776_v15 = vsel %vm1312_vm7, %v3744_v6, %v7154_v58  ;;  %v7165_v40 = vunpack.i.h.bf16 %v7163_v25 }
 0x2bc   :  { %v7160_v22 = vunpack.i.h.bf16 %v7158_v48  ;;  %v7159_v38 = vunpack.i.l.bf16 %v7158_v48  ;;  %v7356_v29 = vpack.i.bf16 %v11071_v53, %v10889_v21  ;;  %v3777_v35 = vsel %vm1312_vm7, %v3745_v14, %v7155_v2 }
 0x2bd   :  { %v4494_v51 = vrot.slane %v11071_v53, 2  ;;  %v4495_v19 = vrot.slane %v4428_v5, 2  ;;  %v4452_v12 = vrot.slane %v11071_v53, 1  ;;  %v4453_v4 = vrot.slane %v4428_v5, 1 }
 0x2be   :  { %v3808_v18 = vsel %vm1345_vm8, %v3776_v15, %v7159_v38  ;;  %v11081_v46 = vpop.permute.xlu2 %7227  ;;  %v3809_v55 = vsel %vm1345_vm8, %v3777_v35, %v7160_v22  ;;  %7357 = vrot.lane.b32.xlu1 %v7356_v29, %s7703_s12  ;;  %v1812_v63 = vrot.slane %v11066_v50, 1  ;;  %v1780_v54 = vrot.slane %v1702_v59, 1  ;;  %v4009_v22 = vpop.f32.mrf.mxu2 }
 0x2bf   :  { %v1705_v42 = vmax.f32 %v1703_v17, %v1704_v27  ;;  %v7169_v52 = vunpack.i.l.bf16 %v10932_v23  ;;  %v7170_v37 = vunpack.i.h.bf16 %v10932_v23  ;;  %v3840_v41 = vsel %vm1378_vm9, %v3808_v18, %v7164_v30 }
 0x2c0   :  { %v11091_v58 = vsel %vm448_vm2, %v4494_v51, %v4495_v19  ;;  %v11094_v25 = vsel %vm271_vm1, %v4452_v12, %v4453_v4  ;;  %v1899_v13 = vrot.slane %v10969_v49, 6  ;;  %v3841_v2 = vsel %vm1378_vm9, %v3809_v55, %v7165_v40 }
 0x2c1   :  { %v7178_v32 = vpop.permute.xlu1 %7177  ;;  %v7366_v6 = vpack.i.bf16 %v11091_v58, %v11005_v28  ;;  %v7361_v48 = vpack.i.bf16 %v11094_v25, %v10947_v44  ;;  %v1966_v1 = vsel %vm1965_vm15, %v1957_v26, %v1883_v36  ;;  %v1607_v14 = vadd.f32 %v10636_v62, %v1606_v16 }
 0x2c2   :  { %v1828_v5 = vrot.slane %v11066_v50, 2  ;;  %v11105_v27 = vmax.f32 %v1702_v59, %v1780_v54  ;;  %v1602_v30 = vadd.f32 %v10636_v62, %v10987_v31  ;;  %v3872_v44 = vsel %vm1411_vm10, %v3840_v41, %v7169_v52  ;;  %v13325_v59 = vld [vmem:[#allocation24_spill] sm:$0xff] }
 0x2c3   :  { %v7173_v23 = vpop.permute.xlu0 %7172  ;;  %7367 = vrot.lane.b32.xlu0 %v7366_v6, %s7706_s0  ;;  %7362 = vrot.lane.b32.xlu2 %v7361_v48, %s7705_s15  ;;  %v1932_v28 = vsel %vm105_vm0, %v11066_v50, %v1812_v63  ;;  %v1749_v36 = vrot.slane %v1705_v42, 1  ;;  %v3873_v26 = vsel %vm1411_vm10, %v3841_v2, %v7170_v37  ;;  %v6640_v29 = vunpack.i.h.bf16 %v13325_v59  ;;  %v13326_v52 = vld [vmem:[#allocation28_spill] sm:$0xff] }
 0x2c4   :  { %v7175_v38 = vunpack.i.h.bf16 %v7173_v23  ;;  %v7174_v17 = vunpack.i.l.bf16 %v7173_v23  ;;  %v6639_v40 = vunpack.i.l.bf16 %v13325_v59  ;;  %v1974_v18 = vsel %vm448_vm2, %v1966_v1, %v1899_v13 }
 0x2c5   :  { %v1670_v51 = vmax.f32 %v1607_v14, 0.0  ;;  %v7180_v55 = vunpack.i.h.bf16 %v7178_v32  ;;  %v7179_v19 = vunpack.i.l.bf16 %v7178_v32  ;;  %v1915_v4 = vrot.slane %v10969_v49, 7  ;;  %v13327_v14 = vld [vmem:[#allocation43_spill] sm:$0xff] }
 0x2c6   :  { %v3904_v15 = vsel %vm1444_vm11, %v3872_v44, %v7174_v17  ;;  %v3905_v31 = vsel %vm1444_vm11, %v3873_v26, %v7175_v38  ;;  %v11119_v35 = vpop.permute.xlu2 %7242  ;;  %v1940_v63 = vsel %vm1566_vm5, %v1932_v28, %v1828_v5  ;;  %v1868_v54 = vrot.slane %v11105_v27, 4  ;;  %v13328_v38 = vld [vmem:[#allocation45_spill] sm:$0xff] }
 0x2c7   :  { %v3925_v12 = vpack.c.bf16 %v3905_v31, %v3904_v15  ;;  %v1668_v16 = vmax.f32 %v1602_v30, 0.0  ;;  %v6635_v37 = vunpack.i.h.bf16 %v13326_v52  ;;  %v1844_v41 = vrot.slane %v11066_v50, 3 }
 0x2c8   :  { %v11127_v2 = vmax.f32 %v1705_v42, %v1749_v36  ;;  %v4008_v13 = vadd.f32 %v10636_v62, %v11060_v9  ;;  %v6634_v6 = vunpack.i.l.bf16 %v13326_v52  ;;  %v7185_v49 = vunpack.i.h.bf16 %v10980_v60 }
 0x2c9   :  { %5656 = vmatmul.msk.bf16.gmra.mxu2 %vm1517_vm12, %v3925_v12  ;;  %v7193_v32 = vpop.permute.xlu1 %7192  ;;  %v7184_v48 = vunpack.i.l.bf16 %v10980_v60  ;;  %v11136_v1 = vsel %vm271_vm1, %v1974_v18, %v1915_v4  ;;  %v1949_v50 = vsel %vm1947_vm13, %v1940_v63, %v1844_v41  ;;  %v1707_v42 = vsel %vm1246_vm4, %v1670_v51, -inf }
 0x2ca   :  { %v3685_v9 = vsel %vm1213_vm3, %v13327_v14, %v7180_v55  ;;  %v3684_v17 = vsel %vm1213_vm3, %v13328_v38, %v7179_v19  ;;  %v1884_v30 = vrot.slane %v11105_v27, 5  ;;  %v1958_v44 = vsel %vm1956_vm14, %v1949_v50, %v1868_v54 }
 0x2cb   :  { %v7188_v23 = vpop.permute.xlu0 %7187  ;;  %v1706_v60 = vsel %vm1246_vm4, %v1668_v16, -inf  ;;  %v1813_v36 = vrot.slane %v11127_v2, 1  ;;  %v4075_v26 = vmax.f32 %v4008_v13, 0.0  ;;  %v3714_v51 = vsel %vm1246_vm4, %v3684_v17, %v7184_v48 }
 0x2cc   :  { %v4012_v5 = vpop.f32.mrf.mxu2  ;;  %v7190_v15 = vunpack.i.h.bf16 %v7188_v23  ;;  %v7189_v31 = vunpack.i.l.bf16 %v7188_v23  ;;  %v1708_v18 = vmax.f32 %v1706_v60, %v1707_v42  ;;  %v3715_v55 = vsel %vm1246_vm4, %v3685_v9, %v7185_v49 }
 0x2cd   :  { %v4013_v28 = vadd.f32 %v10636_v62, %v4012_v5  ;;  %v11155_v4 = vsel %vm1411_vm10, %v10645_v61, %v6634_v6  ;;  %v1900_v63 = vrot.slane %v11105_v27, 6  ;;  %v4010_v54 = vadd.f32 %v10636_v62, %v4009_v22 }
 0x2ce   :  { %v11151_v12 = vpop.permute.xlu2 %7257  ;;  %v1998_v16 = vrot.slane %v11136_v1, 7  ;;  %v1967_v41 = vsel %vm1965_vm15, %v1958_v44, %v1884_v30  ;;  %v1829_v13 = vrot.slane %v11127_v2, 2  ;;  %v7195_v48 = vunpack.i.h.bf16 %v7193_v32 }
 0x2cf   :  { %v4077_v19 = vmax.f32 %v4013_v28, 0.0  ;;  %v7194_v23 = vunpack.i.l.bf16 %v7193_v32  ;;  %v4111_v49 = vsel %vm1246_vm4, %v4075_v26, -inf  ;;  %v3747_v50 = vsel %vm1279_vm6, %v3715_v55, %v7190_v15 }
 0x2d0   :  { %v3746_v42 = vsel %vm1279_vm6, %v3714_v51, %v7189_v31  ;;  %v1933_v22 = vsel %vm105_vm0, %v11127_v2, %v1813_v36  ;;  %v1781_v14 = vrot.slane %v1708_v18, 1  ;;  %v7200_v9 = vunpack.i.h.bf16 %v11020_v43  ;;  %v11173_v51 = vpop.f32.mrf.mxu0 }
 0x2d1   :  { %v4112_v61 = vsel %vm1246_vm4, %v4077_v19, -inf  ;;  %v7208_v6 = vpop.permute.xlu1 %7207  ;;  %v7199_v5 = vunpack.i.l.bf16 %v11020_v43  ;;  %v4076_v32 = vmax.f32 %v4010_v54, 0.0  ;;  %v3779_v28 = vsel %vm1312_vm7, %v3747_v50, %v7195_v48 }
 0x2d2   :  { %v4113_v38 = vmax.f32 %v4111_v49, %v4112_v61  ;;  %v3778_v26 = vsel %vm1312_vm7, %v3746_v42, %v7194_v23  ;;  %v7210_v36 = vunpack.i.h.bf16 %v7208_v6  ;;  %v7209_v55 = vunpack.i.l.bf16 %v7208_v6 }
 0x2d3   :  { %v7203_v17 = vpop.permute.xlu0 %7202  ;;  %v11179_v54 = vmax.f32 %v1708_v18, %v1781_v14  ;;  %v1941_v23 = vsel %vm1566_vm5, %v1933_v22, %v1829_v13  ;;  %v7214_v42 = vunpack.i.l.bf16 %v11051_v57  ;;  %v4114_v6 = vsel %vm1246_vm4, %v4076_v32, -inf }
 0x2d4   :  { %v7205_v30 = vunpack.i.h.bf16 %v7203_v17  ;;  %v7204_v44 = vunpack.i.l.bf16 %v7203_v17  ;;  %v4014_v60 = vpop.f32.mrf.mxu2  ;;  %v4157_v15 = vrot.slane %v4113_v38, 1  ;;  %v1845_v32 = vrot.slane %v11127_v2, 3 }
 0x2d5   :  { %v4015_v31 = vadd.f32 %v10636_v62, %v4014_v60  ;;  %v7215_v62 = vunpack.i.h.bf16 %v11051_v57  ;;  %v1916_v57 = vrot.slane %v11105_v27, 7 }
 0x2d6   :  { %v1467_v19 = vsel %vm1444_vm11, %v10914_v8, %v7204_v44  ;;  %v1468_v43 = vsel %vm1444_vm11, %v10918_v10, %v7205_v30  ;;  %v4173_v49 = vmax.f32 %v4113_v38, %v4157_v15  ;;  %v11181_v50 = vpop.permute.xlu2 %7272  ;;  %v3810_v8 = vsel %vm1345_vm8, %v3778_v26, %v7199_v5 }
 0x2d7   :  { %v4078_v61 = vmax.f32 %v4015_v31, 0.0  ;;  %v1488_v48 = vpack.c.bf16 %v1468_v43, %v1467_v19  ;;  %v3811_v10 = vsel %vm1345_vm8, %v3779_v28, %v7200_v9  ;;  %v3842_v38 = vsel %vm1378_vm9, %v3810_v8, %v7209_v55 }
 0x2d8   :  { %v4221_v17 = vrot.slane %v4173_v49, 1  ;;  %v4237_v14 = vrot.slane %v4173_v49, 2  ;;  %v3843_v13 = vsel %vm1378_vm9, %v3811_v10, %v7210_v36  ;;  %v1869_v44 = vrot.slane %v11179_v54, 4 }
 0x2d9   :  { %v4115_v18 = vsel %vm1246_vm4, %v4078_v61, -inf  ;;  %5588 = vmatmul.msk.bf16.gmra.mxu0 %vm1517_vm12, %v1488_v48  ;;  %v7223_v30 = vpop.permute.xlu1 %7222  ;;  %v1975_v15 = vsel %vm448_vm2, %v1967_v41, %v1900_v63  ;;  %v1950_v31 = vsel %vm1947_vm13, %v1941_v23, %v1845_v32  ;;  %v1885_v36 = vrot.slane %v11179_v54, 5 }
 0x2da   :  { %v4116_v22 = vmax.f32 %v4114_v6, %v4115_v18  ;;  %v4341_v5 = vsel %vm105_vm0, %v4173_v49, %v4221_v17  ;;  %v3874_v55 = vsel %vm1411_vm10, %v3842_v38, %v7214_v42  ;;  %v3875_v27 = vsel %vm1411_vm10, %v3843_v13, %v7215_v62  ;;  %v11214_v62 = vpop.f32.mrf.mxu0 }
 0x2db   :  { %v7218_v9 = vpop.permute.xlu0 %7217  ;;  %v4349_v2 = vsel %vm1566_vm5, %v4341_v5, %v4237_v14  ;;  %v1959_v48 = vsel %vm1956_vm14, %v1950_v31, %v1869_v44  ;;  %v4253_v6 = vrot.slane %v4173_v49, 3  ;;  %v7225_v17 = vunpack.i.h.bf16 %v7223_v30  ;;  %v13329_v5 = vld [vmem:[#allocation46_spill] sm:$0xff] }
 0x2dc   :  { %v4189_v60 = vrot.slane %v4116_v22, 1  ;;  %v7220_v28 = vunpack.i.h.bf16 %v7218_v9  ;;  %v7219_v26 = vunpack.i.l.bf16 %v7218_v9  ;;  %v11212_v23 = vsel %vm1411_vm10, %v10649_v24, %v6635_v37 }
 0x2dd   :  { %v7224_v10 = vunpack.i.l.bf16 %v7223_v30  ;;  %v1901_v18 = vrot.slane %v11179_v54, 6  ;;  %v4357_v14 = vsel %vm1947_vm13, %v4349_v2, %v4253_v6  ;;  %v11222_v49 = vsel %vm105_vm0, 0.0, %v1998_v16 }
 0x2de   :  { %v4205_v19 = vmax.f32 %v4116_v22, %v4189_v60  ;;  %v3906_v43 = vsel %vm1444_vm11, %v3874_v55, %v7219_v26  ;;  %v3907_v61 = vsel %vm1444_vm11, %v3875_v27, %v7220_v28  ;;  %v11206_v41 = vpop.permute.xlu2 %7287  ;;  %v1983_v52 = vsel %vm271_vm1, %v1975_v15, %v1916_v57  ;;  %v11232_v60 = vpop.f32.mrf.mxu2  ;;  %v13330_v57 = vld [vmem:[#allocation38_spill] sm:$0xff] }
 0x2df   :  { %v3926_v63 = vpack.c.bf16 %v3907_v61, %v3906_v43  ;;  %v1968_v24 = vsel %vm1965_vm15, %v1959_v48, %v1885_v36  ;;  %v7230_v37 = vunpack.i.h.bf16 %v11081_v46  ;;  %v7229_v30 = vunpack.i.l.bf16 %v11081_v46  ;;  %v13331_v36 = vld [vmem:[#allocation36_spill] sm:$0xff] }
 0x2e0   :  { %v4277_v42 = vrot.slane %v4205_v19, 4  ;;  %v4293_v8 = vrot.slane %v4205_v19, 5  ;;  %v4309_v38 = vrot.slane %v4205_v19, 6  ;;  %v4325_v32 = vrot.slane %v4205_v19, 7 }
 0x2e1   :  { %5657 = vmatmul.msk.bf16.gmra.mxu2 %vm1517_vm12, %v3926_v63  ;;  %v7238_v22 = vpop.permute.xlu1 %7237  ;;  %v3687_v9 = vsel %vm1213_vm3, %v13329_v5, %v7225_v17  ;;  %v3686_v26 = vsel %vm1213_vm3, %v13330_v57, %v7224_v10  ;;  %v11240_v31 = vsel %vm105_vm0, %v1998_v16, 0.0  ;;  %v1999_v46 = vrot.slane %v1983_v52, 7 }
 0x2e2   :  { %v4365_v13 = vsel %vm1956_vm14, %v4357_v14, %v4277_v42  ;;  %v6649_v55 = vunpack.i.l.bf16 %v13331_v36  ;;  %v1976_v19 = vsel %vm448_vm2, %v1968_v24, %v1901_v18  ;;  %v1917_v43 = vrot.slane %v11179_v54, 7 }
 0x2e3   :  { %v4373_v44 = vsel %vm1965_vm15, %v4365_v13, %v4293_v8  ;;  %v7233_v28 = vpop.permute.xlu0 %7232  ;;  %v3717_v61 = vsel %vm1246_vm4, %v3687_v9, %v7230_v37  ;;  %v3716_v17 = vsel %vm1246_vm4, %v3686_v26, %v7229_v30  ;;  %v2045_v16 = vrot.slane %v11222_v49, 1 }
 0x2e4   :  { %v4381_v15 = vsel %vm448_vm2, %v4373_v44, %v4309_v38  ;;  %v7235_v27 = vunpack.i.h.bf16 %v7233_v28  ;;  %v7234_v48 = vunpack.i.l.bf16 %v7233_v28  ;;  %v2046_v63 = vrot.slane %v11240_v31, 1  ;;  %v11267_v38 = vpop.f32.mrf.mxu0 }
 0x2e5   :  { %v4389_v2 = vsel %vm271_vm1, %v4381_v15, %v4325_v32  ;;  %v2091_v42 = vrot.slane %v11222_v49, 2  ;;  %v7240_v8 = vunpack.i.h.bf16 %v7238_v22  ;;  %v11254_v10 = vsel %vm105_vm0, 0.0, %v1999_v46 }
 0x2e6   :  { %v4405_v6 = vrot.slane %v4389_v2, 7  ;;  %v11248_v1 = vpop.permute.xlu2 %7302  ;;  %v11257_v54 = vsel %vm105_vm0, %v1999_v46, 0.0  ;;  %v11260_v18 = vsel %vm271_vm1, %v1976_v19, %v1917_v43  ;;  %v7239_v14 = vunpack.i.l.bf16 %v7238_v22  ;;  %v11282_v43 = vpop.f32.mrf.mxu2 }
 0x2e7   :  { %v3749_v52 = vsel %vm1279_vm6, %v3717_v61, %v7235_v27  ;;  %v3748_v13 = vsel %vm1279_vm6, %v3716_v17, %v7234_v48  ;;  %v7245_v22 = vunpack.i.h.bf16 %v11119_v35  ;;  %v7244_v9 = vunpack.i.l.bf16 %v11119_v35 }
 0x2e8   :  { %v11264_v24 = vsel %vm105_vm0, 0.0, %v4405_v6  ;;  %v4429_v37 = vsel %vm105_vm0, %v4405_v6, 0.0  ;;  %v3781_v15 = vsel %vm1312_vm7, %v3749_v52, %v7240_v8  ;;  %v3780_v19 = vsel %vm1312_vm7, %v3748_v13, %v7239_v14 }
 0x2e9   :  { %v7253_v30 = vpop.permute.xlu1 %7252  ;;  %v7371_v32 = vpack.i.bf16 %v11264_v24, %v11071_v53  ;;  %v4497_v44 = vrot.slane %v11264_v24, 2  ;;  %v4498_v5 = vrot.slane %v4429_v37, 2  ;;  %v4455_v57 = vrot.slane %v11264_v24, 1 }
 0x2ea   :  { %v4456_v26 = vrot.slane %v4429_v37, 1  ;;  %v7255_v61 = vunpack.i.h.bf16 %v7253_v30  ;;  %v7254_v6 = vunpack.i.l.bf16 %v7253_v30  ;;  %v2092_v13 = vrot.slane %v11240_v31, 2  ;;  %v11312_v31 = vld [vmem:[%s12717_s2] ss:$0 sm:$0xff] }
 0x2eb   :  { %v7248_v28 = vpop.permute.xlu0 %7247  ;;  %7372 = vrot.lane.b32.xlu1 %v7371_v32, %s7707_s14  ;;  %v11279_v2 = vsel %vm448_vm2, %v4497_v44, %v4498_v5  ;;  %v2048_v32 = vrot.slane %v11254_v10, 1  ;;  %v2049_v30 = vrot.slane %v11257_v54, 1  ;;  %v7260_v44 = vunpack.i.h.bf16 %v11151_v12 }
 0x2ec   :  { %v7250_v46 = vunpack.i.h.bf16 %v7248_v28  ;;  %v7249_v27 = vunpack.i.l.bf16 %v7248_v28  ;;  %v7381_v35 = vpack.i.bf16 %v11279_v2, %v11091_v58  ;;  %v11287_v48 = vsel %vm271_vm1, %v4455_v57, %v4456_v26 }
 0x2ed   :  { %v7376_v52 = vpack.i.bf16 %v11287_v48, %v11094_v25  ;;  %v2000_v5 = vrot.slane %v11260_v18, 7  ;;  %v7259_v28 = vunpack.i.l.bf16 %v11151_v12  ;;  %v4018_v57 = vadd.f32 %v11312_v31, %v11232_v60 }
 0x2ee   :  { %v1469_v17 = vsel %vm1444_vm11, %v11155_v4, %v7249_v27  ;;  %v1470_v8 = vsel %vm1444_vm11, %v11212_v23, %v7250_v46  ;;  %7382 = vrot.lane.b32.xlu0 %v7381_v35, %s7708_s24  ;;  %v11296_v37 = vpop.permute.xlu2 %7317  ;;  %v6650_v4 = vunpack.i.h.bf16 %v13331_v36  ;;  %v11305_v23 = vsel %vm271_vm1, %v2045_v16, %v2046_v63 }
 0x2ef   :  { %v1489_v14 = vpack.c.bf16 %v1470_v8, %v1469_v17  ;;  %7377 = vrot.lane.b32.xlu2 %v7376_v52, %s7709_s30  ;;  %v3812_v26 = vsel %vm1345_vm8, %v3780_v19, %v7244_v9  ;;  %v3813_v46 = vsel %vm1345_vm8, %v3781_v15, %v7245_v22  ;;  %v7386_v12 = vpack.i.bf16 %v11094_v25, %v11305_v23 }
 0x2f0   :  { %v3844_v16 = vsel %vm1378_vm9, %v3812_v26, %v7254_v6  ;;  %v3845_v63 = vsel %vm1378_vm9, %v3813_v46, %v7255_v61  ;;  %v1442_v60 = vsel %vm1411_vm10, %v10658_v0, %v6649_v55  ;;  %v7396_v22 = vpack.i.bf16 %v11254_v10, %v11222_v49  ;;  %v11338_v61 = vpop.f32.mrf.mxu0 }
 0x2f1   :  { %5589 = vmatmul.msk.bf16.gmra.mxu0 %vm1517_vm12, %v1489_v14  ;;  %v11321_v18 = vpop.permute.xlu1 %7267  ;;  %v11332_v9 = vsel %vm448_vm2, %v2091_v42, %v2092_v13  ;;  %v11335_v15 = vsel %vm271_vm1, %v2048_v32, %v2049_v30  ;;  %v2094_v19 = vrot.slane %v11254_v10, 2  ;;  %v11342_v0 = vsel %vm105_vm0, 0.0, %v2000_v5 }
 0x2f2   :  { %v2095_v6 = vrot.slane %v11257_v54, 2  ;;  %v4079_v17 = vmax.f32 %v4018_v57, 0.0  ;;  %v3876_v42 = vsel %vm1411_vm10, %v3844_v16, %v7259_v28  ;;  %v3877_v8 = vsel %vm1411_vm10, %v3845_v63, %v7260_v44 }
 0x2f3   :  { %v7263_v27 = vpop.permute.xlu0 %7262  ;;  %7387 = vrot.lane.b32.xlu1 %v7386_v12, %s7699_s23  ;;  %v11348_v14 = vsel %vm105_vm0, %v2000_v5, 0.0  ;;  %v7391_v26 = vpack.i.bf16 %v11091_v58, %v11332_v9  ;;  %v7320_v54 = vunpack.i.h.bf16 %v11296_v37  ;;  %v7401_v44 = vpack.i.bf16 %v11335_v15, %v11305_v23 }
 0x2f4   :  { %v7265_v25 = vunpack.i.h.bf16 %v7263_v27  ;;  %v7264_v35 = vunpack.i.l.bf16 %v7263_v27  ;;  %v1443_v5 = vsel %vm1411_vm10, %v10663_v7, %v6650_v4  ;;  %v7319_v46 = vunpack.i.l.bf16 %v11296_v37 }
 0x2f5   :  { %v4022_v52 = vpop.f32.mrf.mxu2  ;;  %v4117_v12 = vsel %vm1246_vm4, %v4079_v17, -inf  ;;  %v11372_v23 = vsel %vm448_vm2, %v2094_v19, %v2095_v6  ;;  %v2051_v27 = vrot.slane %v11342_v0, 1  ;;  %v2052_v7 = vrot.slane %v11348_v14, 1 }
 0x2f6   :  { %v3908_v13 = vsel %vm1444_vm11, %v3876_v42, %v7264_v35  ;;  %v3909_v32 = vsel %vm1444_vm11, %v3877_v8, %v7265_v25  ;;  %v4023_v30 = vadd.f32 %v11312_v31, %v4022_v52  ;;  %7397 = vrot.lane.b32.xlu0 %v7396_v22, %s7703_s12  ;;  %v11357_v28 = vpop.permute.xlu2 %7332  ;;  %v4020_v37 = vadd.f32 %v11312_v31, %v11282_v43  ;;  %v13333_v52 = vld [vmem:[#allocation61_spill] sm:$0xff] }
 0x2f7   :  { %v3927_v57 = vpack.c.bf16 %v3909_v32, %v3908_v13  ;;  %7392 = vrot.lane.b32.xlu2 %v7391_v26, %s7701_s29  ;;  %v7335_v58 = vunpack.i.h.bf16 %v11357_v28  ;;  %v7334_v63 = vunpack.i.l.bf16 %v11357_v28  ;;  %v1438_v6 = vsel %vm1411_vm10, %v10877_v47, %v6639_v40  ;;  %v13334_v32 = vld [vmem:[#allocation132_spill] sm:$0xff] }
 0x2f8   :  { %v4081_v16 = vmax.f32 %v4023_v30, 0.0  ;;  %v1439_v43 = vsel %vm1411_vm10, %v10898_v3, %v6640_v29  ;;  %v6564_v30 = vunpack.i.l.bf16 %v13334_v32  ;;  %v1471_v26 = vsel %vm1444_vm11, %v1438_v6, %v7319_v46  ;;  %v13336_v6 = vld [vmem:[#allocation62_spill] sm:$0xff] }
 0x2f9   :  { %5658 = vmatmul.msk.bf16.gmra.mxu2 %vm1517_vm12, %v3927_v57  ;;  %v11379_v25 = vpop.permute.xlu1 %7282  ;;  %v1475_v35 = vsel %vm1444_vm11, %v1442_v60, %v7334_v63  ;;  %v1476_v19 = vsel %vm1444_vm11, %v1443_v5, %v7335_v58  ;;  %v13332_v60 = vunpack.i.l.bf16 %v13302_v45  ;;  %v1472_v47 = vsel %vm1444_vm11, %v1439_v43, %v7320_v54  ;;  %v11411_v5 = vpop.f32.mrf.mxu0 }
 0x2fa   :  { %v4118_v22 = vsel %vm1246_vm4, %v4081_v16, -inf  ;;  %v1492_v8 = vpack.c.bf16 %v1476_v19, %v1475_v35  ;;  %v6565_v59 = vunpack.i.h.bf16 %v13334_v32  ;;  %v7411_v40 = vpack.i.bf16 %v11342_v0, %v11254_v10 }
 0x2fb   :  { %v4119_v17 = vmax.f32 %v4117_v12, %v4118_v22  ;;  %v11395_v42 = vpop.permute.xlu0 %7277  ;;  %v1374_v13 = vsel %vm1345_vm8, %v13333_v52, %v13332_v60  ;;  %7402 = vrot.lane.b32.xlu1 %v7401_v44, %s7705_s15  ;;  %v7406_v57 = vpack.i.bf16 %v11372_v23, %v11332_v9  ;;  %v4080_v16 = vmax.f32 %v4020_v37, 0.0  ;;  %v13337_v60 = vld [vmem:[#allocation56_spill] sm:$0xff] }
 0x2fc   :  { %5592 = vmatmul.msk.bf16.vlgmr.msra.gmra.mxu1 %vm1517_vm12, %v1492_v8  ;;  %v11415_v54 = vsel %vm271_vm1, %v2051_v27, %v2052_v7  ;;  %v2097_v44 = vrot.slane %v11342_v0, 2  ;;  %v7275_v12 = vunpack.i.h.bf16 %v11181_v50  ;;  %v1490_v22 = vpack.c.bf16 %v1472_v47, %v1471_v26 }
 0x2fd   :  { %v4158_v3 = vrot.slane %v4119_v17, 1  ;;  %v4024_v29 = vpop.f32.mrf.mxu2  ;;  %v2098_v9 = vrot.slane %v11348_v14, 2  ;;  %v13335_v19 = vunpack.i.h.bf16 %v13302_v45  ;;  %v1407_v43 = vsel %vm1378_vm9, %v1374_v13, %v6564_v30 }
 0x2fe   :  { %v4025_v46 = vadd.f32 %v11312_v31, %v4024_v29  ;;  %7412 = vrot.lane.b32.xlu0 %v7411_v40, %s7707_s14  ;;  %v7274_v27 = vunpack.i.l.bf16 %v11181_v50  ;;  %v6644_v52 = vunpack.i.l.bf16 %v13337_v60  ;;  %v11434_v45 = vadd.f32 %v11312_v31, %v11173_v51 }
 0x2ff   :  { %v4174_v35 = vmax.f32 %v4119_v17, %v4158_v3  ;;  %v1375_v37 = vsel %vm1345_vm8, %v13336_v6, %v13335_v19  ;;  %7407 = vrot.lane.b32.xlu2 %v7406_v57, %s7706_s0  ;;  %v6645_v17 = vunpack.i.h.bf16 %v13337_v60  ;;  %v4120_v14 = vsel %vm1246_vm4, %v4080_v16, -inf }
 0x300   :  { %v4082_v7 = vmax.f32 %v4025_v46, 0.0  ;;  %v1408_v8 = vsel %vm1378_vm9, %v1375_v37, %v6565_v59  ;;  %v7416_v30 = vpack.i.bf16 %v11415_v54, %v11335_v15  ;;  %v3691_v26 = vsel %vm1213_vm3, %v10586_v33, %v7275_v12 }
 0x301   :  { %v4222_v32 = vrot.slane %v4174_v35, 1  ;;  %5590 = vmatmul.msk.bf16.gmra.mxu0 %vm1517_vm12, %v1490_v22  ;;  %v11438_v13 = vpop.permute.xlu1 %7297  ;;  %v4238_v47 = vrot.slane %v4174_v35, 2  ;;  %v11445_v29 = vsel %vm448_vm2, %v2097_v44, %v2098_v9  ;;  %v3690_v51 = vsel %vm1213_vm3, %v10577_v11, %v7274_v27  ;;  %v11467_v27 = vpop.f32.mrf.mxu0 }
 0x302   :  { %v4121_v50 = vsel %vm1246_vm4, %v4082_v7, -inf  ;;  %v7285_v57 = vunpack.i.h.bf16 %v11379_v25  ;;  %v7284_v16 = vunpack.i.l.bf16 %v11379_v25  ;;  %v7426_v12 = vpack.i.bf16 %v11335_v15, %v11287_v48 }
 0x303   :  { %v4122_v59 = vmax.f32 %v4120_v14, %v4121_v50  ;;  %v7293_v3 = vpop.permute.xlu0 %7292  ;;  %v4342_v40 = vsel %vm105_vm0, %v4174_v35, %v4222_v32  ;;  %7417 = vrot.lane.b32.xlu1 %v7416_v30, %s7709_s30  ;;  %v11456_v44 = vsel %vm1411_vm10, %v1407_v43, %v6644_v52  ;;  %v11459_v9 = vsel %vm1411_vm10, %v1408_v8, %v6645_v17 }
 0x304   :  { %v7295_v22 = vunpack.i.h.bf16 %v7293_v3  ;;  %v7294_v33 = vunpack.i.l.bf16 %v7293_v3  ;;  %v7421_v11 = vpack.i.bf16 %v11445_v29, %v11372_v23  ;;  %v1671_v19 = vmax.f32 %v11434_v45, 0.0 }
 0x305   :  { %v4190_v46 = vrot.slane %v4122_v59, 1  ;;  %v7305_v25 = vunpack.i.h.bf16 %v11248_v1  ;;  %v4350_v6 = vsel %vm1566_vm5, %v4342_v40, %v4238_v47  ;;  %v7304_v15 = vunpack.i.l.bf16 %v11248_v1 }
 0x306   :  { %7427 = vrot.lane.b32.xlu0 %v7426_v12, %s7699_s23  ;;  %v4254_v43 = vrot.slane %v4174_v35, 3  ;;  %v3720_v7 = vsel %vm1246_vm4, %v3690_v51, %v7284_v16  ;;  %v3721_v8 = vsel %vm1246_vm4, %v3691_v26, %v7285_v57  ;;  %v1615_v45 = vadd.f32 %v11312_v31, %v11267_v38  ;;  %v13338_v12 = vld [vmem:[#allocation44_spill] sm:$0xff] }
 0x307   :  { %v4206_v37 = vmax.f32 %v4122_v59, %v4190_v46  ;;  %7422 = vrot.lane.b32.xlu2 %v7421_v11, %s7708_s24  ;;  %v3753_v52 = vsel %vm1279_vm6, %v3721_v8, %v7295_v22  ;;  %v3752_v32 = vsel %vm1279_vm6, %v3720_v7, %v7294_v33  ;;  %v7270_v14 = vunpack.i.h.bf16 %v11321_v18 }
 0x308   :  { %v4358_v1 = vsel %vm1947_vm13, %v4350_v6, %v4254_v43  ;;  %v7431_v50 = vpack.i.bf16 %v11372_v23, %v11279_v2  ;;  %v7269_v51 = vunpack.i.l.bf16 %v11321_v18  ;;  %v3784_v38 = vsel %vm1312_vm7, %v3752_v32, %v7304_v15 }
 0x309   :  { %v4278_v60 = vrot.slane %v4206_v37, 4  ;;  %v4294_v17 = vrot.slane %v4206_v37, 5  ;;  %v7313_v35 = vpop.permute.xlu1 %7312  ;;  %v4310_v30 = vrot.slane %v4206_v37, 6  ;;  %v3785_v57 = vsel %vm1312_vm7, %v3753_v52, %v7305_v25 }
 0x30a   :  { %v7315_v47 = vunpack.i.h.bf16 %v7313_v35  ;;  %v7314_v59 = vunpack.i.l.bf16 %v7313_v35  ;;  %v4326_v16 = vrot.slane %v4206_v37, 7  ;;  %v3689_v18 = vsel %vm1213_vm3, %v13338_v12, %v7270_v14 }
 0x30b   :  { %v4366_v26 = vsel %vm1956_vm14, %v4358_v1, %v4278_v60  ;;  %v11482_v3 = vpop.permute.xlu0 %7307  ;;  %7432 = vrot.lane.b32.xlu1 %v7431_v50, %s7701_s29  ;;  %v7280_v11 = vunpack.i.h.bf16 %v11395_v42  ;;  %v13339_v6 = vunpack.i.l.bf16 %v13304_v56  ;;  %v13340_v15 = vunpack.i.h.bf16 %v13304_v56  ;;  %v1624_v1 = vpop.f32.mrf.mxu0 }
 0x30c   :  { %v4374_v40 = vsel %vm1965_vm15, %v4366_v26, %v4294_v17  ;;  %v3816_v23 = vsel %vm1345_vm8, %v3784_v38, %v7314_v59  ;;  %v3817_v46 = vsel %vm1345_vm8, %v3785_v57, %v7315_v47  ;;  %v11491_v22 = vpop.f32.mrf.mxu2  ;;  %v7279_v43 = vunpack.i.l.bf16 %v11395_v42  ;;  %v13341_v17 = vld [vmem:[#allocation60_spill] sm:$0xff] }
 0x30d   :  { %v4382_v33 = vsel %vm448_vm2, %v4374_v40, %v4310_v30  ;;  %v3848_v25 = vsel %vm1378_vm9, %v3816_v23, %v13339_v6  ;;  %v3849_v37 = vsel %vm1378_vm9, %v3817_v46, %v13340_v15  ;;  %v3688_v52 = vsel %vm1213_vm3, %v13341_v17, %v7269_v51 }
 0x30e   :  { %v3880_v7 = vsel %vm1411_vm10, %v3848_v25, %v6649_v55  ;;  %v3881_v8 = vsel %vm1411_vm10, %v3849_v37, %v6650_v4  ;;  %v4390_v60 = vsel %vm271_vm1, %v4382_v33, %v4326_v16  ;;  %v1709_v55 = vsel %vm1246_vm4, %v1671_v19, -inf }
 0x30f   :  { %v3912_v56 = vsel %vm1444_vm11, %v3880_v7, %v7334_v63  ;;  %v3913_v42 = vsel %vm1444_vm11, %v3881_v8, %v7335_v58  ;;  %v4406_v32 = vrot.slane %v4390_v60, 7  ;;  %v11522_v36 = vadd.f32 %v11312_v31, %v11214_v62 }
 0x310   :  { %v1673_v4 = vmax.f32 %v1615_v45, 0.0  ;;  %v3929_v14 = vpack.c.bf16 %v3913_v42, %v3912_v56  ;;  %v7290_v35 = vunpack.i.h.bf16 %v11206_v41  ;;  %v7289_v50 = vunpack.i.l.bf16 %v11206_v41 }
 0x311   :  { %v7328_v30 = vpop.permute.xlu1 %7327  ;;  %v11527_v63 = vsel %vm105_vm0, 0.0, %v4406_v32  ;;  %v4430_v28 = vsel %vm105_vm0, %v4406_v32, 0.0  ;;  %v3719_v58 = vsel %vm1246_vm4, %v3689_v18, %v7280_v11  ;;  %v3718_v19 = vsel %vm1246_vm4, %v3688_v52, %v7279_v43 }
 0x312   :  { %5660 = vmatmul.msk.bf16.vlgmr.msra.gmra.mxu3 %vm1517_vm12, %v3929_v14  ;;  %v7436_v62 = vpack.i.bf16 %v11527_v63, %v11264_v24  ;;  %v4458_v45 = vrot.slane %v11527_v63, 1  ;;  %v7300_v41 = vunpack.i.h.bf16 %v11438_v13  ;;  %v7299_v47 = vunpack.i.l.bf16 %v11438_v13 }
 0x313   :  { %v7323_v26 = vpop.permute.xlu0 %7322  ;;  %v4459_v59 = vrot.slane %v4430_v28, 1  ;;  %v4500_v51 = vrot.slane %v11527_v63, 2  ;;  %v1710_v40 = vsel %vm1246_vm4, %v1673_v4, -inf  ;;  %v7310_v38 = vunpack.i.h.bf16 %v11482_v3 }
 0x314   :  { %v7309_v57 = vunpack.i.l.bf16 %v11482_v3  ;;  %7437 = vrot.lane.b32.xlu2 %v7436_v62, %s7703_s12  ;;  %v4501_v16 = vrot.slane %v4430_v28, 2  ;;  %v1617_v23 = vadd.f32 %v11312_v31, %v11338_v61  ;;  %v7325_v46 = vunpack.i.h.bf16 %v7323_v26  ;;  %v4029_v11 = vpop.f32.mrf.mxu2 }
 0x315   :  { %v7324_v33 = vunpack.i.l.bf16 %v7323_v26  ;;  %v11546_v12 = vsel %vm271_vm1, %v4458_v45, %v4459_v59  ;;  %v3750_v13 = vsel %vm1279_vm6, %v3718_v19, %v7289_v50  ;;  %v3751_v18 = vsel %vm1279_vm6, %v3719_v58, %v7290_v35  ;;  %v1626_v50 = vpop.f32.mrf.mxu0 }
 0x316   :  { %v7441_v6 = vpack.i.bf16 %v11546_v12, %v11287_v48  ;;  %v11553_v3 = vsel %vm448_vm2, %v4500_v51, %v4501_v16  ;;  %v1625_v25 = vadd.f32 %v11312_v31, %v1624_v1  ;;  %v3782_v61 = vsel %vm1312_vm7, %v3750_v13, %v7299_v47 }
 0x317   :  { %v3783_v15 = vsel %vm1312_vm7, %v3751_v18, %v7300_v41  ;;  %v7446_v37 = vpack.i.bf16 %v11553_v3, %v11279_v2  ;;  %v3814_v43 = vsel %vm1345_vm8, %v3782_v61, %v7309_v57  ;;  %v7330_v8 = vunpack.i.h.bf16 %v7328_v30 }
 0x318   :  { %v3815_v7 = vsel %vm1345_vm8, %v3783_v15, %v7310_v38  ;;  %v7329_v60 = vunpack.i.l.bf16 %v7328_v30  ;;  %7442 = vrot.lane.b32.xlu0 %v7441_v6, %s7705_s15  ;;  %v1672_v48 = vmax.f32 %v11522_v36, 0.0  ;;  %v1620_v17 = vadd.f32 %v11312_v31, %v11411_v5 }
 0x319   :  { %v3846_v52 = vsel %vm1378_vm9, %v3814_v43, %v7324_v33  ;;  %v3847_v56 = vsel %vm1378_vm9, %v3815_v7, %v7325_v46  ;;  %7447 = vrot.lane.b32.xlu1 %v7446_v37, %s7706_s0  ;;  %v7343_v2 = vpop.permute.xlu1 %7342  ;;  %v1711_v42 = vmax.f32 %v1709_v55, %v1710_v40  ;;  %v1674_v32 = vmax.f32 %v1617_v23, 0.0 }
 0x31a   :  { %v7345_v4 = vunpack.i.h.bf16 %v7343_v2  ;;  %v7344_v14 = vunpack.i.l.bf16 %v7343_v2  ;;  %v1677_v35 = vmax.f32 %v1625_v25, 0.0  ;;  %v4028_v36 = vadd.f32 %v11312_v31, %v11491_v22 }
 0x31b   :  { %v7338_v1 = vpop.permute.xlu0 %7337  ;;  %v3878_v19 = vsel %vm1411_vm10, %v3846_v52, %v7329_v60  ;;  %v3879_v55 = vsel %vm1411_vm10, %v3847_v56, %v7330_v8  ;;  %v1675_v26 = vmax.f32 %v1620_v17, 0.0  ;;  %v1750_v47 = vrot.slane %v1711_v42, 1 }
 0x31c   :  { %v7340_v30 = vunpack.i.h.bf16 %v7338_v1  ;;  %v7339_v28 = vunpack.i.l.bf16 %v7338_v1  ;;  %v1473_v5 = vsel %vm1444_vm11, %v11456_v44, %v7344_v14  ;;  %v1474_v58 = vsel %vm1444_vm11, %v11459_v9, %v7345_v4 }
 0x31d   :  { %v1491_v62 = vpack.c.bf16 %v1474_v58, %v1473_v5  ;;  %v1713_v22 = vsel %vm1246_vm4, %v1674_v32, -inf  ;;  %v1627_v59 = vadd.f32 %v11312_v31, %v1626_v50  ;;  %v1716_v40 = vsel %vm1246_vm4, %v1677_v35, -inf }
 0x31e   :  { %v3910_v45 = vsel %vm1444_vm11, %v3878_v19, %v7339_v28  ;;  %v3911_v41 = vsel %vm1444_vm11, %v3879_v55, %v7340_v30  ;;  %v4032_v44 = vpop.f32.mrf.mxu2  ;;  %v4083_v9 = vmax.f32 %v4028_v36, 0.0  ;;  %v1712_v57 = vsel %vm1246_vm4, %v1672_v48, -inf }
 0x31f   :  { %v3928_v51 = vpack.c.bf16 %v3911_v41, %v3910_v45  ;;  %v4033_v38 = vadd.f32 %v11312_v31, %v4032_v44  ;;  %5591 = vmatmul.msk.bf16.gmra.mxu0 %vm1517_vm12, %v1491_v62  ;;  %v1622_v16 = vadd.f32 %v11312_v31, %v11467_v27  ;;  %v1714_v23 = vmax.f32 %v1712_v57, %v1713_v22 }
 0x320   :  { %v1715_v46 = vsel %vm1246_vm4, %v1675_v26, -inf  ;;  %v1766_v13 = vmax.f32 %v1711_v42, %v1750_v47  ;;  %v1678_v6 = vmax.f32 %v1627_v59, 0.0  ;;  %v4123_v25 = vsel %vm1246_vm4, %v4083_v9, -inf }
 0x321   :  { %5659 = vmatmul.msk.bf16.gmra.mxu2 %vm1517_vm12, %v3928_v51  ;;  %v4085_v33 = vmax.f32 %v4033_v38, 0.0  ;;  %v1717_v18 = vmax.f32 %v1715_v46, %v1716_v40  ;;  %v4030_v61 = vadd.f32 %v11312_v31, %v4029_v11  ;;  %v1676_v37 = vmax.f32 %v1622_v16, 0.0 }
 0x322   :  { %v1782_v7 = vrot.slane %v1714_v23, 1  ;;  %v1814_v8 = vrot.slane %v1766_v13, 1  ;;  %v1719_v60 = vsel %vm1246_vm4, %v1678_v6, -inf  ;;  %v1830_v32 = vrot.slane %v1766_v13, 2 }
 0x323   :  { %v4124_v15 = vsel %vm1246_vm4, %v4085_v33, -inf  ;;  %v1751_v27 = vrot.slane %v1717_v18, 1  ;;  %v4084_v52 = vmax.f32 %v4030_v61, 0.0  ;;  %v1718_v2 = vsel %vm1246_vm4, %v1676_v37, -inf }
 0x324   :  { %v4125_v43 = vmax.f32 %v4123_v25, %v4124_v15  ;;  %v1798_v4 = vmax.f32 %v1714_v23, %v1782_v7  ;;  %v1720_v11 = vmax.f32 %v1718_v2, %v1719_v60  ;;  %v1934_v1 = vsel %vm105_vm0, %v1766_v13, %v1814_v8 }
 0x325   :  { %v1767_v35 = vmax.f32 %v1717_v18, %v1751_v27  ;;  %v4126_v36 = vsel %vm1246_vm4, %v4084_v52, -inf  ;;  %v1942_v58 = vsel %vm1566_vm5, %v1934_v1, %v1830_v32  ;;  %v1846_v62 = vrot.slane %v1766_v13, 3 }
 0x326   :  { %v4159_v48 = vrot.slane %v4125_v43, 1  ;;  %v4034_v17 = vpop.f32.mrf.mxu2  ;;  %v1870_v19 = vrot.slane %v1798_v4, 4  ;;  %v1783_v55 = vrot.slane %v1720_v11, 1  ;;  %v1886_v22 = vrot.slane %v1798_v4, 5 }
 0x327   :  { %v4035_v56 = vadd.f32 %v11312_v31, %v4034_v17  ;;  %v1815_v45 = vrot.slane %v1767_v35, 1  ;;  %v1951_v47 = vsel %vm1947_vm13, %v1942_v58, %v1846_v62  ;;  %v1831_v40 = vrot.slane %v1767_v35, 2 }
 0x328   :  { %v4175_v42 = vmax.f32 %v4125_v43, %v4159_v48  ;;  %v1960_v44 = vsel %vm1956_vm14, %v1951_v47, %v1870_v19  ;;  %v1799_v9 = vmax.f32 %v1720_v11, %v1783_v55  ;;  %v1902_v33 = vrot.slane %v1798_v4, 6 }
 0x329   :  { %v4086_v14 = vmax.f32 %v4035_v56, 0.0  ;;  %v1935_v57 = vsel %vm105_vm0, %v1767_v35, %v1815_v45  ;;  %v1969_v13 = vsel %vm1965_vm15, %v1960_v44, %v1886_v22  ;;  %v1847_v43 = vrot.slane %v1767_v35, 3 }
 0x32a   :  { %v4223_v50 = vrot.slane %v4175_v42, 1  ;;  %v4239_v28 = vrot.slane %v4175_v42, 2  ;;  %v4255_v38 = vrot.slane %v4175_v42, 3  ;;  %v1943_v25 = vsel %vm1566_vm5, %v1935_v57, %v1831_v40 }
 0x32b   :  { %v4127_v30 = vsel %vm1246_vm4, %v4086_v14, -inf  ;;  %v1871_v61 = vrot.slane %v1799_v9, 4  ;;  %v1977_v27 = vsel %vm448_vm2, %v1969_v13, %v1902_v33  ;;  %v1918_v60 = vrot.slane %v1798_v4, 7 }
 0x32c   :  { %v4128_v5 = vmax.f32 %v4126_v36, %v4127_v30  ;;  %v4343_v26 = vsel %vm105_vm0, %v4175_v42, %v4223_v50  ;;  %v1952_v48 = vsel %vm1947_vm13, %v1943_v25, %v1847_v43  ;;  %v1887_v17 = vrot.slane %v1799_v9, 5  ;;  %v2368_v30 = vld [vmem:[%s12718_s3 + $0x20] sm:$0xf] }
 0x32d   :  { %v4351_v59 = vsel %vm1566_vm5, %v4343_v26, %v4239_v28  ;;  %v1961_v56 = vsel %vm1956_vm14, %v1952_v48, %v1871_v61  ;;  %v1985_v11 = vsel %vm271_vm1, %v1977_v27, %v1918_v60  ;;  %v1903_v28 = vrot.slane %v1799_v9, 6  ;;  %v11667_v61 = vpop.f32.mrf.mxu0 }
 0x32e   :  { %v4191_v41 = vrot.slane %v4128_v5, 1  ;;  %v4359_v46 = vsel %vm1947_vm13, %v4351_v59, %v4255_v38  ;;  %v1970_v4 = vsel %vm1965_vm15, %v1961_v56, %v1887_v17  ;;  %v2390_v58 = vunpack.c.l.b16 %v2368_v30 }
 0x32f   :  { %v1978_v45 = vsel %vm448_vm2, %v1970_v4, %v1903_v28  ;;  %v1919_v47 = vrot.slane %v1799_v9, 7  ;;  %v7466_v40 = vpack.i.bf16 %v11546_v12, %v11415_v54  ;;  %v7471_v33 = vpack.i.bf16 %v11553_v3, %v11445_v29 }
 0x330   :  { %v4207_v51 = vmax.f32 %v4128_v5, %v4191_v41  ;;  %v2001_v5 = vrot.slane %v1985_v11, 7  ;;  %v2395_v41 = vpack.c.b16 %v2390_v58, %v2390_v58  ;;  %v7353_v11 = vpop.permute.xlu0 %7352  ;;  %v7358_v30 = vpop.permute.xlu1 %7357  ;;  %vm2320_vm3 = vcmask 326656  }
 0x331   :  { %v1986_v44 = vsel %vm271_vm1, %v1978_v45, %v1919_v47  ;;  %v7354_v45 = vunpack.i.l.bf16 %v7353_v11  ;;  %vm2329_vm6 = vcmask 392192   ;;  %vm2338_vm8 = vcmask 457728  }
 0x332   :  { %v4279_v16 = vrot.slane %v4207_v51, 4  ;;  %v4295_v23 = vrot.slane %v4207_v51, 5  ;;  %v4311_v18 = vrot.slane %v4207_v51, 6  ;;  %v4327_v15 = vrot.slane %v4207_v51, 7 }
 0x333   :  { %v11642_v22 = vsel %vm105_vm0, 0.0, %v2001_v5  ;;  %v2025_v59 = vsel %vm105_vm0, %v2001_v5, 0.0  ;;  %v2414_v51 = vsel %vm1956_vm14, %v2395_v41, 0  ;;  %vm2347_vm10 = vcmask 523264  }
 0x334   :  { %v4367_v6 = vsel %vm1956_vm14, %v4359_v46, %v4279_v16  ;;  %4757 = vmatpush.bf16.msrb.mxu3 %v2414_v51  ;;  %2419 = vmatpush.bf16.msrb.mxu1 %v2414_v51  ;;  %v2054_v9 = vrot.slane %v11642_v22, 1  ;;  %v2055_v57 = vrot.slane %v2025_v59, 1  ;;  %v2002_v16 = vrot.slane %v1986_v44, 7  ;;  %v11654_v46 = vpop.permute.xlu2 %7347 }
 0x335   :  { %v4375_v37 = vsel %vm1965_vm15, %v4367_v6, %v4295_v23  ;;  %v5990_v23 = vld [vmem:[%s12718_s3 + $0x18] sm:$0xff]  ;;  %v7476_v13 = vpack.i.bf16 %v11642_v22, %v11342_v0  ;;  %v2100_v6 = vrot.slane %v11642_v22, 2  ;;  %v2101_v25 = vrot.slane %v2025_v59, 2  ;;  %v11706_v58 = vpop.f32.mrf.mxu0 }
 0x336   :  { %v4383_v7 = vsel %vm448_vm2, %v4375_v37, %v4311_v18  ;;  %v4037_v2 = vpop.f32.mrf.mxu2  ;;  %v11664_v18 = vsel %vm271_vm1, %v2054_v9, %v2055_v57  ;;  %v2026_v37 = vsel %vm105_vm0, %v2002_v16, 0.0  ;;  %v7349_v5 = vunpack.i.l.bf16 %v11654_v46 }
 0x337   :  { %v4391_v8 = vsel %vm271_vm1, %v4383_v7, %v4327_v15  ;;  %v4038_v15 = vadd.f32 %v11312_v31, %v4037_v2  ;;  %v7481_v43 = vpack.i.bf16 %v11664_v18, %v11415_v54  ;;  %v2058_v60 = vrot.slane %v2026_v37, 1  ;;  %v5988_v54 = vld [vmem:[%s12718_s3 + $0x8] sm:$0xff] }
 0x338   :  { %v4407_v52 = vrot.slane %v4391_v8, 7  ;;  %4758 = vmatpush.bf16.msrb.mxu3 %v5990_v23  ;;  %2420 = vmatpush.bf16.msrb.mxu1 %v5990_v23  ;;  %v11679_v8 = vsel %vm448_vm2, %v2100_v6, %v2101_v25  ;;  %v2104_v4 = vrot.slane %v2026_v37, 2  ;;  %v7355_v51 = vunpack.i.h.bf16 %v7353_v11  ;;  %v7368_v25 = vpop.permute.xlu0 %7367 }
 0x339   :  { %v4087_v48 = vmax.f32 %v4038_v15, 0.0  ;;  %v7486_v2 = vpack.i.bf16 %v11679_v8, %v11445_v29  ;;  %v7359_v44 = vunpack.i.l.bf16 %v7358_v30  ;;  %v7360_v9 = vunpack.i.h.bf16 %v7358_v30 }
 0x33a   :  { %v11615_v42 = vsel %vm105_vm0, 0.0, %v4407_v52  ;;  %v4431_v32 = vsel %vm105_vm0, %v4407_v52, 0.0  ;;  %v2288_v23 = vsel %vm1246_vm4, %v13319_v20, %v7349_v5  ;;  %v7370_v11 = vunpack.i.h.bf16 %v7368_v25 }
 0x33b   :  { %v7451_v14 = vpack.i.bf16 %v11615_v42, %v11527_v63  ;;  %v4461_v1 = vrot.slane %v11615_v42, 1  ;;  %v4462_v35 = vrot.slane %v4431_v32, 1  ;;  %v4503_v50 = vrot.slane %v11615_v42, 2 }
 0x33c   :  { %v4504_v36 = vrot.slane %v4431_v32, 2  ;;  %v11684_v52 = vpop.permute.xlu2 %7362  ;;  %v11725_v6 = vsel %vm1312_vm7, %v2288_v23, %v7354_v45  ;;  %vm2400_vm12 = vcmask 588800  }
 0x33d   :  { %7452 = vrot.lane.b32.xlu2 %v7451_v14, %s7707_s14  ;;  %v11629_v19 = vsel %vm271_vm1, %v4461_v1, %v4462_v35  ;;  %v5987_v35 = vld [vmem:[%s12718_s3] sm:$0xff] }
 0x33e   :  { %v11632_v55 = vsel %vm448_vm2, %v4503_v50, %v4504_v36  ;;  %v7456_v26 = vpack.i.bf16 %v11629_v19, %v11546_v12  ;;  %v4039_v38 = vpop.f32.mrf.mxu2  ;;  %v5989_v12 = vld [vmem:[%s12718_s3 + $0x10] sm:$0xff]  ;;  %v4129_v50 = vsel %vm1246_vm4, %v4087_v48, -inf  ;;  %s7710_s3 = smov [#allocation2]  }
 0x33f   :  { %v7461_v62 = vpack.i.bf16 %v11632_v55, %v11553_v3  ;;  %v11673_v3 = vsel %vm105_vm0, 0.0, %v2002_v16  ;;  %4759 = vmatpush.bf16.msrb.mxu3 %v5989_v12  ;;  %2421 = vmatpush.bf16.msrb.mxu1 %v5989_v12  ;;  %v4040_v29 = vadd.f32 %v11312_v31, %v4039_v38  ;;  %s5558_s17 = sshll.u32 %s7710_s3, 4  ;;  %s5559_s17 = int_to_ptr.vmem [resolvable:$true] %s5558_s17 }
 0x340   :  { %7457 = vrot.lane.b32.xlu0 %v7456_v26, %s7709_s30  ;;  %v2057_v27 = vrot.slane %v11673_v3, 1  ;;  %v7491_v32 = vpack.i.bf16 %v11673_v3, %v11642_v22  ;;  %v2103_v1 = vrot.slane %v11673_v3, 2 }
 0x341   :  { %7462 = vrot.lane.b32.xlu1 %v7461_v62, %s7708_s24  ;;  %v7350_v62 = vunpack.i.h.bf16 %v11654_v46 }
 0x342   :  { %v11694_v14 = vsel %vm271_vm1, %v2057_v27, %v2058_v60  ;;  %v11712_v59 = vsel %vm448_vm2, %v2103_v1, %v2104_v4 }
 0x343   :  { %4760 = vmatpush.bf16.msrb.mxu3 %v5988_v54  ;;  %2422 = vmatpush.bf16.msrb.mxu1 %v5988_v54  ;;  %v7496_v26 = vpack.i.bf16 %v11694_v14, %v11664_v18  ;;  %v4676_v12 = vsel %vm1246_vm4, %v10889_v21, %v7350_v62  ;;  %v7364_v21 = vunpack.i.l.bf16 %v11684_v52  ;;  %v7369_v54 = vunpack.i.l.bf16 %v7368_v25 }
 0x344   :  { %v4683_v37 = vsel %vm1312_vm7, %v4676_v12, %v7355_v51 }
 0x345   :  { %7467 = vrot.lane.b32.xlu2 %v7466_v40, %s7699_s23  ;;  %v4088_v40 = vmax.f32 %v4040_v29, 0.0 }
 0x347   :  { %4761 = vmatpush.bf16.msrb.mxu3 %v5987_v35  ;;  %2423 = vmatpush.bf16.msrb.mxu1 %v5987_v35 }
 0x348   :  { %7472 = vrot.lane.b32.xlu0 %v7471_v33, %s7701_s29  ;;  %v7501_v33 = vpack.i.bf16 %v11712_v59, %v11679_v8 }
 0x349   :  { %7477 = vrot.lane.b32.xlu1 %v7476_v13, %s7703_s12  ;;  %v7378_v57 = vpop.permute.xlu2 %7377  ;;  %v7506_v13 = vpack.i.bf16 %v11664_v18, %v11629_v19  ;;  %v4691_v18 = vsel %vm1378_vm9, %v4683_v37, %v7360_v9 }
 0x34a   :  { %v7379_v51 = vunpack.i.l.bf16 %v7378_v57 }
 0x34c   :  { %v4042_v7 = vpop.f32.mrf.mxu2 }
 0x34d   :  { %v4043_v17 = vadd.f32 %v11312_v31, %v4042_v7  ;;  %7482 = vrot.lane.b32.xlu2 %v7481_v43, %s7705_s15  ;;  %v4690_v43 = vsel %vm1378_vm9, %v11725_v6, %v7359_v44  ;;  %v4132_v7 = vsel %vm1246_vm4, %v4088_v40, -inf }
 0x34e   :  { %v4698_v1 = vsel %vm1444_vm11, %v4690_v43, %v7364_v21 }
 0x34f   :  { %v4089_v56 = vmax.f32 %v4043_v17, 0.0  ;;  %v7365_v17 = vunpack.i.h.bf16 %v11684_v52 }
 0x350   :  { %7487 = vrot.lane.b32.xlu0 %v7486_v2, %s7706_s0 }
 0x351   :  { %v4130_v36 = vsel %vm1246_vm4, %v4089_v56, -inf  ;;  %7492 = vrot.lane.b32.xlu1 %v7491_v32, %s7707_s14  ;;  %v7511_v32 = vpack.i.bf16 %v11679_v8, %v11632_v55  ;;  %v4699_v35 = vsel %vm1444_vm11, %v4691_v18, %v7365_v17 }
 0x352   :  { %v4131_v28 = vmax.f32 %v4129_v50, %v4130_v36  ;;  %v4707_v8 = vsel %vm2320_vm3, %v4699_v35, %v7370_v11 }
 0x354   :  { %v4160_v41 = vrot.slane %v4131_v28, 1  ;;  %v4044_v47 = vpop.f32.mrf.mxu2 }
 0x355   :  { %v4045_v38 = vadd.f32 %v11312_v31, %v4044_v47  ;;  %7497 = vrot.lane.b32.xlu2 %v7496_v26, %s7709_s30  ;;  %v7393_v26 = vpop.permute.xlu2 %7392  ;;  %v7380_v47 = vunpack.i.h.bf16 %v7378_v57 }
 0x356   :  { %v4176_v16 = vmax.f32 %v4131_v28, %v4160_v41  ;;  %v1634_v2 = vpop.f32.mrf.mxu0  ;;  %v4706_v28 = vsel %vm2320_vm3, %v4698_v1, %v7369_v54  ;;  %v7394_v35 = vunpack.i.l.bf16 %v7393_v26 }
 0x357   :  { %v4090_v46 = vmax.f32 %v4045_v38, 0.0 }
 0x358   :  { %v4224_v15 = vrot.slane %v4176_v16, 1  ;;  %7502 = vrot.lane.b32.xlu0 %v7501_v33, %s7708_s24  ;;  %v4240_v60 = vrot.slane %v4176_v16, 2  ;;  %v4256_v5 = vrot.slane %v4176_v16, 3 }
 0x359   :  { %v4133_v27 = vsel %vm1246_vm4, %v4090_v46, -inf  ;;  %7507 = vrot.lane.b32.xlu1 %v7506_v13, %s7699_s23 }
 0x35a   :  { %v4134_v48 = vmax.f32 %v4132_v7, %v4133_v27  ;;  %v4344_v56 = vsel %vm105_vm0, %v4176_v16, %v4224_v15 }
 0x35b   :  { %v4352_v52 = vsel %vm1566_vm5, %v4344_v56, %v4240_v60  ;;  %v7395_v60 = vunpack.i.h.bf16 %v7393_v26 }
 0x35c   :  { %v4192_v4 = vrot.slane %v4134_v48, 1  ;;  %v4360_v44 = vsel %vm1947_vm13, %v4352_v52, %v4256_v5 }
 0x35d   :  { %v7373_v50 = vpop.permute.xlu1 %7372  ;;  %7512 = vrot.lane.b32.xlu2 %v7511_v32, %s7701_s29  ;;  %v7408_v32 = vpop.permute.xlu2 %7407 }
 0x35e   :  { %v4208_v29 = vmax.f32 %v4134_v48, %v4192_v4  ;;  %v7375_v36 = vunpack.i.h.bf16 %v7373_v50  ;;  %v7374_v30 = vunpack.i.l.bf16 %v7373_v50  ;;  %v1636_v25 = vpop.f32.mrf.mxu0  ;;  %v1635_v50 = vadd.f32 %v11312_v31, %v1634_v2 }
 0x360   :  { %v4280_v62 = vrot.slane %v4208_v29, 4  ;;  %v4296_v45 = vrot.slane %v4208_v29, 5  ;;  %v7383_v41 = vpop.permute.xlu0 %7382  ;;  %v4714_v40 = vsel %vm2329_vm6, %v4706_v28, %v7374_v30  ;;  %v4715_v9 = vsel %vm2329_vm6, %v4707_v8, %v7375_v36 }
 0x361   :  { %v7385_v23 = vunpack.i.h.bf16 %v7383_v41  ;;  %v7384_v16 = vunpack.i.l.bf16 %v7383_v41  ;;  %v4722_v46 = vsel %vm2338_vm8, %v4714_v40, %v7379_v51  ;;  %v4723_v13 = vsel %vm2338_vm8, %v4715_v9, %v7380_v47 }
 0x362   :  { %v4368_v38 = vsel %vm1956_vm14, %v4360_v44, %v4280_v62  ;;  %v4312_v12 = vrot.slane %v4208_v29, 6  ;;  %v4328_v43 = vrot.slane %v4208_v29, 7 }
 0x363   :  { %v4376_v33 = vsel %vm1965_vm15, %v4368_v38, %v4296_v45  ;;  %v4730_v57 = vsel %vm2347_vm10, %v4722_v46, %v7384_v16  ;;  %v4731_v15 = vsel %vm2347_vm10, %v4723_v13, %v7385_v23  ;;  %v1681_v45 = vmax.f32 %v1635_v50, 0.0 }
 0x364   :  { %v4738_v7 = vpack.c.bf16 %v4731_v15, %v4730_v57  ;;  %v4384_v18 = vsel %vm448_vm2, %v4376_v33, %v4312_v12  ;;  %v4047_v56 = vpop.f32.mrf.mxu2  ;;  %v7410_v46 = vunpack.i.h.bf16 %v7408_v32  ;;  %v7409_v33 = vunpack.i.l.bf16 %v7408_v32 }
 0x365   :  { %v7388_v37 = vpop.permute.xlu1 %7387  ;;  %v4392_v54 = vsel %vm271_vm1, %v4384_v18, %v4328_v43  ;;  %v1637_v43 = vadd.f32 %v11312_v31, %v1636_v25 }
 0x366   :  { %v7390_v27 = vunpack.i.h.bf16 %v7388_v37  ;;  %v7389_v21 = vunpack.i.l.bf16 %v7388_v37  ;;  %5661 = vmatmul.msk.bf16.vlgmr.msrb.gmra.mxu3 %vm2400_vm12, %v4738_v7  ;;  %v4408_v1 = vrot.slane %v4392_v54, 7  ;;  %v7423_v7 = vpop.permute.xlu2 %7422 }
 0x367   :  { %v7425_v32 = vunpack.i.h.bf16 %v7423_v7  ;;  %v1682_v50 = vmax.f32 %v1637_v43, 0.0 }
 0x368   :  { %v4677_v48 = vsel %vm1246_vm4, %v11071_v53, %v7390_v27  ;;  %v7398_v17 = vpop.permute.xlu0 %7397  ;;  %v2289_v11 = vsel %vm1246_vm4, %v11222_v49, %v7389_v21  ;;  %v1630_v53 = vadd.f32 %v11312_v31, %v11667_v61  ;;  %v11769_v36 = vsel %vm105_vm0, 0.0, %v4408_v1 }
 0x369   :  { %v11763_v4 = vsel %vm1312_vm7, %v4677_v48, %v7395_v60  ;;  %v7400_v52 = vunpack.i.h.bf16 %v7398_v17  ;;  %v7399_v29 = vunpack.i.l.bf16 %v7398_v17  ;;  %v2297_v30 = vsel %vm1312_vm7, %v2289_v11, %v7394_v35  ;;  %v11802_v17 = vld [vmem:[%s12717_s2] ss:$0 sm:$0xff] }
 0x36a   :  { %v7516_v49 = vpack.i.bf16 %v11769_v36, %v11615_v42  ;;  %v4432_v8 = vsel %vm105_vm0, %v4408_v1, 0.0  ;;  %v4506_v26 = vrot.slane %v11769_v36, 2  ;;  %v1679_v41 = vmax.f32 %v1630_v53, 0.0 }
 0x36b   :  { %v4507_v61 = vrot.slane %v4432_v8, 2  ;;  %v2304_v47 = vsel %vm1378_vm9, %v11725_v6, %v7399_v29  ;;  %v2305_v51 = vsel %vm1378_vm9, %v2297_v30, %v7400_v52  ;;  %v4464_v44 = vrot.slane %v11769_v36, 1 }
 0x36c   :  { %7517 = vrot.lane.b32.xlu0 %v7516_v49, %s7703_s12  ;;  %v4465_v16 = vrot.slane %v4432_v8, 1  ;;  %v1722_v6 = vsel %vm1246_vm4, %v1681_v45, -inf  ;;  %v4049_v12 = vpop.f32.mrf.mxu2  ;;  %v1721_v18 = vsel %vm1246_vm4, %v1679_v41, -inf  ;;  %v1632_v31 = vadd.f32 %v11802_v17, %v11706_v58 }
 0x36d   :  { %v7403_v28 = vpop.permute.xlu1 %7402  ;;  %v11784_v23 = vsel %vm448_vm2, %v4506_v26, %v4507_v61  ;;  %v1723_v25 = vmax.f32 %v1721_v18, %v1722_v6  ;;  %v7424_v11 = vunpack.i.l.bf16 %v7423_v7  ;;  %v4048_v53 = vadd.f32 %v11802_v17, %v4047_v56 }
 0x36e   :  { %v1639_v5 = vpop.f32.mrf.mxu0  ;;  %v7405_v2 = vunpack.i.h.bf16 %v7403_v28  ;;  %v7404_v62 = vunpack.i.l.bf16 %v7403_v28  ;;  %v7526_v13 = vpack.i.bf16 %v11784_v23, %v11632_v55  ;;  %v11790_v57 = vsel %vm271_vm1, %v4464_v44, %v4465_v16 }
 0x36f   :  { %v7521_v27 = vpack.i.bf16 %v11790_v57, %v11629_v19  ;;  %v1680_v49 = vmax.f32 %v1632_v31, 0.0  ;;  %v1640_v28 = vadd.f32 %v11802_v17, %v1639_v5  ;;  %v4091_v45 = vmax.f32 %v4048_v53, 0.0 }
 0x370   :  { %v7413_v40 = vpop.permute.xlu0 %7412  ;;  %v2312_v38 = vsel %vm1444_vm11, %v2304_v47, %v7404_v62  ;;  %v2313_v9 = vsel %vm1444_vm11, %v2305_v51, %v7405_v2  ;;  %7527 = vrot.lane.b32.xlu2 %v7526_v13, %s7706_s0  ;;  %v1752_v2 = vrot.slane %v1723_v25, 1  ;;  %v1725_v62 = vsel %vm1246_vm4, %v1682_v50, -inf }
 0x371   :  { %v7415_v15 = vunpack.i.h.bf16 %v7413_v40  ;;  %v7414_v37 = vunpack.i.l.bf16 %v7413_v40  ;;  %v2321_v21 = vsel %vm2320_vm3, %v2312_v38, %v7409_v33  ;;  %v2322_v55 = vsel %vm2320_vm3, %v2313_v9, %v7410_v46  ;;  %7522 = vrot.lane.b32.xlu1 %v7521_v27, %s7705_s15 }
 0x372   :  { %v1724_v41 = vsel %vm1246_vm4, %v1680_v49, -inf  ;;  %v1683_v47 = vmax.f32 %v1640_v28, 0.0  ;;  %v1768_v38 = vmax.f32 %v1723_v25, %v1752_v2  ;;  %v4135_v5 = vsel %vm1246_vm4, %v4091_v45, -inf }
 0x373   :  { %v2330_v1 = vsel %vm2329_vm6, %v2321_v21, %v7414_v37  ;;  %v2331_v35 = vsel %vm2329_vm6, %v2322_v55, %v7415_v15  ;;  %v1726_v40 = vmax.f32 %v1724_v41, %v1725_v62  ;;  %v4050_v46 = vadd.f32 %v11802_v17, %v4049_v12 }
 0x374   :  { %v1727_v13 = vsel %vm1246_vm4, %v1683_v47, -inf  ;;  %v1816_v21 = vrot.slane %v1768_v38, 1  ;;  %v1848_v62 = vrot.slane %v1768_v38, 3 }
 0x375   :  { %v7418_v60 = vpop.permute.xlu1 %7417  ;;  %v1784_v37 = vrot.slane %v1726_v40, 1  ;;  %v4092_v18 = vmax.f32 %v4050_v46, 0.0 }
 0x376   :  { %v1641_v48 = vpop.f32.mrf.mxu0  ;;  %v7420_v19 = vunpack.i.h.bf16 %v7418_v60  ;;  %v7419_v54 = vunpack.i.l.bf16 %v7418_v60 }
 0x377   :  { %v1642_v6 = vadd.f32 %v11802_v17, %v1641_v48 }
 0x378   :  { %v2339_v52 = vsel %vm2338_vm8, %v2330_v1, %v7419_v54  ;;  %v2340_v29 = vsel %vm2338_vm8, %v2331_v35, %v7420_v19  ;;  %v1936_v1 = vsel %vm105_vm0, %v1768_v38, %v1816_v21 }
 0x379   :  { %v2348_v58 = vsel %vm2347_vm10, %v2339_v52, %v7424_v11  ;;  %v2349_v30 = vsel %vm2347_vm10, %v2340_v29, %v7425_v32  ;;  %v1684_v19 = vmax.f32 %v1642_v6, 0.0  ;;  %v1832_v32 = vrot.slane %v1768_v38, 2 }
 0x37a   :  { %v2356_v8 = vpack.c.bf16 %v2349_v30, %v2348_v58  ;;  %v1800_v11 = vmax.f32 %v1726_v40, %v1784_v37  ;;  %v4138_v52 = vsel %vm1246_vm4, %v4092_v18, -inf }
 0x37b   :  { %v1730_v29 = vsel %vm1246_vm4, %v1684_v19, -inf  ;;  %v1944_v28 = vsel %vm1566_vm5, %v1936_v1, %v1832_v32  ;;  %v11852_v1 = vpop.permute.xlu0 %7427 }
 0x37c   :  { %v4052_v26 = vpop.f32.mrf.mxu2  ;;  %5609 = vmatmul.msk.bf16.vlgmr.msrb.gmra.mxu1 %vm2400_vm12, %v2356_v8  ;;  %v1872_v8 = vrot.slane %v1800_v11, 4  ;;  %v1953_v41 = vsel %vm1947_vm13, %v1944_v28, %v1848_v62  ;;  %v1888_v47 = vrot.slane %v1800_v11, 5  ;;  %v7429_v28 = vunpack.i.l.bf16 %v11852_v1 }
 0x37d   :  { %v4053_v56 = vadd.f32 %v11802_v17, %v4052_v26 }
 0x37e   :  { %v1644_v61 = vpop.f32.mrf.mxu0  ;;  %v1962_v40 = vsel %vm1956_vm14, %v1953_v41, %v1872_v8 }
 0x37f   :  { %v4093_v51 = vmax.f32 %v4053_v56, 0.0  ;;  %v1645_v44 = vadd.f32 %v11802_v17, %v1644_v61  ;;  %v1971_v37 = vsel %vm1965_vm15, %v1962_v40, %v1888_v47 }
 0x381   :  { %v4136_v9 = vsel %vm1246_vm4, %v4093_v51, -inf  ;;  %v1685_v16 = vmax.f32 %v1645_v44, 0.0 }
 0x382   :  { %v4137_v33 = vmax.f32 %v4135_v5, %v4136_v9 }
 0x383   :  { %v1728_v15 = vsel %vm1246_vm4, %v1685_v16, -inf  ;;  %v1654_v16 = vpop.f32.mrf.mxu1 }
 0x384   :  { %v4161_v43 = vrot.slane %v4137_v33, 1  ;;  %v1729_v7 = vmax.f32 %v1727_v13, %v1728_v15  ;;  %v4054_v27 = vpop.f32.mrf.mxu2  ;;  %v1904_v15 = vrot.slane %v1800_v11, 6  ;;  %v1655_v62 = vadd.f32 %v11802_v17, %v1654_v16 }
 0x385   :  { %v4055_v55 = vadd.f32 %v11802_v17, %v4054_v27 }
 0x386   :  { %v4177_v60 = vmax.f32 %v4137_v33, %v4161_v43  ;;  %v1753_v31 = vrot.slane %v1729_v7, 1  ;;  %v1646_v25 = vpop.f32.mrf.mxu0  ;;  %v1979_v19 = vsel %vm448_vm2, %v1971_v37, %v1904_v15  ;;  %v1689_v37 = vmax.f32 %v1655_v62, 0.0 }
 0x387   :  { %v4094_v12 = vmax.f32 %v4055_v55, 0.0  ;;  %v1647_v54 = vadd.f32 %v11802_v17, %v1646_v25 }
 0x388   :  { %v4225_v48 = vrot.slane %v4177_v60, 1  ;;  %v1769_v35 = vmax.f32 %v1729_v7, %v1753_v31  ;;  %v4241_v58 = vrot.slane %v4177_v60, 2  ;;  %v4257_v5 = vrot.slane %v4177_v60, 3 }
 0x389   :  { %v4139_v50 = vsel %vm1246_vm4, %v4094_v12, -inf  ;;  %v1686_v53 = vmax.f32 %v1647_v54, 0.0  ;;  %v1920_v12 = vrot.slane %v1800_v11, 7 }
 0x38a   :  { %v4140_v30 = vmax.f32 %v4138_v52, %v4139_v50  ;;  %v4345_v26 = vsel %vm105_vm0, %v4177_v60, %v4225_v48  ;;  %v1817_v45 = vrot.slane %v1769_v35, 1  ;;  %v1833_v9 = vrot.slane %v1769_v35, 2  ;;  %v11859_v52 = vpop.permute.xlu1 %7432 }
 0x38b   :  { %v1731_v49 = vsel %vm1246_vm4, %v1686_v53, -inf  ;;  %v4353_v51 = vsel %vm1566_vm5, %v4345_v26, %v4241_v58  ;;  %v1849_v60 = vrot.slane %v1769_v35, 3  ;;  %v7434_v47 = vunpack.i.l.bf16 %v11859_v52 }
 0x38c   :  { %v1732_v2 = vmax.f32 %v1730_v29, %v1731_v49  ;;  %v4193_v56 = vrot.slane %v4140_v30, 1  ;;  %v1937_v33 = vsel %vm105_vm0, %v1769_v35, %v1817_v45  ;;  %v4361_v6 = vsel %vm1947_vm13, %v4353_v51, %v4257_v5  ;;  %v1656_v29 = vpop.f32.mrf.mxu1 }
 0x38d   :  { %v1945_v27 = vsel %vm1566_vm5, %v1937_v33, %v1833_v9  ;;  %v1987_v35 = vsel %vm271_vm1, %v1979_v19, %v1920_v12  ;;  %v1657_v51 = vadd.f32 %v11802_v17, %v1656_v29 }
 0x38e   :  { %v1785_v61 = vrot.slane %v1732_v2, 1  ;;  %v4209_v44 = vmax.f32 %v4140_v30, %v4193_v56  ;;  %v1954_v54 = vsel %vm1947_vm13, %v1945_v27, %v1849_v60  ;;  %v2003_v41 = vrot.slane %v1987_v35, 7 }
 0x38f   :  { %v7546_v60 = vpack.i.bf16 %v11790_v57, %v11694_v14 }
 0x390   :  { %v11838_v46 = vmax.f32 %v1732_v2, %v1785_v61  ;;  %v4281_v13 = vrot.slane %v4209_v44, 4  ;;  %v4297_v38 = vrot.slane %v4209_v44, 5  ;;  %v4313_v43 = vrot.slane %v4209_v44, 6  ;;  %v7438_v2 = vpop.permute.xlu2 %7437 }
 0x391   :  { %v4329_v21 = vrot.slane %v4209_v44, 7  ;;  %v2027_v27 = vsel %vm105_vm0, %v2003_v41, 0.0 }
 0x392   :  { %v4369_v7 = vsel %vm1956_vm14, %v4361_v6, %v4281_v13  ;;  %v1873_v18 = vrot.slane %v11838_v46, 4  ;;  %v1889_v32 = vrot.slane %v11838_v46, 5  ;;  %v1905_v45 = vrot.slane %v11838_v46, 6 }
 0x393   :  { %v4377_v55 = vsel %vm1965_vm15, %v4369_v7, %v4297_v38  ;;  %v7439_v13 = vunpack.i.l.bf16 %v7438_v2  ;;  %v4678_v38 = vsel %vm1246_vm4, %v11264_v24, %v7429_v28  ;;  %v1921_v6 = vrot.slane %v11838_v46, 7 }
 0x394   :  { %v4385_v31 = vsel %vm448_vm2, %v4377_v55, %v4313_v43  ;;  %v1963_v50 = vsel %vm1956_vm14, %v1954_v54, %v1873_v18  ;;  %v11890_v7 = vsel %vm105_vm0, 0.0, %v2003_v41  ;;  %v1690_v55 = vmax.f32 %v1657_v51, 0.0 }
 0x395   :  { %v4393_v25 = vsel %vm271_vm1, %v4385_v31, %v4329_v21  ;;  %v1972_v8 = vsel %vm1965_vm15, %v1963_v50, %v1889_v32  ;;  %v4062_v56 = vpop.f32.mrf.mxu3  ;;  %v4685_v21 = vsel %vm1312_vm7, %v4678_v38, %v7434_v47  ;;  %v7440_v46 = vunpack.i.h.bf16 %v7438_v2  ;;  %v7443_v32 = vpop.permute.xlu0 %7442 }
 0x396   :  { %v4409_v48 = vrot.slane %v4393_v25, 7  ;;  %v1980_v33 = vsel %vm448_vm2, %v1972_v8, %v1905_v45  ;;  %v4063_v18 = vadd.f32 %v11802_v17, %v4062_v56  ;;  %v2060_v25 = vrot.slane %v11890_v7, 1 }
 0x397   :  { %v1988_v24 = vsel %vm271_vm1, %v1980_v33, %v1921_v6  ;;  %v2061_v19 = vrot.slane %v2027_v27, 1  ;;  %v4692_v12 = vsel %vm1378_vm9, %v11763_v4, %v7439_v13  ;;  %v1734_v54 = vsel %vm1246_vm4, %v1689_v37, -inf }
 0x398   :  { %v11856_v53 = vsel %vm105_vm0, 0.0, %v4409_v48  ;;  %v4433_v58 = vsel %vm105_vm0, %v4409_v48, 0.0  ;;  %v4693_v48 = vsel %vm1378_vm9, %v4685_v21, %v7440_v46  ;;  %v2004_v35 = vrot.slane %v1988_v24, 7  ;;  %v7453_v45 = vpop.permute.xlu2 %7452 }
 0x399   :  { %v7531_v11 = vpack.i.bf16 %v11856_v53, %v11769_v36  ;;  %v4509_v30 = vrot.slane %v11856_v53, 2  ;;  %v4467_v49 = vrot.slane %v11856_v53, 1  ;;  %v4510_v26 = vrot.slane %v4433_v58, 2 }
 0x39a   :  { %v4468_v61 = vrot.slane %v4433_v58, 1  ;;  %v1737_v29 = vsel %vm1246_vm4, %v1690_v55, -inf  ;;  %v2107_v2 = vrot.slane %v2027_v27, 2  ;;  %v7445_v62 = vunpack.i.h.bf16 %v7443_v32 }
 0x39b   :  { %7532 = vrot.lane.b32.xlu0 %v7531_v11, %s7707_s14  ;;  %v11874_v40 = vsel %vm448_vm2, %v4509_v30, %v4510_v26  ;;  %v7556_v30 = vpack.i.bf16 %v11890_v7, %v11673_v3  ;;  %v2106_v26 = vrot.slane %v11890_v7, 2  ;;  %v11915_v41 = vsel %vm271_vm1, %v2060_v25, %v2061_v19 }
 0x39c   :  { %v1649_v44 = vpop.f32.mrf.mxu0  ;;  %v7541_v9 = vpack.i.bf16 %v11874_v40, %v11784_v23  ;;  %v11880_v16 = vsel %vm271_vm1, %v4467_v49, %v4468_v61  ;;  %v7448_v49 = vpop.permute.xlu1 %7447  ;;  %v7551_v61 = vpack.i.bf16 %v11784_v23, %v11712_v59  ;;  %v7444_v47 = vunpack.i.l.bf16 %v7443_v32 }
 0x39d   :  { %v1650_v5 = vadd.f32 %v11802_v17, %v1649_v44  ;;  %v7536_v15 = vpack.i.bf16 %v11880_v16, %v11790_v57  ;;  %v4097_v57 = vmax.f32 %v4063_v18, 0.0  ;;  %v4064_v28 = vpop.f32.mrf.mxu3  ;;  %v11919_v44 = vsel %vm105_vm0, 0.0, %v2004_v35 }
 0x39e   :  { %7542 = vrot.lane.b32.xlu2 %v7541_v9, %s7708_s24  ;;  %v7450_v9 = vunpack.i.h.bf16 %v7448_v49  ;;  %v4065_v13 = vadd.f32 %v11802_v17, %v4064_v28  ;;  %v11929_v37 = vsel %vm448_vm2, %v2106_v26, %v2107_v2  ;;  %v2063_v21 = vrot.slane %v11919_v44, 1 }
 0x39f   :  { %v1687_v43 = vmax.f32 %v1650_v5, 0.0  ;;  %7537 = vrot.lane.b32.xlu1 %v7536_v15, %s7709_s30  ;;  %v2028_v5 = vsel %vm105_vm0, %v2004_v35, 0.0  ;;  %v4142_v33 = vsel %vm1246_vm4, %v4097_v57, -inf  ;;  %v7561_v15 = vpack.i.bf16 %v11915_v41, %v11694_v14 }
 0x3a0   :  { %v2064_v55 = vrot.slane %v2028_v5, 1  ;;  %v4700_v18 = vsel %vm1444_vm11, %v4692_v12, %v7444_v47  ;;  %v7449_v24 = vunpack.i.l.bf16 %v7448_v49  ;;  %v7455_v46 = vunpack.i.h.bf16 %v7453_v45 }
 0x3a1   :  { %v1733_v31 = vsel %vm1246_vm4, %v1687_v43, -inf  ;;  %v4701_v43 = vsel %vm1444_vm11, %v4693_v48, %v7445_v62  ;;  %v7454_v25 = vunpack.i.l.bf16 %v7453_v45  ;;  %v4098_v14 = vmax.f32 %v4065_v13, 0.0 }
 0x3a2   :  { %v1735_v4 = vmax.f32 %v1733_v31, %v1734_v54  ;;  %v7566_v54 = vpack.i.bf16 %v11929_v37, %v11712_v59  ;;  %v7571_v12 = vpack.i.bf16 %v11919_v44, %v11890_v7  ;;  %v11944_v57 = vsel %vm271_vm1, %v2063_v21, %v2064_v55 }
 0x3a3   :  { %7547 = vrot.lane.b32.xlu0 %v7546_v60, %s7699_s23  ;;  %v4709_v59 = vsel %vm2320_vm3, %v4701_v43, %v7450_v9  ;;  %v7576_v2 = vpack.i.bf16 %v11944_v57, %v11915_v41  ;;  %v7586_v13 = vpack.i.bf16 %v11915_v41, %v11880_v16 }
 0x3a4   :  { %v4057_v50 = vpop.f32.mrf.mxu2  ;;  %v1651_v58 = vpop.f32.mrf.mxu0  ;;  %v1754_v23 = vrot.slane %v1735_v4, 1  ;;  %v4717_v62 = vsel %vm2329_vm6, %v4709_v59, %v7455_v46 }
 0x3a5   :  { %v4058_v11 = vadd.f32 %v11802_v17, %v4057_v50  ;;  %v1652_v8 = vadd.f32 %v11802_v17, %v1651_v58  ;;  %v2110_v58 = vrot.slane %v2028_v5, 2 }
 0x3a6   :  { %7557 = vrot.lane.b32.xlu2 %v7556_v30, %s7703_s12  ;;  %v11939_v32 = vmax.f32 %v1735_v4, %v1754_v23  ;;  %v4708_v30 = vsel %vm2320_vm3, %v4700_v18, %v7449_v24  ;;  %v7468_v4 = vpop.permute.xlu2 %7467 }
 0x3a7   :  { %v4095_v56 = vmax.f32 %v4058_v11, 0.0  ;;  %v1688_v51 = vmax.f32 %v1652_v8, 0.0  ;;  %7552 = vrot.lane.b32.xlu1 %v7551_v61, %s7701_s29  ;;  %v2109_v11 = vrot.slane %v11919_v44, 2  ;;  %v4716_v49 = vsel %vm2329_vm6, %v4708_v30, %v7454_v25 }
 0x3a8   :  { %v1818_v28 = vrot.slane %v11939_v32, 1  ;;  %v1834_v47 = vrot.slane %v11939_v32, 2  ;;  %v7430_v30 = vunpack.i.h.bf16 %v11852_v1 }
 0x3a9   :  { %v4141_v38 = vsel %vm1246_vm4, %v4095_v56, -inf  ;;  %v1736_v27 = vsel %vm1246_vm4, %v1688_v51, -inf  ;;  %v11959_v61 = vsel %vm448_vm2, %v2109_v11, %v2110_v58  ;;  %v7470_v51 = vunpack.i.h.bf16 %v7468_v4 }
 0x3aa   :  { %v4143_v6 = vmax.f32 %v4141_v38, %v4142_v33  ;;  %v1738_v50 = vmax.f32 %v1736_v27, %v1737_v29  ;;  %v4145_v29 = vsel %vm1246_vm4, %v4098_v14, -inf  ;;  %v1938_v43 = vsel %vm105_vm0, %v11939_v32, %v1818_v28 }
 0x3ab   :  { %7562 = vrot.lane.b32.xlu0 %v7561_v15, %s7705_s15  ;;  %v7581_v55 = vpack.i.bf16 %v11959_v61, %v11929_v37  ;;  %v4679_v59 = vsel %vm1246_vm4, %v11527_v63, %v7470_v51 }
 0x3ac   :  { %v4162_v60 = vrot.slane %v4143_v6, 1  ;;  %v4059_v31 = vpop.f32.mrf.mxu2  ;;  %v1786_v8 = vrot.slane %v1738_v50, 1 }
 0x3ad   :  { %v4060_v19 = vadd.f32 %v11802_v17, %v4059_v31 }
 0x3ae   :  { %v4178_v48 = vmax.f32 %v4143_v6, %v4162_v60  ;;  %7572 = vrot.lane.b32.xlu2 %v7571_v12, %s7707_s14  ;;  %v11968_v27 = vmax.f32 %v1738_v50, %v1786_v8  ;;  %v7469_v60 = vunpack.i.l.bf16 %v7468_v4  ;;  %v7591_v12 = vpack.i.bf16 %v11929_v37, %v11874_v40 }
 0x3af   :  { %v4096_v35 = vmax.f32 %v4060_v19, 0.0  ;;  %7567 = vrot.lane.b32.xlu1 %v7566_v54, %s7706_s0  ;;  %v1946_v19 = vsel %vm1566_vm5, %v1938_v43, %v1834_v47 }
 0x3b0   :  { %v4226_v17 = vrot.slane %v4178_v48, 1  ;;  %v4242_v45 = vrot.slane %v4178_v48, 2  ;;  %v4258_v31 = vrot.slane %v4178_v48, 3  ;;  %v2291_v37 = vsel %vm1246_vm4, %v11342_v0, %v7469_v60 }
 0x3b1   :  { %v4144_v26 = vsel %vm1246_vm4, %v4096_v35, -inf  ;;  %v1850_v35 = vrot.slane %v11939_v32, 3 }
 0x3b2   :  { %v4146_v56 = vmax.f32 %v4144_v26, %v4145_v29  ;;  %v4346_v5 = vsel %vm105_vm0, %v4178_v48, %v4226_v17  ;;  %v7458_v9 = vpop.permute.xlu0 %7457  ;;  %v1874_v48 = vrot.slane %v11968_v27, 4  ;;  %v7435_v17 = vunpack.i.h.bf16 %v11859_v52 }
 0x3b3   :  { %v7463_v33 = vpop.permute.xlu1 %7462  ;;  %7577 = vrot.lane.b32.xlu0 %v7576_v2, %s7709_s30  ;;  %v7460_v23 = vunpack.i.h.bf16 %v7458_v9  ;;  %v7459_v6 = vunpack.i.l.bf16 %v7458_v9  ;;  %v4354_v18 = vsel %vm1566_vm5, %v4346_v5, %v4242_v45  ;;  %v1955_v29 = vsel %vm1947_vm13, %v1946_v19, %v1850_v35 }
 0x3b4   :  { %v4194_v38 = vrot.slane %v4146_v56, 1  ;;  %v7465_v15 = vunpack.i.h.bf16 %v7463_v33  ;;  %v7464_v21 = vunpack.i.l.bf16 %v7463_v33  ;;  %v4362_v11 = vsel %vm1947_vm13, %v4354_v18, %v4258_v31 }
 0x3b5   :  { %v4724_v46 = vsel %vm2338_vm8, %v4716_v49, %v7459_v6  ;;  %v4725_v41 = vsel %vm2338_vm8, %v4717_v62, %v7460_v23  ;;  %v1890_v52 = vrot.slane %v11968_v27, 5  ;;  %v1964_v2 = vsel %vm1956_vm14, %v1955_v29, %v1874_v48 }
 0x3b6   :  { %v4210_v24 = vmax.f32 %v4146_v56, %v4194_v38  ;;  %7587 = vrot.lane.b32.xlu2 %v7586_v13, %s7699_s23  ;;  %v4732_v25 = vsel %vm2347_vm10, %v4724_v46, %v7464_v21  ;;  %v4733_v14 = vsel %vm2347_vm10, %v4725_v41, %v7465_v15  ;;  %v7483_v56 = vpop.permute.xlu2 %7482  ;;  %v2290_v9 = vsel %vm1246_vm4, %v11254_v10, %v7430_v30 }
 0x3b7   :  { %7582 = vrot.lane.b32.xlu1 %v7581_v55, %s7708_s24  ;;  %v4739_v58 = vpack.c.bf16 %v4733_v14, %v4732_v25  ;;  %v2298_v13 = vsel %vm1312_vm7, %v2290_v9, %v7435_v17  ;;  %v1906_v38 = vrot.slane %v11968_v27, 6  ;;  %v1973_v23 = vsel %vm1965_vm15, %v1964_v2, %v1890_v52 }
 0x3b8   :  { %v4282_v54 = vrot.slane %v4210_v24, 4  ;;  %v4298_v50 = vrot.slane %v4210_v24, 5  ;;  %v4314_v32 = vrot.slane %v4210_v24, 6  ;;  %v4330_v8 = vrot.slane %v4210_v24, 7 }
 0x3b9   :  { %5662 = vmatmul.msk.bf16.gmra.mxu3 %vm2400_vm12, %v4739_v58  ;;  %v7485_v46 = vunpack.i.h.bf16 %v7483_v56  ;;  %v7484_v41 = vunpack.i.l.bf16 %v7483_v56 }
 0x3ba   :  { %v4370_v49 = vsel %vm1956_vm14, %v4362_v11, %v4282_v54  ;;  %v7473_v4 = vpop.permute.xlu0 %7472  ;;  %v1981_v54 = vsel %vm448_vm2, %v1973_v23, %v1906_v38 }
 0x3bb   :  { %v7478_v28 = vpop.permute.xlu1 %7477  ;;  %7592 = vrot.lane.b32.xlu0 %v7591_v12, %s7701_s29  ;;  %v4378_v1 = vsel %vm1965_vm15, %v4370_v49, %v4298_v50  ;;  %v7475_v63 = vunpack.i.h.bf16 %v7473_v4  ;;  %v7474_v26 = vunpack.i.l.bf16 %v7473_v4 }
 0x3bc   :  { %v7480_v62 = vunpack.i.h.bf16 %v7478_v28  ;;  %v7479_v45 = vunpack.i.l.bf16 %v7478_v28  ;;  %v4386_v0 = vsel %vm448_vm2, %v4378_v1, %v4314_v32 }
 0x3bd   :  { %v2299_v47 = vsel %vm1312_vm7, %v2291_v37, %v7474_v26  ;;  %v12001_v51 = vsel %vm1312_vm7, %v4679_v59, %v7475_v63  ;;  %v4394_v5 = vsel %vm271_vm1, %v4386_v0, %v4330_v8  ;;  %v1922_v59 = vrot.slane %v11968_v27, 7 }
 0x3be   :  { %v4410_v33 = vrot.slane %v4394_v5, 7  ;;  %v2307_v6 = vsel %vm1378_vm9, %v2299_v47, %v7480_v62  ;;  %v2306_v15 = vsel %vm1378_vm9, %v2298_v13, %v7479_v45  ;;  %v7498_v37 = vpop.permute.xlu2 %7497 }
 0x3bf   :  { %v2314_v50 = vsel %vm1444_vm11, %v2306_v15, %v7484_v41  ;;  %v2315_v12 = vsel %vm1444_vm11, %v2307_v6, %v7485_v46  ;;  %v1989_v32 = vsel %vm271_vm1, %v1981_v54, %v1922_v59  ;;  %v7499_v1 = vunpack.i.l.bf16 %v7498_v37 }
 0x3c0   :  { %v4426_v43 = vsel %vm105_vm0, 0.0, %v4410_v33  ;;  %v4434_v21 = vsel %vm105_vm0, %v4410_v33, 0.0  ;;  %v2005_v63 = vrot.slane %v1989_v32, 7 }
 0x3c1   :  { %v7596_v55 = vpack.i.bf16 %v4426_v43, %v11856_v53  ;;  %v4586_v18 = vrot.slane %v4426_v43, 2  ;;  %v4587_v24 = vrot.slane %v4434_v21, 2  ;;  %v4559_v10 = vrot.slane %v4426_v43, 1 }
 0x3c2   :  { %v7488_v60 = vpop.permute.xlu0 %7487  ;;  %v4560_v25 = vrot.slane %v4434_v21, 1  ;;  %v2021_v47 = vsel %vm105_vm0, 0.0, %v2005_v63  ;;  %v2029_v5 = vsel %vm105_vm0, %v2005_v63, 0.0 }
 0x3c3   :  { %v7493_v31 = vpop.permute.xlu1 %7492  ;;  %v7490_v14 = vunpack.i.h.bf16 %v7488_v60  ;;  %v7489_v19 = vunpack.i.l.bf16 %v7488_v60  ;;  %7597 = vrot.lane.b32.xlu1 %v7596_v55, %s7703_s12  ;;  %v4588_v35 = vsel %vm448_vm2, %v4586_v18, %v4587_v24  ;;  %v2162_v9 = vrot.slane %v2021_v47, 1 }
 0x3c4   :  { %v4561_v11 = vsel %vm271_vm1, %v4559_v10, %v4560_v25  ;;  %v7495_v48 = vunpack.i.h.bf16 %v7493_v31  ;;  %v7494_v58 = vunpack.i.l.bf16 %v7493_v31  ;;  %v7606_v30 = vpack.i.bf16 %v4588_v35, %v11874_v40 }
 0x3c5   :  { %v7601_v17 = vpack.i.bf16 %v4561_v11, %v11880_v16  ;;  %v2323_v49 = vsel %vm2320_vm3, %v2314_v50, %v7489_v19  ;;  %v2324_v29 = vsel %vm2320_vm3, %v2315_v12, %v7490_v14  ;;  %v7611_v40 = vpack.i.bf16 %v4426_v43, %v13319_v20 }
 0x3c6   :  { %7607 = vrot.lane.b32.xlu0 %v7606_v30, %s7706_s0  ;;  %v2332_v4 = vsel %vm2329_vm6, %v2323_v49, %v7494_v58  ;;  %v2333_v28 = vsel %vm2329_vm6, %v2324_v29, %v7495_v48  ;;  %v7500_v16 = vunpack.i.h.bf16 %v7498_v37  ;;  %v7621_v62 = vpack.i.bf16 %v4588_v35, %v10998_v34  ;;  %v7513_v43 = vpop.permute.xlu2 %7512 }
 0x3c7   :  { %7602 = vrot.lane.b32.xlu2 %v7601_v17, %s7705_s15  ;;  %v2341_v26 = vsel %vm2338_vm8, %v2332_v4, %v7499_v1  ;;  %v7616_v45 = vpack.i.bf16 %v4561_v11, %v10944_v39  ;;  %v2163_v33 = vrot.slane %v2029_v5, 1  ;;  %v7626_v39 = vpack.i.bf16 %v2021_v47, %v11919_v44 }
 0x3c8   :  { %v2342_v2 = vsel %vm2338_vm8, %v2333_v28, %v7500_v16  ;;  %v2189_v13 = vrot.slane %v2021_v47, 2  ;;  %v2190_v38 = vrot.slane %v2029_v5, 2  ;;  %v7514_v60 = vunpack.i.l.bf16 %v7513_v43 }
 0x3c9   :  { %v2164_v34 = vsel %vm271_vm1, %v2162_v9, %v2163_v33  ;;  %v7515_v9 = vunpack.i.h.bf16 %v7513_v43  ;;  %vm2486_vm1 = vcmask 1041409  }
 0x3ca   :  { %v7503_v27 = vpop.permute.xlu0 %7502  ;;  %v7631_v23 = vpack.i.bf16 %v2164_v34, %v11944_v57  ;;  %v2191_v6 = vsel %vm448_vm2, %v2189_v13, %v2190_v38  ;;  %vm2489_vm2 = vcmask 1042434  }
 0x3cb   :  { %v7505_v52 = vunpack.i.h.bf16 %v7503_v27  ;;  %v7504_v8 = vunpack.i.l.bf16 %v7503_v27  ;;  %7612 = vrot.lane.b32.xlu1 %v7611_v40, %s7707_s14  ;;  %v7636_v15 = vpack.i.bf16 %v2191_v6, %v11959_v61  ;;  %v7508_v55 = vpop.permute.xlu1 %7507 }
 0x3cc   :  { %v7509_v24 = vunpack.i.l.bf16 %v7508_v55 }
 0x3cd   :  { %v2350_v0 = vsel %vm2347_vm10, %v2341_v26, %v7504_v8  ;;  %v2351_v20 = vsel %vm2347_vm10, %v2342_v2, %v7505_v52 }
 0x3ce   :  { %v2357_v56 = vpack.c.bf16 %v2351_v20, %v2350_v0  ;;  %7622 = vrot.lane.b32.xlu0 %v7621_v62, %s7708_s24  ;;  %v7528_v21 = vpop.permute.xlu2 %7527  ;;  %v4680_v46 = vsel %vm1246_vm4, %v11615_v42, %v7509_v24  ;;  %v7510_v62 = vunpack.i.h.bf16 %v7508_v55 }
 0x3cf   :  { %7617 = vrot.lane.b32.xlu2 %v7616_v45, %s7709_s30  ;;  %v4687_v19 = vsel %vm1312_vm7, %v4680_v46, %v7514_v60  ;;  %v7530_v42 = vunpack.i.h.bf16 %v7528_v21  ;;  %v7529_v58 = vunpack.i.l.bf16 %v7528_v21 }
 0x3d0   :  { %5610 = vmatmul.msk.bf16.gmra.mxu1 %vm2400_vm12, %v2357_v56  ;;  %v2292_v20 = vsel %vm1246_vm4, %v11642_v22, %v7510_v62 }
 0x3d3   :  { %2080 = vrot.lane.b32.xlu1 %v11944_v57, %s7699_s23 }
 0x3d6   :  { %7627 = vrot.lane.b32.xlu0 %v7626_v39, %s7703_s12 }
 0x3d7   :  { %2126 = vrot.lane.b32.xlu2 %v11959_v61, %s7701_s29 }
 0x3db   :  { %7632 = vrot.lane.b32.xlu1 %v7631_v23, %s7705_s15 }
 0x3de   :  { %2228 = vrot.lane.b32.xlu0 %v2021_v47, %s7707_s14  ;;  %v7518_v18 = vpop.permute.xlu0 %7517 }
 0x3df   :  { %7637 = vrot.lane.b32.xlu2 %v7636_v15, %s7706_s0  ;;  %v7520_v41 = vunpack.i.h.bf16 %v7518_v18  ;;  %v7519_v61 = vunpack.i.l.bf16 %v7518_v18 }
 0x3e1   :  { %v4694_v54 = vsel %vm1378_vm9, %v12001_v51, %v7519_v61  ;;  %v4695_v50 = vsel %vm1378_vm9, %v4687_v19, %v7520_v41 }
 0x3e3   :  { %2252 = vrot.lane.b32.xlu1 %v2164_v34, %s7709_s30  ;;  %v7523_v57 = vpop.permute.xlu1 %7522 }
 0x3e4   :  { %v7525_v31 = vunpack.i.h.bf16 %v7523_v57  ;;  %v7524_v25 = vunpack.i.l.bf16 %v7523_v57 }
 0x3e6   :  { %v4702_v12 = vsel %vm1444_vm11, %v4694_v54, %v7524_v25  ;;  %v4703_v35 = vsel %vm1444_vm11, %v4695_v50, %v7525_v31 }
 0x3e7   :  { %2276 = vrot.lane.b32.xlu2 %v2191_v6, %s7708_s24  ;;  %v4710_v59 = vsel %vm2320_vm3, %v4702_v12, %v7529_v58  ;;  %v4711_v49 = vsel %vm2320_vm3, %v4703_v35, %v7530_v42  ;;  %v2300_v6 = vsel %vm1312_vm7, %v2292_v20, %v7515_v9 }
 0x3f8   :  { %v7543_v10 = vpop.permute.xlu2 %7542 }
 0x3f9   :  { %v7545_v32 = vunpack.i.h.bf16 %v7543_v10  ;;  %v7544_v51 = vunpack.i.l.bf16 %v7543_v10 }
 0x400   :  { %v7558_v17 = vpop.permute.xlu2 %7557 }
 0x401   :  { %v7559_v56 = vunpack.i.l.bf16 %v7558_v17  ;;  %v7560_v13 = vunpack.i.h.bf16 %v7558_v17 }
 0x403   :  { %v2308_v21 = vsel %vm1378_vm9, %v2300_v6, %v7559_v56 }
 0x408   :  { %v7573_v26 = vpop.permute.xlu2 %7572 }
 0x409   :  { %v7575_v46 = vunpack.i.h.bf16 %v7573_v26  ;;  %v7574_v41 = vunpack.i.l.bf16 %v7573_v26 }
 0x40d   :  { %v7533_v14 = vpop.permute.xlu0 %7532 }
 0x40e   :  { %v7535_v11 = vunpack.i.h.bf16 %v7533_v14  ;;  %v7534_v48 = vunpack.i.l.bf16 %v7533_v14 }
 0x410   :  { %v4718_v4 = vsel %vm2329_vm6, %v4710_v59, %v7534_v48  ;;  %v4719_v28 = vsel %vm2329_vm6, %v4711_v49, %v7535_v11  ;;  %v12083_v55 = vpop.permute.xlu2 %7587  ;;  %v12097_v49 = vpop.f32.mrf.mxu3 }
 0x411   :  { %v7538_v30 = vpop.permute.xlu1 %7537  ;;  %v7589_v42 = vunpack.i.l.bf16 %v12083_v55 }
 0x412   :  { %v7540_v29 = vunpack.i.h.bf16 %v7538_v30  ;;  %v7539_v37 = vunpack.i.l.bf16 %v7538_v30 }
 0x414   :  { %v4726_v40 = vsel %vm2338_vm8, %v4718_v4, %v7539_v37  ;;  %v4727_v16 = vsel %vm2338_vm8, %v4719_v28, %v7540_v29 }
 0x415   :  { %v7548_v1 = vpop.permute.xlu0 %7547  ;;  %v4734_v27 = vsel %vm2347_vm10, %v4726_v40, %v7544_v51  ;;  %v4735_v52 = vsel %vm2347_vm10, %v4727_v16, %v7545_v32  ;;  %v4682_v32 = vsel %vm1246_vm4, %v11856_v53, %v7589_v42 }
 0x416   :  { %v4740_v8 = vpack.c.bf16 %v4735_v52, %v4734_v27  ;;  %v7549_v45 = vunpack.i.l.bf16 %v7548_v1  ;;  %v7550_v58 = vunpack.i.h.bf16 %v7548_v1 }
 0x418   :  { %5663 = vmatmul.msk.bf16.gmra.mxu3 %vm2400_vm12, %v4740_v8  ;;  %v2293_v47 = vsel %vm1246_vm4, %v11673_v3, %v7549_v45  ;;  %v4681_v51 = vsel %vm1246_vm4, %v11769_v36, %v7550_v58 }
 0x419   :  { %v7553_v63 = vpop.permute.xlu1 %7552 }
 0x41a   :  { %v7554_v0 = vunpack.i.l.bf16 %v7553_v63  ;;  %v7555_v30 = vunpack.i.h.bf16 %v7553_v63 }
 0x41c   :  { %v2301_v33 = vsel %vm1312_vm7, %v2293_v47, %v7554_v0  ;;  %v4688_v4 = vsel %vm1312_vm7, %v4681_v51, %v7555_v30 }
 0x41d   :  { %v7563_v2 = vpop.permute.xlu0 %7562  ;;  %v2309_v22 = vsel %vm1378_vm9, %v2301_v33, %v7560_v13 }
 0x41e   :  { %v7565_v39 = vunpack.i.h.bf16 %v7563_v2  ;;  %v7564_v34 = vunpack.i.l.bf16 %v7563_v2 }
 0x420   :  { %v2316_v3 = vsel %vm1444_vm11, %v2308_v21, %v7564_v34  ;;  %v2317_v43 = vsel %vm1444_vm11, %v2309_v22, %v7565_v39 }
 0x421   :  { %v7568_v5 = vpop.permute.xlu1 %7567  ;;  %v7603_v11 = vpop.permute.xlu2 %7602 }
 0x422   :  { %v7570_v38 = vunpack.i.h.bf16 %v7568_v5  ;;  %v7569_v23 = vunpack.i.l.bf16 %v7568_v5  ;;  %v7605_v52 = vunpack.i.h.bf16 %v7603_v11  ;;  %v7604_v8 = vunpack.i.l.bf16 %v7603_v11  ;;  %v4765_v5 = vpop.f32.mrf.mxu3 }
 0x424   :  { %v2325_v18 = vsel %vm2320_vm3, %v2316_v3, %v7569_v23  ;;  %v2326_v24 = vsel %vm2320_vm3, %v2317_v43, %v7570_v38  ;;  %v12117_v43 = vpop.f32.mrf.mxu1 }
 0x425   :  { %v7578_v15 = vpop.permute.xlu0 %7577  ;;  %v2334_v60 = vsel %vm2329_vm6, %v2325_v18, %v7574_v41  ;;  %v2335_v31 = vsel %vm2329_vm6, %v2326_v24, %v7575_v46  ;;  %v7590_v24 = vunpack.i.h.bf16 %v12083_v55 }
 0x426   :  { %v7580_v57 = vunpack.i.h.bf16 %v7578_v15  ;;  %v7579_v10 = vunpack.i.l.bf16 %v7578_v15 }
 0x428   :  { %v2343_v19 = vsel %vm2338_vm8, %v2334_v60, %v7579_v10  ;;  %v2344_v54 = vsel %vm2338_vm8, %v2335_v31, %v7580_v57  ;;  %v2294_v31 = vsel %vm1246_vm4, %v11890_v7, %v7590_v24 }
 0x429   :  { %v7583_v61 = vpop.permute.xlu1 %7582  ;;  %v7618_v28 = vpop.permute.xlu2 %7617 }
 0x42a   :  { %v7585_v25 = vunpack.i.h.bf16 %v7583_v61  ;;  %v7584_v14 = vunpack.i.l.bf16 %v7583_v61  ;;  %v7620_v0 = vunpack.i.h.bf16 %v7618_v28  ;;  %v7619_v20 = vunpack.i.l.bf16 %v7618_v28 }
 0x42c   :  { %v2352_v50 = vsel %vm2347_vm10, %v2343_v19, %v7584_v14  ;;  %v2353_v12 = vsel %vm2347_vm10, %v2344_v54, %v7585_v25  ;;  %v2427_v42 = vpop.f32.mrf.mxu1 }
 0x42d   :  { %v2358_v35 = vpack.c.bf16 %v2353_v12, %v2352_v50  ;;  %v7593_v48 = vpop.permute.xlu0 %7592 }
 0x42e   :  { %v7594_v17 = vunpack.i.l.bf16 %v7593_v48  ;;  %v7595_v10 = vunpack.i.h.bf16 %v7593_v48 }
 0x42f   :  { %5611 = vmatmul.msk.bf16.gmra.mxu1 %vm2400_vm12, %v2358_v35 }
 0x430   :  { %v4689_v40 = vsel %vm1312_vm7, %v4682_v32, %v7594_v17  ;;  %v2302_v14 = vsel %vm1312_vm7, %v2294_v31, %v7595_v10 }
 0x431   :  { %v2127_v38 = vpop.permute.xlu2 %2126 }
 0x435   :  { %v7598_v59 = vpop.permute.xlu1 %7597 }
 0x436   :  { %v7600_v29 = vunpack.i.h.bf16 %v7598_v59  ;;  %v7599_v37 = vunpack.i.l.bf16 %v7598_v59  ;;  %v12136_v59 = vld [vmem:[%s12719_s4] ss:$0 sm:$0xff]  ;;  %s5560_s4 = sshll.u32 %s12726_s11, 4  ;;  %s5561_s4 = int_to_ptr.hbm [resolvable:$true] %s5560_s4 }
 0x438   :  { %v4697_v16 = vsel %vm1378_vm9, %v4689_v40, %v7600_v29  ;;  %v4696_v1 = vsel %vm1378_vm9, %v4688_v4, %v7599_v37  ;;  %v7608_v27 = vpop.permute.xlu0 %7607 }
 0x439   :  { %v7610_v63 = vunpack.i.h.bf16 %v7608_v27  ;;  %v7609_v26 = vunpack.i.l.bf16 %v7608_v27  ;;  %v4704_v2 = vsel %vm1444_vm11, %v4696_v1, %v7604_v8  ;;  %v4705_v53 = vsel %vm1444_vm11, %v4697_v16, %v7605_v52  ;;  %v7638_v60 = vpop.permute.xlu2 %7637 }
 0x43a   :  { %v7640_v35 = vunpack.i.h.bf16 %v7638_v60  ;;  %v7639_v11 = vunpack.i.l.bf16 %v7638_v60 }
 0x43b   :  { %v4712_v56 = vsel %vm2320_vm3, %v4704_v2, %v7609_v26  ;;  %v4713_v47 = vsel %vm2320_vm3, %v4705_v53, %v7610_v63  ;;  %v4766_v26 = vadd.f32 %v12136_v59, %v4765_v5  ;;  %v4764_v53 = vadd.f32 %v12136_v59, %v12097_v49 }
 0x43c   :  { %v4768_v18 = vpop.f32.mrf.mxu3 }
 0x43d   :  { %v7613_v62 = vpop.permute.xlu1 %7612  ;;  %v4769_v16 = vadd.f32 %v12136_v59, %v4768_v18 }
 0x43e   :  { %v7615_v36 = vunpack.i.h.bf16 %v7613_v62  ;;  %v7614_v45 = vunpack.i.l.bf16 %v7613_v62 }
 0x43f   :  { %v4785_v2 = vmax.f32 %v4769_v16, 0.0 }
 0x440   :  { %v4720_v9 = vsel %vm2329_vm6, %v4712_v56, %v7615_v36  ;;  %v4721_v33 = vsel %vm2329_vm6, %v4713_v47, %v7614_v45  ;;  %v7623_v39 = vpop.permute.xlu0 %7622  ;;  %v4784_v36 = vmax.f32 %v4766_v26, 0.0 }
 0x441   :  { %v4728_v34 = vsel %vm2338_vm8, %v4720_v9, %v7620_v0  ;;  %v4729_v13 = vsel %vm2338_vm8, %v4721_v33, %v7619_v20  ;;  %v7625_v23 = vunpack.i.h.bf16 %v7623_v39  ;;  %v7624_v6 = vunpack.i.l.bf16 %v7623_v39  ;;  %v2277_v28 = vpop.permute.xlu2 %2276 }
 0x442   :  { %v4792_v56 = vsel %vm1312_vm7, %v4784_v36, -inf }
 0x443   :  { %v4736_v15 = vsel %vm2347_vm10, %v4728_v34, %v7625_v23  ;;  %v4737_v21 = vsel %vm2347_vm10, %v4729_v13, %v7624_v6  ;;  %v2428_v23 = vadd.f32 %v12136_v59, %v2427_v42 }
 0x444   :  { %v4741_v3 = vpack.c.bf16 %v4737_v21, %v4736_v15  ;;  %v4770_v58 = vpop.f32.mrf.mxu3 }
 0x445   :  { %v2081_v22 = vpop.permute.xlu1 %2080  ;;  %v4771_v32 = vadd.f32 %v12136_v59, %v4770_v58  ;;  %v2446_v18 = vmax.f32 %v2428_v23, 0.0 }
 0x446   :  { %5664 = vmatmul.msk.bf16.gmra.mxu3 %vm2400_vm12, %v4741_v3  ;;  %v2295_v46 = vsel %vm1246_vm4, %v11919_v44, %v2081_v22  ;;  %v2426_v22 = vadd.f32 %v12136_v59, %v12117_v43  ;;  %vm2492_vm4 = vcmask 1043459  }
 0x447   :  { %v2303_v19 = vsel %vm1312_vm7, %v2295_v46, %v2127_v38  ;;  %v4786_v8 = vmax.f32 %v4771_v32, 0.0 }
 0x448   :  { %v7628_v57 = vpop.permute.xlu0 %7627  ;;  %v2445_v46 = vmax.f32 %v2426_v22, 0.0 }
 0x449   :  { %v7630_v41 = vunpack.i.h.bf16 %v7628_v57  ;;  %v7629_v61 = vunpack.i.l.bf16 %v7628_v57  ;;  %v4795_v62 = vsel %vm1312_vm7, %v4786_v8, -inf }
 0x44a   :  { %v2453_v60 = vsel %vm1312_vm7, %v2445_v46, -inf }
 0x44b   :  { %v2310_v55 = vsel %vm1378_vm9, %v2302_v14, %v7629_v61  ;;  %v2311_v12 = vsel %vm1378_vm9, %v2303_v19, %v7630_v41  ;;  %v2454_v41 = vsel %vm1312_vm7, %v2446_v18, -inf }
 0x44c   :  { %v2455_v31 = vmax.f32 %v2453_v60, %v2454_v41 }
 0x44d   :  { %v7633_v25 = vpop.permute.xlu1 %7632  ;;  %v2430_v63 = vpop.f32.mrf.mxu1 }
 0x44e   :  { %v7635_v54 = vunpack.i.h.bf16 %v7633_v25  ;;  %v7634_v50 = vunpack.i.l.bf16 %v7633_v25  ;;  %v2431_v49 = vadd.f32 %v12136_v59, %v2430_v63  ;;  %v2469_v43 = vrot.slane %v2455_v31, 1 }
 0x450   :  { %v2319_v44 = vsel %vm1444_vm11, %v2311_v12, %v7635_v54  ;;  %v2318_v48 = vsel %vm1444_vm11, %v2310_v55, %v7634_v50  ;;  %v2229_v30 = vpop.permute.xlu0 %2228  ;;  %v2447_v15 = vmax.f32 %v2431_v49, 0.0  ;;  %v12173_v19 = vmax.f32 %v2455_v31, %v2469_v43 }
 0x451   :  { %v2328_v7 = vsel %vm2320_vm3, %v2319_v44, %v7640_v35  ;;  %v2327_v17 = vsel %vm2320_vm3, %v2318_v48, %v7639_v11 }
 0x452   :  { %v2337_v29 = vsel %vm2329_vm6, %v2328_v7, %v7614_v45  ;;  %v2336_v51 = vsel %vm2329_vm6, %v2327_v17, %v2229_v30  ;;  %v4794_v45 = vsel %vm1312_vm7, %v4785_v2, -inf  ;;  %v2456_v24 = vsel %vm1312_vm7, %v2447_v15, -inf }
 0x453   :  { %v2346_v37 = vsel %vm2338_vm8, %v2337_v29, %v7619_v20  ;;  %v4796_v0 = vmax.f32 %v4794_v45, %v4795_v62  ;;  %v4783_v20 = vmax.f32 %v4764_v53, 0.0  ;;  %v2504_v41 = vrot.slane %v12173_v19, 4 }
 0x454   :  { %v2355_v27 = vsel %vm2347_vm10, %v2346_v37, %v7624_v6 }
 0x455   :  { %v2253_v4 = vpop.permute.xlu1 %2252  ;;  %v2432_v47 = vpop.f32.mrf.mxu1  ;;  %v4808_v9 = vrot.slane %v4796_v0, 1  ;;  %v4791_v33 = vsel %vm1312_vm7, %v4783_v20, -inf }
 0x456   :  { %v2345_v40 = vsel %vm2338_vm8, %v2336_v51, %v2253_v4  ;;  %v4793_v39 = vmax.f32 %v4791_v33, %v4792_v56  ;;  %v2433_v5 = vadd.f32 %v12136_v59, %v2432_v47 }
 0x457   :  { %v2354_v1 = vsel %vm2347_vm10, %v2345_v40, %v2277_v28  ;;  %v12155_v34 = vmax.f32 %v4796_v0, %v4808_v9 }
 0x458   :  { %v2359_v52 = vpack.c.bf16 %v2355_v27, %v2354_v1  ;;  %v4807_v13 = vrot.slane %v4793_v39, 1  ;;  %v2448_v38 = vmax.f32 %v2433_v5, 0.0 }
 0x459   :  { %v4823_v6 = vrot.slane %v12155_v34, 7  ;;  %v4831_v18 = vrot.slane %v12155_v34, 1 }
 0x45a   :  { %5612 = vmatmul.msk.bf16.gmra.mxu1 %vm2400_vm12, %v2359_v52  ;;  %v12160_v21 = vmax.f32 %v4793_v39, %v4807_v13  ;;  %v2457_v3 = vsel %vm1312_vm7, %v2448_v38, -inf }
 0x45b   :  { %v2458_v10 = vmax.f32 %v2456_v24, %v2457_v3  ;;  %v2495_v3 = vrot.slane %v12173_v19, 2  ;;  %v4840_v24 = vrot.slane %v12155_v34, 3 }
 0x45c   :  { %v4824_v57 = vsel %vm2486_vm1, %v4823_v6, %v12160_v21  ;;  %v4830_v38 = vrot.slane %v12160_v21, 2  ;;  %v4839_v23 = vrot.slane %v12160_v21, 4  ;;  %v4850_v6 = vrot.slane %v12155_v34, 5 }
 0x45d   :  { %v2470_v61 = vrot.slane %v2458_v10, 1  ;;  %v4849_v22 = vrot.slane %v12160_v21, 6 }
 0x45f   :  { %v12170_v25 = vmax.f32 %v2458_v10, %v2470_v61  ;;  %v2514_v61 = vrot.slane %v12173_v19, 6  ;;  %v4851_v34 = vsel %vm2486_vm1, %v4850_v6, %v4849_v22  ;;  %v5771_v6 = vld [vmem:[%s12720_s5 + $0xd0] sm:$0xf] }
 0x460   :  { %v5707_v22 = vld [vmem:[%s12720_s5 + $0x50] sm:$0xf] }
 0x461   :  { %v2485_v14 = vrot.slane %v12170_v25, 7  ;;  %v2505_v60 = vrot.slane %v12170_v25, 3  ;;  %v2496_v31 = vrot.slane %v12170_v25, 1 }
 0x463   :  { %v2487_v54 = vsel %vm2486_vm1, %v2485_v14, %v12173_v19 }
 0x49b   :  { %v4773_v50 = vpop.f32.mrf.mxu3 }
 0x49c   :  { %v4774_v35 = vadd.f32 %v12136_v59, %v4773_v50 }
 0x49e   :  { %v4787_v48 = vmax.f32 %v4774_v35, 0.0 }
 0x4a0   :  { %v4797_v58 = vsel %vm1312_vm7, %v4787_v48, -inf }
 0x4a3   :  { %v4775_v55 = vpop.f32.mrf.mxu3 }
 0x4a4   :  { %v4776_v12 = vadd.f32 %v12136_v59, %v4775_v55  ;;  %v4841_v55 = vsel %vm2486_vm1, %v4840_v24, %v4839_v23 }
 0x4a6   :  { %v4788_v11 = vmax.f32 %v4776_v12, 0.0  ;;  %v4832_v12 = vsel %vm2486_vm1, %v4831_v18, %v4830_v38 }
 0x4a8   :  { %v4798_v42 = vsel %vm1312_vm7, %v4788_v11, -inf }
 0x4a9   :  { %v4799_v7 = vmax.f32 %v4797_v58, %v4798_v42 }
 0x4ab   :  { %v4809_v17 = vrot.slane %v4799_v7, 1 }
 0x4ac   :  { %v2435_v44 = vpop.f32.mrf.mxu1 }
 0x4ad   :  { %v12182_v37 = vmax.f32 %v4799_v7, %v4809_v17  ;;  %v2436_v32 = vadd.f32 %v12136_v59, %v2435_v44 }
 0x4af   :  { %v4825_v4 = vrot.slane %v12182_v37, 6  ;;  %v2449_v28 = vmax.f32 %v2436_v32, 0.0  ;;  %v4852_v43 = vrot.slane %v12182_v37, 4  ;;  %v4833_v17 = vsel %vm2489_vm2, %v12182_v37, %v4832_v12  ;;  %v5996_v12 = vld [vmem:[%s12720_s5 + $0x24] sm:$0xf0] }
 0x4b1   :  { %v2459_v1 = vsel %vm1312_vm7, %v2449_v28, -inf  ;;  %v12189_v27 = vsel %vm2489_vm2, %v4825_v4, %v4824_v57  ;;  %v2515_v57 = vrot.slane %v12170_v25, 5  ;;  %v2506_v25 = vsel %vm2486_vm1, %v2505_v60, %v2504_v41  ;;  %v5755_v60 = vld [vmem:[%s12720_s5 + $0xb0] sm:$0xf] }
 0x4b2   :  { %v4853_v7 = vsel %vm2489_vm2, %v4852_v43, %v4851_v34  ;;  %v5998_v43 = vld [vmem:[%s12720_s5 + $0x34] sm:$0xf0] }
 0x4b3   :  { %v2516_v19 = vsel %vm2486_vm1, %v2515_v57, %v2514_v61  ;;  %v5763_v57 = vld [vmem:[%s12720_s5 + $0xc0] sm:$0xf] }
 0x4b4   :  { %v2437_v30 = vpop.f32.mrf.mxu1 }
 0x4b5   :  { %v2438_v29 = vadd.f32 %v12136_v59, %v2437_v30  ;;  %v2497_v30 = vsel %vm2486_vm1, %v2496_v31, %v2495_v3  ;;  %v6002_v3 = vld [vmem:[%s12720_s5 + $0x54] sm:$0xf0]  ;;  %v5691_v31 = vld [vmem:[%s12720_s5 + $0x30] sm:$0xf] }
 0x4b6   :  { %v5708_v24 = vor.u32 %v6002_v3, %v5707_v22  ;;  %v5692_v34 = vor.u32 %v5998_v43, %v5691_v31  ;;  %v5717_v22 = vld [vmem:[%s12720_s5 + $0x68] sm:$0xf0] }
 0x4b7   :  { %v2450_v51 = vmax.f32 %v2438_v29, 0.0  ;;  %v5765_v31 = vld [vmem:[%s12720_s5 + $0xc8] sm:$0xf0] }
 0x4b9   :  { %v2460_v16 = vsel %vm1312_vm7, %v2450_v51, -inf }
 0x4ba   :  { %v2461_v52 = vmax.f32 %v2459_v1, %v2460_v16 }
 0x4bc   :  { %v2471_v63 = vrot.slane %v2461_v52, 1 }
 0x4be   :  { %v2479_v62 = vmax.f32 %v2461_v52, %v2471_v63 }
 0x4c0   :  { %v2488_v20 = vrot.slane %v2479_v62, 6  ;;  %v2517_v14 = vrot.slane %v2479_v62, 4  ;;  %v2507_v35 = vrot.slane %v2479_v62, 2  ;;  %v2498_v1 = vsel %vm2489_vm2, %v2479_v62, %v2497_v30 }
 0x4c2   :  { %v2490_v39 = vsel %vm2489_vm2, %v2488_v20, %v2487_v54  ;;  %v4842_v54 = vrot.slane %v12182_v37, 2  ;;  %v2518_v58 = vsel %vm2489_vm2, %v2517_v14, %v2516_v19  ;;  %v5787_v20 = vld [vmem:[%s12720_s5 + $0xf0] sm:$0xf] }
 0x4c4   :  { %v4843_v51 = vsel %vm2489_vm2, %v4842_v54, %v4841_v55  ;;  %v5747_v54 = vld [vmem:[%s12720_s5 + $0xa0] sm:$0xf] }
 0x4c5   :  { %v5683_v55 = vld [vmem:[%s12720_s5 + $0x20] sm:$0xf] }
 0x4c6   :  { %v5684_v19 = vor.u32 %v5996_v12, %v5683_v55  ;;  %v5757_v55 = vld [vmem:[%s12720_s5 + $0xb8] sm:$0xf0] }
 0x4c9   :  { %v4778_v40 = vpop.f32.mrf.mxu3 }
 0x4ca   :  { %v4779_v26 = vadd.f32 %v12136_v59, %v4778_v40  ;;  %v2508_v40 = vsel %vm2489_vm2, %v2507_v35, %v2506_v25  ;;  %v5675_v25 = vld [vmem:[%s12720_s5 + $0x10] sm:$0xf] }
 0x4cc   :  { %v4789_v36 = vmax.f32 %v4779_v26, 0.0 }
 0x4ce   :  { %v4800_v56 = vsel %vm1312_vm7, %v4789_v36, -inf }
 0x4d1   :  { %v4780_v8 = vpop.f32.mrf.mxu3 }
 0x4d2   :  { %v4781_v2 = vadd.f32 %v12136_v59, %v4780_v8 }
 0x4d4   :  { %v4790_v53 = vmax.f32 %v4781_v2, 0.0 }
 0x4d6   :  { %v4801_v0 = vsel %vm1312_vm7, %v4790_v53, -inf }
 0x4d7   :  { %v2440_v45 = vpop.f32.mrf.mxu1  ;;  %v4802_v47 = vmax.f32 %v4800_v56, %v4801_v0  ;;  %v6022_v56 = vld [vmem:[%s12720_s5 + $0xf4] sm:$0xf0] }
 0x4d8   :  { %v2441_v9 = vadd.f32 %v12136_v59, %v2440_v45 }
 0x4d9   :  { %v4810_v5 = vrot.slane %v4802_v47, 1 }
 0x4da   :  { %v2451_v49 = vmax.f32 %v2441_v9, 0.0  ;;  %v5788_v9 = vor.u32 %v6022_v56, %v5787_v20  ;;  %v6005_v20 = vld [vmem:[%s12720_s5 + $0x74] sm:$0xf]  ;;  %v5725_v56 = vld [vmem:[%s12720_s5 + $0x78] sm:$0xf0] }
 0x4db   :  { %v4818_v10 = vmax.f32 %v4802_v47, %v4810_v5  ;;  %v5723_v47 = vld [vmem:[%s12720_s5 + $0x70] sm:$0xf] }
 0x4dc   :  { %5096 = vmatpush.bf16.msra.mxu3 %v5788_v9 }
 0x4dd   :  { %v4854_v11 = vrot.slane %v4818_v10, 3  ;;  %v4844_v44 = vrot.slane %v4818_v10, 1  ;;  %v4834_v42 = vrot.slane %v4818_v10, 7  ;;  %v4827_v36 = vrot.slane %v4818_v10, 5  ;;  %v6016_v10 = vld [vmem:[%s12720_s5 + $0xc4] sm:$0xf0] }
 0x4de   :  { %v5764_v41 = vor.u32 %v6016_v10, %v5763_v57  ;;  %v5709_v57 = vld [vmem:[%s12720_s5 + $0x58] sm:$0xf0]  ;;  %v6017_v10 = vld [vmem:[%s12720_s5 + $0xd4] sm:$0xf] }
 0x4df   :  { %v2442_v33 = vpop.f32.mrf.mxu1  ;;  %v4855_v28 = vsel %vm2492_vm4, %v4854_v11, %v4853_v7  ;;  %v4845_v16 = vsel %vm2492_vm4, %v4844_v44, %v4843_v51  ;;  %v4835_v37 = vsel %vm2492_vm4, %v4834_v42, %v4833_v17  ;;  %v12238_v62 = vsel %vm2492_vm4, %v4827_v36, %v12189_v27  ;;  %v6006_v27 = vld [vmem:[%s12720_s5 + $0x74] sm:$0xf0]  ;;  %v5739_v11 = vld [vmem:[%s12720_s5 + $0x90] sm:$0xf]  ;;  %v5789_v36 = vld [vmem:[%s12720_s5 + $0xf8] sm:$0xf0] }
 0x4e0   :  { %v2443_v13 = vadd.f32 %v12136_v59, %v2442_v33  ;;  %v2462_v59 = vsel %vm1312_vm7, %v2451_v49, -inf  ;;  %v5779_v33 = vld [vmem:[%s12720_s5 + $0xe0] sm:$0xf]  ;;  %v5724_v5 = vor.u32 %v6006_v27, %v5723_v47  ;;  %v6010_v44 = vld [vmem:[%s12720_s5 + $0x94] sm:$0xf0] }
 0x4e1   :  { %v5715_v49 = vld [vmem:[%s12720_s5 + $0x60] sm:$0xf]  ;;  %v5994_v42 = vld [vmem:[%s12720_s5 + $0x14] sm:$0xf0]  ;;  %v5740_v51 = vor.u32 %v6010_v44, %v5739_v11  ;;  %v5685_v11 = vld [vmem:[%s12720_s5 + $0x28] sm:$0xf0] }
 0x4e2   :  { %v2452_v15 = vmax.f32 %v2443_v13, 0.0  ;;  %v6004_v13 = vld [vmem:[%s12720_s5 + $0x64] sm:$0xf0]  ;;  %5083 = vmatpush.bf16.msra.mxu1 %v5724_v5  ;;  %v6011_v44 = vld [vmem:[%s12720_s5 + $0xa4] sm:$0xf] }
 0x4e3   :  { %v5716_v23 = vor.u32 %v6004_v13, %v5715_v49 }
 0x4e4   :  { %v2463_v46 = vsel %vm1312_vm7, %v2452_v15, -inf  ;;  %v6018_v15 = vld [vmem:[%s12720_s5 + $0xd4] sm:$0xf0] }
 0x4e5   :  { %v2464_v21 = vmax.f32 %v2462_v59, %v2463_v46  ;;  %v5772_v18 = vor.u32 %v6018_v15, %v5771_v6  ;;  %v5699_v59 = vld [vmem:[%s12720_s5 + $0x40] sm:$0xf]  ;;  %v6000_v46 = vld [vmem:[%s12720_s5 + $0x44] sm:$0xf0]  ;;  %v5781_v6 = vld [vmem:[%s12720_s5 + $0xe8] sm:$0xf0] }
 0x4e6   :  { %5084 = vmatpush.bf16.msra.mxu1 %v5716_v23  ;;  %v5700_v61 = vor.u32 %v6000_v46, %v5699_v59  ;;  %v6019_v23 = vld [vmem:[%s12720_s5 + $0xe4] sm:$0xf]  ;;  %v5773_v46 = vld [vmem:[%s12720_s5 + $0xd8] sm:$0xf0] }
 0x4e7   :  { %v2472_v50 = vrot.slane %v2464_v21, 1  ;;  %v6003_v15 = vld [vmem:[%s12720_s5 + $0x64] sm:$0xf]  ;;  %v5784_v3 = vor.u32 %v6019_v23, %v5781_v6  ;;  %v5843_v23 = vld [vmem:[%s12722_s7 + $0x60] sm:$0xf] }
 0x4e9   :  { %v2480_v48 = vmax.f32 %v2464_v21, %v2472_v50  ;;  %v6014_v21 = vld [vmem:[%s12720_s5 + $0xb4] sm:$0xf0]  ;;  %v6012_v50 = vld [vmem:[%s12720_s5 + $0xa4] sm:$0xf0] }
 0x4ea   :  { %5085 = vmatpush.bf16.msra.mxu1 %v5708_v24  ;;  %v5756_v14 = vor.u32 %v6014_v21, %v5755_v60  ;;  %v5748_v35 = vor.u32 %v6012_v50, %v5747_v54  ;;  %v6001_v24 = vld [vmem:[%s12720_s5 + $0x54] sm:$0xf]  ;;  %v5776_v60 = vor.u32 %v6017_v10, %v5773_v46  ;;  %v6015_v21 = vld [vmem:[%s12720_s5 + $0xc4] sm:$0xf]  ;;  %v5693_v54 = vld [vmem:[%s12720_s5 + $0x38] sm:$0xf0] }
 0x4eb   :  { %v2519_v29 = vrot.slane %v2480_v48, 3  ;;  %v2509_v32 = vrot.slane %v2480_v48, 1  ;;  %v2499_v4 = vrot.slane %v2480_v48, 7  ;;  %v2491_v45 = vrot.slane %v2480_v48, 5  ;;  %v6013_v50 = vld [vmem:[%s12720_s5 + $0xb4] sm:$0xf] }
 0x4ec   :  { %v5712_v59 = vor.u32 %v6001_v24, %v5709_v57  ;;  %v5835_v57 = vld [vmem:[%s12722_s7 + $0x50] sm:$0xf] }
 0x4ed   :  { %v2520_v52 = vsel %vm2492_vm4, %v2519_v29, %v2518_v58  ;;  %v2510_v8 = vsel %vm2492_vm4, %v2509_v32, %v2508_v40  ;;  %v2500_v63 = vsel %vm2492_vm4, %v2499_v4, %v2498_v1  ;;  %v12241_v0 = vsel %vm2492_vm4, %v2491_v45, %v2490_v39  ;;  %v6020_v39 = vld [vmem:[%s12720_s5 + $0xe4] sm:$0xf0]  ;;  %v5899_v46 = vld [vmem:[%s12722_s7 + $0xd0] sm:$0xf] }
 0x4ee   :  { %v7651_v26 = vpack.i.bf16 %v2520_v52, %v4855_v28  ;;  %v7646_v2 = vpack.i.bf16 %v2510_v8, %v4845_v16  ;;  %v7641_v53 = vpack.i.bf16 %v2500_v63, %v4835_v37  ;;  %v5780_v38 = vor.u32 %v6020_v39, %v5779_v33  ;;  %5086 = vmatpush.bf16.msra.mxu1 %v5700_v61  ;;  %v5731_v28 = vld [vmem:[%s12720_s5 + $0x80] sm:$0xf]  ;;  %v6008_v40 = vld [vmem:[%s12720_s5 + $0x84] sm:$0xf0]  ;;  %v5701_v61 = vld [vmem:[%s12720_s5 + $0x48] sm:$0xf0] }
 0x4ef   :  { %v5676_v4 = vor.u32 %v5994_v42, %v5675_v25  ;;  %v5667_v63 = vld [vmem:[%s12720_s5] sm:$0xf] }
 0x4f0   :  { %7652 = vrot.lane.b32.xlu2 %v7651_v26, %s7707_s14  ;;  %7647 = vrot.lane.b32.xlu1 %v7646_v2, %s7705_s15  ;;  %v5992_v2 = vld [vmem:[%s12720_s5 + $0x4] sm:$0xf0] }
 0x4f1   :  { %7642 = vrot.lane.b32.xlu0 %v7641_v53, %s7701_s29  ;;  %5097 = vmatpush.bf16.msra.mxu3 %v5780_v38  ;;  %v6021_v53 = vld [vmem:[%s12720_s5 + $0xf4] sm:$0xf]  ;;  %v5668_v39 = vor.u32 %v5992_v2, %v5667_v63  ;;  %v5728_v38 = vor.u32 %v6005_v20, %v5725_v56 }
 0x4f2   :  { %5087 = vmatpush.bf16.msra.mxu1 %v5692_v34  ;;  %v5792_v5 = vor.u32 %v6021_v53, %v5789_v36  ;;  %v5997_v34 = vld [vmem:[%s12720_s5 + $0x34] sm:$0xf] }
 0x4f3   :  { %v5696_v12 = vor.u32 %v5997_v34, %v5693_v54 }
 0x4f5   :  { %5098 = vmatpush.bf16.msra.mxu3 %v5772_v18  ;;  %v5720_v18 = vor.u32 %v6003_v15, %v5717_v22 }
 0x4f6   :  { %5088 = vmatpush.bf16.msra.mxu1 %v5684_v19  ;;  %v5995_v19 = vld [vmem:[%s12720_s5 + $0x24] sm:$0xf] }
 0x4f7   :  { %v5688_v25 = vor.u32 %v5995_v19, %v5685_v11  ;;  %v6028_v19 = vld [vmem:[%s12722_s7 + $0x24] sm:$0xf0] }
 0x4f9   :  { %5099 = vmatpush.bf16.msra.mxu3 %v5764_v41  ;;  %v5999_v41 = vld [vmem:[%s12720_s5 + $0x44] sm:$0xf] }
 0x4fa   :  { %5089 = vmatpush.bf16.msra.mxu1 %v5676_v4  ;;  %v5704_v43 = vor.u32 %v5999_v41, %v5701_v61  ;;  %v5669_v4 = vld [vmem:[%s12720_s5 + $0x8] sm:$0xf0]  ;;  %v6050_v41 = vld [vmem:[%s12722_s7 + $0xd4] sm:$0xf0] }
 0x4fd   :  { %5100 = vmatpush.bf16.msra.mxu3 %v5756_v14  ;;  %v5768_v14 = vor.u32 %v6015_v21, %v5765_v31  ;;  %v5900_v21 = vor.u32 %v6050_v41, %v5899_v46  ;;  %v6032_v31 = vld [vmem:[%s12722_s7 + $0x44] sm:$0xf0]  ;;  %v5797_v46 = vld [vmem:[%s12722_s7 + $0x8] sm:$0xf0] }
 0x4fe   :  { %5090 = vmatpush.bf16.msra.mxu1 %v5668_v39 }
 0x501   :  { %5101 = vmatpush.bf16.msra.mxu3 %v5748_v35  ;;  %v5760_v35 = vor.u32 %v6013_v50, %v5757_v55  ;;  %v5819_v50 = vld [vmem:[%s12722_s7 + $0x30] sm:$0xf]  ;;  %v6030_v55 = vld [vmem:[%s12722_s7 + $0x34] sm:$0xf0] }
 0x502   :  { %5109 = vmatpush.bf16.msrb.mxu1 %v5728_v38 }
 0x505   :  { %5102 = vmatpush.bf16.msra.mxu3 %v5740_v51  ;;  %v5991_v51 = vld [vmem:[%s12720_s5 + $0x4] sm:$0xf] }
 0x506   :  { %5110 = vmatpush.bf16.msrb.mxu1 %v5720_v18  ;;  %v6052_v18 = vld [vmem:[%s12722_s7 + $0xe4] sm:$0xf0] }
 0x50a   :  { %5111 = vmatpush.bf16.msrb.mxu1 %v5712_v59  ;;  %v6034_v59 = vld [vmem:[%s12722_s7 + $0x54] sm:$0xf0] }
 0x50b   :  { %v5836_v61 = vor.u32 %v6034_v59, %v5835_v57  ;;  %v6023_v59 = vld [vmem:[%s12722_s7 + $0x4] sm:$0xf] }
 0x50e   :  { %5112 = vmatpush.bf16.msrb.mxu1 %v5704_v43  ;;  %v5891_v43 = vld [vmem:[%s12722_s7 + $0xc0] sm:$0xf] }
 0x512   :  { %5113 = vmatpush.bf16.msrb.mxu1 %v5696_v12  ;;  %v5820_v12 = vor.u32 %v6030_v55, %v5819_v50 }
 0x516   :  { %5114 = vmatpush.bf16.msrb.mxu1 %v5688_v25 }
 0x54a   :  { %v7653_v58 = vpop.permute.xlu2 %7652 }
 0x54b   :  { %v7655_v16 = vunpack.i.h.bf16 %v7653_v58  ;;  %v7654_v1 = vunpack.i.l.bf16 %v7653_v58  ;;  %v5993_v58 = vld [vmem:[%s12720_s5 + $0x14] sm:$0xf] }
 0x562   :  { %v7648_v48 = vpop.permute.xlu1 %7647 }
 0x563   :  { %v7650_v7 = vunpack.i.h.bf16 %v7648_v48  ;;  %v7649_v30 = vunpack.i.l.bf16 %v7648_v48  ;;  %v7643_v17 = vpop.permute.xlu0 %7642  ;;  %v5749_v48 = vld [vmem:[%s12720_s5 + $0xa8] sm:$0xf0] }
 0x564   :  { %v7645_v29 = vunpack.i.h.bf16 %v7643_v17  ;;  %v7644_v32 = vunpack.i.l.bf16 %v7643_v17  ;;  %v5752_v42 = vor.u32 %v6011_v44, %v5749_v48  ;;  %v5741_v17 = vld [vmem:[%s12720_s5 + $0x98] sm:$0xf0]  ;;  %v5803_v44 = vld [vmem:[%s12722_s7 + $0x10] sm:$0xf]  ;;  %v6026_v48 = vld [vmem:[%s12722_s7 + $0x14] sm:$0xf0] }
 0x565   :  { %v5804_v25 = vor.u32 %v6026_v48, %v5803_v44 }
 0x566   :  { %v2524_v52 = vsel %vm1312_vm7, %v12241_v0, %v7645_v29  ;;  %v4859_v8 = vsel %vm1312_vm7, %v12238_v62, %v7644_v32  ;;  %v5732_v0 = vor.u32 %v6008_v40, %v5731_v28  ;;  %v6007_v28 = vld [vmem:[%s12720_s5 + $0x84] sm:$0xf]  ;;  %v5733_v40 = vld [vmem:[%s12720_s5 + $0x88] sm:$0xf0] }
 0x567   :  { %v2525_v37 = vsel %vm1444_vm11, %v2524_v52, %v7650_v7  ;;  %v4860_v26 = vsel %vm1444_vm11, %v4859_v8, %v7649_v30  ;;  %v5677_v7 = vld [vmem:[%s12720_s5 + $0x18] sm:$0xf0]  ;;  %v6009_v30 = vld [vmem:[%s12720_s5 + $0x94] sm:$0xf] }
 0x568   :  { %v12352_v62 = vsel %vm2329_vm6, %v2525_v37, %v7655_v16  ;;  %v12355_v45 = vsel %vm2329_vm6, %v4860_v26, %v7654_v1  ;;  %5103 = vmatpush.bf16.msra.mxu3 %v5732_v0  ;;  %v5680_v29 = vor.u32 %v5993_v58, %v5677_v7  ;;  %v5744_v32 = vor.u32 %v6009_v30, %v5741_v17  ;;  %v5851_v0 = vld [vmem:[%s12722_s7 + $0x70] sm:$0xf]  ;;  %v6024_v58 = vld [vmem:[%s12722_s7 + $0x4] sm:$0xf0]  ;;  %v6037_v7 = vld [vmem:[%s12722_s7 + $0x74] sm:$0xf] }
 0x569   :  { %v2534_v47 = vrot.slane %v12352_v62, 3  ;;  %v4869_v9 = vrot.slane %v12355_v45, 3  ;;  %v2528_v27 = vrot.slane %v12352_v62, 1  ;;  %v4863_v33 = vrot.slane %v12355_v45, 1  ;;  %v5853_v30 = vld [vmem:[%s12722_s7 + $0x78] sm:$0xf0] }
 0x56a   :  { %5115 = vmatpush.bf16.msrb.mxu1 %v5680_v29  ;;  %v5672_v16 = vor.u32 %v5991_v51, %v5669_v4  ;;  %v5736_v1 = vor.u32 %v6007_v28, %v5733_v40  ;;  %v4867_v52 = vrot.slane %v12355_v45, 2  ;;  %v2532_v36 = vrot.slane %v12352_v62, 2  ;;  %v6046_v51 = vld [vmem:[%s12722_s7 + $0xb4] sm:$0xf0]  ;;  %v6035_v4 = vld [vmem:[%s12722_s7 + $0x64] sm:$0xf] }
 0x56b   :  { %v7656_v49 = vpack.i.bf16 %v2534_v47, %v4869_v9  ;;  %v7661_v13 = vpack.i.bf16 %v2528_v27, %v4863_v33  ;;  %v6038_v47 = vld [vmem:[%s12722_s7 + $0x74] sm:$0xf0]  ;;  %v5915_v9 = vld [vmem:[%s12722_s7 + $0xf0] sm:$0xf]  ;;  %v5856_v29 = vor.u32 %v6037_v7, %v5853_v30  ;;  %v5845_v40 = vld [vmem:[%s12722_s7 + $0x68] sm:$0xf0] }
 0x56c   :  { %5122 = vmatpush.bf16.msrb.mxu3 %v5792_v5  ;;  %v6054_v27 = vld [vmem:[%s12722_s7 + $0xf4] sm:$0xf0]  ;;  %v5852_v38 = vor.u32 %v6038_v47, %v5851_v0  ;;  %v5829_v0 = vld [vmem:[%s12722_s7 + $0x48] sm:$0xf0]  ;;  %v6040_v47 = vld [vmem:[%s12722_s7 + $0x84] sm:$0xf0] }
 0x56d   :  { %7657 = vrot.lane.b32.xlu0 %v7656_v49, %s7708_s24  ;;  %7662 = vrot.lane.b32.xlu1 %v7661_v13, %s7708_s24  ;;  %v5916_v6 = vor.u32 %v6054_v27, %v5915_v9  ;;  %v6053_v27 = vld [vmem:[%s12722_s7 + $0xf4] sm:$0xf] }
 0x56e   :  { %5116 = vmatpush.bf16.msrb.mxu1 %v5672_v16  ;;  %v5875_v16 = vld [vmem:[%s12722_s7 + $0xa0] sm:$0xf] }
 0x570   :  { %5123 = vmatpush.bf16.msrb.mxu3 %v5784_v3  ;;  %v6036_v3 = vld [vmem:[%s12722_s7 + $0x64] sm:$0xf0] }
 0x571   :  { %v5844_v24 = vor.u32 %v6036_v3, %v5843_v23  ;;  %v5909_v23 = vld [vmem:[%s12722_s7 + $0xe8] sm:$0xf0] }
 0x574   :  { %5124 = vmatpush.bf16.msrb.mxu3 %v5776_v60  ;;  %v5827_v60 = vld [vmem:[%s12722_s7 + $0x40] sm:$0xf] }
 0x575   :  { %v5828_v34 = vor.u32 %v6032_v31, %v5827_v60  ;;  %v5893_v60 = vld [vmem:[%s12722_s7 + $0xc8] sm:$0xf0]  ;;  %v5800_v31 = vor.u32 %v6023_v59, %v5797_v46 }
 0x578   :  { %5125 = vmatpush.bf16.msrb.mxu3 %v5768_v14  ;;  %v6048_v14 = vld [vmem:[%s12722_s7 + $0xc4] sm:$0xf0] }
 0x579   :  { %v5892_v54 = vor.u32 %v6048_v14, %v5891_v43 }
 0x57c   :  { %5126 = vmatpush.bf16.msrb.mxu3 %v5760_v35  ;;  %v5811_v35 = vld [vmem:[%s12722_s7 + $0x20] sm:$0xf] }
 0x57d   :  { %v5812_v11 = vor.u32 %v6028_v19, %v5811_v35  ;;  %v5877_v35 = vld [vmem:[%s12722_s7 + $0xa8] sm:$0xf0] }
 0x580   :  { %5127 = vmatpush.bf16.msrb.mxu3 %v5752_v42  ;;  %v5795_v42 = vld [vmem:[%s12722_s7] sm:$0xf] }
 0x581   :  { %v5796_v17 = vor.u32 %v6024_v58, %v5795_v42  ;;  %v6041_v42 = vld [vmem:[%s12722_s7 + $0x94] sm:$0xf]  ;;  %v5869_v58 = vld [vmem:[%s12722_s7 + $0x98] sm:$0xf0] }
 0x584   :  { %5128 = vmatpush.bf16.msrb.mxu3 %v5744_v32  ;;  %v5883_v32 = vld [vmem:[%s12722_s7 + $0xb0] sm:$0xf] }
 0x585   :  { %v5884_v28 = vor.u32 %v6046_v51, %v5883_v32  ;;  %v5861_v32 = vld [vmem:[%s12722_s7 + $0x88] sm:$0xf0]  ;;  %v6062_v51 = vld [vmem:[%s12724_s9 + $0x38] sm:$0xff] }
 0x588   :  { %5129 = vmatpush.bf16.msrb.mxu3 %v5736_v1  ;;  %v6044_v1 = vld [vmem:[%s12722_s7 + $0xa4] sm:$0xf0] }
 0x5df   :  { %v7658_v8 = vpop.permute.xlu0 %7657  ;;  %v7663_v63 = vpop.permute.xlu1 %7662 }
 0x5e0   :  { %v7660_v37 = vunpack.i.h.bf16 %v7658_v8  ;;  %v7659_v26 = vunpack.i.l.bf16 %v7658_v8  ;;  %v7665_v2 = vunpack.i.h.bf16 %v7663_v63  ;;  %v7664_v53 = vunpack.i.l.bf16 %v7663_v63  ;;  %v6033_v63 = vld [vmem:[%s12722_s7 + $0x54] sm:$0xf] }
 0x5e1   :  { %v5876_v8 = vor.u32 %v6044_v1, %v5875_v16 }
 0x5e2   :  { %v4874_v20 = vsel %vm2347_vm10, %v4867_v52, %v7659_v26  ;;  %v4873_v56 = vsel %vm2347_vm10, %v12355_v45, %v7664_v53  ;;  %v2539_v5 = vsel %vm2347_vm10, %v2532_v36, %v7660_v37  ;;  %v2538_v49 = vsel %vm2347_vm10, %v12352_v62, %v7665_v2  ;;  %v5907_v62 = vld [vmem:[%s12722_s7 + $0xe0] sm:$0xf]  ;;  %v5837_v37 = vld [vmem:[%s12722_s7 + $0x58] sm:$0xf0]  ;;  %v5867_v26 = vld [vmem:[%s12722_s7 + $0x90] sm:$0xf] }
 0x5e3   :  { %v4878_v33 = vrot.slane %v4874_v20, 7  ;;  %v4877_v39 = vrot.slane %v4873_v56, 7  ;;  %v5908_v10 = vor.u32 %v6052_v18, %v5907_v62  ;;  %v5848_v52 = vor.u32 %v6035_v4, %v5845_v40  ;;  %v6042_v53 = vld [vmem:[%s12722_s7 + $0x94] sm:$0xf0]  ;;  %v6031_v36 = vld [vmem:[%s12722_s7 + $0x44] sm:$0xf] }
 0x5e4   :  { %v5840_v2 = vor.u32 %v6033_v63, %v5837_v37  ;;  %v5868_v20 = vor.u32 %v6042_v53, %v5867_v26  ;;  %v5859_v56 = vld [vmem:[%s12722_s7 + $0x80] sm:$0xf]  ;;  %v5832_v9 = vor.u32 %v6031_v36, %v5829_v0  ;;  %v6025_v62 = vld [vmem:[%s12722_s7 + $0x14] sm:$0xf]  ;;  %v5805_v18 = vld [vmem:[%s12722_s7 + $0x18] sm:$0xf0] }
 0x5e5   :  { %v4882_v45 = vsel %vm105_vm0, %v2539_v5, %v4878_v33  ;;  %v4881_v13 = vsel %vm105_vm0, %v2538_v49, %v4877_v39  ;;  %v5860_v33 = vor.u32 %v6040_v47, %v5859_v56  ;;  %v6029_v39 = vld [vmem:[%s12722_s7 + $0x34] sm:$0xf]  ;;  %v5821_v5 = vld [vmem:[%s12722_s7 + $0x38] sm:$0xf0]  ;;  %v5808_v57 = vor.u32 %v6025_v62, %v5805_v18  ;;  %v6060_v36 = vld [vmem:[%s12724_s9 + $0x28] sm:$0xff] }
 0x5e6   :  { %v4883_v15 = vpack.c.bf16 %v4881_v13, %v4881_v13  ;;  %v4884_v22 = vpack.c.bf16 %v4882_v45, %v4882_v45  ;;  %v5917_v49 = vld [vmem:[%s12722_s7 + $0xf8] sm:$0xf0]  ;;  %v6051_v13 = vld [vmem:[%s12722_s7 + $0xe4] sm:$0xf]  ;;  %v6061_v53 = vld [vmem:[%s12724_s9 + $0x30] sm:$0xff]  ;;  %vm5551_vm0 = vcmask 123904  }
 0x5e7   :  { %v5920_v45 = vor.u32 %v6053_v27, %v5917_v49  ;;  %v6059_v0 = vld [vmem:[%s12724_s9 + $0x20] sm:$0xff]  ;;  %v6058_v56 = vld [vmem:[%s12724_s9 + $0x18] sm:$0xff]  ;;  %v6057_v47 = vld [vmem:[%s12724_s9 + $0x10] sm:$0xff] }
 0x5e8   :  { %5091 = vmatmul.bf16.vlgmr.msra.gmra.mxu1 %v4883_v15  ;;  %5104 = vmatmul.bf16.vlgmr.msra.gmra.mxu3 %v4884_v22  ;;  %v6056_v27 = vld [vmem:[%s12724_s9 + $0x8] sm:$0xff] }
 0x5e9   :  { %5337 = vmatpush.bf16.msra.mxu1 %v5852_v38  ;;  %5350 = vmatpush.bf16.msra.mxu3 %v5916_v6  ;;  %v5824_v38 = vor.u32 %v6029_v39, %v5821_v5  ;;  %v6027_v6 = vld [vmem:[%s12722_s7 + $0x24] sm:$0xf] }
 0x5ea   :  { %v6055_v39 = vld [vmem:[%s12724_s9] sm:$0xff] }
 0x5eb   :  { %v6067_v5 = vld [vmem:[%s12724_s9 + $0x60] sm:$0xff] }
 0x5ed   :  { %5338 = vmatpush.bf16.msra.mxu1 %v5844_v24  ;;  %5351 = vmatpush.bf16.msra.mxu3 %v5908_v10  ;;  %v6049_v24 = vld [vmem:[%s12722_s7 + $0xd4] sm:$0xf]  ;;  %v5901_v10 = vld [vmem:[%s12722_s7 + $0xd8] sm:$0xf0] }
 0x5ee   :  { %v5904_v41 = vor.u32 %v6049_v24, %v5901_v10 }
 0x5f1   :  { %5339 = vmatpush.bf16.msra.mxu1 %v5836_v61  ;;  %5352 = vmatpush.bf16.msra.mxu3 %v5900_v21  ;;  %v6047_v61 = vld [vmem:[%s12722_s7 + $0xc4] sm:$0xf]  ;;  %v4917_v21 = vld [vmem:[%s12721_s6] sm:$0x3] }
 0x5f2   :  { %v5896_v43 = vor.u32 %v6047_v61, %v5893_v60  ;;  %v4919_v50 = vperm.slane %v4917_v21, 0  ;;  %v4920_v16 = vperm.slane %v4917_v21, 1 }
 0x5f5   :  { %5340 = vmatpush.bf16.msra.mxu1 %v5828_v34  ;;  %5353 = vmatpush.bf16.msra.mxu3 %v5892_v54  ;;  %v6045_v34 = vld [vmem:[%s12722_s7 + $0xb4] sm:$0xf]  ;;  %v5885_v54 = vld [vmem:[%s12722_s7 + $0xb8] sm:$0xf0] }
 0x5f6   :  { %v5888_v55 = vor.u32 %v6045_v34, %v5885_v54 }
 0x5f8   :  { %5117 = vmatmul.bf16.vlgmr.msrb.gmra.mxu1 %v4883_v15  ;;  %5130 = vmatmul.bf16.vlgmr.msrb.gmra.mxu3 %v4884_v22  ;;  %v5813_v15 = vld [vmem:[%s12722_s7 + $0x28] sm:$0xf0]  ;;  %v5912_v22 = vor.u32 %v6051_v13, %v5909_v23  ;;  %v6065_v13 = vld [vmem:[%s12724_s9 + $0x50] sm:$0xff] }
 0x5f9   :  { %5341 = vmatpush.bf16.msra.mxu1 %v5820_v12  ;;  %5354 = vmatpush.bf16.msra.mxu3 %v5884_v28  ;;  %v5816_v3 = vor.u32 %v6027_v6, %v5813_v15  ;;  %v6043_v12 = vld [vmem:[%s12722_s7 + $0xa4] sm:$0xf]  ;;  %v6064_v23 = vld [vmem:[%s12724_s9 + $0x48] sm:$0xff]  ;;  %v5171_v15 = vld [vmem:[%s12723_s8] sm:$0x3] }
 0x5fa   :  { %v5880_v48 = vor.u32 %v6043_v12, %v5877_v35  ;;  %v6063_v6 = vld [vmem:[%s12724_s9 + $0x40] sm:$0xff] }
 0x5fd   :  { %5342 = vmatpush.bf16.msra.mxu1 %v5812_v11  ;;  %5355 = vmatpush.bf16.msra.mxu3 %v5876_v8 }
 0x601   :  { %5343 = vmatpush.bf16.msra.mxu1 %v5804_v25  ;;  %5356 = vmatpush.bf16.msra.mxu3 %v5868_v20  ;;  %v6070_v20 = vld [vmem:[%s12724_s9 + $0x78] sm:$0xff] }
 0x605   :  { %5344 = vmatpush.bf16.msra.mxu1 %v5796_v17  ;;  %5357 = vmatpush.bf16.msra.mxu3 %v5860_v33  ;;  %v5872_v17 = vor.u32 %v6041_v42, %v5869_v58  ;;  %v6068_v33 = vld [vmem:[%s12724_s9 + $0x68] sm:$0xff] }
 0x609   :  { %5363 = vmatpush.bf16.msrb.mxu1 %v5856_v29  ;;  %5376 = vmatpush.bf16.msrb.mxu3 %v5920_v45  ;;  %v6039_v29 = vld [vmem:[%s12722_s7 + $0x84] sm:$0xf]  ;;  %v6066_v45 = vld [vmem:[%s12724_s9 + $0x58] sm:$0xff] }
 0x60a   :  { %v5864_v28 = vor.u32 %v6039_v29, %v5861_v32 }
 0x60d   :  { %5364 = vmatpush.bf16.msrb.mxu1 %v5848_v52  ;;  %5377 = vmatpush.bf16.msrb.mxu3 %v5912_v22 }
 0x611   :  { %5365 = vmatpush.bf16.msrb.mxu1 %v5840_v2  ;;  %5378 = vmatpush.bf16.msrb.mxu3 %v5904_v41  ;;  %v5174_v41 = vperm.slane %v5171_v15, 1 }
 0x615   :  { %5366 = vmatpush.bf16.msrb.mxu1 %v5832_v9  ;;  %5379 = vmatpush.bf16.msrb.mxu3 %v5896_v43  ;;  %v6069_v9 = vld [vmem:[%s12724_s9 + $0x70] sm:$0xff] }
 0x619   :  { %5367 = vmatpush.bf16.msrb.mxu1 %v5824_v38  ;;  %5380 = vmatpush.bf16.msrb.mxu3 %v5888_v55 }
 0x61d   :  { %5368 = vmatpush.bf16.msrb.mxu1 %v5816_v3  ;;  %5381 = vmatpush.bf16.msrb.mxu3 %v5880_v48  ;;  %v5173_v3 = vperm.slane %v5171_v15, 0 }
 0x621   :  { %5369 = vmatpush.bf16.msrb.mxu1 %v5808_v57  ;;  %5382 = vmatpush.bf16.msrb.mxu3 %v5872_v17 }
 0x625   :  { %5370 = vmatpush.bf16.msrb.mxu1 %v5800_v31  ;;  %5383 = vmatpush.bf16.msrb.mxu3 %v5864_v28 }
 0x665   :  { %v5092_v14 = vpop.f32.mrf.mxu1 }
 0x666   :  { %v5093_v19 = vadd.f32 %v5092_v14, %v4919_v50  ;;  %v7668_v50 = vld [vmem:[%s12725_s10] ss:$0 sm:$0xff] }
 0x66b   :  { %v5105_v11 = vpop.f32.mrf.mxu3 }
 0x66c   :  { %v5106_v44 = vadd.f32 %v5105_v11, %v5093_v19 }
 0x66d   :  { %v5094_v25 = vpop.f32.mrf.mxu1 }
 0x66e   :  { %v5135_v7 = vmax.f32 %v5106_v44, 0.0 }
 0x670   :  { %v5137_v30 = vpack.c.bf16 %v5135_v7, %v5135_v7 }
 0x672   :  { %5345 = vmatmul.bf16.vlgmr.msra.gmra.mxu1 %v5137_v30 }
 0x673   :  { %v5107_v4 = vpop.f32.mrf.mxu3  ;;  %5525 = vmatpush.bf16.msra.mxu1 %v6062_v51 }
 0x675   :  { %v5118_v40 = vpop.f32.mrf.mxu1 }
 0x676   :  { %v5119_v1 = vadd.f32 %v5118_v40, %v4920_v16 }
 0x677   :  { %5526 = vmatpush.bf16.msra.mxu1 %v6061_v53 }
 0x67b   :  { %v5131_v52 = vpop.f32.mrf.mxu3  ;;  %5527 = vmatpush.bf16.msra.mxu1 %v6060_v36 }
 0x67c   :  { %v5132_v8 = vadd.f32 %v5131_v52, %v5119_v1 }
 0x67d   :  { %v5120_v63 = vpop.f32.mrf.mxu1 }
 0x67e   :  { %v5136_v37 = vmax.f32 %v5132_v8, 0.0 }
 0x67f   :  { %5528 = vmatpush.bf16.msra.mxu1 %v6059_v0 }
 0x680   :  { %v5138_v26 = vpack.c.bf16 %v5136_v37, %v5136_v37 }
 0x682   :  { %5358 = vmatmul.bf16.vlgmr.msra.gmra.mxu3 %v5138_v26  ;;  %5371 = vmatmul.bf16.vlgmr.msrb.gmra.mxu1 %v5137_v30 }
 0x683   :  { %v5133_v2 = vpop.f32.mrf.mxu3  ;;  %5538 = vmatpush.bf16.msra.mxu3 %v6070_v20  ;;  %5529 = vmatpush.bf16.msra.mxu1 %v6058_v56 }
 0x687   :  { %5530 = vmatpush.bf16.msra.mxu1 %v6057_v47  ;;  %5539 = vmatpush.bf16.msra.mxu3 %v6069_v9 }
 0x68b   :  { %5531 = vmatpush.bf16.msra.mxu1 %v6056_v27  ;;  %5540 = vmatpush.bf16.msra.mxu3 %v6068_v33 }
 0x68f   :  { %5532 = vmatpush.bf16.msra.mxu1 %v6055_v39  ;;  %5541 = vmatpush.bf16.msra.mxu3 %v6067_v5 }
 0x692   :  { %5384 = vmatmul.bf16.vlgmr.msrb.gmra.mxu3 %v5138_v26 }
 0x693   :  { %5542 = vmatpush.bf16.msra.mxu3 %v6066_v45 }
 0x697   :  { %5543 = vmatpush.bf16.msra.mxu3 %v6065_v13 }
 0x69b   :  { %5544 = vmatpush.bf16.msra.mxu3 %v6064_v23 }
 0x69f   :  { %5545 = vmatpush.bf16.msra.mxu3 %v6063_v6 }
 0x6ef   :  { %v5346_v49 = vpop.f32.mrf.mxu1 }
 0x6f0   :  { %v5347_v62 = vadd.f32 %v5346_v49, %v5173_v3 }
 0x6f7   :  { %v5348_v38 = vpop.f32.mrf.mxu1 }
 0x6ff   :  { %v5372_v22 = vpop.f32.mrf.mxu1 }
 0x700   :  { %v5373_v61 = vadd.f32 %v5372_v22, %v5174_v41 }
 0x705   :  { %v5359_v18 = vpop.f32.mrf.mxu3 }
 0x706   :  { %v5360_v24 = vadd.f32 %v5359_v18, %v5347_v62 }
 0x707   :  { %v5374_v57 = vpop.f32.mrf.mxu1 }
 0x708   :  { %v5389_v10 = vmax.f32 %v5360_v24, 0.0 }
 0x70a   :  { %v5391_v59 = vpack.c.bf16 %v5389_v10, %v5389_v10 }
 0x70c   :  { %5533 = vmatmul.bf16.vlgmr.msra.gmra.mxu1 %v5391_v59 }
 0x70d   :  { %v5361_v46 = vpop.f32.mrf.mxu3 }
 0x715   :  { %v5385_v60 = vpop.f32.mrf.mxu3 }
 0x716   :  { %v5386_v21 = vadd.f32 %v5385_v60, %v5373_v61 }
 0x718   :  { %v5390_v31 = vmax.f32 %v5386_v21, 0.0 }
 0x71a   :  { %v5392_v43 = vpack.c.bf16 %v5390_v31, %v5390_v31 }
 0x71c   :  { %5546 = vmatmul.bf16.vlgmr.msra.gmra.mxu3 %v5392_v43 }
 0x71d   :  { %v5387_v14 = vpop.f32.mrf.mxu3 }
 0x789   :  { %v5534_v34 = vpop.f32.mrf.mxu1 }
 0x78a   :  { %v5535_v55 = vadd.f32 %v7668_v50, %v5534_v34 }
 0x791   :  { %v5536_v54 = vpop.f32.mrf.mxu1 }
 0x79f   :  { %v5547_v12 = vpop.f32.mrf.mxu3 }
 0x7a0   :  { %v5548_v35 = vadd.f32 %v5547_v12, %v5535_v55 }
 0x7a2   :  { %5552 = vst.msk [vmem:[#allocation2] sm:$0x3] %vm5551_vm0, %v5548_v35 }
 0x7a3   :  { %5563 = dma.vmem_to_hbm [thread:$0]  %s5559_s17, 32, %s5561_s4, [#allocation3]  }
 0x7a7   :  { %v5549_v19 = vpop.f32.mrf.mxu3 }
 0x7a8   :  { %7695 = dma.done.wait [#allocation3], 32  }
 0x7a9   :  { %7696 = vsyncadd [#allocation3], 4294967264 }
 0x7aa   :  { %5568 = vsyncpa [#allocation3], 1 }

</bundles_post_ra>
